<compile_context>
chip_gen: v6e
topology: v6e:2x2x1
jax: 0.10.0
libtpu: 0.0.40
codegen_flags: <defaults>
</compile_context>

<pallas_src>
import jax
import jax.numpy as jnp
from jax.experimental import pallas as pl
from jax.experimental.pallas import tpu as pltpu

D = 768        # hidden dim (fixed by the module)
H = 12         # heads
DH = D // H    # 64 head dim
LN_EPS = 1e-5
MiB = 1024 * 1024


def encoder_layer_kernel(x_ref,          # VMEM [Bt, S, D] f32
                         lens_ref,       # VMEM [Bt, 1, S] int32
                         wqkv_ref,       # VMEM [D, 3D] bf16 (scale folded into q cols)
                         bqkv_ref,       # VMEM [1, 3D] f32
                         wo_ref, bo_ref,
                         wl_ref, bl_ref,
                         gamma_ref, beta_ref,
                         o_ref,          # VMEM [Bt, S, D] f32
                         attn_acc):      # VMEM scratch [Bt, S, D] bf16
    f32 = jnp.float32
    bf16 = jnp.bfloat16
    Bt, S, _ = x_ref.shape
    M = Bt * S

    x3 = x_ref[...]                              # [Bt, S, D] f32
    xf = x3.reshape(M, D)                        # token-major slab
    xb = xf.astype(bf16)

    # --- fused QKV projection: one bf16 matmul, f32 accumulation (MXU) ---
    qkv = jnp.dot(xb, wqkv_ref[...], preferred_element_type=f32) + bqkv_ref[...]
    q3 = qkv[:, 0:D].reshape(Bt, S, D).astype(bf16)        # scale already folded in
    k3 = qkv[:, D:2 * D].reshape(Bt, S, D).astype(bf16)
    v3 = qkv[:, 2 * D:3 * D].reshape(Bt, S, D).astype(bf16)

    # key-padding mask as an additive (Bt, 1, S) bias row, broadcast over queries
    col = jax.lax.broadcasted_iota(jnp.int32, (1, 1, S), 2)
    neg_bias = jnp.where(col < lens_ref[...], 0.0, -1e30).astype(f32)  # [Bt,1,S]

    # --- attention over head PAIRS (128-lane dense loads / stores) ---
    for p in range(H // 2):
        lo = p * 2 * DH
        qp = q3[:, :, lo:lo + 2 * DH]            # [Bt, S, 128] bf16 (full vreg)
        kp = k3[:, :, lo:lo + 2 * DH]
        vp = v3[:, :, lo:lo + 2 * DH]
        outs = []
        for hh in range(2):                      # the two heads inside the pair
            a = hh * DH
            qh = qp[:, :, a:a + DH]              # [Bt, S, 64] bf16
            kh = kp[:, :, a:a + DH]
            vh = vp[:, :, a:a + DH]
            s = jnp.einsum("bqd,bkd->bqk", qh, kh,
                           preferred_element_type=f32)       # [Bt, S, S] f32
            s = s + neg_bias                                  # key-padding mask
            m = jnp.max(s, axis=-1, keepdims=True)
            u = jnp.exp(s - m)
            denom = jnp.sum(u, axis=-1, keepdims=True)        # [Bt, S, 1] f32
            oh = jnp.einsum("bqk,bkd->bqd", u.astype(bf16), vh,
                            preferred_element_type=f32)       # [Bt, S, 64] f32
            # deferred softmax normalization on the EUP
            oh = oh * pl.reciprocal(denom, approx=True)
            outs.append(oh)
        # TODO(synk): attention dropout (p=0.5) treated as identity (eval mode)
        attn_acc[:, :, lo:lo + 2 * DH] = (
            jnp.concatenate(outs, axis=-1).astype(bf16))      # full-vreg bf16 store

    attn = attn_acc[...].reshape(M, D)                        # bf16, feeds MXU directly
    attn = jnp.dot(attn, wo_ref[...], preferred_element_type=f32) + bo_ref[...]

    # --- first residual (f32) ---
    x1 = xf + attn

    # --- Linear -> LayerNorm -> residual (stats in f32, single-pass variance) ---
    lin = jnp.dot(x1.astype(bf16), wl_ref[...],
                  preferred_element_type=f32) + bl_ref[...]
    mu = jnp.mean(lin, axis=-1, keepdims=True)
    ex2 = jnp.mean(lin * lin, axis=-1, keepdims=True)
    var = jnp.maximum(ex2 - mu * mu, 0.0)
    ln = (lin - mu) * jax.lax.rsqrt(var + LN_EPS)
    ln = ln * gamma_ref[...] + beta_ref[...]
    # TODO(synk): output dropout (p=0.5) treated as identity (eval mode)

    o_ref[...] = (ln + x1).reshape(Bt, S, D)


def _vmem_capacity_bytes():
    """Best-effort query of per-core VMEM; conservative fallback (v7x = 64 MiB)."""
    try:
        info = pltpu.get_tpu_info()
        cap = getattr(info, "vmem_capacity_bytes", None)
        if cap:
            return int(cap)
    except Exception:
        pass
    return 64 * MiB


def _pick_block_b(B, S, max_rows):
    """Largest batch-block Bt (divisor of B) with Bt*S <= max_rows.

    Keeps the grid >= 2 steps when B >= 2 (v7x has 2 TensorCores and the
    single 'parallel' axis is what shards across them) and prefers Bt*S that
    is a multiple of 256 (full MXU passes), then 128.
    """
    cap = B if B == 1 else max(1, B // 2)
    cands = [d for d in range(1, cap + 1) if B % d == 0 and d * S <= max_rows]
    if not cands:
        cands = [1]
    for align in (256, 128):
        aligned = [d for d in cands if (d * S) % align == 0]
        if aligned:
            return max(aligned)
    return max(cands)


@jax.jit
def encoder_layer(x, seq_len, params):
    """x: [B, S, D] f32, seq_len: [B] int32, params: dict of f32 weights."""
    B, S, _ = x.shape

    # generation-aware VMEM budget / block sizing
    cap = _vmem_capacity_bytes()
    if cap >= 100 * MiB:            # v5e / v6e (128 MiB physical)
        vmem_limit = 96 * MiB
        max_rows = 1024
    else:                           # v7x (64 MiB physical) or unknown
        vmem_limit = 40 * MiB
        max_rows = 512

    Bt = _pick_block_b(B, S, max_rows)
    grid = (B // Bt,)

    # seq_len -> (B, 1, S) int32 slab (block = full last-two dims, any Bt lead)
    lens = jnp.broadcast_to(seq_len.astype(jnp.int32)[:, None, None], (B, 1, S))

    bf16 = jnp.bfloat16
    scale = 1.0 / float(DH) ** 0.5
    # fused QKV weight/bias, with 1/sqrt(dh) folded into the q columns
    wqkv = jnp.concatenate(
        [params["wq"] * scale, params["wk"], params["wv"]], axis=1).astype(bf16)
    bqkv = jnp.concatenate(
        [params["bq"] * scale, params["bk"], params["bv"]], axis=1)  # f32 [1, 3D]
    wo = params["wo"].astype(bf16)
    wl = params["wl"].astype(bf16)

    full_qkv_mat = pl.BlockSpec((D, 3 * D), lambda i: (0, 0))
    full_qkv_vec = pl.BlockSpec((1, 3 * D), lambda i: (0, 0))
    full_mat = pl.BlockSpec((D, D), lambda i: (0, 0))
    full_vec = pl.BlockSpec((1, D), lambda i: (0, 0))
    act_spec = pl.BlockSpec((Bt, S, D), lambda i: (i, 0, 0))
    lens_spec = pl.BlockSpec((Bt, 1, S), lambda i: (i, 0, 0))

    grid_spec = pltpu.PrefetchScalarGridSpec(
        num_scalar_prefetch=0,
        grid=grid,
        in_specs=[
            act_spec, lens_spec,
            full_qkv_mat, full_qkv_vec,        # wqkv, bqkv
            full_mat, full_vec,                # wo, bo
            full_mat, full_vec,                # w_lin, b_lin
            full_vec, full_vec,                # gamma, beta
        ],
        out_specs=act_spec,
        scratch_shapes=[pltpu.VMEM((Bt, S, D), jnp.bfloat16)],
    )

    return pl.pallas_call(
        encoder_layer_kernel,
        out_shape=jax.ShapeDtypeStruct((B, S, D), jnp.float32),
        grid_spec=grid_spec,
        compiler_params=pltpu.CompilerParams(
            dimension_semantics=("parallel",),
            vmem_limit_bytes=int(vmem_limit),
        ),
    )(x, lens,
      wqkv, bqkv,
      wo, params["bo"], wl, params["bl"],
      params["gamma"], params["beta"])


def reference_encoder_layer(x, seq_len, params):
    """Pure-JAX reference mirroring the kernel's dtype policy
    (bf16 matmul operands, f32 accumulation / elementwise)."""
    bf16, f32 = jnp.bfloat16, jnp.float32
    B, S, _ = x.shape
    xf = x.reshape(B * S, D)

    def proj(w, b):
        return jnp.dot(xf.astype(bf16), w.astype(bf16),
                       preferred_element_type=f32) + b

    q = proj(params["wq"], params["bq"]) / jnp.sqrt(jnp.float32(DH))
    k = proj(params["wk"], params["bk"])
    v = proj(params["wv"], params["bv"])
    q = q.reshape(B, S, H, DH).transpose(0, 2, 1, 3).astype(bf16)
    k = k.reshape(B, S, H, DH).transpose(0, 2, 1, 3).astype(bf16)
    v = v.reshape(B, S, H, DH).transpose(0, 2, 1, 3).astype(bf16)
    s = jnp.einsum("bhqd,bhkd->bhqk", q, k, preferred_element_type=f32)
    mask = (jnp.arange(S)[None, :] < seq_len[:, None])[:, None, None, :]
    s = jnp.where(mask, s, -1e30)
    p = jax.nn.softmax(s, axis=-1)
    attn = jnp.einsum("bhqk,bhkd->bhqd", p.astype(bf16), v,
                      preferred_element_type=f32)
    attn = attn.transpose(0, 2, 1, 3).reshape(B * S, D)
    attn = jnp.dot(attn.astype(bf16), params["wo"].astype(bf16),
                   preferred_element_type=f32) + params["bo"]
    x1 = xf + attn
    lin = jnp.dot(x1.astype(bf16), params["wl"].astype(bf16),
                  preferred_element_type=f32) + params["bl"]
    mu = jnp.mean(lin, axis=-1, keepdims=True)
    var = jnp.mean((lin - mu) ** 2, axis=-1, keepdims=True)
    ln = (lin - mu) * jax.lax.rsqrt(var + LN_EPS) * params["gamma"] + params["beta"]
    return (ln + x1).reshape(B, S, D)


def init_params(key):
    ks = jax.random.split(key, 6)
    std = 1.0 / jnp.sqrt(jnp.float32(D))

    def mat(k):
        return (jax.random.normal(k, (D, D), jnp.float32) * std).astype(jnp.float32)

    return {
        "wq": mat(ks[0]), "bq": jnp.zeros((1, D), jnp.float32),
        "wk": mat(ks[1]), "bk": jnp.zeros((1, D), jnp.float32),
        "wv": mat(ks[2]), "bv": jnp.zeros((1, D), jnp.float32),
        "wo": mat(ks[3]), "bo": jnp.zeros((1, D), jnp.float32),
        "wl": mat(ks[4]), "bl": (jax.random.normal(ks[5], (1, D), jnp.float32) * 0.02),
        "gamma": jnp.ones((1, D), jnp.float32),
        "beta": jnp.zeros((1, D), jnp.float32),
    }


if __name__ == "__main__":
    key = jax.random.PRNGKey(0)
    kx, kp = jax.random.split(key)

    B, S = 2, 8
    x = jax.random.normal(kx, (B, S, D), jnp.float32)
    seq_len = jnp.array([8, 5], dtype=jnp.int32)
    params = init_params(kp)

    out = jax.block_until_ready(encoder_layer(x, seq_len, params))
    ref = jax.block_until_ready(reference_encoder_layer(x, seq_len, params))

    assert out.shape == (B, S, D)
    max_err = float(jnp.max(jnp.abs(out - ref)))
    assert jnp.allclose(out, ref, atol=3e-2, rtol=3e-2), max_err

    print("KERNEL_OK")
</pallas_src>

<mosaic_0001>
module attributes {stable_mosaic.version = 11 : i64} {
  func.func @encoder_layer_kernel(%arg0: i32, %arg1: memref<1x8x768xf32, #tpu.memory_space<vmem>>, %arg2: memref<1x1x8xi32, #tpu.memory_space<vmem>>, %arg3: memref<768x2304xbf16, #tpu.memory_space<vmem>>, %arg4: memref<1x2304xf32, #tpu.memory_space<vmem>>, %arg5: memref<768x768xbf16, #tpu.memory_space<vmem>>, %arg6: memref<1x768xf32, #tpu.memory_space<vmem>>, %arg7: memref<768x768xbf16, #tpu.memory_space<vmem>>, %arg8: memref<1x768xf32, #tpu.memory_space<vmem>>, %arg9: memref<1x768xf32, #tpu.memory_space<vmem>>, %arg10: memref<1x768xf32, #tpu.memory_space<vmem>>, %arg11: memref<1x8x768xf32, #tpu.memory_space<vmem>>, %arg12: memref<1x8x768xbf16, #tpu.memory_space<vmem>>) attributes {dimension_semantics = [#tpu.dimension_semantics<parallel>], iteration_bounds = array<i64: 2>, scalar_prefetch = 0 : i64, scratch_operands = 1 : i64, tpu.core_type = #tpu.core_type<tc>, window_params = [{transform_indices = @transform_0, window_bounds = array<i64: 1, 8, 768>}, {transform_indices = @transform_1, window_bounds = array<i64: 1, 1, 8>}, {pipeline_mode = #tpu.pipeline_mode<synchronous>, transform_indices = @transform_2, window_bounds = array<i64: 768, 2304>}, {pipeline_mode = #tpu.pipeline_mode<synchronous>, transform_indices = @transform_3, window_bounds = array<i64: 1, 2304>}, {pipeline_mode = #tpu.pipeline_mode<synchronous>, transform_indices = @transform_4, window_bounds = array<i64: 768, 768>}, {pipeline_mode = #tpu.pipeline_mode<synchronous>, transform_indices = @transform_5, window_bounds = array<i64: 1, 768>}, {pipeline_mode = #tpu.pipeline_mode<synchronous>, transform_indices = @transform_6, window_bounds = array<i64: 768, 768>}, {pipeline_mode = #tpu.pipeline_mode<synchronous>, transform_indices = @transform_7, window_bounds = array<i64: 1, 768>}, {pipeline_mode = #tpu.pipeline_mode<synchronous>, transform_indices = @transform_8, window_bounds = array<i64: 1, 768>}, {pipeline_mode = #tpu.pipeline_mode<synchronous>, transform_indices = @transform_9, window_bounds = array<i64: 1, 768>}, {transform_indices = @transform_10, window_bounds = array<i64: 1, 8, 768>}]} {
    %c0 = arith.constant 0 : index
    %c0_0 = arith.constant 0 : index
    %c0_1 = arith.constant 0 : index
    %0 = vector.load %arg1[%c0, %c0_0, %c0_1] : memref<1x8x768xf32, #tpu.memory_space<vmem>>, vector<1x8x768xf32>
    %1 = vector.shape_cast %0 : vector<1x8x768xf32> to vector<8x768xf32>
    %2 = arith.truncf %1 : vector<8x768xf32> to vector<8x768xbf16>
    %c0_2 = arith.constant 0 : index
    %c0_3 = arith.constant 0 : index
    %3 = vector.load %arg3[%c0_2, %c0_3] : memref<768x2304xbf16, #tpu.memory_space<vmem>>, vector<768x2304xbf16>
    %cst = arith.constant dense<0.000000e+00> : vector<8x2304xf32>
    %4 = tpu.matmul %2, %3, %cst {dimension_numbers = #tpu.dot_dimension_numbers<[1], [0], [0], [1], [0, 0, 1, 1], [], []>} : vector<8x768xbf16>, vector<768x2304xbf16>, vector<8x2304xf32> -> vector<8x2304xf32>
    %c0_4 = arith.constant 0 : index
    %c0_5 = arith.constant 0 : index
    %5 = vector.load %arg4[%c0_4, %c0_5] : memref<1x2304xf32, #tpu.memory_space<vmem>>, vector<1x2304xf32>
    %6 = vector.broadcast %5 : vector<1x2304xf32> to vector<8x2304xf32>
    %7 = arith.addf %4, %6 : vector<8x2304xf32>
    %8 = vector.extract_strided_slice %7 {offsets = [0, 0], sizes = [8, 768], strides = [1, 1]} : vector<8x2304xf32> to vector<8x768xf32>
    %9 = vector.shape_cast %8 : vector<8x768xf32> to vector<1x8x768xf32>
    %10 = arith.truncf %9 : vector<1x8x768xf32> to vector<1x8x768xbf16>
    %11 = vector.extract_strided_slice %7 {offsets = [0, 768], sizes = [8, 768], strides = [1, 1]} : vector<8x2304xf32> to vector<8x768xf32>
    %12 = vector.shape_cast %11 : vector<8x768xf32> to vector<1x8x768xf32>
    %13 = arith.truncf %12 : vector<1x8x768xf32> to vector<1x8x768xbf16>
    %14 = vector.extract_strided_slice %7 {offsets = [0, 1536], sizes = [8, 768], strides = [1, 1]} : vector<8x2304xf32> to vector<8x768xf32>
    %15 = vector.shape_cast %14 : vector<8x768xf32> to vector<1x8x768xf32>
    %16 = arith.truncf %15 : vector<1x8x768xf32> to vector<1x8x768xbf16>
    %17 = tpu.iota {dimensions = array<i32: 2>} : vector<1x1x8xi32>
    %c0_6 = arith.constant 0 : index
    %c0_7 = arith.constant 0 : index
    %c0_8 = arith.constant 0 : index
    %18 = vector.load %arg2[%c0_6, %c0_7, %c0_8] : memref<1x1x8xi32, #tpu.memory_space<vmem>>, vector<1x1x8xi32>
    %19 = arith.cmpi slt, %17, %18 : vector<1x1x8xi32>
    %cst_9 = arith.constant 0.000000e+00 : f32
    %cst_10 = arith.constant -1.000000e+30 : f32
    %20 = vector.broadcast %cst_9 : f32 to vector<1x1x8xf32>
    %21 = vector.broadcast %cst_10 : f32 to vector<1x1x8xf32>
    %22 = arith.select %19, %20, %21 : vector<1x1x8xi1>, vector<1x1x8xf32>
    %23 = vector.extract_strided_slice %10 {offsets = [0, 0, 0], sizes = [1, 8, 128], strides = [1, 1, 1]} : vector<1x8x768xbf16> to vector<1x8x128xbf16>
    %24 = vector.extract_strided_slice %13 {offsets = [0, 0, 0], sizes = [1, 8, 128], strides = [1, 1, 1]} : vector<1x8x768xbf16> to vector<1x8x128xbf16>
    %25 = vector.extract_strided_slice %16 {offsets = [0, 0, 0], sizes = [1, 8, 128], strides = [1, 1, 1]} : vector<1x8x768xbf16> to vector<1x8x128xbf16>
    %26 = vector.extract_strided_slice %23 {offsets = [0, 0, 0], sizes = [1, 8, 64], strides = [1, 1, 1]} : vector<1x8x128xbf16> to vector<1x8x64xbf16>
    %27 = vector.extract_strided_slice %24 {offsets = [0, 0, 0], sizes = [1, 8, 64], strides = [1, 1, 1]} : vector<1x8x128xbf16> to vector<1x8x64xbf16>
    %28 = vector.extract_strided_slice %25 {offsets = [0, 0, 0], sizes = [1, 8, 64], strides = [1, 1, 1]} : vector<1x8x128xbf16> to vector<1x8x64xbf16>
    "tpu.trace_start"() <{level = 10 : i32, message = "bqd,bkd->bqk"}> : () -> ()
    %cst_11 = arith.constant dense<0.000000e+00> : vector<1x8x8xf32>
    %29 = tpu.matmul %26, %27, %cst_11 {dimension_numbers = #tpu.dot_dimension_numbers<[2], [2], [1], [1], [0, 0, 0, 1, 1, 1], [0], [0]>} : vector<1x8x64xbf16>, vector<1x8x64xbf16>, vector<1x8x8xf32> -> vector<1x8x8xf32>
    "tpu.trace_stop"() : () -> ()
    %30 = vector.broadcast %22 : vector<1x1x8xf32> to vector<1x8x8xf32>
    %31 = arith.addf %29, %30 : vector<1x8x8xf32>
    %cst_12 = arith.constant dense<0xFF800000> : vector<1x8xf32>
    %32 = vector.multi_reduction <maximumf>, %31, %cst_12 [2] : vector<1x8x8xf32> to vector<1x8xf32>
    %33 = vector.shape_cast %32 : vector<1x8xf32> to vector<1x8x1xf32>
    %34 = vector.broadcast %33 : vector<1x8x1xf32> to vector<1x8x8xf32>
    %35 = arith.subf %31, %34 : vector<1x8x8xf32>
    %36 = math.exp %35 : vector<1x8x8xf32>
    %cst_13 = arith.constant dense<0.000000e+00> : vector<1x8xf32>
    %37 = vector.multi_reduction <add>, %36, %cst_13 [2] : vector<1x8x8xf32> to vector<1x8xf32>
    %38 = vector.shape_cast %37 : vector<1x8xf32> to vector<1x8x1xf32>
    %39 = arith.truncf %36 : vector<1x8x8xf32> to vector<1x8x8xbf16>
    "tpu.trace_start"() <{level = 10 : i32, message = "bqk,bkd->bqd"}> : () -> ()
    %cst_14 = arith.constant dense<0.000000e+00> : vector<1x8x64xf32>
    %40 = tpu.matmul %39, %28, %cst_14 {dimension_numbers = #tpu.dot_dimension_numbers<[2], [1], [1], [2], [0, 0, 0, 1, 1, 2], [0], [0]>} : vector<1x8x8xbf16>, vector<1x8x64xbf16>, vector<1x8x64xf32> -> vector<1x8x64xf32>
    "tpu.trace_stop"() : () -> ()
    %41 = tpu.reciprocal %38 {approx = true} : vector<1x8x1xf32> -> vector<1x8x1xf32>
    %42 = vector.broadcast %41 : vector<1x8x1xf32> to vector<1x8x64xf32>
    %43 = arith.mulf %40, %42 : vector<1x8x64xf32>
    %44 = vector.extract_strided_slice %23 {offsets = [0, 0, 64], sizes = [1, 8, 64], strides = [1, 1, 1]} : vector<1x8x128xbf16> to vector<1x8x64xbf16>
    %45 = vector.extract_strided_slice %24 {offsets = [0, 0, 64], sizes = [1, 8, 64], strides = [1, 1, 1]} : vector<1x8x128xbf16> to vector<1x8x64xbf16>
    %46 = vector.extract_strided_slice %25 {offsets = [0, 0, 64], sizes = [1, 8, 64], strides = [1, 1, 1]} : vector<1x8x128xbf16> to vector<1x8x64xbf16>
    "tpu.trace_start"() <{level = 10 : i32, message = "bqd,bkd->bqk"}> : () -> ()
    %cst_15 = arith.constant dense<0.000000e+00> : vector<1x8x8xf32>
    %47 = tpu.matmul %44, %45, %cst_15 {dimension_numbers = #tpu.dot_dimension_numbers<[2], [2], [1], [1], [0, 0, 0, 1, 1, 1], [0], [0]>} : vector<1x8x64xbf16>, vector<1x8x64xbf16>, vector<1x8x8xf32> -> vector<1x8x8xf32>
    "tpu.trace_stop"() : () -> ()
    %48 = vector.broadcast %22 : vector<1x1x8xf32> to vector<1x8x8xf32>
    %49 = arith.addf %47, %48 : vector<1x8x8xf32>
    %cst_16 = arith.constant dense<0xFF800000> : vector<1x8xf32>
    %50 = vector.multi_reduction <maximumf>, %49, %cst_16 [2] : vector<1x8x8xf32> to vector<1x8xf32>
    %51 = vector.shape_cast %50 : vector<1x8xf32> to vector<1x8x1xf32>
    %52 = vector.broadcast %51 : vector<1x8x1xf32> to vector<1x8x8xf32>
    %53 = arith.subf %49, %52 : vector<1x8x8xf32>
    %54 = math.exp %53 : vector<1x8x8xf32>
    %cst_17 = arith.constant dense<0.000000e+00> : vector<1x8xf32>
    %55 = vector.multi_reduction <add>, %54, %cst_17 [2] : vector<1x8x8xf32> to vector<1x8xf32>
    %56 = vector.shape_cast %55 : vector<1x8xf32> to vector<1x8x1xf32>
    %57 = arith.truncf %54 : vector<1x8x8xf32> to vector<1x8x8xbf16>
    "tpu.trace_start"() <{level = 10 : i32, message = "bqk,bkd->bqd"}> : () -> ()
    %cst_18 = arith.constant dense<0.000000e+00> : vector<1x8x64xf32>
    %58 = tpu.matmul %57, %46, %cst_18 {dimension_numbers = #tpu.dot_dimension_numbers<[2], [1], [1], [2], [0, 0, 0, 1, 1, 2], [0], [0]>} : vector<1x8x8xbf16>, vector<1x8x64xbf16>, vector<1x8x64xf32> -> vector<1x8x64xf32>
    "tpu.trace_stop"() : () -> ()
    %59 = tpu.reciprocal %56 {approx = true} : vector<1x8x1xf32> -> vector<1x8x1xf32>
    %60 = vector.broadcast %59 : vector<1x8x1xf32> to vector<1x8x64xf32>
    %61 = arith.mulf %58, %60 : vector<1x8x64xf32>
    %62 = tpu.concatenate %43, %61 in 2 : vector<1x8x64xf32>, vector<1x8x64xf32> -> vector<1x8x128xf32>
    %63 = arith.truncf %62 : vector<1x8x128xf32> to vector<1x8x128xbf16>
    %c0_19 = arith.constant 0 : index
    %c0_20 = arith.constant 0 : index
    %c0_21 = arith.constant 0 : index
    %64 = vector.load %arg12[%c0_19, %c0_20, %c0_21] : memref<1x8x768xbf16, #tpu.memory_space<vmem>>, vector<1x8x128xbf16>
    tpu.vector_store %arg12[%c0_19, %c0_20, %c0_21], %63 {strides = array<i32>} : memref<1x8x768xbf16, #tpu.memory_space<vmem>>, vector<1x8x128xbf16>,
    %65 = vector.extract_strided_slice %10 {offsets = [0, 0, 128], sizes = [1, 8, 128], strides = [1, 1, 1]} : vector<1x8x768xbf16> to vector<1x8x128xbf16>
    %66 = vector.extract_strided_slice %13 {offsets = [0, 0, 128], sizes = [1, 8, 128], strides = [1, 1, 1]} : vector<1x8x768xbf16> to vector<1x8x128xbf16>
    %67 = vector.extract_strided_slice %16 {offsets = [0, 0, 128], sizes = [1, 8, 128], strides = [1, 1, 1]} : vector<1x8x768xbf16> to vector<1x8x128xbf16>
    %68 = vector.extract_strided_slice %65 {offsets = [0, 0, 0], sizes = [1, 8, 64], strides = [1, 1, 1]} : vector<1x8x128xbf16> to vector<1x8x64xbf16>
    %69 = vector.extract_strided_slice %66 {offsets = [0, 0, 0], sizes = [1, 8, 64], strides = [1, 1, 1]} : vector<1x8x128xbf16> to vector<1x8x64xbf16>
    %70 = vector.extract_strided_slice %67 {offsets = [0, 0, 0], sizes = [1, 8, 64], strides = [1, 1, 1]} : vector<1x8x128xbf16> to vector<1x8x64xbf16>
    "tpu.trace_start"() <{level = 10 : i32, message = "bqd,bkd->bqk"}> : () -> ()
    %cst_22 = arith.constant dense<0.000000e+00> : vector<1x8x8xf32>
    %71 = tpu.matmul %68, %69, %cst_22 {dimension_numbers = #tpu.dot_dimension_numbers<[2], [2], [1], [1], [0, 0, 0, 1, 1, 1], [0], [0]>} : vector<1x8x64xbf16>, vector<1x8x64xbf16>, vector<1x8x8xf32> -> vector<1x8x8xf32>
    "tpu.trace_stop"() : () -> ()
    %72 = vector.broadcast %22 : vector<1x1x8xf32> to vector<1x8x8xf32>
    %73 = arith.addf %71, %72 : vector<1x8x8xf32>
    %cst_23 = arith.constant dense<0xFF800000> : vector<1x8xf32>
    %74 = vector.multi_reduction <maximumf>, %73, %cst_23 [2] : vector<1x8x8xf32> to vector<1x8xf32>
    %75 = vector.shape_cast %74 : vector<1x8xf32> to vector<1x8x1xf32>
    %76 = vector.broadcast %75 : vector<1x8x1xf32> to vector<1x8x8xf32>
    %77 = arith.subf %73, %76 : vector<1x8x8xf32>
    %78 = math.exp %77 : vector<1x8x8xf32>
    %cst_24 = arith.constant dense<0.000000e+00> : vector<1x8xf32>
    %79 = vector.multi_reduction <add>, %78, %cst_24 [2] : vector<1x8x8xf32> to vector<1x8xf32>
    %80 = vector.shape_cast %79 : vector<1x8xf32> to vector<1x8x1xf32>
    %81 = arith.truncf %78 : vector<1x8x8xf32> to vector<1x8x8xbf16>
    "tpu.trace_start"() <{level = 10 : i32, message = "bqk,bkd->bqd"}> : () -> ()
    %cst_25 = arith.constant dense<0.000000e+00> : vector<1x8x64xf32>
    %82 = tpu.matmul %81, %70, %cst_25 {dimension_numbers = #tpu.dot_dimension_numbers<[2], [1], [1], [2], [0, 0, 0, 1, 1, 2], [0], [0]>} : vector<1x8x8xbf16>, vector<1x8x64xbf16>, vector<1x8x64xf32> -> vector<1x8x64xf32>
    "tpu.trace_stop"() : () -> ()
    %83 = tpu.reciprocal %80 {approx = true} : vector<1x8x1xf32> -> vector<1x8x1xf32>
    %84 = vector.broadcast %83 : vector<1x8x1xf32> to vector<1x8x64xf32>
    %85 = arith.mulf %82, %84 : vector<1x8x64xf32>
    %86 = vector.extract_strided_slice %65 {offsets = [0, 0, 64], sizes = [1, 8, 64], strides = [1, 1, 1]} : vector<1x8x128xbf16> to vector<1x8x64xbf16>
    %87 = vector.extract_strided_slice %66 {offsets = [0, 0, 64], sizes = [1, 8, 64], strides = [1, 1, 1]} : vector<1x8x128xbf16> to vector<1x8x64xbf16>
    %88 = vector.extract_strided_slice %67 {offsets = [0, 0, 64], sizes = [1, 8, 64], strides = [1, 1, 1]} : vector<1x8x128xbf16> to vector<1x8x64xbf16>
    "tpu.trace_start"() <{level = 10 : i32, message = "bqd,bkd->bqk"}> : () -> ()
    %cst_26 = arith.constant dense<0.000000e+00> : vector<1x8x8xf32>
    %89 = tpu.matmul %86, %87, %cst_26 {dimension_numbers = #tpu.dot_dimension_numbers<[2], [2], [1], [1], [0, 0, 0, 1, 1, 1], [0], [0]>} : vector<1x8x64xbf16>, vector<1x8x64xbf16>, vector<1x8x8xf32> -> vector<1x8x8xf32>
    "tpu.trace_stop"() : () -> ()
    %90 = vector.broadcast %22 : vector<1x1x8xf32> to vector<1x8x8xf32>
    %91 = arith.addf %89, %90 : vector<1x8x8xf32>
    %cst_27 = arith.constant dense<0xFF800000> : vector<1x8xf32>
    %92 = vector.multi_reduction <maximumf>, %91, %cst_27 [2] : vector<1x8x8xf32> to vector<1x8xf32>
    %93 = vector.shape_cast %92 : vector<1x8xf32> to vector<1x8x1xf32>
    %94 = vector.broadcast %93 : vector<1x8x1xf32> to vector<1x8x8xf32>
    %95 = arith.subf %91, %94 : vector<1x8x8xf32>
    %96 = math.exp %95 : vector<1x8x8xf32>
    %cst_28 = arith.constant dense<0.000000e+00> : vector<1x8xf32>
    %97 = vector.multi_reduction <add>, %96, %cst_28 [2] : vector<1x8x8xf32> to vector<1x8xf32>
    %98 = vector.shape_cast %97 : vector<1x8xf32> to vector<1x8x1xf32>
    %99 = arith.truncf %96 : vector<1x8x8xf32> to vector<1x8x8xbf16>
    "tpu.trace_start"() <{level = 10 : i32, message = "bqk,bkd->bqd"}> : () -> ()
    %cst_29 = arith.constant dense<0.000000e+00> : vector<1x8x64xf32>
    %100 = tpu.matmul %99, %88, %cst_29 {dimension_numbers = #tpu.dot_dimension_numbers<[2], [1], [1], [2], [0, 0, 0, 1, 1, 2], [0], [0]>} : vector<1x8x8xbf16>, vector<1x8x64xbf16>, vector<1x8x64xf32> -> vector<1x8x64xf32>
    "tpu.trace_stop"() : () -> ()
    %101 = tpu.reciprocal %98 {approx = true} : vector<1x8x1xf32> -> vector<1x8x1xf32>
    %102 = vector.broadcast %101 : vector<1x8x1xf32> to vector<1x8x64xf32>
    %103 = arith.mulf %100, %102 : vector<1x8x64xf32>
    %104 = tpu.concatenate %85, %103 in 2 : vector<1x8x64xf32>, vector<1x8x64xf32> -> vector<1x8x128xf32>
    %105 = arith.truncf %104 : vector<1x8x128xf32> to vector<1x8x128xbf16>
    %c0_30 = arith.constant 0 : index
    %c0_31 = arith.constant 0 : index
    %c128 = arith.constant 128 : index
    %106 = vector.load %arg12[%c0_30, %c0_31, %c128] : memref<1x8x768xbf16, #tpu.memory_space<vmem>>, vector<1x8x128xbf16>
    tpu.vector_store %arg12[%c0_30, %c0_31, %c128], %105 {strides = array<i32>} : memref<1x8x768xbf16, #tpu.memory_space<vmem>>, vector<1x8x128xbf16>,
    %107 = vector.extract_strided_slice %10 {offsets = [0, 0, 256], sizes = [1, 8, 128], strides = [1, 1, 1]} : vector<1x8x768xbf16> to vector<1x8x128xbf16>
    %108 = vector.extract_strided_slice %13 {offsets = [0, 0, 256], sizes = [1, 8, 128], strides = [1, 1, 1]} : vector<1x8x768xbf16> to vector<1x8x128xbf16>
    %109 = vector.extract_strided_slice %16 {offsets = [0, 0, 256], sizes = [1, 8, 128], strides = [1, 1, 1]} : vector<1x8x768xbf16> to vector<1x8x128xbf16>
    %110 = vector.extract_strided_slice %107 {offsets = [0, 0, 0], sizes = [1, 8, 64], strides = [1, 1, 1]} : vector<1x8x128xbf16> to vector<1x8x64xbf16>
    %111 = vector.extract_strided_slice %108 {offsets = [0, 0, 0], sizes = [1, 8, 64], strides = [1, 1, 1]} : vector<1x8x128xbf16> to vector<1x8x64xbf16>
    %112 = vector.extract_strided_slice %109 {offsets = [0, 0, 0], sizes = [1, 8, 64], strides = [1, 1, 1]} : vector<1x8x128xbf16> to vector<1x8x64xbf16>
    "tpu.trace_start"() <{level = 10 : i32, message = "bqd,bkd->bqk"}> : () -> ()
    %cst_32 = arith.constant dense<0.000000e+00> : vector<1x8x8xf32>
    %113 = tpu.matmul %110, %111, %cst_32 {dimension_numbers = #tpu.dot_dimension_numbers<[2], [2], [1], [1], [0, 0, 0, 1, 1, 1], [0], [0]>} : vector<1x8x64xbf16>, vector<1x8x64xbf16>, vector<1x8x8xf32> -> vector<1x8x8xf32>
    "tpu.trace_stop"() : () -> ()
    %114 = vector.broadcast %22 : vector<1x1x8xf32> to vector<1x8x8xf32>
    %115 = arith.addf %113, %114 : vector<1x8x8xf32>
    %cst_33 = arith.constant dense<0xFF800000> : vector<1x8xf32>
    %116 = vector.multi_reduction <maximumf>, %115, %cst_33 [2] : vector<1x8x8xf32> to vector<1x8xf32>
    %117 = vector.shape_cast %116 : vector<1x8xf32> to vector<1x8x1xf32>
    %118 = vector.broadcast %117 : vector<1x8x1xf32> to vector<1x8x8xf32>
    %119 = arith.subf %115, %118 : vector<1x8x8xf32>
    %120 = math.exp %119 : vector<1x8x8xf32>
    %cst_34 = arith.constant dense<0.000000e+00> : vector<1x8xf32>
    %121 = vector.multi_reduction <add>, %120, %cst_34 [2] : vector<1x8x8xf32> to vector<1x8xf32>
    %122 = vector.shape_cast %121 : vector<1x8xf32> to vector<1x8x1xf32>
    %123 = arith.truncf %120 : vector<1x8x8xf32> to vector<1x8x8xbf16>
    "tpu.trace_start"() <{level = 10 : i32, message = "bqk,bkd->bqd"}> : () -> ()
    %cst_35 = arith.constant dense<0.000000e+00> : vector<1x8x64xf32>
    %124 = tpu.matmul %123, %112, %cst_35 {dimension_numbers = #tpu.dot_dimension_numbers<[2], [1], [1], [2], [0, 0, 0, 1, 1, 2], [0], [0]>} : vector<1x8x8xbf16>, vector<1x8x64xbf16>, vector<1x8x64xf32> -> vector<1x8x64xf32>
    "tpu.trace_stop"() : () -> ()
    %125 = tpu.reciprocal %122 {approx = true} : vector<1x8x1xf32> -> vector<1x8x1xf32>
    %126 = vector.broadcast %125 : vector<1x8x1xf32> to vector<1x8x64xf32>
    %127 = arith.mulf %124, %126 : vector<1x8x64xf32>
    %128 = vector.extract_strided_slice %107 {offsets = [0, 0, 64], sizes = [1, 8, 64], strides = [1, 1, 1]} : vector<1x8x128xbf16> to vector<1x8x64xbf16>
    %129 = vector.extract_strided_slice %108 {offsets = [0, 0, 64], sizes = [1, 8, 64], strides = [1, 1, 1]} : vector<1x8x128xbf16> to vector<1x8x64xbf16>
    %130 = vector.extract_strided_slice %109 {offsets = [0, 0, 64], sizes = [1, 8, 64], strides = [1, 1, 1]} : vector<1x8x128xbf16> to vector<1x8x64xbf16>
    "tpu.trace_start"() <{level = 10 : i32, message = "bqd,bkd->bqk"}> : () -> ()
    %cst_36 = arith.constant dense<0.000000e+00> : vector<1x8x8xf32>
    %131 = tpu.matmul %128, %129, %cst_36 {dimension_numbers = #tpu.dot_dimension_numbers<[2], [2], [1], [1], [0, 0, 0, 1, 1, 1], [0], [0]>} : vector<1x8x64xbf16>, vector<1x8x64xbf16>, vector<1x8x8xf32> -> vector<1x8x8xf32>
    "tpu.trace_stop"() : () -> ()
    %132 = vector.broadcast %22 : vector<1x1x8xf32> to vector<1x8x8xf32>
    %133 = arith.addf %131, %132 : vector<1x8x8xf32>
    %cst_37 = arith.constant dense<0xFF800000> : vector<1x8xf32>
    %134 = vector.multi_reduction <maximumf>, %133, %cst_37 [2] : vector<1x8x8xf32> to vector<1x8xf32>
    %135 = vector.shape_cast %134 : vector<1x8xf32> to vector<1x8x1xf32>
    %136 = vector.broadcast %135 : vector<1x8x1xf32> to vector<1x8x8xf32>
    %137 = arith.subf %133, %136 : vector<1x8x8xf32>
    %138 = math.exp %137 : vector<1x8x8xf32>
    %cst_38 = arith.constant dense<0.000000e+00> : vector<1x8xf32>
    %139 = vector.multi_reduction <add>, %138, %cst_38 [2] : vector<1x8x8xf32> to vector<1x8xf32>
    %140 = vector.shape_cast %139 : vector<1x8xf32> to vector<1x8x1xf32>
    %141 = arith.truncf %138 : vector<1x8x8xf32> to vector<1x8x8xbf16>
    "tpu.trace_start"() <{level = 10 : i32, message = "bqk,bkd->bqd"}> : () -> ()
    %cst_39 = arith.constant dense<0.000000e+00> : vector<1x8x64xf32>
    %142 = tpu.matmul %141, %130, %cst_39 {dimension_numbers = #tpu.dot_dimension_numbers<[2], [1], [1], [2], [0, 0, 0, 1, 1, 2], [0], [0]>} : vector<1x8x8xbf16>, vector<1x8x64xbf16>, vector<1x8x64xf32> -> vector<1x8x64xf32>
    "tpu.trace_stop"() : () -> ()
    %143 = tpu.reciprocal %140 {approx = true} : vector<1x8x1xf32> -> vector<1x8x1xf32>
    %144 = vector.broadcast %143 : vector<1x8x1xf32> to vector<1x8x64xf32>
    %145 = arith.mulf %142, %144 : vector<1x8x64xf32>
    %146 = tpu.concatenate %127, %145 in 2 : vector<1x8x64xf32>, vector<1x8x64xf32> -> vector<1x8x128xf32>
    %147 = arith.truncf %146 : vector<1x8x128xf32> to vector<1x8x128xbf16>
    %c0_40 = arith.constant 0 : index
    %c0_41 = arith.constant 0 : index
    %c256 = arith.constant 256 : index
    %148 = vector.load %arg12[%c0_40, %c0_41, %c256] : memref<1x8x768xbf16, #tpu.memory_space<vmem>>, vector<1x8x128xbf16>
    tpu.vector_store %arg12[%c0_40, %c0_41, %c256], %147 {strides = array<i32>} : memref<1x8x768xbf16, #tpu.memory_space<vmem>>, vector<1x8x128xbf16>,
    %149 = vector.extract_strided_slice %10 {offsets = [0, 0, 384], sizes = [1, 8, 128], strides = [1, 1, 1]} : vector<1x8x768xbf16> to vector<1x8x128xbf16>
    %150 = vector.extract_strided_slice %13 {offsets = [0, 0, 384], sizes = [1, 8, 128], strides = [1, 1, 1]} : vector<1x8x768xbf16> to vector<1x8x128xbf16>
    %151 = vector.extract_strided_slice %16 {offsets = [0, 0, 384], sizes = [1, 8, 128], strides = [1, 1, 1]} : vector<1x8x768xbf16> to vector<1x8x128xbf16>
    %152 = vector.extract_strided_slice %149 {offsets = [0, 0, 0], sizes = [1, 8, 64], strides = [1, 1, 1]} : vector<1x8x128xbf16> to vector<1x8x64xbf16>
    %153 = vector.extract_strided_slice %150 {offsets = [0, 0, 0], sizes = [1, 8, 64], strides = [1, 1, 1]} : vector<1x8x128xbf16> to vector<1x8x64xbf16>
    %154 = vector.extract_strided_slice %151 {offsets = [0, 0, 0], sizes = [1, 8, 64], strides = [1, 1, 1]} : vector<1x8x128xbf16> to vector<1x8x64xbf16>
    "tpu.trace_start"() <{level = 10 : i32, message = "bqd,bkd->bqk"}> : () -> ()
    %cst_42 = arith.constant dense<0.000000e+00> : vector<1x8x8xf32>
    %155 = tpu.matmul %152, %153, %cst_42 {dimension_numbers = #tpu.dot_dimension_numbers<[2], [2], [1], [1], [0, 0, 0, 1, 1, 1], [0], [0]>} : vector<1x8x64xbf16>, vector<1x8x64xbf16>, vector<1x8x8xf32> -> vector<1x8x8xf32>
    "tpu.trace_stop"() : () -> ()
    %156 = vector.broadcast %22 : vector<1x1x8xf32> to vector<1x8x8xf32>
    %157 = arith.addf %155, %156 : vector<1x8x8xf32>
    %cst_43 = arith.constant dense<0xFF800000> : vector<1x8xf32>
    %158 = vector.multi_reduction <maximumf>, %157, %cst_43 [2] : vector<1x8x8xf32> to vector<1x8xf32>
    %159 = vector.shape_cast %158 : vector<1x8xf32> to vector<1x8x1xf32>
    %160 = vector.broadcast %159 : vector<1x8x1xf32> to vector<1x8x8xf32>
    %161 = arith.subf %157, %160 : vector<1x8x8xf32>
    %162 = math.exp %161 : vector<1x8x8xf32>
    %cst_44 = arith.constant dense<0.000000e+00> : vector<1x8xf32>
    %163 = vector.multi_reduction <add>, %162, %cst_44 [2] : vector<1x8x8xf32> to vector<1x8xf32>
    %164 = vector.shape_cast %163 : vector<1x8xf32> to vector<1x8x1xf32>
    %165 = arith.truncf %162 : vector<1x8x8xf32> to vector<1x8x8xbf16>
    "tpu.trace_start"() <{level = 10 : i32, message = "bqk,bkd->bqd"}> : () -> ()
    %cst_45 = arith.constant dense<0.000000e+00> : vector<1x8x64xf32>
    %166 = tpu.matmul %165, %154, %cst_45 {dimension_numbers = #tpu.dot_dimension_numbers<[2], [1], [1], [2], [0, 0, 0, 1, 1, 2], [0], [0]>} : vector<1x8x8xbf16>, vector<1x8x64xbf16>, vector<1x8x64xf32> -> vector<1x8x64xf32>
    "tpu.trace_stop"() : () -> ()
    %167 = tpu.reciprocal %164 {approx = true} : vector<1x8x1xf32> -> vector<1x8x1xf32>
    %168 = vector.broadcast %167 : vector<1x8x1xf32> to vector<1x8x64xf32>
    %169 = arith.mulf %166, %168 : vector<1x8x64xf32>
    %170 = vector.extract_strided_slice %149 {offsets = [0, 0, 64], sizes = [1, 8, 64], strides = [1, 1, 1]} : vector<1x8x128xbf16> to vector<1x8x64xbf16>
    %171 = vector.extract_strided_slice %150 {offsets = [0, 0, 64], sizes = [1, 8, 64], strides = [1, 1, 1]} : vector<1x8x128xbf16> to vector<1x8x64xbf16>
    %172 = vector.extract_strided_slice %151 {offsets = [0, 0, 64], sizes = [1, 8, 64], strides = [1, 1, 1]} : vector<1x8x128xbf16> to vector<1x8x64xbf16>
    "tpu.trace_start"() <{level = 10 : i32, message = "bqd,bkd->bqk"}> : () -> ()
    %cst_46 = arith.constant dense<0.000000e+00> : vector<1x8x8xf32>
    %173 = tpu.matmul %170, %171, %cst_46 {dimension_numbers = #tpu.dot_dimension_numbers<[2], [2], [1], [1], [0, 0, 0, 1, 1, 1], [0], [0]>} : vector<1x8x64xbf16>, vector<1x8x64xbf16>, vector<1x8x8xf32> -> vector<1x8x8xf32>
    "tpu.trace_stop"() : () -> ()
    %174 = vector.broadcast %22 : vector<1x1x8xf32> to vector<1x8x8xf32>
    %175 = arith.addf %173, %174 : vector<1x8x8xf32>
    %cst_47 = arith.constant dense<0xFF800000> : vector<1x8xf32>
    %176 = vector.multi_reduction <maximumf>, %175, %cst_47 [2] : vector<1x8x8xf32> to vector<1x8xf32>
    %177 = vector.shape_cast %176 : vector<1x8xf32> to vector<1x8x1xf32>
    %178 = vector.broadcast %177 : vector<1x8x1xf32> to vector<1x8x8xf32>
    %179 = arith.subf %175, %178 : vector<1x8x8xf32>
    %180 = math.exp %179 : vector<1x8x8xf32>
    %cst_48 = arith.constant dense<0.000000e+00> : vector<1x8xf32>
    %181 = vector.multi_reduction <add>, %180, %cst_48 [2] : vector<1x8x8xf32> to vector<1x8xf32>
    %182 = vector.shape_cast %181 : vector<1x8xf32> to vector<1x8x1xf32>
    %183 = arith.truncf %180 : vector<1x8x8xf32> to vector<1x8x8xbf16>
    "tpu.trace_start"() <{level = 10 : i32, message = "bqk,bkd->bqd"}> : () -> ()
    %cst_49 = arith.constant dense<0.000000e+00> : vector<1x8x64xf32>
    %184 = tpu.matmul %183, %172, %cst_49 {dimension_numbers = #tpu.dot_dimension_numbers<[2], [1], [1], [2], [0, 0, 0, 1, 1, 2], [0], [0]>} : vector<1x8x8xbf16>, vector<1x8x64xbf16>, vector<1x8x64xf32> -> vector<1x8x64xf32>
    "tpu.trace_stop"() : () -> ()
    %185 = tpu.reciprocal %182 {approx = true} : vector<1x8x1xf32> -> vector<1x8x1xf32>
    %186 = vector.broadcast %185 : vector<1x8x1xf32> to vector<1x8x64xf32>
    %187 = arith.mulf %184, %186 : vector<1x8x64xf32>
    %188 = tpu.concatenate %169, %187 in 2 : vector<1x8x64xf32>, vector<1x8x64xf32> -> vector<1x8x128xf32>
    %189 = arith.truncf %188 : vector<1x8x128xf32> to vector<1x8x128xbf16>
    %c0_50 = arith.constant 0 : index
    %c0_51 = arith.constant 0 : index
    %c384 = arith.constant 384 : index
    %190 = vector.load %arg12[%c0_50, %c0_51, %c384] : memref<1x8x768xbf16, #tpu.memory_space<vmem>>, vector<1x8x128xbf16>
    tpu.vector_store %arg12[%c0_50, %c0_51, %c384], %189 {strides = array<i32>} : memref<1x8x768xbf16, #tpu.memory_space<vmem>>, vector<1x8x128xbf16>,
    %191 = vector.extract_strided_slice %10 {offsets = [0, 0, 512], sizes = [1, 8, 128], strides = [1, 1, 1]} : vector<1x8x768xbf16> to vector<1x8x128xbf16>
    %192 = vector.extract_strided_slice %13 {offsets = [0, 0, 512], sizes = [1, 8, 128], strides = [1, 1, 1]} : vector<1x8x768xbf16> to vector<1x8x128xbf16>
    %193 = vector.extract_strided_slice %16 {offsets = [0, 0, 512], sizes = [1, 8, 128], strides = [1, 1, 1]} : vector<1x8x768xbf16> to vector<1x8x128xbf16>
    %194 = vector.extract_strided_slice %191 {offsets = [0, 0, 0], sizes = [1, 8, 64], strides = [1, 1, 1]} : vector<1x8x128xbf16> to vector<1x8x64xbf16>
    %195 = vector.extract_strided_slice %192 {offsets = [0, 0, 0], sizes = [1, 8, 64], strides = [1, 1, 1]} : vector<1x8x128xbf16> to vector<1x8x64xbf16>
    %196 = vector.extract_strided_slice %193 {offsets = [0, 0, 0], sizes = [1, 8, 64], strides = [1, 1, 1]} : vector<1x8x128xbf16> to vector<1x8x64xbf16>
    "tpu.trace_start"() <{level = 10 : i32, message = "bqd,bkd->bqk"}> : () -> ()
    %cst_52 = arith.constant dense<0.000000e+00> : vector<1x8x8xf32>
    %197 = tpu.matmul %194, %195, %cst_52 {dimension_numbers = #tpu.dot_dimension_numbers<[2], [2], [1], [1], [0, 0, 0, 1, 1, 1], [0], [0]>} : vector<1x8x64xbf16>, vector<1x8x64xbf16>, vector<1x8x8xf32> -> vector<1x8x8xf32>
    "tpu.trace_stop"() : () -> ()
    %198 = vector.broadcast %22 : vector<1x1x8xf32> to vector<1x8x8xf32>
    %199 = arith.addf %197, %198 : vector<1x8x8xf32>
    %cst_53 = arith.constant dense<0xFF800000> : vector<1x8xf32>
    %200 = vector.multi_reduction <maximumf>, %199, %cst_53 [2] : vector<1x8x8xf32> to vector<1x8xf32>
    %201 = vector.shape_cast %200 : vector<1x8xf32> to vector<1x8x1xf32>
    %202 = vector.broadcast %201 : vector<1x8x1xf32> to vector<1x8x8xf32>
    %203 = arith.subf %199, %202 : vector<1x8x8xf32>
    %204 = math.exp %203 : vector<1x8x8xf32>
    %cst_54 = arith.constant dense<0.000000e+00> : vector<1x8xf32>
    %205 = vector.multi_reduction <add>, %204, %cst_54 [2] : vector<1x8x8xf32> to vector<1x8xf32>
    %206 = vector.shape_cast %205 : vector<1x8xf32> to vector<1x8x1xf32>
    %207 = arith.truncf %204 : vector<1x8x8xf32> to vector<1x8x8xbf16>
    "tpu.trace_start"() <{level = 10 : i32, message = "bqk,bkd->bqd"}> : () -> ()
    %cst_55 = arith.constant dense<0.000000e+00> : vector<1x8x64xf32>
    %208 = tpu.matmul %207, %196, %cst_55 {dimension_numbers = #tpu.dot_dimension_numbers<[2], [1], [1], [2], [0, 0, 0, 1, 1, 2], [0], [0]>} : vector<1x8x8xbf16>, vector<1x8x64xbf16>, vector<1x8x64xf32> -> vector<1x8x64xf32>
    "tpu.trace_stop"() : () -> ()
    %209 = tpu.reciprocal %206 {approx = true} : vector<1x8x1xf32> -> vector<1x8x1xf32>
    %210 = vector.broadcast %209 : vector<1x8x1xf32> to vector<1x8x64xf32>
    %211 = arith.mulf %208, %210 : vector<1x8x64xf32>
    %212 = vector.extract_strided_slice %191 {offsets = [0, 0, 64], sizes = [1, 8, 64], strides = [1, 1, 1]} : vector<1x8x128xbf16> to vector<1x8x64xbf16>
    %213 = vector.extract_strided_slice %192 {offsets = [0, 0, 64], sizes = [1, 8, 64], strides = [1, 1, 1]} : vector<1x8x128xbf16> to vector<1x8x64xbf16>
    %214 = vector.extract_strided_slice %193 {offsets = [0, 0, 64], sizes = [1, 8, 64], strides = [1, 1, 1]} : vector<1x8x128xbf16> to vector<1x8x64xbf16>
    "tpu.trace_start"() <{level = 10 : i32, message = "bqd,bkd->bqk"}> : () -> ()
    %cst_56 = arith.constant dense<0.000000e+00> : vector<1x8x8xf32>
    %215 = tpu.matmul %212, %213, %cst_56 {dimension_numbers = #tpu.dot_dimension_numbers<[2], [2], [1], [1], [0, 0, 0, 1, 1, 1], [0], [0]>} : vector<1x8x64xbf16>, vector<1x8x64xbf16>, vector<1x8x8xf32> -> vector<1x8x8xf32>
    "tpu.trace_stop"() : () -> ()
    %216 = vector.broadcast %22 : vector<1x1x8xf32> to vector<1x8x8xf32>
    %217 = arith.addf %215, %216 : vector<1x8x8xf32>
    %cst_57 = arith.constant dense<0xFF800000> : vector<1x8xf32>
    %218 = vector.multi_reduction <maximumf>, %217, %cst_57 [2] : vector<1x8x8xf32> to vector<1x8xf32>
    %219 = vector.shape_cast %218 : vector<1x8xf32> to vector<1x8x1xf32>
    %220 = vector.broadcast %219 : vector<1x8x1xf32> to vector<1x8x8xf32>
    %221 = arith.subf %217, %220 : vector<1x8x8xf32>
    %222 = math.exp %221 : vector<1x8x8xf32>
    %cst_58 = arith.constant dense<0.000000e+00> : vector<1x8xf32>
    %223 = vector.multi_reduction <add>, %222, %cst_58 [2] : vector<1x8x8xf32> to vector<1x8xf32>
    %224 = vector.shape_cast %223 : vector<1x8xf32> to vector<1x8x1xf32>
    %225 = arith.truncf %222 : vector<1x8x8xf32> to vector<1x8x8xbf16>
    "tpu.trace_start"() <{level = 10 : i32, message = "bqk,bkd->bqd"}> : () -> ()
    %cst_59 = arith.constant dense<0.000000e+00> : vector<1x8x64xf32>
    %226 = tpu.matmul %225, %214, %cst_59 {dimension_numbers = #tpu.dot_dimension_numbers<[2], [1], [1], [2], [0, 0, 0, 1, 1, 2], [0], [0]>} : vector<1x8x8xbf16>, vector<1x8x64xbf16>, vector<1x8x64xf32> -> vector<1x8x64xf32>
    "tpu.trace_stop"() : () -> ()
    %227 = tpu.reciprocal %224 {approx = true} : vector<1x8x1xf32> -> vector<1x8x1xf32>
    %228 = vector.broadcast %227 : vector<1x8x1xf32> to vector<1x8x64xf32>
    %229 = arith.mulf %226, %228 : vector<1x8x64xf32>
    %230 = tpu.concatenate %211, %229 in 2 : vector<1x8x64xf32>, vector<1x8x64xf32> -> vector<1x8x128xf32>
    %231 = arith.truncf %230 : vector<1x8x128xf32> to vector<1x8x128xbf16>
    %c0_60 = arith.constant 0 : index
    %c0_61 = arith.constant 0 : index
    %c512 = arith.constant 512 : index
    %232 = vector.load %arg12[%c0_60, %c0_61, %c512] : memref<1x8x768xbf16, #tpu.memory_space<vmem>>, vector<1x8x128xbf16>
    tpu.vector_store %arg12[%c0_60, %c0_61, %c512], %231 {strides = array<i32>} : memref<1x8x768xbf16, #tpu.memory_space<vmem>>, vector<1x8x128xbf16>,
    %233 = vector.extract_strided_slice %10 {offsets = [0, 0, 640], sizes = [1, 8, 128], strides = [1, 1, 1]} : vector<1x8x768xbf16> to vector<1x8x128xbf16>
    %234 = vector.extract_strided_slice %13 {offsets = [0, 0, 640], sizes = [1, 8, 128], strides = [1, 1, 1]} : vector<1x8x768xbf16> to vector<1x8x128xbf16>
    %235 = vector.extract_strided_slice %16 {offsets = [0, 0, 640], sizes = [1, 8, 128], strides = [1, 1, 1]} : vector<1x8x768xbf16> to vector<1x8x128xbf16>
    %236 = vector.extract_strided_slice %233 {offsets = [0, 0, 0], sizes = [1, 8, 64], strides = [1, 1, 1]} : vector<1x8x128xbf16> to vector<1x8x64xbf16>
    %237 = vector.extract_strided_slice %234 {offsets = [0, 0, 0], sizes = [1, 8, 64], strides = [1, 1, 1]} : vector<1x8x128xbf16> to vector<1x8x64xbf16>
    %238 = vector.extract_strided_slice %235 {offsets = [0, 0, 0], sizes = [1, 8, 64], strides = [1, 1, 1]} : vector<1x8x128xbf16> to vector<1x8x64xbf16>
    "tpu.trace_start"() <{level = 10 : i32, message = "bqd,bkd->bqk"}> : () -> ()
    %cst_62 = arith.constant dense<0.000000e+00> : vector<1x8x8xf32>
    %239 = tpu.matmul %236, %237, %cst_62 {dimension_numbers = #tpu.dot_dimension_numbers<[2], [2], [1], [1], [0, 0, 0, 1, 1, 1], [0], [0]>} : vector<1x8x64xbf16>, vector<1x8x64xbf16>, vector<1x8x8xf32> -> vector<1x8x8xf32>
    "tpu.trace_stop"() : () -> ()
    %240 = vector.broadcast %22 : vector<1x1x8xf32> to vector<1x8x8xf32>
    %241 = arith.addf %239, %240 : vector<1x8x8xf32>
    %cst_63 = arith.constant dense<0xFF800000> : vector<1x8xf32>
    %242 = vector.multi_reduction <maximumf>, %241, %cst_63 [2] : vector<1x8x8xf32> to vector<1x8xf32>
    %243 = vector.shape_cast %242 : vector<1x8xf32> to vector<1x8x1xf32>
    %244 = vector.broadcast %243 : vector<1x8x1xf32> to vector<1x8x8xf32>
    %245 = arith.subf %241, %244 : vector<1x8x8xf32>
    %246 = math.exp %245 : vector<1x8x8xf32>
    %cst_64 = arith.constant dense<0.000000e+00> : vector<1x8xf32>
    %247 = vector.multi_reduction <add>, %246, %cst_64 [2] : vector<1x8x8xf32> to vector<1x8xf32>
    %248 = vector.shape_cast %247 : vector<1x8xf32> to vector<1x8x1xf32>
    %249 = arith.truncf %246 : vector<1x8x8xf32> to vector<1x8x8xbf16>
    "tpu.trace_start"() <{level = 10 : i32, message = "bqk,bkd->bqd"}> : () -> ()
    %cst_65 = arith.constant dense<0.000000e+00> : vector<1x8x64xf32>
    %250 = tpu.matmul %249, %238, %cst_65 {dimension_numbers = #tpu.dot_dimension_numbers<[2], [1], [1], [2], [0, 0, 0, 1, 1, 2], [0], [0]>} : vector<1x8x8xbf16>, vector<1x8x64xbf16>, vector<1x8x64xf32> -> vector<1x8x64xf32>
    "tpu.trace_stop"() : () -> ()
    %251 = tpu.reciprocal %248 {approx = true} : vector<1x8x1xf32> -> vector<1x8x1xf32>
    %252 = vector.broadcast %251 : vector<1x8x1xf32> to vector<1x8x64xf32>
    %253 = arith.mulf %250, %252 : vector<1x8x64xf32>
    %254 = vector.extract_strided_slice %233 {offsets = [0, 0, 64], sizes = [1, 8, 64], strides = [1, 1, 1]} : vector<1x8x128xbf16> to vector<1x8x64xbf16>
    %255 = vector.extract_strided_slice %234 {offsets = [0, 0, 64], sizes = [1, 8, 64], strides = [1, 1, 1]} : vector<1x8x128xbf16> to vector<1x8x64xbf16>
    %256 = vector.extract_strided_slice %235 {offsets = [0, 0, 64], sizes = [1, 8, 64], strides = [1, 1, 1]} : vector<1x8x128xbf16> to vector<1x8x64xbf16>
    "tpu.trace_start"() <{level = 10 : i32, message = "bqd,bkd->bqk"}> : () -> ()
    %cst_66 = arith.constant dense<0.000000e+00> : vector<1x8x8xf32>
    %257 = tpu.matmul %254, %255, %cst_66 {dimension_numbers = #tpu.dot_dimension_numbers<[2], [2], [1], [1], [0, 0, 0, 1, 1, 1], [0], [0]>} : vector<1x8x64xbf16>, vector<1x8x64xbf16>, vector<1x8x8xf32> -> vector<1x8x8xf32>
    "tpu.trace_stop"() : () -> ()
    %258 = vector.broadcast %22 : vector<1x1x8xf32> to vector<1x8x8xf32>
    %259 = arith.addf %257, %258 : vector<1x8x8xf32>
    %cst_67 = arith.constant dense<0xFF800000> : vector<1x8xf32>
    %260 = vector.multi_reduction <maximumf>, %259, %cst_67 [2] : vector<1x8x8xf32> to vector<1x8xf32>
    %261 = vector.shape_cast %260 : vector<1x8xf32> to vector<1x8x1xf32>
    %262 = vector.broadcast %261 : vector<1x8x1xf32> to vector<1x8x8xf32>
    %263 = arith.subf %259, %262 : vector<1x8x8xf32>
    %264 = math.exp %263 : vector<1x8x8xf32>
    %cst_68 = arith.constant dense<0.000000e+00> : vector<1x8xf32>
    %265 = vector.multi_reduction <add>, %264, %cst_68 [2] : vector<1x8x8xf32> to vector<1x8xf32>
    %266 = vector.shape_cast %265 : vector<1x8xf32> to vector<1x8x1xf32>
    %267 = arith.truncf %264 : vector<1x8x8xf32> to vector<1x8x8xbf16>
    "tpu.trace_start"() <{level = 10 : i32, message = "bqk,bkd->bqd"}> : () -> ()
    %cst_69 = arith.constant dense<0.000000e+00> : vector<1x8x64xf32>
    %268 = tpu.matmul %267, %256, %cst_69 {dimension_numbers = #tpu.dot_dimension_numbers<[2], [1], [1], [2], [0, 0, 0, 1, 1, 2], [0], [0]>} : vector<1x8x8xbf16>, vector<1x8x64xbf16>, vector<1x8x64xf32> -> vector<1x8x64xf32>
    "tpu.trace_stop"() : () -> ()
    %269 = tpu.reciprocal %266 {approx = true} : vector<1x8x1xf32> -> vector<1x8x1xf32>
    %270 = vector.broadcast %269 : vector<1x8x1xf32> to vector<1x8x64xf32>
    %271 = arith.mulf %268, %270 : vector<1x8x64xf32>
    %272 = tpu.concatenate %253, %271 in 2 : vector<1x8x64xf32>, vector<1x8x64xf32> -> vector<1x8x128xf32>
    %273 = arith.truncf %272 : vector<1x8x128xf32> to vector<1x8x128xbf16>
    %c0_70 = arith.constant 0 : index
    %c0_71 = arith.constant 0 : index
    %c640 = arith.constant 640 : index
    %274 = vector.load %arg12[%c0_70, %c0_71, %c640] : memref<1x8x768xbf16, #tpu.memory_space<vmem>>, vector<1x8x128xbf16>
    tpu.vector_store %arg12[%c0_70, %c0_71, %c640], %273 {strides = array<i32>} : memref<1x8x768xbf16, #tpu.memory_space<vmem>>, vector<1x8x128xbf16>,
    %c0_72 = arith.constant 0 : index
    %c0_73 = arith.constant 0 : index
    %c0_74 = arith.constant 0 : index
    %275 = vector.load %arg12[%c0_72, %c0_73, %c0_74] : memref<1x8x768xbf16, #tpu.memory_space<vmem>>, vector<1x8x768xbf16>
    %276 = vector.shape_cast %275 : vector<1x8x768xbf16> to vector<8x768xbf16>
    %c0_75 = arith.constant 0 : index
    %c0_76 = arith.constant 0 : index
    %277 = vector.load %arg5[%c0_75, %c0_76] : memref<768x768xbf16, #tpu.memory_space<vmem>>, vector<768x768xbf16>
    %cst_77 = arith.constant dense<0.000000e+00> : vector<8x768xf32>
    %278 = tpu.matmul %276, %277, %cst_77 {dimension_numbers = #tpu.dot_dimension_numbers<[1], [0], [0], [1], [0, 0, 1, 1], [], []>} : vector<8x768xbf16>, vector<768x768xbf16>, vector<8x768xf32> -> vector<8x768xf32>
    %c0_78 = arith.constant 0 : index
    %c0_79 = arith.constant 0 : index
    %279 = vector.load %arg6[%c0_78, %c0_79] : memref<1x768xf32, #tpu.memory_space<vmem>>, vector<1x768xf32>
    %280 = vector.broadcast %279 : vector<1x768xf32> to vector<8x768xf32>
    %281 = arith.addf %278, %280 : vector<8x768xf32>
    %282 = arith.addf %1, %281 : vector<8x768xf32>
    %283 = arith.truncf %282 : vector<8x768xf32> to vector<8x768xbf16>
    %c0_80 = arith.constant 0 : index
    %c0_81 = arith.constant 0 : index
    %284 = vector.load %arg7[%c0_80, %c0_81] : memref<768x768xbf16, #tpu.memory_space<vmem>>, vector<768x768xbf16>
    %cst_82 = arith.constant dense<0.000000e+00> : vector<8x768xf32>
    %285 = tpu.matmul %283, %284, %cst_82 {dimension_numbers = #tpu.dot_dimension_numbers<[1], [0], [0], [1], [0, 0, 1, 1], [], []>} : vector<8x768xbf16>, vector<768x768xbf16>, vector<8x768xf32> -> vector<8x768xf32>
    %c0_83 = arith.constant 0 : index
    %c0_84 = arith.constant 0 : index
    %286 = vector.load %arg8[%c0_83, %c0_84] : memref<1x768xf32, #tpu.memory_space<vmem>>, vector<1x768xf32>
    %287 = vector.broadcast %286 : vector<1x768xf32> to vector<8x768xf32>
    %288 = arith.addf %285, %287 : vector<8x768xf32>
    %cst_85 = arith.constant dense<0.000000e+00> : vector<8xf32>
    %289 = vector.multi_reduction <add>, %288, %cst_85 [1] : vector<8x768xf32> to vector<8xf32>
    %290 = vector.shape_cast %289 : vector<8xf32> to vector<8x1xf32>
    %cst_86 = arith.constant 7.680000e+02 : f32
    %291 = vector.broadcast %cst_86 : f32 to vector<8x1xf32>
    %292 = arith.divf %290, %291 : vector<8x1xf32>
    %293 = arith.mulf %288, %288 : vector<8x768xf32>
    %cst_87 = arith.constant dense<0.000000e+00> : vector<8xf32>
    %294 = vector.multi_reduction <add>, %293, %cst_87 [1] : vector<8x768xf32> to vector<8xf32>
    %295 = vector.shape_cast %294 : vector<8xf32> to vector<8x1xf32>
    %cst_88 = arith.constant 7.680000e+02 : f32
    %296 = vector.broadcast %cst_88 : f32 to vector<8x1xf32>
    %297 = arith.divf %295, %296 : vector<8x1xf32>
    %298 = arith.mulf %292, %292 : vector<8x1xf32>
    %299 = arith.subf %297, %298 : vector<8x1xf32>
    %cst_89 = arith.constant 0.000000e+00 : f32
    %300 = vector.broadcast %cst_89 : f32 to vector<8x1xf32>
    %301 = arith.maximumf %299, %300 : vector<8x1xf32>
    %302 = vector.broadcast %292 : vector<8x1xf32> to vector<8x768xf32>
    %303 = arith.subf %288, %302 : vector<8x768xf32>
    %cst_90 = arith.constant 9.99999974E-6 : f32
    %304 = vector.broadcast %cst_90 : f32 to vector<8x1xf32>
    %305 = arith.addf %301, %304 : vector<8x1xf32>
    %306 = math.rsqrt %305 : vector<8x1xf32>
    %307 = vector.broadcast %306 : vector<8x1xf32> to vector<8x768xf32>
    %308 = arith.mulf %303, %307 : vector<8x768xf32>
    %c0_91 = arith.constant 0 : index
    %c0_92 = arith.constant 0 : index
    %309 = vector.load %arg9[%c0_91, %c0_92] : memref<1x768xf32, #tpu.memory_space<vmem>>, vector<1x768xf32>
    %310 = vector.broadcast %309 : vector<1x768xf32> to vector<8x768xf32>
    %311 = arith.mulf %308, %310 : vector<8x768xf32>
    %c0_93 = arith.constant 0 : index
    %c0_94 = arith.constant 0 : index
    %312 = vector.load %arg10[%c0_93, %c0_94] : memref<1x768xf32, #tpu.memory_space<vmem>>, vector<1x768xf32>
    %313 = vector.broadcast %312 : vector<1x768xf32> to vector<8x768xf32>
    %314 = arith.addf %311, %313 : vector<8x768xf32>
    %315 = arith.addf %314, %282 : vector<8x768xf32>
    %316 = vector.shape_cast %315 : vector<8x768xf32> to vector<1x8x768xf32>
    %c0_95 = arith.constant 0 : index
    %c0_96 = arith.constant 0 : index
    %c0_97 = arith.constant 0 : index
    %317 = vector.load %arg11[%c0_95, %c0_96, %c0_97] : memref<1x8x768xf32, #tpu.memory_space<vmem>>, vector<1x8x768xf32>
    tpu.vector_store %arg11[%c0_95, %c0_96, %c0_97], %316 {strides = array<i32>} : memref<1x8x768xf32, #tpu.memory_space<vmem>>, vector<1x8x768xf32>,
    return
  }
  func.func @transform_0(%arg0: i32) -> (i32, i32, i32) {
    %c0_i32 = arith.constant 0 : i32
    %c0_i32_0 = arith.constant 0 : i32
    %c0_i32_1 = arith.constant 0 : i32
    return %arg0, %c0_i32, %c0_i32_0 : i32, i32, i32
  }
  func.func @transform_1(%arg0: i32) -> (i32, i32, i32) {
    %c0_i32 = arith.constant 0 : i32
    %c0_i32_0 = arith.constant 0 : i32
    %c0_i32_1 = arith.constant 0 : i32
    return %arg0, %c0_i32, %c0_i32_0 : i32, i32, i32
  }
  func.func @transform_2(%arg0: i32) -> (i32, i32) {
    %c0_i32 = arith.constant 0 : i32
    %c0_i32_0 = arith.constant 0 : i32
    %c0_i32_1 = arith.constant 0 : i32
    return %c0_i32, %c0_i32_0 : i32, i32
  }
  func.func @transform_3(%arg0: i32) -> (i32, i32) {
    %c0_i32 = arith.constant 0 : i32
    %c0_i32_0 = arith.constant 0 : i32
    %c0_i32_1 = arith.constant 0 : i32
    return %c0_i32, %c0_i32_0 : i32, i32
  }
  func.func @transform_4(%arg0: i32) -> (i32, i32) {
    %c0_i32 = arith.constant 0 : i32
    %c0_i32_0 = arith.constant 0 : i32
    %c0_i32_1 = arith.constant 0 : i32
    return %c0_i32, %c0_i32_0 : i32, i32
  }
  func.func @transform_5(%arg0: i32) -> (i32, i32) {
    %c0_i32 = arith.constant 0 : i32
    %c0_i32_0 = arith.constant 0 : i32
    %c0_i32_1 = arith.constant 0 : i32
    return %c0_i32, %c0_i32_0 : i32, i32
  }
  func.func @transform_6(%arg0: i32) -> (i32, i32) {
    %c0_i32 = arith.constant 0 : i32
    %c0_i32_0 = arith.constant 0 : i32
    %c0_i32_1 = arith.constant 0 : i32
    return %c0_i32, %c0_i32_0 : i32, i32
  }
  func.func @transform_7(%arg0: i32) -> (i32, i32) {
    %c0_i32 = arith.constant 0 : i32
    %c0_i32_0 = arith.constant 0 : i32
    %c0_i32_1 = arith.constant 0 : i32
    return %c0_i32, %c0_i32_0 : i32, i32
  }
  func.func @transform_8(%arg0: i32) -> (i32, i32) {
    %c0_i32 = arith.constant 0 : i32
    %c0_i32_0 = arith.constant 0 : i32
    %c0_i32_1 = arith.constant 0 : i32
    return %c0_i32, %c0_i32_0 : i32, i32
  }
  func.func @transform_9(%arg0: i32) -> (i32, i32) {
    %c0_i32 = arith.constant 0 : i32
    %c0_i32_0 = arith.constant 0 : i32
    %c0_i32_1 = arith.constant 0 : i32
    return %c0_i32, %c0_i32_0 : i32, i32
  }
  func.func @transform_10(%arg0: i32) -> (i32, i32, i32) {
    %c0_i32 = arith.constant 0 : i32
    %c0_i32_0 = arith.constant 0 : i32
    %c0_i32_1 = arith.constant 0 : i32
    return %arg0, %c0_i32, %c0_i32_0 : i32, i32, i32
  }
}

</mosaic_0001>

<bundles_post_ra>
// kernel: encoder_layer.1
= control target key start
LH: loop header
LB: loop body
LE: loop exit
PB: predicated region body
PF: predicated region fallthrough
CT: control target
= control target key end

     0   :  { %s21954_s0 = inlined_call_operand.vmem [shape: f32[2,8,768], index: 0, kind: input, shape index: {}]   ;;  %s21955_s1 = inlined_call_operand.vmem [shape: s32[2,1,8], index: 1, kind: input, shape index: {}]   ;;  %s21956_s2 = inlined_call_operand.vmem [shape: bf16[768,2304], index: 2, kind: input, shape index: {}]   ;;  %s21957_s3 = inlined_call_operand.vmem [shape: f32[1,2304], index: 3, kind: input, shape index: {}]   ;;  %s21958_s4 = inlined_call_operand.vmem [shape: bf16[768,768], index: 4, kind: input, shape index: {}]   ;;  %s21959_s5 = inlined_call_operand.vmem [shape: f32[1,768], index: 5, kind: input, shape index: {}]   ;;  %s21960_s6 = inlined_call_operand.vmem [shape: bf16[768,768], index: 6, kind: input, shape index: {}]   ;;  %s21961_s7 = inlined_call_operand.vmem [shape: f32[1,768], index: 7, kind: input, shape index: {}]   ;;  %s21962_s8 = inlined_call_operand.vmem [shape: f32[1,768], index: 8, kind: input, shape index: {}]   ;;  %s21963_s9 = inlined_call_operand.vmem [shape: f32[1,768], index: 9, kind: input, shape index: {}]   ;;  %s21964_s10 = inlined_call_operand.hbm [shape: f32[2,8,768], index: 10, kind: output, shape index: {}]  }
   0x1   :  { %21968 = sst [smem:[#allocation8_spill]] %s21954_s0 }
   0x2   :  { %15 = vsyncpa [#allocation4], 0 }
   0x3   :  { %17 = vsyncpa [#allocation4 + $0x1], 0  ;;  %s16729_s13 = smov 0   ;;  %s16731_s14 = smov 0  }
   0x4   :  { %s16733_s15 = smov 0   ;;  %s16735_s16 = smov 0  }
   0x5 LB: > { %21969 = sst [smem:[#allocation6_spill]] %s16663_s15  ;;  %s16750_s17 = sadd.s32 4294967295, %s16667_s16   ;;  %s16667_s16 = sphi %s16735_s16, %s21980_s16   ;;  %s16663_s15 = sphi %s16733_s15, %s21979_s15   ;;  %s16659_s14 = sphi %s16731_s14, %s21978_s14   ;;  %s16655_s13 = sphi %s16729_s13, %s21977_s13  }
   0x6   : > { %s12651_s18 = sadd.s32 4294967294, %s16667_s16   ;;  %s16754_s19 = sadd.s32 1, %s16667_s16  }
   0x7   : > { %s250_s20 = sadd.s32 1, %s16663_s15  ;;  %s247_s21 = ssub.s32 %s16667_s16, %s16754_s19 }
   0x8   : > { %p260_p0 = scmp.ne.s32.totalorder %s16663_s15, %s16659_s14  ;;  %p248_p1 = scmp.eq.s32.totalorder %s247_s21, 0 }
   0x9   : > { %p261_p2 = scmp.eq.s32.totalorder %s16750_s17, 1  ;;  %p266_p3 = scmp.ne.s32.totalorder %s16659_s14, %s16655_s13 }
   0xa   : > { %p267_p4 = scmp.eq.s32.totalorder %s12651_s18, 1  ;;  %p12654_p7 = scmp.ge.s32.totalorder %s16667_s16, 1 }
   0xb   : > { %s16765_s22 = scalar_select %p248_p1, %s16663_s15, %s250_s20  }
   0xc   : > { %p16767_p5 = por %p261_p2, %p260_p0  ;;  %p16771_p6 = por %p267_p4, %p266_p3 }
   0xd   : > { %21970 = sst [smem:[#allocation7_spill]] %s16765_s22  ;;  %p323_p8 = scmp.lt.s32.totalorder %s16667_s16, 3 }
   0xf   : > { %p324_p9 = pnand %p12654_p7, %p323_p8 }
  0x10   : > { %p364_p10 = scmp.lt.s32.totalorder (!%p324_p9), %s16750_s17, 1  ;;  %s21973_s0 = sld [smem:[#allocation8_spill]] (!%p324_p9) }
  0x11   : > { %327 = sbr.rel (%p324_p9) target bundleno = 3678 (0xe5e), region = 60  ;;  %s361_s30 = sand.u32 (!%p324_p9), 1, %s16659_s14  }
  0x12   : > { %s14323_s18 = smul.u32 (!%p324_p9), 768, %s16750_s17  ;;  %s16673_s26 = smov (!%p324_p9), [#allocation3]  }
  0x13   : > { %s16611_s28 = sshll.u32 (!%p324_p9), %s16673_s26, 4  ;;  %s16612_s28 = int_to_ptr.vmem [resolvable:$false] %s16611_s28 }
  0x14   : > { %s21911_s25 = scalar_lea.hbm (!%p324_p9), %s21964_s10, %s14323_s18  ;;  %s16613_s29 = scalar_lea.vmem (!%p324_p9), %s16612_s28, 1536 }
  0x16   : > { %v14382_v0 = vld [vmem:[%s21956_s2 + $0x3f4] ss:$72 sps:$4 sm:$0xff]   ;;  %v14386_v2 = vld [vmem:[%s21956_s2 + $0x3f0] ss:$72 sps:$4 sm:$0xff]   ;;  %v14388_v4 = vld [vmem:[%s21956_s2 + $0x364] ss:$72 sps:$4 sm:$0xff]  }
  0x17   : > { %v14384_v1 = vld [vmem:[%s21956_s2 + $0xcf4] ss:$72 sps:$4 sm:$0xff]   ;;  %5665 = vmatprep.subr.bf16.mxu0 %v14382_v0  ;;  %v14387_v3 = vld [vmem:[%s21956_s2 + $0xcf0] ss:$72 sps:$4 sm:$0xff]   ;;  %v14390_v5 = vld [vmem:[%s21956_s2 + $0xc64] ss:$72 sps:$4 sm:$0xff]  }
  0x18   : > { %5706 = vmatprep.subr.bf16.mxu1 %v14384_v1  ;;  %5666 = vmatpush1.bf16.msra.mxu0 %v14386_v2  ;;  %v14392_v6 = vld [vmem:[%s21956_s2 + $0x360] ss:$72 sps:$4 sm:$0xff]   ;;  %v14394_v8 = vld [vmem:[%s21956_s2 + $0x2d4] ss:$72 sps:$4 sm:$0xff]   ;;  %v14398_v10 = vld [vmem:[%s21956_s2 + $0x2d0] ss:$72 sps:$4 sm:$0xff]  }
  0x19   : > { %5707 = vmatpush1.bf16.msra.mxu1 %v14387_v3  ;;  %5667 = vmatprep.subr.bf16.mxu0 %v14388_v4  ;;  %v14393_v7 = vld [vmem:[%s21956_s2 + $0xc60] ss:$72 sps:$4 sm:$0xff]   ;;  %v14396_v9 = vld [vmem:[%s21956_s2 + $0xbd4] ss:$72 sps:$4 sm:$0xff]   ;;  %v14399_v11 = vld [vmem:[%s21956_s2 + $0xbd0] ss:$72 sps:$4 sm:$0xff]  }
  0x1a   : > { %5708 = vmatprep.subr.bf16.mxu1 %v14390_v5  ;;  %v14400_v12 = vld [vmem:[%s21956_s2 + $0x244] ss:$72 sps:$4 sm:$0xff]   ;;  %v14404_v14 = vld [vmem:[%s21956_s2 + $0x240] ss:$72 sps:$4 sm:$0xff]   ;;  %v14406_v16 = vld [vmem:[%s21956_s2 + $0x1b4] ss:$72 sps:$4 sm:$0xff]  }
  0x1b   : > { %v14402_v13 = vld [vmem:[%s21956_s2 + $0xb44] ss:$72 sps:$4 sm:$0xff]   ;;  %v14405_v15 = vld [vmem:[%s21956_s2 + $0xb40] ss:$72 sps:$4 sm:$0xff]   ;;  %v14408_v17 = vld [vmem:[%s21956_s2 + $0xab4] ss:$72 sps:$4 sm:$0xff]  }
  0x1c   : > { %5668 = vmatpush1.bf16.msra.mxu0 %v14392_v6  ;;  %v14410_v18 = vld [vmem:[%s21956_s2 + $0x1b0] ss:$72 sps:$4 sm:$0xff]   ;;  %v14412_v20 = vld [vmem:[%s21956_s2 + $0x124] ss:$72 sps:$4 sm:$0xff]   ;;  %v14416_v22 = vld [vmem:[%s21956_s2 + $0x120] ss:$72 sps:$4 sm:$0xff]  }
  0x1d   : > { %5709 = vmatpush1.bf16.msra.mxu1 %v14393_v7  ;;  %5669 = vmatprep.subr.bf16.mxu0 %v14394_v8  ;;  %v14411_v19 = vld [vmem:[%s21956_s2 + $0xab0] ss:$72 sps:$4 sm:$0xff]   ;;  %v14414_v21 = vld [vmem:[%s21956_s2 + $0xa24] ss:$72 sps:$4 sm:$0xff]   ;;  %v14417_v23 = vld [vmem:[%s21956_s2 + $0xa20] ss:$72 sps:$4 sm:$0xff]  }
  0x1e   : > { %5710 = vmatprep.subr.bf16.mxu1 %v14396_v9  ;;  %v14418_v24 = vld [vmem:[%s21956_s2 + $0x94] ss:$72 sps:$4 sm:$0xff]   ;;  %v14422_v26 = vld [vmem:[%s21956_s2 + $0x90] ss:$72 sps:$4 sm:$0xff]   ;;  %v14424_v28 = vld [vmem:[%s21956_s2 + $0x4] ss:$72 sps:$4 sm:$0xff]  }
  0x1f   : > { %v14420_v25 = vld [vmem:[%s21956_s2 + $0x994] ss:$72 sps:$4 sm:$0xff]   ;;  %v14423_v27 = vld [vmem:[%s21956_s2 + $0x990] ss:$72 sps:$4 sm:$0xff]   ;;  %v14426_v29 = vld [vmem:[%s21956_s2 + $0x904] ss:$72 sps:$4 sm:$0xff]  }
  0x20   : > { %5670 = vmatpush1.bf16.msra.mxu0 %v14398_v10  ;;  %v14428_v30 = vld [vmem:[%s21956_s2] ss:$72 sps:$4 sm:$0xff]   ;;  %v14430_v32 = vld [vmem:[%s21956_s2 + $0x874] ss:$72 sps:$4 sm:$0xff]   ;;  %v14434_v34 = vld [vmem:[%s21956_s2 + $0x870] ss:$72 sps:$4 sm:$0xff]  }
  0x21   : > { %5711 = vmatpush1.bf16.msra.mxu1 %v14399_v11  ;;  %5671 = vmatprep.subr.bf16.mxu0 %v14400_v12  ;;  %v14429_v31 = vld [vmem:[%s21956_s2 + $0x900] ss:$72 sps:$4 sm:$0xff]   ;;  %v14432_v33 = vld [vmem:[%s21956_s2 + $0x1174] ss:$72 sps:$4 sm:$0xff]   ;;  %v14435_v35 = vld [vmem:[%s21956_s2 + $0x1170] ss:$72 sps:$4 sm:$0xff]  }
  0x22   : > { %5712 = vmatprep.subr.bf16.mxu1 %v14402_v13  ;;  %s16887_s11 = scalar_select %p364_p10, %s16750_s17, 1  ;;  %v14436_v36 = vld [vmem:[%s21956_s2 + $0x7e4] ss:$72 sps:$4 sm:$0xff]   ;;  %v14440_v38 = vld [vmem:[%s21956_s2 + $0x7e0] ss:$72 sps:$4 sm:$0xff]   ;;  %vm6799_vm0 = vcmask 523264  }
  0x23   : > { %v14438_v37 = vld [vmem:[%s21956_s2 + $0x10e4] ss:$72 sps:$4 sm:$0xff]   ;;  %v14441_v39 = vld [vmem:[%s21956_s2 + $0x10e0] ss:$72 sps:$4 sm:$0xff]   ;;  %v14442_v40 = vld [vmem:[%s21956_s2 + $0x754] ss:$72 sps:$4 sm:$0xff]  }
  0x24   : > { %5672 = vmatpush1.bf16.msra.mxu0 %v14404_v14  ;;  %s14322_s27 = smul.u32 48, %s16887_s11  ;;  %v14444_v41 = vld [vmem:[%s21956_s2 + $0x1054] ss:$72 sps:$4 sm:$0xff]   ;;  %v14446_v42 = vld [vmem:[%s21956_s2 + $0x750] ss:$72 sps:$4 sm:$0xff]   ;;  %vm16671_vm1 = vmmov 0   ;;  %s371_s22 = scalar_lea.vmem %s21955_s1, %s16887_s11 }
  0x25   : > { %5713 = vmatpush1.bf16.msra.mxu1 %v14405_v15  ;;  %5673 = vmatprep.subr.bf16.mxu0 %v14406_v16  ;;  %v14447_v43 = vld [vmem:[%s21956_s2 + $0x1050] ss:$72 sps:$4 sm:$0xff]   ;;  %v14448_v44 = vld [vmem:[%s21956_s2 + $0x6c4] ss:$72 sps:$4 sm:$0xff]   ;;  %v14452_v47 = vld [vmem:[%s21956_s2 + $0x6c0] ss:$72 sps:$4 sm:$0xff]  }
  0x26   : > { %5714 = vmatprep.subr.bf16.mxu1 %v14408_v17  ;;  %s16917_s15 = scalar_lea.vmem %s21973_s0, %s14322_s27  ;;  %v14450_v45 = vld [vmem:[%s21956_s2 + $0xfc4] ss:$72 sps:$4 sm:$0xff]   ;;  %v14453_v50 = vld [vmem:[%s21956_s2 + $0xfc0] ss:$72 sps:$4 sm:$0xff]   ;;  %v14454_v52 = vld [vmem:[%s21956_s2 + $0x634] ss:$72 sps:$4 sm:$0xff]  }
  0x27   : > { %v374_v46 = vld [vmem:[%s16917_s15 + $0x8] sm:$0xff]  ;;  %v376_v49 = vld [vmem:[%s16917_s15 + $0x18] sm:$0xff]  ;;  %v373_v4 = vld [vmem:[%s16917_s15] sm:$0xff]  ;;  %s21966_s27 = smov 64   ;;  %vm6860_vm2 = vcmask 1043456   ;;  %vm6846_vm4 = vcmask 64512  }
  0x28   : > { %5674 = vmatpush1.bf16.msra.mxu0 %v14410_v18  ;;  %v16929_v48 = vpack.c.bf16 %v374_v46, %v374_v46  ;;  %v16935_v51 = vpack.c.bf16 %v376_v49, %v376_v49  ;;  %v14456_v53 = vld [vmem:[%s21956_s2 + $0xf34] ss:$72 sps:$4 sm:$0xff]   ;;  %v14458_v54 = vld [vmem:[%s21956_s2 + $0x630] ss:$72 sps:$4 sm:$0xff]   ;;  %v14460_v56 = vld [vmem:[%s21956_s2 + $0x5a4] ss:$72 sps:$4 sm:$0xff]   ;;  %v16995_v8 = vpack.c.bf16 %v373_v4, %v373_v4 }
  0x29   : > { %5715 = vmatpush1.bf16.msra.mxu1 %v14411_v19  ;;  %5675 = vmatprep.subr.bf16.mxu0 %v14412_v20  ;;  %v14459_v55 = vld [vmem:[%s21956_s2 + $0xf30] ss:$72 sps:$4 sm:$0xff]   ;;  %v14462_v57 = vld [vmem:[%s21956_s2 + $0xea4] ss:$72 sps:$4 sm:$0xff]   ;;  %v14464_v58 = vld [vmem:[%s21956_s2 + $0x5a0] ss:$72 sps:$4 sm:$0xff]  }
  0x2a   : > { %5716 = vmatprep.subr.bf16.mxu1 %v14414_v21  ;;  %5697 = vmatprep.mubr.bf16.mxu0 %v16929_v48  ;;  %v14465_v59 = vld [vmem:[%s21956_s2 + $0xea0] ss:$72 sps:$4 sm:$0xff]   ;;  %v14466_v60 = vld [vmem:[%s21956_s2 + $0x514] ss:$72 sps:$4 sm:$0xff]   ;;  %v14470_v62 = vld [vmem:[%s21956_s2 + $0x510] ss:$72 sps:$4 sm:$0xff]  }
  0x2b   : > { %5738 = vmatprep.mubr.bf16.mxu1 %v16935_v51  ;;  %v14468_v61 = vld [vmem:[%s21956_s2 + $0xe14] ss:$72 sps:$4 sm:$0xff]   ;;  %v14471_v63 = vld [vmem:[%s21956_s2 + $0xe10] ss:$72 sps:$4 sm:$0xff]   ;;  %v14472_v0 = vld [vmem:[%s21956_s2 + $0x484] ss:$72 sps:$4 sm:$0xff]  }
  0x2c   : > { %5676 = vmatpush1.bf16.msra.mxu0 %v14416_v22  ;;  %v14474_v1 = vld [vmem:[%s21956_s2 + $0xd84] ss:$72 sps:$4 sm:$0xff]   ;;  %v14476_v2 = vld [vmem:[%s21956_s2 + $0x480] ss:$72 sps:$4 sm:$0xff]   ;;  %v375_v5 = vld [vmem:[%s16917_s15 + $0x10] sm:$0xff]  ;;  %s21974_s11 = smov 64  }
  0x2d   : > { %5717 = vmatpush1.bf16.msra.mxu1 %v14417_v23  ;;  %5677 = vmatprep.subr.bf16.mxu0 %v14418_v24  ;;  %v14477_v3 = vld [vmem:[%s21956_s2 + $0xd80] ss:$72 sps:$4 sm:$0xff]   ;;  %v14480_v6 = vld [vmem:[%s21956_s2 + $0x15f4] ss:$72 sps:$4 sm:$0xff]   ;;  %v16997_v9 = vpack.c.bf16 %v375_v5, %v375_v5  ;;  %v14478_v10 = vld [vmem:[%s21956_s2 + $0x15f0] ss:$72 sps:$4 sm:$0xff]  }
  0x2e   : > { %5718 = vmatprep.subr.bf16.mxu1 %v14420_v25  ;;  %v14483_v7 = vld [vmem:[%s21956_s2 + $0x3fc] ss:$72 sps:$4 sm:$0xff]   ;;  %v14481_v11 = vld [vmem:[%s21956_s2 + $0x3f8] ss:$72 sps:$4 sm:$0xff]   ;;  %v14489_v13 = vld [vmem:[%s21956_s2 + $0x36c] ss:$72 sps:$4 sm:$0xff]  }
  0x2f   : > { %v14486_v12 = vld [vmem:[%s21956_s2 + $0x1564] ss:$72 sps:$4 sm:$0xff]   ;;  %v14484_v14 = vld [vmem:[%s21956_s2 + $0x1560] ss:$72 sps:$4 sm:$0xff]   ;;  %v14492_v16 = vld [vmem:[%s21956_s2 + $0x14d4] ss:$72 sps:$4 sm:$0xff]  }
  0x30   : > { %5678 = vmatpush1.bf16.msra.mxu0 %v14422_v26  ;;  %v14487_v15 = vld [vmem:[%s21956_s2 + $0x368] ss:$72 sps:$4 sm:$0xff]   ;;  %v14495_v17 = vld [vmem:[%s21956_s2 + $0x2dc] ss:$72 sps:$4 sm:$0xff]   ;;  %v14493_v19 = vld [vmem:[%s21956_s2 + $0x2d8] ss:$72 sps:$4 sm:$0xff]  }
  0x31   : > { %5719 = vmatpush1.bf16.msra.mxu1 %v14423_v27  ;;  %5679 = vmatprep.subr.bf16.mxu0 %v14424_v28  ;;  %v14490_v18 = vld [vmem:[%s21956_s2 + $0x14d0] ss:$72 sps:$4 sm:$0xff]   ;;  %v14498_v20 = vld [vmem:[%s21956_s2 + $0x1444] ss:$72 sps:$4 sm:$0xff]   ;;  %v14496_v22 = vld [vmem:[%s21956_s2 + $0x1440] ss:$72 sps:$4 sm:$0xff]  }
  0x32   : > { %5720 = vmatprep.subr.bf16.mxu1 %v14426_v29  ;;  %v14501_v21 = vld [vmem:[%s21956_s2 + $0x24c] ss:$72 sps:$4 sm:$0xff]   ;;  %v14499_v23 = vld [vmem:[%s21956_s2 + $0x248] ss:$72 sps:$4 sm:$0xff]   ;;  %v14507_v25 = vld [vmem:[%s21956_s2 + $0x1bc] ss:$72 sps:$4 sm:$0xff]  }
  0x33   : > { %v14504_v24 = vld [vmem:[%s21956_s2 + $0x13b4] ss:$72 sps:$4 sm:$0xff]   ;;  %v14502_v26 = vld [vmem:[%s21956_s2 + $0x13b0] ss:$72 sps:$4 sm:$0xff]   ;;  %v14510_v28 = vld [vmem:[%s21956_s2 + $0x1324] ss:$72 sps:$4 sm:$0xff]  }
  0x34   : > { %5680 = vmatpush1.bf16.msra.mxu0 %v14428_v30  ;;  %v14505_v27 = vld [vmem:[%s21956_s2 + $0x1b8] ss:$72 sps:$4 sm:$0xff]   ;;  %v14513_v29 = vld [vmem:[%s21956_s2 + $0x12c] ss:$72 sps:$4 sm:$0xff]   ;;  %v14567_v5 = vld [vmem:[%s21956_s2 + $0x51c] ss:$72 sps:$4 sm:$0xff]  }
  0x35   : > { %5721 = vmatpush1.bf16.msra.mxu1 %v14429_v31  ;;  %5681 = vmatprep.subr.bf16.mxu0 %v14430_v32  ;;  %v14508_v30 = vld [vmem:[%s21956_s2 + $0x1320] ss:$72 sps:$4 sm:$0xff]   ;;  %v14516_v32 = vld [vmem:[%s21956_s2 + $0x1294] ss:$72 sps:$4 sm:$0xff]   ;;  %v14534_v46 = vld [vmem:[%s21956_s2 + $0x19e4] ss:$72 sps:$4 sm:$0xff]  }
  0x36   : > { %5722 = vmatprep.subr.bf16.mxu1 %v14432_v33  ;;  %v14511_v31 = vld [vmem:[%s21956_s2 + $0x128] ss:$72 sps:$4 sm:$0xff]   ;;  %v14519_v33 = vld [vmem:[%s21956_s2 + $0x9c] ss:$72 sps:$4 sm:$0xff]  }
  0x37   : > { %v14532_v49 = vld [vmem:[%s21956_s2 + $0x19e0] ss:$72 sps:$4 sm:$0xff]   ;;  %v14564_v4 = vld [vmem:[%s21956_s2 + $0x1714] ss:$72 sps:$4 sm:$0xff]  }
  0x38   : > { %5682 = vmatpush2.bf16.msra.mxu0 %v14434_v34  ;;  %v14514_v34 = vld [vmem:[%s21956_s2 + $0x1290] ss:$72 sps:$4 sm:$0xff]  }
  0x39   : > { %5723 = vmatpush2.bf16.msra.mxu1 %v14435_v35  ;;  %5683 = vmatprep.subr.bf16.mxu0 %v14436_v36  ;;  %v378_v35 = vld [vmem:[%s16917_s15 + $0x28] sm:$0xff]  ;;  %v14517_v36 = vld [vmem:[%s21956_s2 + $0x98] ss:$72 sps:$4 sm:$0xff]  }
  0x3a   : > { %5724 = vmatprep.subr.bf16.mxu1 %v14438_v37  ;;  %v14522_v37 = vld [vmem:[%s21956_s2 + $0x1204] ss:$72 sps:$4 sm:$0xff]  }
  0x3c   : > { %5684 = vmatpush2.bf16.msra.mxu0 %v14440_v38  ;;  %v17084_v38 = vpack.c.bf16 %v378_v35, %v378_v35  ;;  %v14601_v35 = vld [vmem:[%s21956_s2 + $0x13b8] ss:$72 sps:$4 sm:$0xff]  }
  0x3d   : > { %5725 = vmatpush2.bf16.msra.mxu1 %v14441_v39  ;;  %5685 = vmatprep.subr.bf16.mxu0 %v14442_v40  ;;  %v14525_v39 = vld [vmem:[%s21956_s2 + $0xc] ss:$72 sps:$4 sm:$0xff]   ;;  %v14520_v40 = vld [vmem:[%s21956_s2 + $0x1200] ss:$72 sps:$4 sm:$0xff]  }
  0x3e   : > { %5726 = vmatprep.subr.bf16.mxu1 %v14444_v41  ;;  %v14523_v41 = vld [vmem:[%s21956_s2 + $0x8] ss:$72 sps:$4 sm:$0xff]  }
  0x40   : > { %5686 = vmatpush2.bf16.msra.mxu0 %v14446_v42  ;;  %v14528_v42 = vld [vmem:[%s21956_s2 + $0x1a74] ss:$72 sps:$4 sm:$0xff]  }
  0x41   : > { %5727 = vmatpush2.bf16.msra.mxu1 %v14447_v43  ;;  %5687 = vmatprep.subr.bf16.mxu0 %v14448_v44  ;;  %v14531_v43 = vld [vmem:[%s21956_s2 + $0x87c] ss:$72 sps:$4 sm:$0xff]   ;;  %v14526_v44 = vld [vmem:[%s21956_s2 + $0x1a70] ss:$72 sps:$4 sm:$0xff]  }
  0x42   : > { %5728 = vmatprep.subr.bf16.mxu1 %v14450_v45  ;;  %v14529_v45 = vld [vmem:[%s21956_s2 + $0x878] ss:$72 sps:$4 sm:$0xff]  }
  0x44   : > { %5688 = vmatpush2.bf16.msra.mxu0 %v14452_v47  ;;  %v14537_v47 = vld [vmem:[%s21956_s2 + $0x7ec] ss:$72 sps:$4 sm:$0xff]  }
  0x45   : > { %5729 = vmatpush2.bf16.msra.mxu1 %v14453_v50  ;;  %5689 = vmatprep.subr.bf16.mxu0 %v14454_v52  ;;  %v14535_v50 = vld [vmem:[%s21956_s2 + $0x7e8] ss:$72 sps:$4 sm:$0xff]   ;;  %v14540_v52 = vld [vmem:[%s21956_s2 + $0x1954] ss:$72 sps:$4 sm:$0xff]  }
  0x46   : > { %5730 = vmatprep.subr.bf16.mxu1 %v14456_v53  ;;  %v14543_v53 = vld [vmem:[%s21956_s2 + $0x75c] ss:$72 sps:$4 sm:$0xff]  }
  0x48   : > { %5690 = vmatpush2.bf16.msra.mxu0 %v14458_v54  ;;  %v14538_v54 = vld [vmem:[%s21956_s2 + $0x1950] ss:$72 sps:$4 sm:$0xff]  }
  0x49   : > { %5731 = vmatpush2.bf16.msra.mxu1 %v14459_v55  ;;  %5691 = vmatprep.subr.bf16.mxu0 %v14460_v56  ;;  %v14541_v55 = vld [vmem:[%s21956_s2 + $0x758] ss:$72 sps:$4 sm:$0xff]   ;;  %v14546_v56 = vld [vmem:[%s21956_s2 + $0x18c4] ss:$72 sps:$4 sm:$0xff]  }
  0x4a   : > { %5732 = vmatprep.subr.bf16.mxu1 %v14462_v57  ;;  %v14549_v57 = vld [vmem:[%s21956_s2 + $0x6cc] ss:$72 sps:$4 sm:$0xff]  }
  0x4c   : > { %5692 = vmatpush2.bf16.msra.mxu0 %v14464_v58  ;;  %v14544_v58 = vld [vmem:[%s21956_s2 + $0x18c0] ss:$72 sps:$4 sm:$0xff]  }
  0x4d   : > { %5733 = vmatpush2.bf16.msra.mxu1 %v14465_v59  ;;  %5693 = vmatprep.subr.bf16.mxu0 %v14466_v60  ;;  %v14547_v59 = vld [vmem:[%s21956_s2 + $0x6c8] ss:$72 sps:$4 sm:$0xff]   ;;  %v14552_v60 = vld [vmem:[%s21956_s2 + $0x1834] ss:$72 sps:$4 sm:$0xff]  }
  0x4e   : > { %5734 = vmatprep.subr.bf16.mxu1 %v14468_v61  ;;  %v14555_v61 = vld [vmem:[%s21956_s2 + $0x63c] ss:$72 sps:$4 sm:$0xff]  }
  0x50   : > { %5694 = vmatpush2.bf16.msra.mxu0 %v14470_v62  ;;  %v14550_v62 = vld [vmem:[%s21956_s2 + $0x1830] ss:$72 sps:$4 sm:$0xff]  }
  0x51   : > { %5735 = vmatpush2.bf16.msra.mxu1 %v14471_v63  ;;  %5695 = vmatprep.subr.bf16.mxu0 %v14472_v0  ;;  %v14553_v63 = vld [vmem:[%s21956_s2 + $0x638] ss:$72 sps:$4 sm:$0xff]   ;;  %v14558_v0 = vld [vmem:[%s21956_s2 + $0x17a4] ss:$72 sps:$4 sm:$0xff]  }
  0x52   : > { %5736 = vmatprep.subr.bf16.mxu1 %v14474_v1  ;;  %v14561_v1 = vld [vmem:[%s21956_s2 + $0x5ac] ss:$72 sps:$4 sm:$0xff]  }
  0x54   : > { %5696 = vmatpush2.bf16.msra.mxu0 %v14476_v2  ;;  %v14556_v2 = vld [vmem:[%s21956_s2 + $0x17a0] ss:$72 sps:$4 sm:$0xff]  }
  0x55   : > { %5737 = vmatpush2.bf16.msra.mxu1 %v14477_v3  ;;  %5747 = vmatprep.subr.bf16.mxu0 %v14480_v6  ;;  %v14559_v3 = vld [vmem:[%s21956_s2 + $0x5a8] ss:$72 sps:$4 sm:$0xff]  }
  0x56   : > { %5788 = vmatprep.subr.bf16.mxu1 %v14483_v7  ;;  %v14562_v6 = vld [vmem:[%s21956_s2 + $0x1710] ss:$72 sps:$4 sm:$0xff]  }
  0x57   : > { %5698 = vmatmul.mubr.bf16.vlgmr.msra.gmra.mxu0 %v16995_v8  ;;  %v14565_v7 = vld [vmem:[%s21956_s2 + $0x518] ss:$72 sps:$4 sm:$0xff]  }
  0x58   : > { %5739 = vmatmul.mubr.bf16.vlgmr.msra.gmra.mxu1 %v16997_v9  ;;  %5748 = vmatpush1.bf16.msra.mxu0 %v14478_v10  ;;  %v14570_v10 = vld [vmem:[%s21956_s2 + $0x1684] ss:$72 sps:$4 sm:$0xff]  }
  0x59   : > { %5789 = vmatpush1.bf16.msra.mxu1 %v14481_v11  ;;  %5749 = vmatprep.subr.bf16.mxu0 %v14486_v12  ;;  %v14573_v11 = vld [vmem:[%s21956_s2 + $0x48c] ss:$72 sps:$4 sm:$0xff]   ;;  %v14568_v12 = vld [vmem:[%s21956_s2 + $0x1680] ss:$72 sps:$4 sm:$0xff]  }
  0x5a   : > { %5790 = vmatprep.subr.bf16.mxu1 %v14489_v13  ;;  %5820 = vmatprep.mubr.bf16.mxu1 %v16929_v48  ;;  %v14571_v13 = vld [vmem:[%s21956_s2 + $0x488] ss:$72 sps:$4 sm:$0xff]  }
  0x5b   : > { %5779 = vmatprep.mubr.bf16.mxu0 %v17084_v38 }
  0x5c   : > { %5750 = vmatpush1.bf16.msra.mxu0 %v14484_v14  ;;  %v377_v14 = vld [vmem:[%s16917_s15 + $0x20] sm:$0xff] }
  0x5d   : > { %5791 = vmatpush1.bf16.msra.mxu1 %v14487_v15  ;;  %5751 = vmatprep.subr.bf16.mxu0 %v14492_v16  ;;  %v14576_v15 = vld [vmem:[%s21956_s2 + $0xcfc] ss:$72 sps:$4 sm:$0xff]  }
  0x5e   : > { %5792 = vmatprep.subr.bf16.mxu1 %v14495_v17  ;;  %v14579_v16 = vld [vmem:[%s21956_s2 + $0x15fc] ss:$72 sps:$4 sm:$0xff]   ;;  %v17199_v17 = vpack.c.bf16 %v377_v14, %v377_v14 }
  0x5f   : > { %v14663_v14 = vld [vmem:[%s21956_s2 + $0x171c] ss:$72 sps:$4 sm:$0xff]  }
  0x60   : > { %5752 = vmatpush1.bf16.msra.mxu0 %v14490_v18  ;;  %v14574_v18 = vld [vmem:[%s21956_s2 + $0xcf8] ss:$72 sps:$4 sm:$0xff]  }
  0x61   : > { %5793 = vmatpush1.bf16.msra.mxu1 %v14493_v19  ;;  %5753 = vmatprep.subr.bf16.mxu0 %v14498_v20  ;;  %v14577_v19 = vld [vmem:[%s21956_s2 + $0x15f8] ss:$72 sps:$4 sm:$0xff]   ;;  %v14582_v20 = vld [vmem:[%s21956_s2 + $0xc6c] ss:$72 sps:$4 sm:$0xff]  }
  0x62   : > { %5794 = vmatprep.subr.bf16.mxu1 %v14501_v21  ;;  %v14585_v21 = vld [vmem:[%s21956_s2 + $0x156c] ss:$72 sps:$4 sm:$0xff]  }
  0x64   : > { %5754 = vmatpush1.bf16.msra.mxu0 %v14496_v22  ;;  %v14580_v22 = vld [vmem:[%s21956_s2 + $0xc68] ss:$72 sps:$4 sm:$0xff]  }
  0x65   : > { %5795 = vmatpush1.bf16.msra.mxu1 %v14499_v23  ;;  %5755 = vmatprep.subr.bf16.mxu0 %v14504_v24  ;;  %v14583_v23 = vld [vmem:[%s21956_s2 + $0x1568] ss:$72 sps:$4 sm:$0xff]   ;;  %v14588_v24 = vld [vmem:[%s21956_s2 + $0xbdc] ss:$72 sps:$4 sm:$0xff]  }
  0x66   : > { %5796 = vmatprep.subr.bf16.mxu1 %v14507_v25  ;;  %v14591_v25 = vld [vmem:[%s21956_s2 + $0x14dc] ss:$72 sps:$4 sm:$0xff]  }
  0x68   : > { %5756 = vmatpush1.bf16.msra.mxu0 %v14502_v26  ;;  %v14586_v26 = vld [vmem:[%s21956_s2 + $0xbd8] ss:$72 sps:$4 sm:$0xff]  }
  0x69   : > { %5797 = vmatpush1.bf16.msra.mxu1 %v14505_v27  ;;  %5757 = vmatprep.subr.bf16.mxu0 %v14510_v28  ;;  %v14589_v27 = vld [vmem:[%s21956_s2 + $0x14d8] ss:$72 sps:$4 sm:$0xff]   ;;  %v14594_v28 = vld [vmem:[%s21956_s2 + $0xb4c] ss:$72 sps:$4 sm:$0xff]  }
  0x6a   : > { %5798 = vmatprep.subr.bf16.mxu1 %v14513_v29  ;;  %v14597_v29 = vld [vmem:[%s21956_s2 + $0x144c] ss:$72 sps:$4 sm:$0xff]  }
  0x6c   : > { %5758 = vmatpush1.bf16.msra.mxu0 %v14508_v30  ;;  %v14592_v30 = vld [vmem:[%s21956_s2 + $0xb48] ss:$72 sps:$4 sm:$0xff]  }
  0x6d   : > { %5799 = vmatpush1.bf16.msra.mxu1 %v14511_v31  ;;  %5759 = vmatprep.subr.bf16.mxu0 %v14516_v32  ;;  %v14595_v31 = vld [vmem:[%s21956_s2 + $0x1448] ss:$72 sps:$4 sm:$0xff]   ;;  %v14600_v32 = vld [vmem:[%s21956_s2 + $0xabc] ss:$72 sps:$4 sm:$0xff]  }
  0x6e   : > { %5800 = vmatprep.subr.bf16.mxu1 %v14519_v33  ;;  %v14603_v33 = vld [vmem:[%s21956_s2 + $0x13bc] ss:$72 sps:$4 sm:$0xff]  }
  0x70   : > { %5760 = vmatpush1.bf16.msra.mxu0 %v14514_v34  ;;  %v14598_v34 = vld [vmem:[%s21956_s2 + $0xab8] ss:$72 sps:$4 sm:$0xff]  }
  0x71   : > { %5801 = vmatpush1.bf16.msra.mxu1 %v14517_v36  ;;  %5761 = vmatprep.subr.bf16.mxu0 %v14522_v37  ;;  %v14606_v36 = vld [vmem:[%s21956_s2 + $0xa2c] ss:$72 sps:$4 sm:$0xff]  }
  0x72   : > { %5802 = vmatprep.subr.bf16.mxu1 %v14525_v39  ;;  %v14609_v37 = vld [vmem:[%s21956_s2 + $0x132c] ss:$72 sps:$4 sm:$0xff]   ;;  %v14604_v39 = vld [vmem:[%s21956_s2 + $0xa28] ss:$72 sps:$4 sm:$0xff]  }
  0x74   : > { %5762 = vmatpush1.bf16.msra.mxu0 %v14520_v40  ;;  %v14607_v40 = vld [vmem:[%s21956_s2 + $0x1328] ss:$72 sps:$4 sm:$0xff]  }
  0x75   : > { %5803 = vmatpush1.bf16.msra.mxu1 %v14523_v41  ;;  %5763 = vmatprep.subr.bf16.mxu0 %v14528_v42  ;;  %v14612_v41 = vld [vmem:[%s21956_s2 + $0x99c] ss:$72 sps:$4 sm:$0xff]  }
  0x76   : > { %5804 = vmatprep.subr.bf16.mxu1 %v14531_v43  ;;  %v14615_v42 = vld [vmem:[%s21956_s2 + $0x129c] ss:$72 sps:$4 sm:$0xff]   ;;  %v14610_v43 = vld [vmem:[%s21956_s2 + $0x998] ss:$72 sps:$4 sm:$0xff]  }
  0x78   : > { %5764 = vmatpush2.bf16.msra.mxu0 %v14526_v44  ;;  %v14613_v44 = vld [vmem:[%s21956_s2 + $0x1298] ss:$72 sps:$4 sm:$0xff]  }
  0x79   : > { %5805 = vmatpush2.bf16.msra.mxu1 %v14529_v45  ;;  %5765 = vmatprep.subr.bf16.mxu0 %v14534_v46  ;;  %v14618_v45 = vld [vmem:[%s21956_s2 + $0x90c] ss:$72 sps:$4 sm:$0xff]  }
  0x7a   : > { %5806 = vmatprep.subr.bf16.mxu1 %v14537_v47  ;;  %v14621_v46 = vld [vmem:[%s21956_s2 + $0x120c] ss:$72 sps:$4 sm:$0xff]   ;;  %v14616_v47 = vld [vmem:[%s21956_s2 + $0x908] ss:$72 sps:$4 sm:$0xff]  }
  0x7c   : > { %5766 = vmatpush2.bf16.msra.mxu0 %v14532_v49  ;;  %v14619_v49 = vld [vmem:[%s21956_s2 + $0x1208] ss:$72 sps:$4 sm:$0xff]  }
  0x7d   : > { %5807 = vmatpush2.bf16.msra.mxu1 %v14535_v50  ;;  %5767 = vmatprep.subr.bf16.mxu0 %v14540_v52  ;;  %v14624_v50 = vld [vmem:[%s21956_s2 + $0x117c] ss:$72 sps:$4 sm:$0xff]  }
  0x7e   : > { %5808 = vmatprep.subr.bf16.mxu1 %v14543_v53  ;;  %v14627_v52 = vld [vmem:[%s21956_s2 + $0x1a7c] ss:$72 sps:$4 sm:$0xff]   ;;  %v14622_v53 = vld [vmem:[%s21956_s2 + $0x1178] ss:$72 sps:$4 sm:$0xff]  }
  0x80   : > { %5768 = vmatpush2.bf16.msra.mxu0 %v14538_v54  ;;  %v14625_v54 = vld [vmem:[%s21956_s2 + $0x1a78] ss:$72 sps:$4 sm:$0xff]  }
  0x81   : > { %5809 = vmatpush2.bf16.msra.mxu1 %v14541_v55  ;;  %5769 = vmatprep.subr.bf16.mxu0 %v14546_v56  ;;  %v14630_v55 = vld [vmem:[%s21956_s2 + $0x10ec] ss:$72 sps:$4 sm:$0xff]  }
  0x82   : > { %5810 = vmatprep.subr.bf16.mxu1 %v14549_v57  ;;  %v14633_v56 = vld [vmem:[%s21956_s2 + $0x19ec] ss:$72 sps:$4 sm:$0xff]   ;;  %v14628_v57 = vld [vmem:[%s21956_s2 + $0x10e8] ss:$72 sps:$4 sm:$0xff]  }
  0x84   : > { %5770 = vmatpush2.bf16.msra.mxu0 %v14544_v58  ;;  %v14631_v58 = vld [vmem:[%s21956_s2 + $0x19e8] ss:$72 sps:$4 sm:$0xff]  }
  0x85   : > { %5811 = vmatpush2.bf16.msra.mxu1 %v14547_v59  ;;  %5771 = vmatprep.subr.bf16.mxu0 %v14552_v60  ;;  %v14636_v59 = vld [vmem:[%s21956_s2 + $0x105c] ss:$72 sps:$4 sm:$0xff]  }
  0x86   : > { %5812 = vmatprep.subr.bf16.mxu1 %v14555_v61  ;;  %v14639_v60 = vld [vmem:[%s21956_s2 + $0x195c] ss:$72 sps:$4 sm:$0xff]   ;;  %v14634_v61 = vld [vmem:[%s21956_s2 + $0x1058] ss:$72 sps:$4 sm:$0xff]  }
  0x88   : > { %5772 = vmatpush2.bf16.msra.mxu0 %v14550_v62  ;;  %v14637_v62 = vld [vmem:[%s21956_s2 + $0x1958] ss:$72 sps:$4 sm:$0xff]  }
  0x89   : > { %5813 = vmatpush2.bf16.msra.mxu1 %v14553_v63  ;;  %5773 = vmatprep.subr.bf16.mxu0 %v14558_v0  ;;  %v14642_v63 = vld [vmem:[%s21956_s2 + $0xfcc] ss:$72 sps:$4 sm:$0xff]  }
  0x8a   : > { %5814 = vmatprep.subr.bf16.mxu1 %v14561_v1  ;;  %v14645_v0 = vld [vmem:[%s21956_s2 + $0x18cc] ss:$72 sps:$4 sm:$0xff]   ;;  %v14640_v1 = vld [vmem:[%s21956_s2 + $0xfc8] ss:$72 sps:$4 sm:$0xff]  }
  0x8c   : > { %5774 = vmatpush2.bf16.msra.mxu0 %v14556_v2  ;;  %v14643_v2 = vld [vmem:[%s21956_s2 + $0x18c8] ss:$72 sps:$4 sm:$0xff]  }
  0x8d   : > { %5815 = vmatpush2.bf16.msra.mxu1 %v14559_v3  ;;  %5775 = vmatprep.subr.bf16.mxu0 %v14564_v4  ;;  %v14648_v3 = vld [vmem:[%s21956_s2 + $0xf3c] ss:$72 sps:$4 sm:$0xff]  }
  0x8e   : > { %5816 = vmatprep.subr.bf16.mxu1 %v14567_v5  ;;  %v14651_v4 = vld [vmem:[%s21956_s2 + $0x183c] ss:$72 sps:$4 sm:$0xff]   ;;  %v14646_v5 = vld [vmem:[%s21956_s2 + $0xf38] ss:$72 sps:$4 sm:$0xff]  }
  0x90   : > { %5776 = vmatpush2.bf16.msra.mxu0 %v14562_v6  ;;  %v14649_v6 = vld [vmem:[%s21956_s2 + $0x1838] ss:$72 sps:$4 sm:$0xff]  }
  0x91   : > { %5817 = vmatpush2.bf16.msra.mxu1 %v14565_v7  ;;  %5777 = vmatprep.subr.bf16.mxu0 %v14570_v10  ;;  %v14654_v7 = vld [vmem:[%s21956_s2 + $0xeac] ss:$72 sps:$4 sm:$0xff]  }
  0x92   : > { %5818 = vmatprep.subr.bf16.mxu1 %v14573_v11  ;;  %v14657_v10 = vld [vmem:[%s21956_s2 + $0x17ac] ss:$72 sps:$4 sm:$0xff]   ;;  %v14652_v11 = vld [vmem:[%s21956_s2 + $0xea8] ss:$72 sps:$4 sm:$0xff]  }
  0x94   : > { %5778 = vmatpush2.bf16.msra.mxu0 %v14568_v12  ;;  %v14655_v12 = vld [vmem:[%s21956_s2 + $0x17a8] ss:$72 sps:$4 sm:$0xff]  }
  0x95   : > { %5819 = vmatpush2.bf16.msra.mxu1 %v14571_v13  ;;  %5829 = vmatprep.subr.bf16.mxu0 %v14576_v15  ;;  %v14660_v13 = vld [vmem:[%s21956_s2 + $0xe1c] ss:$72 sps:$4 sm:$0xff]   ;;  %v14658_v15 = vld [vmem:[%s21956_s2 + $0xe18] ss:$72 sps:$4 sm:$0xff]  }
  0x96   : > { %5870 = vmatprep.subr.bf16.mxu1 %v14579_v16  ;;  %v14661_v16 = vld [vmem:[%s21956_s2 + $0x1718] ss:$72 sps:$4 sm:$0xff]  }
  0x97   : > { %5780 = vmatmul.mubr.bf16.vlgmr.msra.gmra.mxu0 %v17199_v17 }
  0x98   : > { %5821 = vmatmul.mubr.bf16.vlgmr.msra.gmra.mxu1 %v16995_v8  ;;  %5830 = vmatpush1.bf16.msra.mxu0 %v14574_v18  ;;  %v14666_v18 = vld [vmem:[%s21956_s2 + $0xd8c] ss:$72 sps:$4 sm:$0xff]  }
  0x99   : > { %5871 = vmatpush1.bf16.msra.mxu1 %v14577_v19  ;;  %5831 = vmatprep.subr.bf16.mxu0 %v14582_v20  ;;  %v14669_v19 = vld [vmem:[%s21956_s2 + $0x168c] ss:$72 sps:$4 sm:$0xff]   ;;  %v14664_v20 = vld [vmem:[%s21956_s2 + $0xd88] ss:$72 sps:$4 sm:$0xff]  }
  0x9a   : > { %5872 = vmatprep.subr.bf16.mxu1 %v14585_v21  ;;  %5861 = vmatprep.mubr.bf16.mxu0 %v16935_v51  ;;  %v14667_v21 = vld [vmem:[%s21956_s2 + $0x1688] ss:$72 sps:$4 sm:$0xff]  }
  0x9b   : > { %5902 = vmatprep.mubr.bf16.mxu1 %v17084_v38 }
  0x9c   : > { %5832 = vmatpush1.bf16.msra.mxu0 %v14580_v22  ;;  %v14672_v22 = vld [vmem:[%s21956_s2 + $0x404] ss:$72 sps:$4 sm:$0xff]  }
  0x9d   : > { %5873 = vmatpush1.bf16.msra.mxu1 %v14583_v23  ;;  %5833 = vmatprep.subr.bf16.mxu0 %v14588_v24  ;;  %v14675_v23 = vld [vmem:[%s21956_s2 + $0xd04] ss:$72 sps:$4 sm:$0xff]   ;;  %v14670_v24 = vld [vmem:[%s21956_s2 + $0x400] ss:$72 sps:$4 sm:$0xff]  }
  0x9e   : > { %5874 = vmatprep.subr.bf16.mxu1 %v14591_v25  ;;  %v14673_v25 = vld [vmem:[%s21956_s2 + $0xd00] ss:$72 sps:$4 sm:$0xff]  }
  0xa0   : > { %5834 = vmatpush1.bf16.msra.mxu0 %v14586_v26  ;;  %v14678_v26 = vld [vmem:[%s21956_s2 + $0x374] ss:$72 sps:$4 sm:$0xff]  }
  0xa1   : > { %5875 = vmatpush1.bf16.msra.mxu1 %v14589_v27  ;;  %5835 = vmatprep.subr.bf16.mxu0 %v14594_v28  ;;  %v14681_v27 = vld [vmem:[%s21956_s2 + $0xc74] ss:$72 sps:$4 sm:$0xff]   ;;  %v14676_v28 = vld [vmem:[%s21956_s2 + $0x370] ss:$72 sps:$4 sm:$0xff]  }
  0xa2   : > { %5876 = vmatprep.subr.bf16.mxu1 %v14597_v29  ;;  %v14679_v29 = vld [vmem:[%s21956_s2 + $0xc70] ss:$72 sps:$4 sm:$0xff]  }
  0xa4   : > { %5836 = vmatpush1.bf16.msra.mxu0 %v14592_v30  ;;  %v14684_v30 = vld [vmem:[%s21956_s2 + $0x2e4] ss:$72 sps:$4 sm:$0xff]  }
  0xa5   : > { %5877 = vmatpush1.bf16.msra.mxu1 %v14595_v31  ;;  %5837 = vmatprep.subr.bf16.mxu0 %v14600_v32  ;;  %v14687_v31 = vld [vmem:[%s21956_s2 + $0xbe4] ss:$72 sps:$4 sm:$0xff]   ;;  %v14682_v32 = vld [vmem:[%s21956_s2 + $0x2e0] ss:$72 sps:$4 sm:$0xff]  }
  0xa6   : > { %5878 = vmatprep.subr.bf16.mxu1 %v14603_v33  ;;  %v14685_v33 = vld [vmem:[%s21956_s2 + $0xbe0] ss:$72 sps:$4 sm:$0xff]  }
  0xa8   : > { %5838 = vmatpush1.bf16.msra.mxu0 %v14598_v34  ;;  %v14690_v34 = vld [vmem:[%s21956_s2 + $0x254] ss:$72 sps:$4 sm:$0xff]  }
  0xa9   : > { %5879 = vmatpush1.bf16.msra.mxu1 %v14601_v35  ;;  %5839 = vmatprep.subr.bf16.mxu0 %v14606_v36  ;;  %v14693_v35 = vld [vmem:[%s21956_s2 + $0xb54] ss:$72 sps:$4 sm:$0xff]   ;;  %v14688_v36 = vld [vmem:[%s21956_s2 + $0x250] ss:$72 sps:$4 sm:$0xff]  }
  0xaa   : > { %5880 = vmatprep.subr.bf16.mxu1 %v14609_v37  ;;  %v14691_v37 = vld [vmem:[%s21956_s2 + $0xb50] ss:$72 sps:$4 sm:$0xff]  }
  0xac   : > { %5840 = vmatpush1.bf16.msra.mxu0 %v14604_v39  ;;  %v14696_v39 = vld [vmem:[%s21956_s2 + $0x1c4] ss:$72 sps:$4 sm:$0xff]  }
  0xad   : > { %5881 = vmatpush1.bf16.msra.mxu1 %v14607_v40  ;;  %5841 = vmatprep.subr.bf16.mxu0 %v14612_v41  ;;  %v14699_v40 = vld [vmem:[%s21956_s2 + $0xac4] ss:$72 sps:$4 sm:$0xff]   ;;  %v14694_v41 = vld [vmem:[%s21956_s2 + $0x1c0] ss:$72 sps:$4 sm:$0xff]  }
  0xae   : > { %5882 = vmatprep.subr.bf16.mxu1 %v14615_v42  ;;  %v14697_v42 = vld [vmem:[%s21956_s2 + $0xac0] ss:$72 sps:$4 sm:$0xff]  }
  0xb0   : > { %5842 = vmatpush1.bf16.msra.mxu0 %v14610_v43  ;;  %v14702_v43 = vld [vmem:[%s21956_s2 + $0x134] ss:$72 sps:$4 sm:$0xff]  }
  0xb1   : > { %5883 = vmatpush1.bf16.msra.mxu1 %v14613_v44  ;;  %5843 = vmatprep.subr.bf16.mxu0 %v14618_v45  ;;  %v14705_v44 = vld [vmem:[%s21956_s2 + $0xa34] ss:$72 sps:$4 sm:$0xff]   ;;  %v14700_v45 = vld [vmem:[%s21956_s2 + $0x130] ss:$72 sps:$4 sm:$0xff]  }
  0xb2   : > { %5884 = vmatprep.subr.bf16.mxu1 %v14621_v46  ;;  %v14703_v46 = vld [vmem:[%s21956_s2 + $0xa30] ss:$72 sps:$4 sm:$0xff]  }
  0xb4   : > { %5844 = vmatpush1.bf16.msra.mxu0 %v14616_v47  ;;  %v14708_v47 = vld [vmem:[%s21956_s2 + $0xa4] ss:$72 sps:$4 sm:$0xff]  }
  0xb5   : > { %5885 = vmatpush1.bf16.msra.mxu1 %v14619_v49  ;;  %5845 = vmatprep.subr.bf16.mxu0 %v14624_v50  ;;  %v14711_v49 = vld [vmem:[%s21956_s2 + $0x9a4] ss:$72 sps:$4 sm:$0xff]   ;;  %v14706_v50 = vld [vmem:[%s21956_s2 + $0xa0] ss:$72 sps:$4 sm:$0xff]  }
  0xb6   : > { %5886 = vmatprep.subr.bf16.mxu1 %v14627_v52  ;;  %v14709_v52 = vld [vmem:[%s21956_s2 + $0x9a0] ss:$72 sps:$4 sm:$0xff]  }
  0xb8   : > { %5846 = vmatpush2.bf16.msra.mxu0 %v14622_v53  ;;  %v14714_v53 = vld [vmem:[%s21956_s2 + $0x14] ss:$72 sps:$4 sm:$0xff]  }
  0xb9   : > { %5887 = vmatpush2.bf16.msra.mxu1 %v14625_v54  ;;  %5847 = vmatprep.subr.bf16.mxu0 %v14630_v55  ;;  %v14717_v54 = vld [vmem:[%s21956_s2 + $0x914] ss:$72 sps:$4 sm:$0xff]   ;;  %v14712_v55 = vld [vmem:[%s21956_s2 + $0x10] ss:$72 sps:$4 sm:$0xff]  }
  0xba   : > { %5888 = vmatprep.subr.bf16.mxu1 %v14633_v56  ;;  %v14715_v56 = vld [vmem:[%s21956_s2 + $0x910] ss:$72 sps:$4 sm:$0xff]  }
  0xbc   : > { %5848 = vmatpush2.bf16.msra.mxu0 %v14628_v57  ;;  %v14720_v57 = vld [vmem:[%s21956_s2 + $0x884] ss:$72 sps:$4 sm:$0xff]  }
  0xbd   : > { %5889 = vmatpush2.bf16.msra.mxu1 %v14631_v58  ;;  %5849 = vmatprep.subr.bf16.mxu0 %v14636_v59  ;;  %v14723_v58 = vld [vmem:[%s21956_s2 + $0x1184] ss:$72 sps:$4 sm:$0xff]   ;;  %v14718_v59 = vld [vmem:[%s21956_s2 + $0x880] ss:$72 sps:$4 sm:$0xff]  }
  0xbe   : > { %5890 = vmatprep.subr.bf16.mxu1 %v14639_v60  ;;  %v14721_v60 = vld [vmem:[%s21956_s2 + $0x1180] ss:$72 sps:$4 sm:$0xff]  }
  0xc0   : > { %5850 = vmatpush2.bf16.msra.mxu0 %v14634_v61  ;;  %v14726_v61 = vld [vmem:[%s21956_s2 + $0x7f4] ss:$72 sps:$4 sm:$0xff]  }
  0xc1   : > { %5891 = vmatpush2.bf16.msra.mxu1 %v14637_v62  ;;  %5851 = vmatprep.subr.bf16.mxu0 %v14642_v63  ;;  %v14729_v62 = vld [vmem:[%s21956_s2 + $0x10f4] ss:$72 sps:$4 sm:$0xff]   ;;  %v14724_v63 = vld [vmem:[%s21956_s2 + $0x7f0] ss:$72 sps:$4 sm:$0xff]  }
  0xc2   : > { %5892 = vmatprep.subr.bf16.mxu1 %v14645_v0  ;;  %v14727_v0 = vld [vmem:[%s21956_s2 + $0x10f0] ss:$72 sps:$4 sm:$0xff]  }
  0xc4   : > { %5852 = vmatpush2.bf16.msra.mxu0 %v14640_v1  ;;  %v14732_v1 = vld [vmem:[%s21956_s2 + $0x764] ss:$72 sps:$4 sm:$0xff]  }
  0xc5   : > { %5893 = vmatpush2.bf16.msra.mxu1 %v14643_v2  ;;  %5853 = vmatprep.subr.bf16.mxu0 %v14648_v3  ;;  %v14735_v2 = vld [vmem:[%s21956_s2 + $0x1064] ss:$72 sps:$4 sm:$0xff]   ;;  %v14730_v3 = vld [vmem:[%s21956_s2 + $0x760] ss:$72 sps:$4 sm:$0xff]  }
  0xc6   : > { %5894 = vmatprep.subr.bf16.mxu1 %v14651_v4  ;;  %v14733_v4 = vld [vmem:[%s21956_s2 + $0x1060] ss:$72 sps:$4 sm:$0xff]  }
  0xc8   : > { %5854 = vmatpush2.bf16.msra.mxu0 %v14646_v5  ;;  %v14738_v5 = vld [vmem:[%s21956_s2 + $0x6d4] ss:$72 sps:$4 sm:$0xff]  }
  0xc9   : > { %5895 = vmatpush2.bf16.msra.mxu1 %v14649_v6  ;;  %5855 = vmatprep.subr.bf16.mxu0 %v14654_v7  ;;  %v14741_v6 = vld [vmem:[%s21956_s2 + $0xfd4] ss:$72 sps:$4 sm:$0xff]   ;;  %v14736_v7 = vld [vmem:[%s21956_s2 + $0x6d0] ss:$72 sps:$4 sm:$0xff]  }
  0xca   : > { %5896 = vmatprep.subr.bf16.mxu1 %v14657_v10  ;;  %v14739_v10 = vld [vmem:[%s21956_s2 + $0xfd0] ss:$72 sps:$4 sm:$0xff]  }
  0xcc   : > { %5856 = vmatpush2.bf16.msra.mxu0 %v14652_v11  ;;  %v14744_v11 = vld [vmem:[%s21956_s2 + $0x644] ss:$72 sps:$4 sm:$0xff]  }
  0xcd   : > { %5897 = vmatpush2.bf16.msra.mxu1 %v14655_v12  ;;  %5857 = vmatprep.subr.bf16.mxu0 %v14660_v13  ;;  %v14747_v12 = vld [vmem:[%s21956_s2 + $0xf44] ss:$72 sps:$4 sm:$0xff]   ;;  %v14742_v13 = vld [vmem:[%s21956_s2 + $0x640] ss:$72 sps:$4 sm:$0xff]  }
  0xce   : > { %5898 = vmatprep.subr.bf16.mxu1 %v14663_v14  ;;  %v14745_v14 = vld [vmem:[%s21956_s2 + $0xf40] ss:$72 sps:$4 sm:$0xff]  }
  0xd0   : > { %5858 = vmatpush2.bf16.msra.mxu0 %v14658_v15  ;;  %v14750_v15 = vld [vmem:[%s21956_s2 + $0x5b4] ss:$72 sps:$4 sm:$0xff]  }
  0xd1   : > { %5899 = vmatpush2.bf16.msra.mxu1 %v14661_v16  ;;  %5859 = vmatprep.subr.bf16.mxu0 %v14666_v18  ;;  %v14753_v16 = vld [vmem:[%s21956_s2 + $0xeb4] ss:$72 sps:$4 sm:$0xff]   ;;  %v14748_v18 = vld [vmem:[%s21956_s2 + $0x5b0] ss:$72 sps:$4 sm:$0xff]  }
  0xd2   : > { %5900 = vmatprep.subr.bf16.mxu1 %v14669_v19  ;;  %v14751_v19 = vld [vmem:[%s21956_s2 + $0xeb0] ss:$72 sps:$4 sm:$0xff]  }
  0xd4   : > { %5860 = vmatpush2.bf16.msra.mxu0 %v14664_v20  ;;  %v14756_v20 = vld [vmem:[%s21956_s2 + $0x524] ss:$72 sps:$4 sm:$0xff]  }
  0xd5   : > { %5901 = vmatpush2.bf16.msra.mxu1 %v14667_v21  ;;  %5911 = vmatprep.subr.bf16.mxu0 %v14672_v22  ;;  %v14759_v21 = vld [vmem:[%s21956_s2 + $0xe24] ss:$72 sps:$4 sm:$0xff]   ;;  %v14754_v22 = vld [vmem:[%s21956_s2 + $0x520] ss:$72 sps:$4 sm:$0xff]  }
  0xd6   : > { %5952 = vmatprep.subr.bf16.mxu1 %v14675_v23  ;;  %v14757_v23 = vld [vmem:[%s21956_s2 + $0xe20] ss:$72 sps:$4 sm:$0xff]  }
  0xd7   : > { %5862 = vmatmul.mubr.bf16.vlgmr.msra.gmra.mxu0 %v16997_v9 }
  0xd8   : > { %5903 = vmatmul.mubr.bf16.vlgmr.msra.gmra.mxu1 %v17199_v17  ;;  %5912 = vmatpush1.bf16.msra.mxu0 %v14670_v24  ;;  %v1255_v24 = vlaneseq }
  0xd9   : > { %5953 = vmatpush1.bf16.msra.mxu1 %v14673_v25  ;;  %5913 = vmatprep.subr.bf16.mxu0 %v14678_v26  ;;  %v14762_v25 = vld [vmem:[%s21956_s2 + $0x494] ss:$72 sps:$4 sm:$0xff]  }
  0xda   : > { %5954 = vmatprep.subr.bf16.mxu1 %v14681_v27  ;;  %5943 = vmatprep.mubr.bf16.mxu0 %v16929_v48  ;;  %v14765_v26 = vld [vmem:[%s21956_s2 + $0xd94] ss:$72 sps:$4 sm:$0xff]   ;;  %v14760_v27 = vld [vmem:[%s21956_s2 + $0x490] ss:$72 sps:$4 sm:$0xff]  }
  0xdb   : > { %5984 = vmatprep.mubr.bf16.mxu1 %v16935_v51 }
  0xdc   : > { %5914 = vmatpush1.bf16.msra.mxu0 %v14676_v28  ;;  %v14763_v28 = vld [vmem:[%s21956_s2 + $0xd90] ss:$72 sps:$4 sm:$0xff]  }
  0xdd   : > { %5955 = vmatpush1.bf16.msra.mxu1 %v14679_v29  ;;  %5915 = vmatprep.subr.bf16.mxu0 %v14684_v30  ;;  %v17588_v29 = vshrl.u32 %v1255_v24, 7  ;;  %v14768_v30 = vld [vmem:[%s21956_s2 + $0x1604] ss:$72 sps:$4 sm:$0xff]  }
  0xde   : > { %5956 = vmatprep.subr.bf16.mxu1 %v14687_v31  ;;  %v14771_v31 = vld [vmem:[%s21956_s2 + $0x40c] ss:$72 sps:$4 sm:$0xff]  }
  0xe0   : > { %5916 = vmatpush1.bf16.msra.mxu0 %v14682_v32  ;;  %v17597_v32 = vsub.s32 1, %v17588_v29 }
  0xe1   : > { %5957 = vmatpush1.bf16.msra.mxu1 %v14685_v33  ;;  %5917 = vmatprep.subr.bf16.mxu0 %v14690_v34  ;;  %v17602_v33 = vld [vmem:[%s21957_s3] sm:$0xff] }
  0xe2   : > { %5958 = vmatprep.subr.bf16.mxu1 %v14693_v35  ;;  %v14766_v34 = vld [vmem:[%s21956_s2 + $0x1600] ss:$72 sps:$4 sm:$0xff]  }
  0xe3   : > { %v14769_v35 = vld [vmem:[%s21956_s2 + $0x408] ss:$72 sps:$4 sm:$0xff]  }
  0xe4   : > { %5918 = vmatpush1.bf16.msra.mxu0 %v14688_v36  ;;  %v14774_v36 = vld [vmem:[%s21956_s2 + $0x1574] ss:$72 sps:$4 sm:$0xff]  }
  0xe5   : > { %5959 = vmatpush1.bf16.msra.mxu1 %v14691_v37  ;;  %5919 = vmatprep.subr.bf16.mxu0 %v14696_v39  ;;  %v14777_v37 = vld [vmem:[%s21956_s2 + $0x37c] ss:$72 sps:$4 sm:$0xff]   ;;  %v1262_v39 = vrot.slane %v17602_v33, %v17597_v32 }
  0xe6   : > { %5960 = vmatprep.subr.bf16.mxu1 %v14699_v40 }
  0xe8   : > { %5920 = vmatpush1.bf16.msra.mxu0 %v14694_v41 }
  0xe9   : > { %5961 = vmatpush1.bf16.msra.mxu1 %v14697_v42  ;;  %5921 = vmatprep.subr.bf16.mxu0 %v14702_v43  ;;  %v14772_v42 = vld [vmem:[%s21956_s2 + $0x1570] ss:$72 sps:$4 sm:$0xff]  }
  0xea   : > { %5962 = vmatprep.subr.bf16.mxu1 %v14705_v44  ;;  %v14775_v43 = vld [vmem:[%s21956_s2 + $0x378] ss:$72 sps:$4 sm:$0xff]   ;;  %v14780_v44 = vld [vmem:[%s21956_s2 + $0x14e4] ss:$72 sps:$4 sm:$0xff]  }
  0xec   : > { %5922 = vmatpush1.bf16.msra.mxu0 %v14700_v45 }
  0xed   : > { %5963 = vmatpush1.bf16.msra.mxu1 %v14703_v46  ;;  %5923 = vmatprep.subr.bf16.mxu0 %v14708_v47  ;;  %v14783_v47 = vld [vmem:[%s21956_s2 + $0x2ec] ss:$72 sps:$4 sm:$0xff]  }
  0xee   : > { %5964 = vmatprep.subr.bf16.mxu1 %v14711_v49 }
  0xf0   : > { %5924 = vmatpush1.bf16.msra.mxu0 %v14706_v50  ;;  %v14778_v50 = vld [vmem:[%s21956_s2 + $0x14e0] ss:$72 sps:$4 sm:$0xff]  }
  0xf1   : > { %5965 = vmatpush1.bf16.msra.mxu1 %v14709_v52  ;;  %5925 = vmatprep.subr.bf16.mxu0 %v14714_v53  ;;  %v14781_v53 = vld [vmem:[%s21956_s2 + $0x2e8] ss:$72 sps:$4 sm:$0xff]  }
  0xf2   : > { %5966 = vmatprep.subr.bf16.mxu1 %v14717_v54  ;;  %v14786_v54 = vld [vmem:[%s21956_s2 + $0x1454] ss:$72 sps:$4 sm:$0xff]  }
  0xf4   : > { %5926 = vmatpush1.bf16.msra.mxu0 %v14712_v55  ;;  %v14789_v55 = vld [vmem:[%s21956_s2 + $0x25c] ss:$72 sps:$4 sm:$0xff]  }
  0xf5   : > { %5967 = vmatpush1.bf16.msra.mxu1 %v14715_v56  ;;  %5927 = vmatprep.subr.bf16.mxu0 %v14720_v57 }
  0xf6   : > { %5968 = vmatprep.subr.bf16.mxu1 %v14723_v58 }
  0xf8   : > { %5928 = vmatpush2.bf16.msra.mxu0 %v14718_v59 }
  0xf9   : > { %5969 = vmatpush2.bf16.msra.mxu1 %v14721_v60  ;;  %5929 = vmatprep.subr.bf16.mxu0 %v14726_v61  ;;  %v14784_v60 = vld [vmem:[%s21956_s2 + $0x1450] ss:$72 sps:$4 sm:$0xff]  }
  0xfa   : > { %5970 = vmatprep.subr.bf16.mxu1 %v14729_v62  ;;  %v14787_v61 = vld [vmem:[%s21956_s2 + $0x258] ss:$72 sps:$4 sm:$0xff]   ;;  %v14792_v62 = vld [vmem:[%s21956_s2 + $0x13c4] ss:$72 sps:$4 sm:$0xff]  }
  0xfc   : > { %5930 = vmatpush2.bf16.msra.mxu0 %v14724_v63  ;;  %v14795_v63 = vld [vmem:[%s21956_s2 + $0x1cc] ss:$72 sps:$4 sm:$0xff]  }
  0xfd   : > { %5971 = vmatpush2.bf16.msra.mxu1 %v14727_v0  ;;  %5931 = vmatprep.subr.bf16.mxu0 %v14732_v1  ;;  %v14790_v0 = vld [vmem:[%s21956_s2 + $0x13c0] ss:$72 sps:$4 sm:$0xff]  }
  0xfe   : > { %5972 = vmatprep.subr.bf16.mxu1 %v14735_v2  ;;  %v14793_v1 = vld [vmem:[%s21956_s2 + $0x1c8] ss:$72 sps:$4 sm:$0xff]   ;;  %v14798_v2 = vld [vmem:[%s21956_s2 + $0x1334] ss:$72 sps:$4 sm:$0xff]  }
 0x100   : > { %5932 = vmatpush2.bf16.msra.mxu0 %v14730_v3  ;;  %v14801_v3 = vld [vmem:[%s21956_s2 + $0x13c] ss:$72 sps:$4 sm:$0xff]  }
 0x101   : > { %5973 = vmatpush2.bf16.msra.mxu1 %v14733_v4  ;;  %5933 = vmatprep.subr.bf16.mxu0 %v14738_v5  ;;  %v14796_v4 = vld [vmem:[%s21956_s2 + $0x1330] ss:$72 sps:$4 sm:$0xff]  }
 0x102   : > { %5974 = vmatprep.subr.bf16.mxu1 %v14741_v6  ;;  %v14799_v5 = vld [vmem:[%s21956_s2 + $0x138] ss:$72 sps:$4 sm:$0xff]   ;;  %v14804_v6 = vld [vmem:[%s21956_s2 + $0x12a4] ss:$72 sps:$4 sm:$0xff]  }
 0x104   : > { %5934 = vmatpush2.bf16.msra.mxu0 %v14736_v7  ;;  %v14807_v7 = vld [vmem:[%s21956_s2 + $0xac] ss:$72 sps:$4 sm:$0xff]  }
 0x105   : > { %5975 = vmatpush2.bf16.msra.mxu1 %v14739_v10  ;;  %5935 = vmatprep.subr.bf16.mxu0 %v14744_v11  ;;  %v14802_v10 = vld [vmem:[%s21956_s2 + $0x12a0] ss:$72 sps:$4 sm:$0xff]  }
 0x106   : > { %5976 = vmatprep.subr.bf16.mxu1 %v14747_v12  ;;  %v14805_v11 = vld [vmem:[%s21956_s2 + $0xa8] ss:$72 sps:$4 sm:$0xff]   ;;  %v14810_v12 = vld [vmem:[%s21956_s2 + $0x1214] ss:$72 sps:$4 sm:$0xff]  }
 0x108   : > { %5936 = vmatpush2.bf16.msra.mxu0 %v14742_v13  ;;  %v14813_v13 = vld [vmem:[%s21956_s2 + $0x1c] ss:$72 sps:$4 sm:$0xff]  }
 0x109   : > { %5977 = vmatpush2.bf16.msra.mxu1 %v14745_v14  ;;  %5937 = vmatprep.subr.bf16.mxu0 %v14750_v15  ;;  %v14808_v14 = vld [vmem:[%s21956_s2 + $0x1210] ss:$72 sps:$4 sm:$0xff]  }
 0x10a   : > { %5978 = vmatprep.subr.bf16.mxu1 %v14753_v16  ;;  %v14811_v15 = vld [vmem:[%s21956_s2 + $0x18] ss:$72 sps:$4 sm:$0xff]   ;;  %v14816_v16 = vld [vmem:[%s21956_s2 + $0x1a84] ss:$72 sps:$4 sm:$0xff]  }
 0x10c   : > { %5938 = vmatpush2.bf16.msra.mxu0 %v14748_v18  ;;  %v14819_v18 = vld [vmem:[%s21956_s2 + $0x88c] ss:$72 sps:$4 sm:$0xff]  }
 0x10d   : > { %5979 = vmatpush2.bf16.msra.mxu1 %v14751_v19  ;;  %5939 = vmatprep.subr.bf16.mxu0 %v14756_v20  ;;  %v14814_v19 = vld [vmem:[%s21956_s2 + $0x1a80] ss:$72 sps:$4 sm:$0xff]  }
 0x10e   : > { %5980 = vmatprep.subr.bf16.mxu1 %v14759_v21  ;;  %v14817_v20 = vld [vmem:[%s21956_s2 + $0x888] ss:$72 sps:$4 sm:$0xff]   ;;  %v14822_v21 = vld [vmem:[%s21956_s2 + $0x19f4] ss:$72 sps:$4 sm:$0xff]  }
 0x110   : > { %5940 = vmatpush2.bf16.msra.mxu0 %v14754_v22  ;;  %v14825_v22 = vld [vmem:[%s21956_s2 + $0x7fc] ss:$72 sps:$4 sm:$0xff]  }
 0x111   : > { %5981 = vmatpush2.bf16.msra.mxu1 %v14757_v23  ;;  %5941 = vmatprep.subr.bf16.mxu0 %v14762_v25  ;;  %v14820_v23 = vld [vmem:[%s21956_s2 + $0x19f0] ss:$72 sps:$4 sm:$0xff]  }
 0x112   : > { %5982 = vmatprep.subr.bf16.mxu1 %v14765_v26  ;;  %v14823_v25 = vld [vmem:[%s21956_s2 + $0x7f8] ss:$72 sps:$4 sm:$0xff]   ;;  %v14828_v26 = vld [vmem:[%s21956_s2 + $0x1964] ss:$72 sps:$4 sm:$0xff]  }
 0x114   : > { %5942 = vmatpush2.bf16.msra.mxu0 %v14760_v27  ;;  %v14831_v27 = vld [vmem:[%s21956_s2 + $0x76c] ss:$72 sps:$4 sm:$0xff]  }
 0x115   : > { %5983 = vmatpush2.bf16.msra.mxu1 %v14763_v28  ;;  %5993 = vmatprep.subr.bf16.mxu0 %v14768_v30  ;;  %v14826_v28 = vld [vmem:[%s21956_s2 + $0x1960] ss:$72 sps:$4 sm:$0xff]  }
 0x116   : > { %6034 = vmatprep.subr.bf16.mxu1 %v14771_v31  ;;  %v14829_v30 = vld [vmem:[%s21956_s2 + $0x768] ss:$72 sps:$4 sm:$0xff]   ;;  %v14834_v31 = vld [vmem:[%s21956_s2 + $0x18d4] ss:$72 sps:$4 sm:$0xff]  }
 0x117   : > { %v17618_v40 = vpop.f32.mrf.mxu0  ;;  %5944 = vmatmul.mubr.bf16.vlgmr.msra.gmra.mxu0 %v16995_v8 }
 0x118   : > { %v17620_v41 = vpop.f32.mrf.mxu1  ;;  %5985 = vmatmul.mubr.bf16.vlgmr.msra.gmra.mxu1 %v16997_v9  ;;  %5994 = vmatpush1.bf16.msra.mxu0 %v14766_v34  ;;  %v14837_v34 = vld [vmem:[%s21956_s2 + $0x6dc] ss:$72 sps:$4 sm:$0xff]  }
 0x119   : > { %6035 = vmatpush1.bf16.msra.mxu1 %v14769_v35  ;;  %v5701_v45 = vpop.f32.mrf.mxu0  ;;  %5995 = vmatprep.subr.bf16.mxu0 %v14774_v36  ;;  %v14832_v35 = vld [vmem:[%s21956_s2 + $0x18d0] ss:$72 sps:$4 sm:$0xff]  }
 0x11a   : > { %v5742_v46 = vpop.f32.mrf.mxu1  ;;  %6036 = vmatprep.subr.bf16.mxu1 %v14777_v37  ;;  %v5702_v49 = vadd.f32 %v5701_v45, %v1262_v39  ;;  %6025 = vmatprep.mubr.bf16.mxu0 %v17084_v38  ;;  %v14835_v36 = vld [vmem:[%s21956_s2 + $0x6d8] ss:$72 sps:$4 sm:$0xff]   ;;  %v14840_v37 = vld [vmem:[%s21956_s2 + $0x1844] ss:$72 sps:$4 sm:$0xff]  }
 0x11b   : > { %6066 = vmatprep.mubr.bf16.mxu1 %v16929_v48  ;;  %v5703_v56 = vpop.f32.mrf.mxu0  ;;  %v14843_v39 = vld [vmem:[%s21956_s2 + $0x64c] ss:$72 sps:$4 sm:$0xff]   ;;  %v14849_v45 = vld [vmem:[%s21956_s2 + $0x5bc] ss:$72 sps:$4 sm:$0xff]  }
 0x11c   : > { %v5744_v52 = vpop.f32.mrf.mxu1  ;;  %v17650_v57 = vadd.f32 %v5742_v46, %v5702_v49  ;;  %5996 = vmatpush1.bf16.msra.mxu0 %v14772_v42  ;;  %v14838_v42 = vld [vmem:[%s21956_s2 + $0x1840] ss:$72 sps:$4 sm:$0xff]   ;;  %v14844_v46 = vld [vmem:[%s21956_s2 + $0x17b0] ss:$72 sps:$4 sm:$0xff]   ;;  %v14852_v49 = vld [vmem:[%s21956_s2 + $0x1724] ss:$72 sps:$4 sm:$0xff]  }
 0x11d   : > { %6037 = vmatpush1.bf16.msra.mxu1 %v14775_v43  ;;  %5997 = vmatprep.subr.bf16.mxu0 %v14780_v44  ;;  %v5704_v59 = vpop.f32.mrf.mxu0  ;;  %v14841_v43 = vld [vmem:[%s21956_s2 + $0x648] ss:$72 sps:$4 sm:$0xff]   ;;  %v14846_v44 = vld [vmem:[%s21956_s2 + $0x17b4] ss:$72 sps:$4 sm:$0xff]   ;;  %v17785_v52 = vsub.s32 0, %v17588_v29 }
 0x11e   : > { %v5745_v58 = vpop.f32.mrf.mxu1  ;;  %6038 = vmatprep.subr.bf16.mxu1 %v14783_v47  ;;  %v14847_v47 = vld [vmem:[%s21956_s2 + $0x5b8] ss:$72 sps:$4 sm:$0xff]   ;;  %v14861_v56 = vld [vmem:[%s21956_s2 + $0x49c] ss:$72 sps:$4 sm:$0xff]  }
 0x11f   : > { %v1258_v58 = vrot.slane %v17602_v33, %v17785_v52  ;;  %v14856_v59 = vld [vmem:[%s21956_s2 + $0x1690] ss:$72 sps:$4 sm:$0xff]   ;;  %v14867_v33 = vld [vmem:[%s21956_s2 + $0x160c] ss:$72 sps:$4 sm:$0xff]  }
 0x120   : > { %5998 = vmatpush1.bf16.msra.mxu0 %v14778_v50  ;;  %v14855_v50 = vld [vmem:[%s21956_s2 + $0x52c] ss:$72 sps:$4 sm:$0xff]  }
 0x121   : > { %6039 = vmatpush1.bf16.msra.mxu1 %v14781_v53  ;;  %5999 = vmatprep.subr.bf16.mxu0 %v14786_v54  ;;  %v14850_v53 = vld [vmem:[%s21956_s2 + $0x1720] ss:$72 sps:$4 sm:$0xff]  }
 0x122   : > { %6040 = vmatprep.subr.bf16.mxu1 %v14789_v55  ;;  %v14853_v54 = vld [vmem:[%s21956_s2 + $0x528] ss:$72 sps:$4 sm:$0xff]   ;;  %v14858_v55 = vld [vmem:[%s21956_s2 + $0x1694] ss:$72 sps:$4 sm:$0xff]  }
 0x124   : > { %6000 = vmatpush1.bf16.msra.mxu0 %v14784_v60  ;;  %v14859_v60 = vld [vmem:[%s21956_s2 + $0x498] ss:$72 sps:$4 sm:$0xff]  }
 0x125   : > { %6041 = vmatpush1.bf16.msra.mxu1 %v14787_v61  ;;  %6001 = vmatprep.subr.bf16.mxu0 %v14792_v62  ;;  %v14864_v61 = vld [vmem:[%s21956_s2 + $0xd0c] ss:$72 sps:$4 sm:$0xff]   ;;  %v5700_v62 = vadd.f32 %v17618_v40, %v1258_v58  ;;  %v14916_v58 = vld [vmem:[%s21956_s2 + $0x10f8] ss:$72 sps:$4 sm:$0xff]  }
 0x126   : > { %6042 = vmatprep.subr.bf16.mxu1 %v14795_v63  ;;  %v14862_v63 = vld [vmem:[%s21956_s2 + $0xd08] ss:$72 sps:$4 sm:$0xff]  }
 0x127   : > { %v5741_v40 = vadd.f32 %v17620_v41, %v5700_v62  ;;  %v14925_v62 = vld [vmem:[%s21956_s2 + $0x1968] ss:$72 sps:$4 sm:$0xff]  }
 0x128   : > { %6002 = vmatpush1.bf16.msra.mxu0 %v14790_v0  ;;  %v14865_v0 = vld [vmem:[%s21956_s2 + $0x1608] ss:$72 sps:$4 sm:$0xff]  }
 0x129   : > { %6043 = vmatpush1.bf16.msra.mxu1 %v14793_v1  ;;  %6003 = vmatprep.subr.bf16.mxu0 %v14798_v2  ;;  %v14870_v1 = vld [vmem:[%s21956_s2 + $0xc7c] ss:$72 sps:$4 sm:$0xff]  }
 0x12a   : > { %6044 = vmatprep.subr.bf16.mxu1 %v14801_v3  ;;  %v14873_v2 = vld [vmem:[%s21956_s2 + $0x157c] ss:$72 sps:$4 sm:$0xff]   ;;  %v14868_v3 = vld [vmem:[%s21956_s2 + $0xc78] ss:$72 sps:$4 sm:$0xff]  }
 0x12c   : > { %6004 = vmatpush1.bf16.msra.mxu0 %v14796_v4 }
 0x12d   : > { %6045 = vmatpush1.bf16.msra.mxu1 %v14799_v5  ;;  %6005 = vmatprep.subr.bf16.mxu0 %v14804_v6  ;;  %v14871_v6 = vld [vmem:[%s21956_s2 + $0x1578] ss:$72 sps:$4 sm:$0xff]  }
 0x12e   : > { %6046 = vmatprep.subr.bf16.mxu1 %v14807_v7  ;;  %v14876_v7 = vld [vmem:[%s21956_s2 + $0xbec] ss:$72 sps:$4 sm:$0xff]  }
 0x130   : > { %6006 = vmatpush1.bf16.msra.mxu0 %v14802_v10 }
 0x131   : > { %6047 = vmatpush1.bf16.msra.mxu1 %v14805_v11  ;;  %6007 = vmatprep.subr.bf16.mxu0 %v14810_v12 }
 0x132   : > { %6048 = vmatprep.subr.bf16.mxu1 %v14813_v13 }
 0x134   : > { %6008 = vmatpush1.bf16.msra.mxu0 %v14808_v14  ;;  %v14879_v14 = vld [vmem:[%s21956_s2 + $0x14ec] ss:$72 sps:$4 sm:$0xff]  }
 0x135   : > { %6049 = vmatpush1.bf16.msra.mxu1 %v14811_v15  ;;  %6009 = vmatprep.subr.bf16.mxu0 %v14816_v16  ;;  %v14874_v16 = vld [vmem:[%s21956_s2 + $0xbe8] ss:$72 sps:$4 sm:$0xff]  }
 0x136   : > { %6050 = vmatprep.subr.bf16.mxu1 %v14819_v18  ;;  %v14877_v18 = vld [vmem:[%s21956_s2 + $0x14e8] ss:$72 sps:$4 sm:$0xff]  }
 0x138   : > { %6010 = vmatpush2.bf16.msra.mxu0 %v14814_v19 }
 0x139   : > { %6051 = vmatpush2.bf16.msra.mxu1 %v14817_v20  ;;  %6011 = vmatprep.subr.bf16.mxu0 %v14822_v21  ;;  %v14882_v20 = vld [vmem:[%s21956_s2 + $0xb5c] ss:$72 sps:$4 sm:$0xff]  }
 0x13a   : > { %6052 = vmatprep.subr.bf16.mxu1 %v14825_v22  ;;  %v14885_v21 = vld [vmem:[%s21956_s2 + $0x145c] ss:$72 sps:$4 sm:$0xff]  }
 0x13c   : > { %6012 = vmatpush2.bf16.msra.mxu0 %v14820_v23  ;;  %v14880_v23 = vld [vmem:[%s21956_s2 + $0xb58] ss:$72 sps:$4 sm:$0xff]  }
 0x13d   : > { %6053 = vmatpush2.bf16.msra.mxu1 %v14823_v25  ;;  %6013 = vmatprep.subr.bf16.mxu0 %v14828_v26  ;;  %v14883_v25 = vld [vmem:[%s21956_s2 + $0x1458] ss:$72 sps:$4 sm:$0xff]   ;;  %v14888_v26 = vld [vmem:[%s21956_s2 + $0xacc] ss:$72 sps:$4 sm:$0xff]  }
 0x13e   : > { %6054 = vmatprep.subr.bf16.mxu1 %v14831_v27  ;;  %v14891_v27 = vld [vmem:[%s21956_s2 + $0x13cc] ss:$72 sps:$4 sm:$0xff]  }
 0x140   : > { %6014 = vmatpush2.bf16.msra.mxu0 %v14826_v28  ;;  %v14886_v28 = vld [vmem:[%s21956_s2 + $0xac8] ss:$72 sps:$4 sm:$0xff]  }
 0x141   : > { %6055 = vmatpush2.bf16.msra.mxu1 %v14829_v30  ;;  %6015 = vmatprep.subr.bf16.mxu0 %v14834_v31  ;;  %v14889_v30 = vld [vmem:[%s21956_s2 + $0x13c8] ss:$72 sps:$4 sm:$0xff]   ;;  %v14894_v31 = vld [vmem:[%s21956_s2 + $0xa3c] ss:$72 sps:$4 sm:$0xff]  }
 0x142   : > { %6056 = vmatprep.subr.bf16.mxu1 %v14837_v34  ;;  %v14897_v34 = vld [vmem:[%s21956_s2 + $0x133c] ss:$72 sps:$4 sm:$0xff]  }
 0x144   : > { %6016 = vmatpush2.bf16.msra.mxu0 %v14832_v35  ;;  %v14892_v35 = vld [vmem:[%s21956_s2 + $0xa38] ss:$72 sps:$4 sm:$0xff]  }
 0x145   : > { %6057 = vmatpush2.bf16.msra.mxu1 %v14835_v36  ;;  %6017 = vmatprep.subr.bf16.mxu0 %v14840_v37  ;;  %v14895_v36 = vld [vmem:[%s21956_s2 + $0x1338] ss:$72 sps:$4 sm:$0xff]   ;;  %v14900_v37 = vld [vmem:[%s21956_s2 + $0x9ac] ss:$72 sps:$4 sm:$0xff]  }
 0x146   : > { %6058 = vmatprep.subr.bf16.mxu1 %v14843_v39  ;;  %v14903_v39 = vld [vmem:[%s21956_s2 + $0x12ac] ss:$72 sps:$4 sm:$0xff]  }
 0x148   : > { %6018 = vmatpush2.bf16.msra.mxu0 %v14838_v42  ;;  %v14898_v42 = vld [vmem:[%s21956_s2 + $0x9a8] ss:$72 sps:$4 sm:$0xff]  }
 0x149   : > { %6059 = vmatpush2.bf16.msra.mxu1 %v14841_v43  ;;  %6019 = vmatprep.subr.bf16.mxu0 %v14846_v44  ;;  %v14901_v43 = vld [vmem:[%s21956_s2 + $0x12a8] ss:$72 sps:$4 sm:$0xff]   ;;  %v14906_v44 = vld [vmem:[%s21956_s2 + $0x91c] ss:$72 sps:$4 sm:$0xff]  }
 0x14a   : > { %6060 = vmatprep.subr.bf16.mxu1 %v14849_v45  ;;  %v14909_v45 = vld [vmem:[%s21956_s2 + $0x121c] ss:$72 sps:$4 sm:$0xff]  }
 0x14c   : > { %6020 = vmatpush2.bf16.msra.mxu0 %v14844_v46  ;;  %v14904_v46 = vld [vmem:[%s21956_s2 + $0x918] ss:$72 sps:$4 sm:$0xff]  }
 0x14d   : > { %6061 = vmatpush2.bf16.msra.mxu1 %v14847_v47  ;;  %6021 = vmatprep.subr.bf16.mxu0 %v14852_v49  ;;  %v14907_v47 = vld [vmem:[%s21956_s2 + $0x1218] ss:$72 sps:$4 sm:$0xff]   ;;  %v14912_v49 = vld [vmem:[%s21956_s2 + $0x118c] ss:$72 sps:$4 sm:$0xff]  }
 0x14e   : > { %6062 = vmatprep.subr.bf16.mxu1 %v14855_v50  ;;  %v14915_v50 = vld [vmem:[%s21956_s2 + $0x1a8c] ss:$72 sps:$4 sm:$0xff]  }
 0x150   : > { %6022 = vmatpush2.bf16.msra.mxu0 %v14850_v53  ;;  %v14910_v53 = vld [vmem:[%s21956_s2 + $0x1188] ss:$72 sps:$4 sm:$0xff]  }
 0x151   : > { %6063 = vmatpush2.bf16.msra.mxu1 %v14853_v54  ;;  %6023 = vmatprep.subr.bf16.mxu0 %v14858_v55  ;;  %v14913_v54 = vld [vmem:[%s21956_s2 + $0x1a88] ss:$72 sps:$4 sm:$0xff]   ;;  %v14918_v55 = vld [vmem:[%s21956_s2 + $0x10fc] ss:$72 sps:$4 sm:$0xff]  }
 0x152   : > { %6064 = vmatprep.subr.bf16.mxu1 %v14861_v56  ;;  %v14921_v56 = vld [vmem:[%s21956_s2 + $0x19fc] ss:$72 sps:$4 sm:$0xff]  }
 0x154   : > { %6024 = vmatpush2.bf16.msra.mxu0 %v14856_v59  ;;  %v14919_v59 = vld [vmem:[%s21956_s2 + $0x19f8] ss:$72 sps:$4 sm:$0xff]  }
 0x155   : > { %6065 = vmatpush2.bf16.msra.mxu1 %v14859_v60  ;;  %6075 = vmatprep.subr.bf16.mxu0 %v14864_v61  ;;  %v14924_v60 = vld [vmem:[%s21956_s2 + $0x106c] ss:$72 sps:$4 sm:$0xff]  }
 0x156   : > { %6116 = vmatprep.subr.bf16.mxu1 %v14867_v33  ;;  %v14927_v61 = vld [vmem:[%s21956_s2 + $0x196c] ss:$72 sps:$4 sm:$0xff]   ;;  %v14922_v33 = vld [vmem:[%s21956_s2 + $0x1068] ss:$72 sps:$4 sm:$0xff]  }
 0x157   : > { %v5781_v4 = vpop.f32.mrf.mxu0  ;;  %6026 = vmatmul.mubr.bf16.vlgmr.msra.gmra.mxu0 %v17199_v17 }
 0x158   : > { %v17830_v5 = vpop.f32.mrf.mxu1  ;;  %6067 = vmatmul.mubr.bf16.vlgmr.msra.gmra.mxu1 %v16995_v8  ;;  %v5782_v41 = vadd.f32 %v5781_v4, %v5741_v40  ;;  %6076 = vmatpush1.bf16.msra.mxu0 %v14862_v63  ;;  %v14930_v63 = vld [vmem:[%s21956_s2 + $0xfdc] ss:$72 sps:$4 sm:$0xff]   ;;  %v14936_v40 = vld [vmem:[%s21956_s2 + $0xf4c] ss:$72 sps:$4 sm:$0xff]   ;;  %v14934_v4 = vld [vmem:[%s21956_s2 + $0xf48] ss:$72 sps:$4 sm:$0xff]  }
 0x159   : > { %6117 = vmatpush1.bf16.msra.mxu1 %v14865_v0  ;;  %v5783_v10 = vpop.f32.mrf.mxu0  ;;  %6077 = vmatprep.subr.bf16.mxu0 %v14870_v1  ;;  %v14933_v0 = vld [vmem:[%s21956_s2 + $0x18dc] ss:$72 sps:$4 sm:$0xff]   ;;  %v14928_v1 = vld [vmem:[%s21956_s2 + $0xfd8] ss:$72 sps:$4 sm:$0xff]  }
 0x15a   : > { %v17840_v11 = vpop.f32.mrf.mxu1  ;;  %6118 = vmatprep.subr.bf16.mxu1 %v14873_v2  ;;  %v17842_v12 = vpack.c.bf16 %v5782_v41, %v5782_v41  ;;  %v17845_v13 = vadd.f32 %v5783_v10, %v17650_v57  ;;  %6107 = vmatprep.mubr.bf16.mxu0 %v16935_v51  ;;  %v14931_v2 = vld [vmem:[%s21956_s2 + $0x18d8] ss:$72 sps:$4 sm:$0xff]   ;;  %v14945_v41 = vld [vmem:[%s21956_s2 + $0x17bc] ss:$72 sps:$4 sm:$0xff]  }
 0x15b   : > { %6148 = vmatprep.mubr.bf16.mxu1 %v17084_v38  ;;  %v5785_v19 = vpop.f32.mrf.mxu0  ;;  %v14940_v10 = vld [vmem:[%s21956_s2 + $0xeb8] ss:$72 sps:$4 sm:$0xff]  }
 0x15c   : > { %v5826_v15 = vpop.f32.mrf.mxu1  ;;  %6078 = vmatpush1.bf16.msra.mxu0 %v14868_v3  ;;  %6907 = vrot.lane.b32.xlu1 %v17842_v12, %s21966_s27  ;;  %v14939_v3 = vld [vmem:[%s21956_s2 + $0x184c] ss:$72 sps:$4 sm:$0xff]   ;;  %v14949_v19 = vld [vmem:[%s21956_s2 + $0x1728] ss:$72 sps:$4 sm:$0xff]   ;;  %s21886_s27 = smul.u32 48, %s361_s30 }
 0x15d   : > { %6119 = vmatpush1.bf16.msra.mxu1 %v14871_v6  ;;  %6079 = vmatprep.subr.bf16.mxu0 %v14876_v7  ;;  %v5786_v22 = vpop.f32.mrf.mxu0  ;;  %v14937_v6 = vld [vmem:[%s21956_s2 + $0x1848] ss:$72 sps:$4 sm:$0xff]   ;;  %v14942_v7 = vld [vmem:[%s21956_s2 + $0xebc] ss:$72 sps:$4 sm:$0xff]   ;;  %v14948_v15 = vld [vmem:[%s21956_s2 + $0xe2c] ss:$72 sps:$4 sm:$0xff]  }
 0x15e   : > { %v5827_v57 = vpop.f32.mrf.mxu1  ;;  %6120 = vmatprep.subr.bf16.mxu1 %v14879_v14  ;;  %v14943_v14 = vld [vmem:[%s21956_s2 + $0x17b8] ss:$72 sps:$4 sm:$0xff]   ;;  %v18014_v22 = vsub.s32 3, %v17588_v29  ;;  %s363_s20 = scalar_lea.vmem [#allocation3], %s21886_s27 }
 0x15f   : > { %v14954_v57 = vld [vmem:[%s21956_s2 + $0xd9c] ss:$72 sps:$4 sm:$0xff]  }
 0x160   : > { %6080 = vmatpush1.bf16.msra.mxu0 %v14874_v16  ;;  %v14951_v16 = vld [vmem:[%s21956_s2 + $0x172c] ss:$72 sps:$4 sm:$0xff]  }
 0x161   : > { %6121 = vmatpush1.bf16.msra.mxu1 %v14877_v18  ;;  %6081 = vmatprep.subr.bf16.mxu0 %v14882_v20  ;;  %v14946_v18 = vld [vmem:[%s21956_s2 + $0xe28] ss:$72 sps:$4 sm:$0xff]   ;;  %v14957_v20 = vld [vmem:[%s21956_s2 + $0x169c] ss:$72 sps:$4 sm:$0xff]  }
 0x162   : > { %6122 = vmatprep.subr.bf16.mxu1 %v14885_v21  ;;  %v18011_v21 = vsub.s32 2, %v17588_v29 }
 0x164   : > { %6082 = vmatpush1.bf16.msra.mxu0 %v14880_v23  ;;  %v14952_v23 = vld [vmem:[%s21956_s2 + $0xd98] ss:$72 sps:$4 sm:$0xff]  }
 0x165   : > { %6123 = vmatpush1.bf16.msra.mxu1 %v14883_v25  ;;  %6083 = vmatprep.subr.bf16.mxu0 %v14888_v26  ;;  %v14955_v25 = vld [vmem:[%s21956_s2 + $0x1698] ss:$72 sps:$4 sm:$0xff]   ;;  %v14960_v26 = vld [vmem:[%s21956_s2 + $0x414] ss:$72 sps:$4 sm:$0xff]  }
 0x166   : > { %6124 = vmatprep.subr.bf16.mxu1 %v14891_v27  ;;  %v14963_v27 = vld [vmem:[%s21956_s2 + $0xd14] ss:$72 sps:$4 sm:$0xff]  }
 0x168   : > { %6084 = vmatpush1.bf16.msra.mxu0 %v14886_v28  ;;  %v18031_v28 = vld [vmem:[%s21957_s3] sm:$0xff] }
 0x169   : > { %6125 = vmatpush1.bf16.msra.mxu1 %v14889_v30  ;;  %6085 = vmatprep.subr.bf16.mxu0 %v14894_v31  ;;  %v1266_v30 = vrot.slane %v18031_v28, %v18011_v21  ;;  %v14958_v31 = vld [vmem:[%s21956_s2 + $0x410] ss:$72 sps:$4 sm:$0xff]  }
 0x16a   : > { %6126 = vmatprep.subr.bf16.mxu1 %v14897_v34  ;;  %v14961_v34 = vld [vmem:[%s21956_s2 + $0xd10] ss:$72 sps:$4 sm:$0xff]  }
 0x16c   : > { %6086 = vmatpush1.bf16.msra.mxu0 %v14892_v35  ;;  %v14966_v35 = vld [vmem:[%s21956_s2 + $0x384] ss:$72 sps:$4 sm:$0xff]  }
 0x16d   : > { %6127 = vmatpush1.bf16.msra.mxu1 %v14895_v36  ;;  %6087 = vmatprep.subr.bf16.mxu0 %v14900_v37  ;;  %v14969_v36 = vld [vmem:[%s21956_s2 + $0xc84] ss:$72 sps:$4 sm:$0xff]   ;;  %v1270_v37 = vrot.slane %v18031_v28, %v18014_v22 }
 0x16e   : > { %6128 = vmatprep.subr.bf16.mxu1 %v14903_v39  ;;  %v5823_v39 = vadd.f32 %v17830_v5, %v1266_v30  ;;  %v14975_v5 = vld [vmem:[%s21956_s2 + $0xbf4] ss:$72 sps:$4 sm:$0xff]   ;;  %v15009_v30 = vld [vmem:[%s21956_s2 + $0x1190] ss:$72 sps:$4 sm:$0xff]  }
 0x170   : > { %6088 = vmatpush1.bf16.msra.mxu0 %v14898_v42  ;;  %v14964_v42 = vld [vmem:[%s21956_s2 + $0x380] ss:$72 sps:$4 sm:$0xff]  }
 0x171   : > { %6129 = vmatpush1.bf16.msra.mxu1 %v14901_v43  ;;  %6089 = vmatprep.subr.bf16.mxu0 %v14906_v44  ;;  %v14967_v43 = vld [vmem:[%s21956_s2 + $0xc80] ss:$72 sps:$4 sm:$0xff]  }
 0x172   : > { %6130 = vmatprep.subr.bf16.mxu1 %v14909_v45 }
 0x174   : > { %6090 = vmatpush1.bf16.msra.mxu0 %v14904_v46  ;;  %v14972_v46 = vld [vmem:[%s21956_s2 + $0x2f4] ss:$72 sps:$4 sm:$0xff]  }
 0x175   : > { %6131 = vmatpush1.bf16.msra.mxu1 %v14907_v47  ;;  %6091 = vmatprep.subr.bf16.mxu0 %v14912_v49  ;;  %v5825_v47 = vadd.f32 %v17840_v11, %v1270_v37  ;;  %v14973_v11 = vld [vmem:[%s21956_s2 + $0xbf0] ss:$72 sps:$4 sm:$0xff]   ;;  %v15020_v37 = vld [vmem:[%s21956_s2 + $0x774] ss:$72 sps:$4 sm:$0xff]  }
 0x176   : > { %6132 = vmatprep.subr.bf16.mxu1 %v14915_v50 }
 0x178   : > { %6092 = vmatpush2.bf16.msra.mxu0 %v14910_v53 }
 0x179   : > { %6133 = vmatpush2.bf16.msra.mxu1 %v14913_v54  ;;  %6093 = vmatprep.subr.bf16.mxu0 %v14918_v55 }
 0x17a   : > { %6134 = vmatprep.subr.bf16.mxu1 %v14921_v56 }
 0x17c   : > { %6094 = vmatpush2.bf16.msra.mxu0 %v14916_v58  ;;  %v14970_v58 = vld [vmem:[%s21956_s2 + $0x2f0] ss:$72 sps:$4 sm:$0xff]  }
 0x17d   : > { %6135 = vmatpush2.bf16.msra.mxu1 %v14919_v59  ;;  %6095 = vmatprep.subr.bf16.mxu0 %v14924_v60 }
 0x17e   : > { %6136 = vmatprep.subr.bf16.mxu1 %v14927_v61 }
 0x180   : > { %6096 = vmatpush2.bf16.msra.mxu0 %v14922_v33  ;;  %v14978_v33 = vld [vmem:[%s21956_s2 + $0x264] ss:$72 sps:$4 sm:$0xff]  }
 0x181   : > { %6137 = vmatpush2.bf16.msra.mxu1 %v14925_v62  ;;  %6097 = vmatprep.subr.bf16.mxu0 %v14930_v63  ;;  %v14981_v62 = vld [vmem:[%s21956_s2 + $0xb64] ss:$72 sps:$4 sm:$0xff]  }
 0x182   : > { %6138 = vmatprep.subr.bf16.mxu1 %v14933_v0  ;;  %v14976_v0 = vld [vmem:[%s21956_s2 + $0x260] ss:$72 sps:$4 sm:$0xff]  }
 0x184   : > { %6098 = vmatpush2.bf16.msra.mxu0 %v14928_v1  ;;  %v14979_v1 = vld [vmem:[%s21956_s2 + $0xb60] ss:$72 sps:$4 sm:$0xff]  }
 0x185   : > { %6139 = vmatpush2.bf16.msra.mxu1 %v14931_v2  ;;  %6099 = vmatprep.subr.bf16.mxu0 %v14936_v40  ;;  %v14984_v2 = vld [vmem:[%s21956_s2 + $0x1d4] ss:$72 sps:$4 sm:$0xff]  }
 0x186   : > { %6140 = vmatprep.subr.bf16.mxu1 %v14939_v3  ;;  %v14987_v40 = vld [vmem:[%s21956_s2 + $0xad4] ss:$72 sps:$4 sm:$0xff]   ;;  %v14982_v3 = vld [vmem:[%s21956_s2 + $0x1d0] ss:$72 sps:$4 sm:$0xff]  }
 0x188   : > { %6100 = vmatpush2.bf16.msra.mxu0 %v14934_v4  ;;  %v14985_v4 = vld [vmem:[%s21956_s2 + $0xad0] ss:$72 sps:$4 sm:$0xff]  }
 0x189   : > { %6141 = vmatpush2.bf16.msra.mxu1 %v14937_v6  ;;  %6101 = vmatprep.subr.bf16.mxu0 %v14942_v7  ;;  %v14990_v6 = vld [vmem:[%s21956_s2 + $0x144] ss:$72 sps:$4 sm:$0xff]  }
 0x18a   : > { %6142 = vmatprep.subr.bf16.mxu1 %v14945_v41  ;;  %v14993_v7 = vld [vmem:[%s21956_s2 + $0xa44] ss:$72 sps:$4 sm:$0xff]   ;;  %v14988_v41 = vld [vmem:[%s21956_s2 + $0x140] ss:$72 sps:$4 sm:$0xff]  }
 0x18c   : > { %6102 = vmatpush2.bf16.msra.mxu0 %v14940_v10  ;;  %v14991_v10 = vld [vmem:[%s21956_s2 + $0xa40] ss:$72 sps:$4 sm:$0xff]  }
 0x18d   : > { %6143 = vmatpush2.bf16.msra.mxu1 %v14943_v14  ;;  %6103 = vmatprep.subr.bf16.mxu0 %v14948_v15  ;;  %v14996_v14 = vld [vmem:[%s21956_s2 + $0xb4] ss:$72 sps:$4 sm:$0xff]  }
 0x18e   : > { %6144 = vmatprep.subr.bf16.mxu1 %v14951_v16  ;;  %v14999_v15 = vld [vmem:[%s21956_s2 + $0x9b4] ss:$72 sps:$4 sm:$0xff]   ;;  %v14994_v16 = vld [vmem:[%s21956_s2 + $0xb0] ss:$72 sps:$4 sm:$0xff]  }
 0x190   : > { %6104 = vmatpush2.bf16.msra.mxu0 %v14946_v18  ;;  %v14997_v18 = vld [vmem:[%s21956_s2 + $0x9b0] ss:$72 sps:$4 sm:$0xff]  }
 0x191   : > { %6145 = vmatpush2.bf16.msra.mxu1 %v14949_v19  ;;  %6105 = vmatprep.subr.bf16.mxu0 %v14954_v57  ;;  %v15002_v19 = vld [vmem:[%s21956_s2 + $0x24] ss:$72 sps:$4 sm:$0xff]  }
 0x192   : > { %6146 = vmatprep.subr.bf16.mxu1 %v14957_v20  ;;  %v15005_v57 = vld [vmem:[%s21956_s2 + $0x924] ss:$72 sps:$4 sm:$0xff]   ;;  %v15000_v20 = vld [vmem:[%s21956_s2 + $0x20] ss:$72 sps:$4 sm:$0xff]  }
 0x194   : > { %6106 = vmatpush2.bf16.msra.mxu0 %v14952_v23  ;;  %v15003_v23 = vld [vmem:[%s21956_s2 + $0x920] ss:$72 sps:$4 sm:$0xff]  }
 0x195   : > { %6147 = vmatpush2.bf16.msra.mxu1 %v14955_v25  ;;  %6157 = vmatprep.subr.bf16.mxu0 %v14960_v26  ;;  %v15008_v25 = vld [vmem:[%s21956_s2 + $0x894] ss:$72 sps:$4 sm:$0xff]  }
 0x196   : > { %6198 = vmatprep.subr.bf16.mxu1 %v14963_v27  ;;  %v15011_v26 = vld [vmem:[%s21956_s2 + $0x1194] ss:$72 sps:$4 sm:$0xff]   ;;  %v15006_v27 = vld [vmem:[%s21956_s2 + $0x890] ss:$72 sps:$4 sm:$0xff]  }
 0x197   : > { %v5863_v44 = vpop.f32.mrf.mxu0  ;;  %6108 = vmatmul.mubr.bf16.vlgmr.msra.gmra.mxu0 %v16997_v9 }
 0x198   : > { %v5904_v45 = vpop.f32.mrf.mxu1  ;;  %6149 = vmatmul.mubr.bf16.vlgmr.msra.gmra.mxu1 %v17199_v17  ;;  %v5864_v49 = vadd.f32 %v5863_v44, %v5823_v39  ;;  %6158 = vmatpush1.bf16.msra.mxu0 %v14958_v31  ;;  %v15014_v31 = vld [vmem:[%s21956_s2 + $0x804] ss:$72 sps:$4 sm:$0xff]   ;;  %v15023_v39 = vld [vmem:[%s21956_s2 + $0x1074] ss:$72 sps:$4 sm:$0xff]  }
 0x199   : > { %6199 = vmatpush1.bf16.msra.mxu1 %v14961_v34  ;;  %v5865_v50 = vpop.f32.mrf.mxu0  ;;  %6159 = vmatprep.subr.bf16.mxu0 %v14966_v35  ;;  %v15017_v34 = vld [vmem:[%s21956_s2 + $0x1104] ss:$72 sps:$4 sm:$0xff]   ;;  %v15012_v35 = vld [vmem:[%s21956_s2 + $0x800] ss:$72 sps:$4 sm:$0xff]  }
 0x19a   : > { %v5906_v53 = vpop.f32.mrf.mxu1  ;;  %6200 = vmatprep.subr.bf16.mxu1 %v14969_v36  ;;  %v18065_v54 = vadd.f32 %v5904_v45, %v5864_v49  ;;  %v5866_v55 = vadd.f32 %v5865_v50, %v5825_v47  ;;  %6189 = vmatprep.mubr.bf16.mxu0 %v16929_v48  ;;  %v15015_v36 = vld [vmem:[%s21956_s2 + $0x1100] ss:$72 sps:$4 sm:$0xff]   ;;  %v15026_v44 = vld [vmem:[%s21956_s2 + $0x6e4] ss:$72 sps:$4 sm:$0xff]   ;;  %v15032_v47 = vld [vmem:[%s21956_s2 + $0x654] ss:$72 sps:$4 sm:$0xff]  }
 0x19b   : > { %6230 = vmatprep.mubr.bf16.mxu1 %v16935_v51  ;;  %v5867_v59 = vpop.f32.mrf.mxu0  ;;  %v15029_v45 = vld [vmem:[%s21956_s2 + $0xfe4] ss:$72 sps:$4 sm:$0xff]   ;;  %v15035_v49 = vld [vmem:[%s21956_s2 + $0xf54] ss:$72 sps:$4 sm:$0xff]   ;;  %v15030_v50 = vld [vmem:[%s21956_s2 + $0x650] ss:$72 sps:$4 sm:$0xff]  }
 0x19c   : > { %v5908_v56 = vpop.f32.mrf.mxu1  ;;  %v18075_v60 = vadd.f32 %v5906_v53, %v5866_v55  ;;  %6160 = vmatpush1.bf16.msra.mxu0 %v14964_v42  ;;  %v15018_v42 = vld [vmem:[%s21956_s2 + $0x770] ss:$72 sps:$4 sm:$0xff]   ;;  %v15038_v55 = vld [vmem:[%s21956_s2 + $0x5c4] ss:$72 sps:$4 sm:$0xff]   ;;  %v15044_v59 = vld [vmem:[%s21956_s2 + $0x534] ss:$72 sps:$4 sm:$0xff]  }
 0x19d   : > { %6201 = vmatpush1.bf16.msra.mxu1 %v14967_v43  ;;  %6161 = vmatprep.subr.bf16.mxu0 %v14972_v46  ;;  %v5868_v63 = vpop.f32.mrf.mxu0  ;;  %v15021_v43 = vld [vmem:[%s21956_s2 + $0x1070] ss:$72 sps:$4 sm:$0xff]   ;;  %v15024_v46 = vld [vmem:[%s21956_s2 + $0x6e0] ss:$72 sps:$4 sm:$0xff]   ;;  %v15041_v56 = vld [vmem:[%s21956_s2 + $0xec4] ss:$72 sps:$4 sm:$0xff]  }
 0x19e   : > { %v5909_v61 = vpop.f32.mrf.mxu1  ;;  %6202 = vmatprep.subr.bf16.mxu1 %v14975_v5  ;;  %v15027_v5 = vld [vmem:[%s21956_s2 + $0xfe0] ss:$72 sps:$4 sm:$0xff]   ;;  %v15033_v53 = vld [vmem:[%s21956_s2 + $0xf50] ss:$72 sps:$4 sm:$0xff]   ;;  %v15050_v63 = vld [vmem:[%s21956_s2 + $0x4a4] ss:$72 sps:$4 sm:$0xff]  }
 0x19f   : > { %v15047_v61 = vld [vmem:[%s21956_s2 + $0xe34] ss:$72 sps:$4 sm:$0xff]  }
 0x1a0   : > { %6162 = vmatpush1.bf16.msra.mxu0 %v14970_v58  ;;  %v15036_v58 = vld [vmem:[%s21956_s2 + $0x5c0] ss:$72 sps:$4 sm:$0xff]  }
 0x1a1   : > { %6203 = vmatpush1.bf16.msra.mxu1 %v14973_v11  ;;  %6163 = vmatprep.subr.bf16.mxu0 %v14978_v33  ;;  %v15039_v11 = vld [vmem:[%s21956_s2 + $0xec0] ss:$72 sps:$4 sm:$0xff]   ;;  %v15042_v33 = vld [vmem:[%s21956_s2 + $0x530] ss:$72 sps:$4 sm:$0xff]  }
 0x1a2   : > { %6204 = vmatprep.subr.bf16.mxu1 %v14981_v62  ;;  %v15045_v62 = vld [vmem:[%s21956_s2 + $0xe30] ss:$72 sps:$4 sm:$0xff]  }
 0x1a4   : > { %6164 = vmatpush1.bf16.msra.mxu0 %v14976_v0  ;;  %v15053_v0 = vld [vmem:[%s21956_s2 + $0xda4] ss:$72 sps:$4 sm:$0xff]  }
 0x1a5   : > { %6205 = vmatpush1.bf16.msra.mxu1 %v14979_v1  ;;  %6165 = vmatprep.subr.bf16.mxu0 %v14984_v2  ;;  %v15048_v1 = vld [vmem:[%s21956_s2 + $0x4a0] ss:$72 sps:$4 sm:$0xff]  }
 0x1a6   : > { %6206 = vmatprep.subr.bf16.mxu1 %v14987_v40  ;;  %v15051_v2 = vld [vmem:[%s21956_s2 + $0xda0] ss:$72 sps:$4 sm:$0xff]   ;;  %v18234_v40 = vsub.s32 4, %v17588_v29 }
 0x1a8   : > { %6166 = vmatpush1.bf16.msra.mxu0 %v14982_v3  ;;  %v15056_v3 = vld [vmem:[%s21956_s2 + $0x1614] ss:$72 sps:$4 sm:$0xff]  }
 0x1a9   : > { %6207 = vmatpush1.bf16.msra.mxu1 %v14985_v4  ;;  %6167 = vmatprep.subr.bf16.mxu0 %v14990_v6  ;;  %v15059_v4 = vld [vmem:[%s21956_s2 + $0x41c] ss:$72 sps:$4 sm:$0xff]   ;;  %v15054_v6 = vld [vmem:[%s21956_s2 + $0x1610] ss:$72 sps:$4 sm:$0xff]  }
 0x1aa   : > { %6208 = vmatprep.subr.bf16.mxu1 %v14993_v7  ;;  %v15057_v7 = vld [vmem:[%s21956_s2 + $0x418] ss:$72 sps:$4 sm:$0xff]  }
 0x1ac   : > { %6168 = vmatpush1.bf16.msra.mxu0 %v14988_v41  ;;  %v18249_v41 = vsub.s32 5, %v17588_v29 }
 0x1ad   : > { %6209 = vmatpush1.bf16.msra.mxu1 %v14991_v10  ;;  %6169 = vmatprep.subr.bf16.mxu0 %v14996_v14  ;;  %v15062_v10 = vld [vmem:[%s21956_s2 + $0x1584] ss:$72 sps:$4 sm:$0xff]  }
 0x1ae   : > { %6210 = vmatprep.subr.bf16.mxu1 %v14999_v15  ;;  %v15065_v14 = vld [vmem:[%s21956_s2 + $0x38c] ss:$72 sps:$4 sm:$0xff]   ;;  %v1274_v15 = vrot.slane %v18031_v28, %v18234_v40 }
 0x1b0   : > { %6170 = vmatpush1.bf16.msra.mxu0 %v14994_v16  ;;  %v1278_v16 = vrot.slane %v18031_v28, %v18249_v41  ;;  %v15071_v28 = vld [vmem:[%s21956_s2 + $0x2fc] ss:$72 sps:$4 sm:$0xff]  }
 0x1b1   : > { %6211 = vmatpush1.bf16.msra.mxu1 %v14997_v18  ;;  %6171 = vmatprep.subr.bf16.mxu0 %v15002_v19  ;;  %v15060_v18 = vld [vmem:[%s21956_s2 + $0x1580] ss:$72 sps:$4 sm:$0xff]  }
 0x1b2   : > { %6212 = vmatprep.subr.bf16.mxu1 %v15005_v57  ;;  %v15063_v19 = vld [vmem:[%s21956_s2 + $0x388] ss:$72 sps:$4 sm:$0xff]  }
 0x1b4   : > { %6172 = vmatpush1.bf16.msra.mxu0 %v15000_v20 }
 0x1b5   : > { %6213 = vmatpush1.bf16.msra.mxu1 %v15003_v23  ;;  %6173 = vmatprep.subr.bf16.mxu0 %v15008_v25  ;;  %v15068_v23 = vld [vmem:[%s21956_s2 + $0x14f4] ss:$72 sps:$4 sm:$0xff]  }
 0x1b6   : > { %6214 = vmatprep.subr.bf16.mxu1 %v15011_v26 }
 0x1b8   : > { %6174 = vmatpush2.bf16.msra.mxu0 %v15006_v27 }
 0x1b9   : > { %6215 = vmatpush2.bf16.msra.mxu1 %v15009_v30  ;;  %6175 = vmatprep.subr.bf16.mxu0 %v15014_v31 }
 0x1ba   : > { %6216 = vmatprep.subr.bf16.mxu1 %v15017_v34  ;;  %v15066_v34 = vld [vmem:[%s21956_s2 + $0x14f0] ss:$72 sps:$4 sm:$0xff]  }
 0x1bc   : > { %6176 = vmatpush2.bf16.msra.mxu0 %v15012_v35  ;;  %v15069_v35 = vld [vmem:[%s21956_s2 + $0x2f8] ss:$72 sps:$4 sm:$0xff]  }
 0x1bd   : > { %6217 = vmatpush2.bf16.msra.mxu1 %v15015_v36  ;;  %6177 = vmatprep.subr.bf16.mxu0 %v15020_v37  ;;  %v15074_v37 = vld [vmem:[%s21956_s2 + $0x1464] ss:$72 sps:$4 sm:$0xff]  }
 0x1be   : > { %6218 = vmatprep.subr.bf16.mxu1 %v15023_v39  ;;  %v15077_v39 = vld [vmem:[%s21956_s2 + $0x26c] ss:$72 sps:$4 sm:$0xff]  }
 0x1c0   : > { %6178 = vmatpush2.bf16.msra.mxu0 %v15018_v42 }
 0x1c1   : > { %6219 = vmatpush2.bf16.msra.mxu1 %v15021_v43  ;;  %6179 = vmatprep.subr.bf16.mxu0 %v15026_v44 }
 0x1c2   : > { %6220 = vmatprep.subr.bf16.mxu1 %v15029_v45 }
 0x1c4   : > { %6180 = vmatpush2.bf16.msra.mxu0 %v15024_v46  ;;  %v15072_v46 = vld [vmem:[%s21956_s2 + $0x1460] ss:$72 sps:$4 sm:$0xff]  }
 0x1c5   : > { %6221 = vmatpush2.bf16.msra.mxu1 %v15027_v5  ;;  %6181 = vmatprep.subr.bf16.mxu0 %v15032_v47  ;;  %v15075_v5 = vld [vmem:[%s21956_s2 + $0x268] ss:$72 sps:$4 sm:$0xff]   ;;  %v15080_v47 = vld [vmem:[%s21956_s2 + $0x13d4] ss:$72 sps:$4 sm:$0xff]  }
 0x1c6   : > { %6222 = vmatprep.subr.bf16.mxu1 %v15035_v49  ;;  %v15083_v49 = vld [vmem:[%s21956_s2 + $0x1dc] ss:$72 sps:$4 sm:$0xff]  }
 0x1c8   : > { %6182 = vmatpush2.bf16.msra.mxu0 %v15030_v50  ;;  %v15078_v50 = vld [vmem:[%s21956_s2 + $0x13d0] ss:$72 sps:$4 sm:$0xff]  }
 0x1c9   : > { %6223 = vmatpush2.bf16.msra.mxu1 %v15033_v53  ;;  %6183 = vmatprep.subr.bf16.mxu0 %v15038_v55  ;;  %v15081_v53 = vld [vmem:[%s21956_s2 + $0x1d8] ss:$72 sps:$4 sm:$0xff]   ;;  %v15086_v55 = vld [vmem:[%s21956_s2 + $0x1344] ss:$72 sps:$4 sm:$0xff]  }
 0x1ca   : > { %6224 = vmatprep.subr.bf16.mxu1 %v15041_v56  ;;  %v15089_v56 = vld [vmem:[%s21956_s2 + $0x14c] ss:$72 sps:$4 sm:$0xff]  }
 0x1cc   : > { %6184 = vmatpush2.bf16.msra.mxu0 %v15036_v58  ;;  %v15084_v58 = vld [vmem:[%s21956_s2 + $0x1340] ss:$72 sps:$4 sm:$0xff]  }
 0x1cd   : > { %6225 = vmatpush2.bf16.msra.mxu1 %v15039_v11  ;;  %6185 = vmatprep.subr.bf16.mxu0 %v15044_v59  ;;  %v15087_v11 = vld [vmem:[%s21956_s2 + $0x148] ss:$72 sps:$4 sm:$0xff]   ;;  %v15092_v59 = vld [vmem:[%s21956_s2 + $0x12b4] ss:$72 sps:$4 sm:$0xff]  }
 0x1ce   : > { %6226 = vmatprep.subr.bf16.mxu1 %v15047_v61  ;;  %v15095_v61 = vld [vmem:[%s21956_s2 + $0xbc] ss:$72 sps:$4 sm:$0xff]  }
 0x1d0   : > { %6186 = vmatpush2.bf16.msra.mxu0 %v15042_v33  ;;  %v15090_v33 = vld [vmem:[%s21956_s2 + $0x12b0] ss:$72 sps:$4 sm:$0xff]  }
 0x1d1   : > { %6227 = vmatpush2.bf16.msra.mxu1 %v15045_v62  ;;  %6187 = vmatprep.subr.bf16.mxu0 %v15050_v63  ;;  %v15093_v62 = vld [vmem:[%s21956_s2 + $0xb8] ss:$72 sps:$4 sm:$0xff]   ;;  %v15098_v63 = vld [vmem:[%s21956_s2 + $0x1224] ss:$72 sps:$4 sm:$0xff]  }
 0x1d2   : > { %6228 = vmatprep.subr.bf16.mxu1 %v15053_v0  ;;  %v15101_v0 = vld [vmem:[%s21956_s2 + $0x2c] ss:$72 sps:$4 sm:$0xff]  }
 0x1d4   : > { %6188 = vmatpush2.bf16.msra.mxu0 %v15048_v1  ;;  %v15096_v1 = vld [vmem:[%s21956_s2 + $0x1220] ss:$72 sps:$4 sm:$0xff]  }
 0x1d5   : > { %6229 = vmatpush2.bf16.msra.mxu1 %v15051_v2  ;;  %6239 = vmatprep.subr.bf16.mxu0 %v15056_v3  ;;  %v15099_v2 = vld [vmem:[%s21956_s2 + $0x28] ss:$72 sps:$4 sm:$0xff]   ;;  %v15104_v3 = vld [vmem:[%s21956_s2 + $0x1a94] ss:$72 sps:$4 sm:$0xff]  }
 0x1d6   : > { %6280 = vmatprep.subr.bf16.mxu1 %v15059_v4  ;;  %v15107_v4 = vld [vmem:[%s21956_s2 + $0x89c] ss:$72 sps:$4 sm:$0xff]  }
 0x1d7   : > { %v5945_v57 = vpop.f32.mrf.mxu0  ;;  %6190 = vmatmul.mubr.bf16.vlgmr.msra.gmra.mxu0 %v16995_v8 }
 0x1d8   : > { %v5986_v20 = vpop.f32.mrf.mxu1  ;;  %6231 = vmatmul.mubr.bf16.vlgmr.msra.gmra.mxu1 %v16997_v9  ;;  %v5946_v25 = vadd.f32 %v5945_v57, %v1274_v15  ;;  %6240 = vmatpush1.bf16.msra.mxu0 %v15054_v6  ;;  %v15102_v6 = vld [vmem:[%s21956_s2 + $0x1a90] ss:$72 sps:$4 sm:$0xff]   ;;  %v15108_v15 = vld [vmem:[%s21956_s2 + $0x1a00] ss:$72 sps:$4 sm:$0xff]  }
 0x1d9   : > { %6281 = vmatpush1.bf16.msra.mxu1 %v15057_v7  ;;  %v5947_v26 = vpop.f32.mrf.mxu0  ;;  %6241 = vmatprep.subr.bf16.mxu0 %v15062_v10  ;;  %v15105_v7 = vld [vmem:[%s21956_s2 + $0x898] ss:$72 sps:$4 sm:$0xff]   ;;  %v15110_v10 = vld [vmem:[%s21956_s2 + $0x1a04] ss:$72 sps:$4 sm:$0xff]  }
 0x1da   : > { %v5988_v27 = vpop.f32.mrf.mxu1  ;;  %6282 = vmatprep.subr.bf16.mxu1 %v15065_v14  ;;  %v18275_v30 = vadd.f32 %v5986_v20, %v5946_v25  ;;  %v5948_v31 = vadd.f32 %v5947_v26, %v1278_v16  ;;  %6271 = vmatprep.mubr.bf16.mxu0 %v17084_v38  ;;  %v15113_v14 = vld [vmem:[%s21956_s2 + $0x80c] ss:$72 sps:$4 sm:$0xff]   ;;  %v15111_v16 = vld [vmem:[%s21956_s2 + $0x808] ss:$72 sps:$4 sm:$0xff]   ;;  %v15117_v20 = vld [vmem:[%s21956_s2 + $0x778] ss:$72 sps:$4 sm:$0xff]  }
 0x1db   : > { %6312 = vmatprep.mubr.bf16.mxu1 %v16929_v48  ;;  %v5949_v42 = vpop.f32.mrf.mxu0  ;;  %v15114_v57 = vld [vmem:[%s21956_s2 + $0x1970] ss:$72 sps:$4 sm:$0xff]   ;;  %v15120_v25 = vld [vmem:[%s21956_s2 + $0x18e0] ss:$72 sps:$4 sm:$0xff]  }
 0x1dc   : > { %v5990_v36 = vpop.f32.mrf.mxu1  ;;  %v18291_v43 = vadd.f32 %v5988_v27, %v5948_v31  ;;  %6242 = vmatpush1.bf16.msra.mxu0 %v15060_v18  ;;  %v15116_v18 = vld [vmem:[%s21956_s2 + $0x1974] ss:$72 sps:$4 sm:$0xff]   ;;  %v15123_v26 = vld [vmem:[%s21956_s2 + $0x6e8] ss:$72 sps:$4 sm:$0xff]  }
 0x1dd   : > { %6283 = vmatpush1.bf16.msra.mxu1 %v15063_v19  ;;  %6243 = vmatprep.subr.bf16.mxu0 %v15068_v23  ;;  %v5950_v45 = vpop.f32.mrf.mxu0  ;;  %v15119_v19 = vld [vmem:[%s21956_s2 + $0x77c] ss:$72 sps:$4 sm:$0xff]   ;;  %v15135_v42 = vld [vmem:[%s21956_s2 + $0x5c8] ss:$72 sps:$4 sm:$0xff]  }
 0x1de   : > { %v5991_v44 = vpop.f32.mrf.mxu1  ;;  %6284 = vmatprep.subr.bf16.mxu1 %v15071_v28  ;;  %v15122_v23 = vld [vmem:[%s21956_s2 + $0x18e4] ss:$72 sps:$4 sm:$0xff]   ;;  %v15128_v27 = vld [vmem:[%s21956_s2 + $0x1854] ss:$72 sps:$4 sm:$0xff]  }
 0x1df   : > { %v15125_v28 = vld [vmem:[%s21956_s2 + $0x6ec] ss:$72 sps:$4 sm:$0xff]   ;;  %v15131_v31 = vld [vmem:[%s21956_s2 + $0x65c] ss:$72 sps:$4 sm:$0xff]  }
 0x1e0   : > { %6244 = vmatpush1.bf16.msra.mxu0 %v15066_v34  ;;  %v15126_v34 = vld [vmem:[%s21956_s2 + $0x1850] ss:$72 sps:$4 sm:$0xff]   ;;  %v15134_v36 = vld [vmem:[%s21956_s2 + $0x17c4] ss:$72 sps:$4 sm:$0xff]   ;;  %v15140_v44 = vld [vmem:[%s21956_s2 + $0x1734] ss:$72 sps:$4 sm:$0xff]  }
 0x1e1   : > { %6285 = vmatpush1.bf16.msra.mxu1 %v15069_v35  ;;  %6245 = vmatprep.subr.bf16.mxu0 %v15074_v37  ;;  %v15129_v35 = vld [vmem:[%s21956_s2 + $0x658] ss:$72 sps:$4 sm:$0xff]   ;;  %v15137_v37 = vld [vmem:[%s21956_s2 + $0x5cc] ss:$72 sps:$4 sm:$0xff]   ;;  %v15143_v45 = vld [vmem:[%s21956_s2 + $0x53c] ss:$72 sps:$4 sm:$0xff]  }
 0x1e2   : > { %6286 = vmatprep.subr.bf16.mxu1 %v15077_v39  ;;  %v15132_v39 = vld [vmem:[%s21956_s2 + $0x17c0] ss:$72 sps:$4 sm:$0xff]  }
 0x1e4   : > { %6246 = vmatpush1.bf16.msra.mxu0 %v15072_v46  ;;  %v15138_v46 = vld [vmem:[%s21956_s2 + $0x1730] ss:$72 sps:$4 sm:$0xff]  }
 0x1e5   : > { %6287 = vmatpush1.bf16.msra.mxu1 %v15075_v5  ;;  %6247 = vmatprep.subr.bf16.mxu0 %v15080_v47  ;;  %v15141_v5 = vld [vmem:[%s21956_s2 + $0x538] ss:$72 sps:$4 sm:$0xff]   ;;  %v15146_v47 = vld [vmem:[%s21956_s2 + $0x16a4] ss:$72 sps:$4 sm:$0xff]  }
 0x1e6   : > { %6288 = vmatprep.subr.bf16.mxu1 %v15083_v49  ;;  %v15149_v49 = vld [vmem:[%s21956_s2 + $0x4ac] ss:$72 sps:$4 sm:$0xff]  }
 0x1e8   : > { %6248 = vmatpush1.bf16.msra.mxu0 %v15078_v50  ;;  %v15144_v50 = vld [vmem:[%s21956_s2 + $0x16a0] ss:$72 sps:$4 sm:$0xff]  }
 0x1e9   : > { %6289 = vmatpush1.bf16.msra.mxu1 %v15081_v53  ;;  %6249 = vmatprep.subr.bf16.mxu0 %v15086_v55  ;;  %v15147_v53 = vld [vmem:[%s21956_s2 + $0x4a8] ss:$72 sps:$4 sm:$0xff]   ;;  %v15152_v55 = vld [vmem:[%s21956_s2 + $0xd1c] ss:$72 sps:$4 sm:$0xff]  }
 0x1ea   : > { %6290 = vmatprep.subr.bf16.mxu1 %v15089_v56  ;;  %v15155_v56 = vld [vmem:[%s21956_s2 + $0x161c] ss:$72 sps:$4 sm:$0xff]  }
 0x1ec   : > { %6250 = vmatpush1.bf16.msra.mxu0 %v15084_v58  ;;  %v15150_v58 = vld [vmem:[%s21956_s2 + $0xd18] ss:$72 sps:$4 sm:$0xff]  }
 0x1ed   : > { %6291 = vmatpush1.bf16.msra.mxu1 %v15087_v11  ;;  %6251 = vmatprep.subr.bf16.mxu0 %v15092_v59  ;;  %v15153_v11 = vld [vmem:[%s21956_s2 + $0x1618] ss:$72 sps:$4 sm:$0xff]   ;;  %v15158_v59 = vld [vmem:[%s21956_s2 + $0xc8c] ss:$72 sps:$4 sm:$0xff]  }
 0x1ee   : > { %6292 = vmatprep.subr.bf16.mxu1 %v15095_v61  ;;  %v15161_v61 = vld [vmem:[%s21956_s2 + $0x158c] ss:$72 sps:$4 sm:$0xff]  }
 0x1f0   : > { %6252 = vmatpush1.bf16.msra.mxu0 %v15090_v33  ;;  %v15156_v33 = vld [vmem:[%s21956_s2 + $0xc88] ss:$72 sps:$4 sm:$0xff]  }
 0x1f1   : > { %6293 = vmatpush1.bf16.msra.mxu1 %v15093_v62  ;;  %6253 = vmatprep.subr.bf16.mxu0 %v15098_v63  ;;  %v15159_v62 = vld [vmem:[%s21956_s2 + $0x1588] ss:$72 sps:$4 sm:$0xff]  }
 0x1f2   : > { %6294 = vmatprep.subr.bf16.mxu1 %v15101_v0 }
 0x1f4   : > { %6254 = vmatpush1.bf16.msra.mxu0 %v15096_v1  ;;  %v15164_v1 = vld [vmem:[%s21956_s2 + $0xbfc] ss:$72 sps:$4 sm:$0xff]  }
 0x1f5   : > { %6295 = vmatpush1.bf16.msra.mxu1 %v15099_v2  ;;  %6255 = vmatprep.subr.bf16.mxu0 %v15104_v3  ;;  %v15167_v2 = vld [vmem:[%s21956_s2 + $0x14fc] ss:$72 sps:$4 sm:$0xff]  }
 0x1f6   : > { %6296 = vmatprep.subr.bf16.mxu1 %v15107_v4 }
 0x1f8   : > { %6256 = vmatpush2.bf16.msra.mxu0 %v15102_v6 }
 0x1f9   : > { %6297 = vmatpush2.bf16.msra.mxu1 %v15105_v7  ;;  %6257 = vmatprep.subr.bf16.mxu0 %v15110_v10 }
 0x1fa   : > { %6298 = vmatprep.subr.bf16.mxu1 %v15113_v14  ;;  %v15165_v14 = vld [vmem:[%s21956_s2 + $0x14f8] ss:$72 sps:$4 sm:$0xff]  }
 0x1fc   : > { %6258 = vmatpush2.bf16.msra.mxu0 %v15108_v15 }
 0x1fd   : > { %6299 = vmatpush2.bf16.msra.mxu1 %v15111_v16  ;;  %6259 = vmatprep.subr.bf16.mxu0 %v15116_v18  ;;  %v15173_v18 = vld [vmem:[%s21956_s2 + $0x146c] ss:$72 sps:$4 sm:$0xff]  }
 0x1fe   : > { %6300 = vmatprep.subr.bf16.mxu1 %v15119_v19 }
 0x200   : > { %6260 = vmatpush2.bf16.msra.mxu0 %v15114_v57  ;;  %v15168_v57 = vld [vmem:[%s21956_s2 + $0xb68] ss:$72 sps:$4 sm:$0xff]  }
 0x201   : > { %6301 = vmatpush2.bf16.msra.mxu1 %v15117_v20  ;;  %6261 = vmatprep.subr.bf16.mxu0 %v15122_v23  ;;  %v15171_v20 = vld [vmem:[%s21956_s2 + $0x1468] ss:$72 sps:$4 sm:$0xff]   ;;  %v15176_v23 = vld [vmem:[%s21956_s2 + $0xadc] ss:$72 sps:$4 sm:$0xff]  }
 0x202   : > { %6302 = vmatprep.subr.bf16.mxu1 %v15125_v28  ;;  %v15179_v28 = vld [vmem:[%s21956_s2 + $0x13dc] ss:$72 sps:$4 sm:$0xff]  }
 0x204   : > { %6262 = vmatpush2.bf16.msra.mxu0 %v15120_v25  ;;  %v15174_v25 = vld [vmem:[%s21956_s2 + $0xad8] ss:$72 sps:$4 sm:$0xff]  }
 0x205   : > { %6303 = vmatpush2.bf16.msra.mxu1 %v15123_v26  ;;  %6263 = vmatprep.subr.bf16.mxu0 %v15128_v27  ;;  %v15177_v26 = vld [vmem:[%s21956_s2 + $0x13d8] ss:$72 sps:$4 sm:$0xff]   ;;  %v15182_v27 = vld [vmem:[%s21956_s2 + $0xa4c] ss:$72 sps:$4 sm:$0xff]  }
 0x206   : > { %6304 = vmatprep.subr.bf16.mxu1 %v15131_v31  ;;  %v15185_v31 = vld [vmem:[%s21956_s2 + $0x134c] ss:$72 sps:$4 sm:$0xff]  }
 0x208   : > { %6264 = vmatpush2.bf16.msra.mxu0 %v15126_v34  ;;  %v15180_v34 = vld [vmem:[%s21956_s2 + $0xa48] ss:$72 sps:$4 sm:$0xff]  }
 0x209   : > { %6305 = vmatpush2.bf16.msra.mxu1 %v15129_v35  ;;  %6265 = vmatprep.subr.bf16.mxu0 %v15134_v36  ;;  %v15183_v35 = vld [vmem:[%s21956_s2 + $0x1348] ss:$72 sps:$4 sm:$0xff]   ;;  %v15188_v36 = vld [vmem:[%s21956_s2 + $0x9bc] ss:$72 sps:$4 sm:$0xff]  }
 0x20a   : > { %6306 = vmatprep.subr.bf16.mxu1 %v15137_v37  ;;  %v15191_v37 = vld [vmem:[%s21956_s2 + $0x12bc] ss:$72 sps:$4 sm:$0xff]  }
 0x20c   : > { %6266 = vmatpush2.bf16.msra.mxu0 %v15132_v39  ;;  %v15186_v39 = vld [vmem:[%s21956_s2 + $0x9b8] ss:$72 sps:$4 sm:$0xff]  }
 0x20d   : > { %6307 = vmatpush2.bf16.msra.mxu1 %v15135_v42  ;;  %6267 = vmatprep.subr.bf16.mxu0 %v15140_v44  ;;  %v15189_v42 = vld [vmem:[%s21956_s2 + $0x12b8] ss:$72 sps:$4 sm:$0xff]   ;;  %v15194_v44 = vld [vmem:[%s21956_s2 + $0x92c] ss:$72 sps:$4 sm:$0xff]  }
 0x20e   : > { %6308 = vmatprep.subr.bf16.mxu1 %v15143_v45  ;;  %v15197_v45 = vld [vmem:[%s21956_s2 + $0x122c] ss:$72 sps:$4 sm:$0xff]  }
 0x210   : > { %6268 = vmatpush2.bf16.msra.mxu0 %v15138_v46  ;;  %v15192_v46 = vld [vmem:[%s21956_s2 + $0x928] ss:$72 sps:$4 sm:$0xff]  }
 0x211   : > { %6309 = vmatpush2.bf16.msra.mxu1 %v15141_v5  ;;  %6269 = vmatprep.subr.bf16.mxu0 %v15146_v47  ;;  %v15195_v5 = vld [vmem:[%s21956_s2 + $0x1228] ss:$72 sps:$4 sm:$0xff]   ;;  %v15200_v47 = vld [vmem:[%s21956_s2 + $0x119c] ss:$72 sps:$4 sm:$0xff]  }
 0x212   : > { %6310 = vmatprep.subr.bf16.mxu1 %v15149_v49  ;;  %v15203_v49 = vld [vmem:[%s21956_s2 + $0x1a9c] ss:$72 sps:$4 sm:$0xff]  }
 0x214   : > { %6270 = vmatpush2.bf16.msra.mxu0 %v15144_v50  ;;  %v15198_v50 = vld [vmem:[%s21956_s2 + $0x1198] ss:$72 sps:$4 sm:$0xff]  }
 0x215   : > { %6311 = vmatpush2.bf16.msra.mxu1 %v15147_v53  ;;  %6321 = vmatprep.subr.bf16.mxu0 %v15152_v55  ;;  %v15201_v53 = vld [vmem:[%s21956_s2 + $0x1a98] ss:$72 sps:$4 sm:$0xff]   ;;  %v15206_v55 = vld [vmem:[%s21956_s2 + $0x110c] ss:$72 sps:$4 sm:$0xff]  }
 0x216   : > { %6362 = vmatprep.subr.bf16.mxu1 %v15155_v56  ;;  %v15209_v56 = vld [vmem:[%s21956_s2 + $0x1a0c] ss:$72 sps:$4 sm:$0xff]  }
 0x217   : > { %v6027_v63 = vpop.f32.mrf.mxu0  ;;  %6272 = vmatmul.mubr.bf16.vlgmr.msra.gmra.mxu0 %v17199_v17 }
 0x218   : > { %v18467_v0 = vpop.f32.mrf.mxu1  ;;  %6313 = vmatmul.mubr.bf16.vlgmr.msra.gmra.mxu1 %v16995_v8  ;;  %v18478_v3 = vadd.f32 %v6027_v63, %v18275_v30  ;;  %6322 = vmatpush1.bf16.msra.mxu0 %v15150_v58  ;;  %v15162_v30 = vld [vmem:[%s21956_s2 + $0xbf8] ss:$72 sps:$4 sm:$0xff]   ;;  %v15204_v58 = vld [vmem:[%s21956_s2 + $0x1108] ss:$72 sps:$4 sm:$0xff]   ;;  %v15218_v63 = vld [vmem:[%s21956_s2 + $0xfec] ss:$72 sps:$4 sm:$0xff]  }
 0x219   : > { %6363 = vmatpush1.bf16.msra.mxu1 %v15153_v11  ;;  %v6029_v4 = vpop.f32.mrf.mxu0  ;;  %6323 = vmatprep.subr.bf16.mxu0 %v15158_v59  ;;  %v15207_v11 = vld [vmem:[%s21956_s2 + $0x1a08] ss:$72 sps:$4 sm:$0xff]   ;;  %v15212_v59 = vld [vmem:[%s21956_s2 + $0x107c] ss:$72 sps:$4 sm:$0xff]  }
 0x21a   : > { %v18480_v6 = vpop.f32.mrf.mxu1  ;;  %6364 = vmatprep.subr.bf16.mxu1 %v15161_v61  ;;  %v18483_v7 = vadd.f32 %v6029_v4, %v18291_v43  ;;  %6353 = vmatprep.mubr.bf16.mxu0 %v16935_v51  ;;  %v15170_v43 = vld [vmem:[%s21956_s2 + $0xb6c] ss:$72 sps:$4 sm:$0xff]   ;;  %v15215_v61 = vld [vmem:[%s21956_s2 + $0x197c] ss:$72 sps:$4 sm:$0xff]   ;;  %v15219_v4 = vld [vmem:[%s21956_s2 + $0x18e8] ss:$72 sps:$4 sm:$0xff]  }
 0x21b   : > { %6394 = vmatprep.mubr.bf16.mxu1 %v17084_v38  ;;  %v6031_v15 = vpop.f32.mrf.mxu0 }
 0x21c   : > { %v6072_v10 = vpop.f32.mrf.mxu1  ;;  %6324 = vmatpush1.bf16.msra.mxu0 %v15156_v33  ;;  %v15210_v33 = vld [vmem:[%s21956_s2 + $0x1078] ss:$72 sps:$4 sm:$0xff]  }
 0x21d   : > { %6365 = vmatpush1.bf16.msra.mxu1 %v15159_v62  ;;  %6325 = vmatprep.subr.bf16.mxu0 %v15164_v1  ;;  %v6032_v19 = vpop.f32.mrf.mxu0  ;;  %v15213_v62 = vld [vmem:[%s21956_s2 + $0x1978] ss:$72 sps:$4 sm:$0xff]   ;;  %v15221_v1 = vld [vmem:[%s21956_s2 + $0x18ec] ss:$72 sps:$4 sm:$0xff]   ;;  %v15224_v10 = vld [vmem:[%s21956_s2 + $0xf5c] ss:$72 sps:$4 sm:$0xff]  }
 0x21e   : > { %v6073_v16 = vpop.f32.mrf.mxu1  ;;  %6366 = vmatprep.subr.bf16.mxu1 %v15167_v2  ;;  %v15216_v2 = vld [vmem:[%s21956_s2 + $0xfe8] ss:$72 sps:$4 sm:$0xff]   ;;  %v15225_v15 = vld [vmem:[%s21956_s2 + $0x1858] ss:$72 sps:$4 sm:$0xff]  }
 0x21f   : > { %v15230_v16 = vld [vmem:[%s21956_s2 + $0xecc] ss:$72 sps:$4 sm:$0xff]   ;;  %v15231_v19 = vld [vmem:[%s21956_s2 + $0x17c8] ss:$72 sps:$4 sm:$0xff]  }
 0x220   : > { %6326 = vmatpush1.bf16.msra.mxu0 %v15162_v30  ;;  %v15227_v30 = vld [vmem:[%s21956_s2 + $0x185c] ss:$72 sps:$4 sm:$0xff]  }
 0x221   : > { %6367 = vmatpush1.bf16.msra.mxu1 %v15165_v14  ;;  %6327 = vmatprep.subr.bf16.mxu0 %v15170_v43  ;;  %v15222_v14 = vld [vmem:[%s21956_s2 + $0xf58] ss:$72 sps:$4 sm:$0xff]   ;;  %v15233_v43 = vld [vmem:[%s21956_s2 + $0x17cc] ss:$72 sps:$4 sm:$0xff]  }
 0x222   : > { %6368 = vmatprep.subr.bf16.mxu1 %v15173_v18  ;;  %v15228_v18 = vld [vmem:[%s21956_s2 + $0xec8] ss:$72 sps:$4 sm:$0xff]  }
 0x224   : > { %6328 = vmatpush1.bf16.msra.mxu0 %v15168_v57  ;;  %v15236_v57 = vld [vmem:[%s21956_s2 + $0xe3c] ss:$72 sps:$4 sm:$0xff]  }
 0x225   : > { %6369 = vmatpush1.bf16.msra.mxu1 %v15171_v20  ;;  %6329 = vmatprep.subr.bf16.mxu0 %v15176_v23  ;;  %v15239_v20 = vld [vmem:[%s21956_s2 + $0x173c] ss:$72 sps:$4 sm:$0xff]   ;;  %v15234_v23 = vld [vmem:[%s21956_s2 + $0xe38] ss:$72 sps:$4 sm:$0xff]  }
 0x226   : > { %6370 = vmatprep.subr.bf16.mxu1 %v15179_v28  ;;  %v15237_v28 = vld [vmem:[%s21956_s2 + $0x1738] ss:$72 sps:$4 sm:$0xff]  }
 0x228   : > { %6330 = vmatpush1.bf16.msra.mxu0 %v15174_v25  ;;  %v15242_v25 = vld [vmem:[%s21956_s2 + $0xdac] ss:$72 sps:$4 sm:$0xff]  }
 0x229   : > { %6371 = vmatpush1.bf16.msra.mxu1 %v15177_v26  ;;  %6331 = vmatprep.subr.bf16.mxu0 %v15182_v27  ;;  %v15245_v26 = vld [vmem:[%s21956_s2 + $0x16ac] ss:$72 sps:$4 sm:$0xff]   ;;  %v1281_v27 = vsub.s32 6, %v17588_v29 }
 0x22a   : > { %6372 = vmatprep.subr.bf16.mxu1 %v15185_v31  ;;  %v1285_v31 = vsub.s32 7, %v17588_v29  ;;  %v1251_v29 = vld [vmem:[%s21957_s3 + $0x10] sm:$0x3] }
 0x22c   : > { %6332 = vmatpush1.bf16.msra.mxu0 %v15180_v34  ;;  %v15240_v34 = vld [vmem:[%s21956_s2 + $0xda8] ss:$72 sps:$4 sm:$0xff]  }
 0x22d   : > { %6373 = vmatpush1.bf16.msra.mxu1 %v15183_v35  ;;  %6333 = vmatprep.subr.bf16.mxu0 %v15188_v36  ;;  %v15243_v35 = vld [vmem:[%s21956_s2 + $0x16a8] ss:$72 sps:$4 sm:$0xff]   ;;  %v15248_v36 = vld [vmem:[%s21956_s2 + $0x424] ss:$72 sps:$4 sm:$0xff]  }
 0x22e   : > { %6374 = vmatprep.subr.bf16.mxu1 %v15191_v37  ;;  %v15251_v37 = vld [vmem:[%s21956_s2 + $0xd24] ss:$72 sps:$4 sm:$0xff]  }
 0x230   : > { %6334 = vmatpush1.bf16.msra.mxu0 %v15186_v39  ;;  %v16599_v39 = vld [vmem:[%s21957_s3] sm:$0xff] }
 0x231   : > { %6375 = vmatpush1.bf16.msra.mxu1 %v15189_v42  ;;  %6335 = vmatprep.subr.bf16.mxu0 %v15194_v44  ;;  %v1282_v42 = vrot.slane %v16599_v39, %v1281_v27  ;;  %v15246_v44 = vld [vmem:[%s21956_s2 + $0x420] ss:$72 sps:$4 sm:$0xff]  }
 0x232   : > { %6376 = vmatprep.subr.bf16.mxu1 %v15197_v45  ;;  %v15249_v45 = vld [vmem:[%s21956_s2 + $0xd20] ss:$72 sps:$4 sm:$0xff]  }
 0x234   : > { %6336 = vmatpush1.bf16.msra.mxu0 %v15192_v46  ;;  %v15254_v46 = vld [vmem:[%s21956_s2 + $0x394] ss:$72 sps:$4 sm:$0xff]  }
 0x235   : > { %6377 = vmatpush1.bf16.msra.mxu1 %v15195_v5  ;;  %6337 = vmatprep.subr.bf16.mxu0 %v15200_v47  ;;  %v15257_v5 = vld [vmem:[%s21956_s2 + $0xc94] ss:$72 sps:$4 sm:$0xff]   ;;  %v1286_v47 = vrot.slane %v16599_v39, %v1285_v31  ;;  %v15285_v39 = vld [vmem:[%s21956_s2 + $0x9c0] ss:$72 sps:$4 sm:$0xff]  }
 0x236   : > { %6378 = vmatprep.subr.bf16.mxu1 %v15203_v49  ;;  %v6069_v49 = vadd.f32 %v18467_v0, %v1282_v42  ;;  %v15263_v0 = vld [vmem:[%s21956_s2 + $0xc04] ss:$72 sps:$4 sm:$0xff]   ;;  %v15290_v42 = vld [vmem:[%s21956_s2 + $0x34] ss:$72 sps:$4 sm:$0xff]  }
 0x238   : > { %6338 = vmatpush2.bf16.msra.mxu0 %v15198_v50  ;;  %v15252_v50 = vld [vmem:[%s21956_s2 + $0x390] ss:$72 sps:$4 sm:$0xff]  }
 0x239   : > { %6379 = vmatpush2.bf16.msra.mxu1 %v15201_v53  ;;  %6339 = vmatprep.subr.bf16.mxu0 %v15206_v55  ;;  %v15255_v53 = vld [vmem:[%s21956_s2 + $0xc90] ss:$72 sps:$4 sm:$0xff]  }
 0x23a   : > { %6380 = vmatprep.subr.bf16.mxu1 %v15209_v56 }
 0x23c   : > { %6340 = vmatpush2.bf16.msra.mxu0 %v15204_v58  ;;  %v15260_v58 = vld [vmem:[%s21956_s2 + $0x304] ss:$72 sps:$4 sm:$0xff]  }
 0x23d   : > { %6381 = vmatpush2.bf16.msra.mxu1 %v15207_v11  ;;  %6341 = vmatprep.subr.bf16.mxu0 %v15212_v59  ;;  %v6071_v11 = vadd.f32 %v18480_v6, %v1286_v47  ;;  %v15299_v47 = vld [vmem:[%s21956_s2 + $0x11a4] ss:$72 sps:$4 sm:$0xff]  }
 0x23e   : > { %6382 = vmatprep.subr.bf16.mxu1 %v15215_v61 }
 0x240   : > { %6342 = vmatpush2.bf16.msra.mxu0 %v15210_v33 }
 0x241   : > { %6383 = vmatpush2.bf16.msra.mxu1 %v15213_v62  ;;  %6343 = vmatprep.subr.bf16.mxu0 %v15218_v63 }
 0x242   : > { %6384 = vmatprep.subr.bf16.mxu1 %v15221_v1  ;;  %v15258_v1 = vld [vmem:[%s21956_s2 + $0x300] ss:$72 sps:$4 sm:$0xff]  }
 0x244   : > { %6344 = vmatpush2.bf16.msra.mxu0 %v15216_v2  ;;  %v15261_v2 = vld [vmem:[%s21956_s2 + $0xc00] ss:$72 sps:$4 sm:$0xff]  }
 0x245   : > { %6385 = vmatpush2.bf16.msra.mxu1 %v15219_v4  ;;  %6345 = vmatprep.subr.bf16.mxu0 %v15224_v10  ;;  %v15266_v4 = vld [vmem:[%s21956_s2 + $0x274] ss:$72 sps:$4 sm:$0xff]  }
 0x246   : > { %6386 = vmatprep.subr.bf16.mxu1 %v15227_v30  ;;  %v15269_v10 = vld [vmem:[%s21956_s2 + $0xb74] ss:$72 sps:$4 sm:$0xff]  }
 0x248   : > { %6346 = vmatpush2.bf16.msra.mxu0 %v15222_v14 }
 0x249   : > { %6387 = vmatpush2.bf16.msra.mxu1 %v15225_v15  ;;  %6347 = vmatprep.subr.bf16.mxu0 %v15230_v16 }
 0x24a   : > { %6388 = vmatprep.subr.bf16.mxu1 %v15233_v43  ;;  %v15264_v43 = vld [vmem:[%s21956_s2 + $0x270] ss:$72 sps:$4 sm:$0xff]  }
 0x24c   : > { %6348 = vmatpush2.bf16.msra.mxu0 %v15228_v18  ;;  %v15267_v18 = vld [vmem:[%s21956_s2 + $0xb70] ss:$72 sps:$4 sm:$0xff]  }
 0x24d   : > { %6389 = vmatpush2.bf16.msra.mxu1 %v15231_v19  ;;  %6349 = vmatprep.subr.bf16.mxu0 %v15236_v57  ;;  %v15272_v19 = vld [vmem:[%s21956_s2 + $0x1e4] ss:$72 sps:$4 sm:$0xff]  }
 0x24e   : > { %6390 = vmatprep.subr.bf16.mxu1 %v15239_v20  ;;  %v15275_v57 = vld [vmem:[%s21956_s2 + $0xae4] ss:$72 sps:$4 sm:$0xff]   ;;  %v15270_v20 = vld [vmem:[%s21956_s2 + $0x1e0] ss:$72 sps:$4 sm:$0xff]  }
 0x250   : > { %6350 = vmatpush2.bf16.msra.mxu0 %v15234_v23  ;;  %v15273_v23 = vld [vmem:[%s21956_s2 + $0xae0] ss:$72 sps:$4 sm:$0xff]  }
 0x251   : > { %6391 = vmatpush2.bf16.msra.mxu1 %v15237_v28  ;;  %6351 = vmatprep.subr.bf16.mxu0 %v15242_v25  ;;  %v15278_v28 = vld [vmem:[%s21956_s2 + $0x154] ss:$72 sps:$4 sm:$0xff]  }
 0x252   : > { %6392 = vmatprep.subr.bf16.mxu1 %v15245_v26  ;;  %v15281_v25 = vld [vmem:[%s21956_s2 + $0xa54] ss:$72 sps:$4 sm:$0xff]   ;;  %v15276_v26 = vld [vmem:[%s21956_s2 + $0x150] ss:$72 sps:$4 sm:$0xff]  }
 0x254   : > { %6352 = vmatpush2.bf16.msra.mxu0 %v15240_v34  ;;  %v15279_v34 = vld [vmem:[%s21956_s2 + $0xa50] ss:$72 sps:$4 sm:$0xff]  }
 0x255   : > { %6393 = vmatpush2.bf16.msra.mxu1 %v15243_v35  ;;  %6403 = vmatprep.subr.bf16.mxu0 %v15248_v36  ;;  %v15284_v35 = vld [vmem:[%s21956_s2 + $0xc4] ss:$72 sps:$4 sm:$0xff]  }
 0x256   : > { %6444 = vmatprep.subr.bf16.mxu1 %v15251_v37  ;;  %v15287_v36 = vld [vmem:[%s21956_s2 + $0x9c4] ss:$72 sps:$4 sm:$0xff]   ;;  %v15282_v37 = vld [vmem:[%s21956_s2 + $0xc0] ss:$72 sps:$4 sm:$0xff]  }
 0x257   : > { %v6109_v55 = vpop.f32.mrf.mxu0  ;;  %6354 = vmatmul.mubr.bf16.vlgmr.msra.gmra.mxu0 %v16997_v9 }
 0x258   : > { %v6150_v56 = vpop.f32.mrf.mxu1  ;;  %6395 = vmatmul.mubr.bf16.vlgmr.msra.gmra.mxu1 %v17199_v17  ;;  %v6110_v59 = vadd.f32 %v6109_v55, %v6069_v49  ;;  %6404 = vmatpush1.bf16.msra.mxu0 %v15246_v44  ;;  %v15293_v44 = vld [vmem:[%s21956_s2 + $0x934] ss:$72 sps:$4 sm:$0xff]   ;;  %v15294_v49 = vld [vmem:[%s21956_s2 + $0x8a0] ss:$72 sps:$4 sm:$0xff]  }
 0x259   : > { %6445 = vmatpush1.bf16.msra.mxu1 %v15249_v45  ;;  %v6111_v61 = vpop.f32.mrf.mxu0  ;;  %6405 = vmatprep.subr.bf16.mxu0 %v15254_v46  ;;  %v15288_v45 = vld [vmem:[%s21956_s2 + $0x30] ss:$72 sps:$4 sm:$0xff]   ;;  %v15305_v55 = vld [vmem:[%s21956_s2 + $0x1114] ss:$72 sps:$4 sm:$0xff]  }
 0x25a   : > { %v6152_v33 = vpop.f32.mrf.mxu1  ;;  %6446 = vmatprep.subr.bf16.mxu1 %v15257_v5  ;;  %v18692_v62 = vadd.f32 %v6150_v56, %v6110_v59  ;;  %v6112_v63 = vadd.f32 %v6111_v61, %v6071_v11  ;;  %6435 = vmatprep.mubr.bf16.mxu0 %v16929_v48  ;;  %v15291_v46 = vld [vmem:[%s21956_s2 + $0x930] ss:$72 sps:$4 sm:$0xff]   ;;  %v15296_v5 = vld [vmem:[%s21956_s2 + $0x8a4] ss:$72 sps:$4 sm:$0xff]   ;;  %v15306_v59 = vld [vmem:[%s21956_s2 + $0x780] ss:$72 sps:$4 sm:$0xff]  }
 0x25b   : > { %6476 = vmatprep.mubr.bf16.mxu1 %v16935_v51  ;;  %v6113_v30 = vpop.f32.mrf.mxu0  ;;  %v15300_v56 = vld [vmem:[%s21956_s2 + $0x810] ss:$72 sps:$4 sm:$0xff]   ;;  %v15311_v11 = vld [vmem:[%s21956_s2 + $0x1084] ss:$72 sps:$4 sm:$0xff]   ;;  %v15309_v61 = vld [vmem:[%s21956_s2 + $0x1080] ss:$72 sps:$4 sm:$0xff]  }
 0x25c   : > { %v6154_v6 = vpop.f32.mrf.mxu1  ;;  %v18708_v14 = vadd.f32 %v6152_v33, %v6112_v63  ;;  %6406 = vmatpush1.bf16.msra.mxu0 %v15252_v50  ;;  %v15297_v50 = vld [vmem:[%s21956_s2 + $0x11a0] ss:$72 sps:$4 sm:$0xff]   ;;  %v15314_v33 = vld [vmem:[%s21956_s2 + $0x6f4] ss:$72 sps:$4 sm:$0xff]  }
 0x25d   : > { %6447 = vmatpush1.bf16.msra.mxu1 %v15255_v53  ;;  %6407 = vmatprep.subr.bf16.mxu0 %v15260_v58  ;;  %v6114_v16 = vpop.f32.mrf.mxu0  ;;  %v15302_v53 = vld [vmem:[%s21956_s2 + $0x814] ss:$72 sps:$4 sm:$0xff]   ;;  %v15303_v58 = vld [vmem:[%s21956_s2 + $0x1110] ss:$72 sps:$4 sm:$0xff]   ;;  %v15320_v6 = vld [vmem:[%s21956_s2 + $0x664] ss:$72 sps:$4 sm:$0xff]  }
 0x25e   : > { %v6155_v15 = vpop.f32.mrf.mxu1  ;;  %6448 = vmatprep.subr.bf16.mxu1 %v15263_v0  ;;  %v15308_v0 = vld [vmem:[%s21956_s2 + $0x784] ss:$72 sps:$4 sm:$0xff]   ;;  %v15317_v63 = vld [vmem:[%s21956_s2 + $0xff4] ss:$72 sps:$4 sm:$0xff]   ;;  %v15321_v30 = vld [vmem:[%s21956_s2 + $0xf60] ss:$72 sps:$4 sm:$0xff]  }
 0x25f   : > { %v15326_v15 = vld [vmem:[%s21956_s2 + $0x5d4] ss:$72 sps:$4 sm:$0xff]  }
 0x260   : > { %6408 = vmatpush1.bf16.msra.mxu0 %v15258_v1  ;;  %v15312_v1 = vld [vmem:[%s21956_s2 + $0x6f0] ss:$72 sps:$4 sm:$0xff]   ;;  %v15329_v16 = vld [vmem:[%s21956_s2 + $0xed4] ss:$72 sps:$4 sm:$0xff]  }
 0x261   : > { %6449 = vmatpush1.bf16.msra.mxu1 %v15261_v2  ;;  %6409 = vmatprep.subr.bf16.mxu0 %v15266_v4  ;;  %v15315_v2 = vld [vmem:[%s21956_s2 + $0xff0] ss:$72 sps:$4 sm:$0xff]   ;;  %v15323_v4 = vld [vmem:[%s21956_s2 + $0xf64] ss:$72 sps:$4 sm:$0xff]  }
 0x262   : > { %6450 = vmatprep.subr.bf16.mxu1 %v15269_v10  ;;  %v15318_v10 = vld [vmem:[%s21956_s2 + $0x660] ss:$72 sps:$4 sm:$0xff]  }
 0x264   : > { %6410 = vmatpush1.bf16.msra.mxu0 %v15264_v43  ;;  %v15324_v43 = vld [vmem:[%s21956_s2 + $0x5d0] ss:$72 sps:$4 sm:$0xff]  }
 0x265   : > { %6451 = vmatpush1.bf16.msra.mxu1 %v15267_v18  ;;  %6411 = vmatprep.subr.bf16.mxu0 %v15272_v19  ;;  %v15327_v18 = vld [vmem:[%s21956_s2 + $0xed0] ss:$72 sps:$4 sm:$0xff]   ;;  %v15332_v19 = vld [vmem:[%s21956_s2 + $0x544] ss:$72 sps:$4 sm:$0xff]  }
 0x266   : > { %6452 = vmatprep.subr.bf16.mxu1 %v15275_v57  ;;  %v15335_v57 = vld [vmem:[%s21956_s2 + $0xe44] ss:$72 sps:$4 sm:$0xff]  }
 0x268   : > { %6412 = vmatpush1.bf16.msra.mxu0 %v15270_v20  ;;  %v15330_v20 = vld [vmem:[%s21956_s2 + $0x540] ss:$72 sps:$4 sm:$0xff]  }
 0x269   : > { %6453 = vmatpush1.bf16.msra.mxu1 %v15273_v23  ;;  %6413 = vmatprep.subr.bf16.mxu0 %v15278_v28  ;;  %v15333_v23 = vld [vmem:[%s21956_s2 + $0xe40] ss:$72 sps:$4 sm:$0xff]   ;;  %v15338_v28 = vld [vmem:[%s21956_s2 + $0x4b4] ss:$72 sps:$4 sm:$0xff]  }
 0x26a   : > { %6454 = vmatprep.subr.bf16.mxu1 %v15281_v25  ;;  %v15341_v25 = vld [vmem:[%s21956_s2 + $0xdb4] ss:$72 sps:$4 sm:$0xff]  }
 0x26c   : > { %6414 = vmatpush1.bf16.msra.mxu0 %v15276_v26  ;;  %v15336_v26 = vld [vmem:[%s21956_s2 + $0x4b0] ss:$72 sps:$4 sm:$0xff]  }
 0x26d   : > { %6455 = vmatpush1.bf16.msra.mxu1 %v15279_v34  ;;  %6415 = vmatprep.subr.bf16.mxu0 %v15284_v35  ;;  %v15339_v34 = vld [vmem:[%s21956_s2 + $0xdb0] ss:$72 sps:$4 sm:$0xff]   ;;  %v1250_v35 = vld [vmem:[%s21957_s3 + $0x8] sm:$0xff] }
 0x26e   : > { %6456 = vmatprep.subr.bf16.mxu1 %v15287_v36  ;;  %v15344_v36 = vld [vmem:[%s21956_s2 + $0x1624] ss:$72 sps:$4 sm:$0xff]  }
 0x270   : > { %6416 = vmatpush1.bf16.msra.mxu0 %v15282_v37  ;;  %v15347_v37 = vld [vmem:[%s21956_s2 + $0x42c] ss:$72 sps:$4 sm:$0xff]  }
 0x271   : > { %6457 = vmatpush1.bf16.msra.mxu1 %v15285_v39  ;;  %6417 = vmatprep.subr.bf16.mxu0 %v15290_v42  ;;  %v15342_v39 = vld [vmem:[%s21956_s2 + $0x1620] ss:$72 sps:$4 sm:$0xff]  }
 0x272   : > { %6458 = vmatprep.subr.bf16.mxu1 %v15293_v44  ;;  %v15345_v42 = vld [vmem:[%s21956_s2 + $0x428] ss:$72 sps:$4 sm:$0xff]   ;;  %v15350_v44 = vld [vmem:[%s21956_s2 + $0x1594] ss:$72 sps:$4 sm:$0xff]  }
 0x274   : > { %6418 = vmatpush1.bf16.msra.mxu0 %v15288_v45  ;;  %v15353_v45 = vld [vmem:[%s21956_s2 + $0x39c] ss:$72 sps:$4 sm:$0xff]  }
 0x275   : > { %6459 = vmatpush1.bf16.msra.mxu1 %v15291_v46  ;;  %6419 = vmatprep.subr.bf16.mxu0 %v15296_v5  ;;  %v1290_v46 = vrot.slane %v1250_v35, %v17785_v52  ;;  %v1294_v5 = vrot.slane %v1250_v35, %v17597_v32  ;;  %v15383_v35 = vld [vmem:[%s21956_s2 + $0xcc] ss:$72 sps:$4 sm:$0xff]  }
 0x276   : > { %6460 = vmatprep.subr.bf16.mxu1 %v15299_v47  ;;  %v15348_v47 = vld [vmem:[%s21956_s2 + $0x1590] ss:$72 sps:$4 sm:$0xff]  }
 0x278   : > { %6420 = vmatpush2.bf16.msra.mxu0 %v15294_v49  ;;  %v15351_v49 = vld [vmem:[%s21956_s2 + $0x398] ss:$72 sps:$4 sm:$0xff]  }
 0x279   : > { %6461 = vmatpush2.bf16.msra.mxu1 %v15297_v50  ;;  %6421 = vmatprep.subr.bf16.mxu0 %v15302_v53 }
 0x27a   : > { %6462 = vmatprep.subr.bf16.mxu1 %v15305_v55  ;;  %v15356_v55 = vld [vmem:[%s21956_s2 + $0x1504] ss:$72 sps:$4 sm:$0xff]  }
 0x27c   : > { %6422 = vmatpush2.bf16.msra.mxu0 %v15300_v56  ;;  %v15359_v56 = vld [vmem:[%s21956_s2 + $0x30c] ss:$72 sps:$4 sm:$0xff]  }
 0x27d   : > { %6463 = vmatpush2.bf16.msra.mxu1 %v15303_v58  ;;  %6423 = vmatprep.subr.bf16.mxu0 %v15308_v0 }
 0x27e   : > { %6464 = vmatprep.subr.bf16.mxu1 %v15311_v11 }
 0x280   : > { %6424 = vmatpush2.bf16.msra.mxu0 %v15306_v59 }
 0x281   : > { %6465 = vmatpush2.bf16.msra.mxu1 %v15309_v61  ;;  %6425 = vmatprep.subr.bf16.mxu0 %v15314_v33  ;;  %v15354_v33 = vld [vmem:[%s21956_s2 + $0x1500] ss:$72 sps:$4 sm:$0xff]  }
 0x282   : > { %6466 = vmatprep.subr.bf16.mxu1 %v15317_v63  ;;  %v15357_v63 = vld [vmem:[%s21956_s2 + $0x308] ss:$72 sps:$4 sm:$0xff]  }
 0x284   : > { %6426 = vmatpush2.bf16.msra.mxu0 %v15312_v1 }
 0x285   : > { %6467 = vmatpush2.bf16.msra.mxu1 %v15315_v2  ;;  %6427 = vmatprep.subr.bf16.mxu0 %v15320_v6  ;;  %v15362_v2 = vld [vmem:[%s21956_s2 + $0x1474] ss:$72 sps:$4 sm:$0xff]  }
 0x286   : > { %6468 = vmatprep.subr.bf16.mxu1 %v15323_v4  ;;  %v15365_v6 = vld [vmem:[%s21956_s2 + $0x27c] ss:$72 sps:$4 sm:$0xff]  }
 0x288   : > { %6428 = vmatpush2.bf16.msra.mxu0 %v15318_v10 }
 0x289   : > { %6469 = vmatpush2.bf16.msra.mxu1 %v15321_v30  ;;  %6429 = vmatprep.subr.bf16.mxu0 %v15326_v15 }
 0x28a   : > { %6470 = vmatprep.subr.bf16.mxu1 %v15329_v16  ;;  %v15360_v16 = vld [vmem:[%s21956_s2 + $0x1470] ss:$72 sps:$4 sm:$0xff]  }
 0x28c   : > { %6430 = vmatpush2.bf16.msra.mxu0 %v15324_v43  ;;  %v15363_v43 = vld [vmem:[%s21956_s2 + $0x278] ss:$72 sps:$4 sm:$0xff]  }
 0x28d   : > { %6471 = vmatpush2.bf16.msra.mxu1 %v15327_v18  ;;  %6431 = vmatprep.subr.bf16.mxu0 %v15332_v19  ;;  %v15368_v18 = vld [vmem:[%s21956_s2 + $0x13e4] ss:$72 sps:$4 sm:$0xff]  }
 0x28e   : > { %6472 = vmatprep.subr.bf16.mxu1 %v15335_v57  ;;  %v15371_v19 = vld [vmem:[%s21956_s2 + $0x1ec] ss:$72 sps:$4 sm:$0xff]   ;;  %v15366_v57 = vld [vmem:[%s21956_s2 + $0x13e0] ss:$72 sps:$4 sm:$0xff]  }
 0x290   : > { %6432 = vmatpush2.bf16.msra.mxu0 %v15330_v20  ;;  %v15369_v20 = vld [vmem:[%s21956_s2 + $0x1e8] ss:$72 sps:$4 sm:$0xff]  }
 0x291   : > { %6473 = vmatpush2.bf16.msra.mxu1 %v15333_v23  ;;  %6433 = vmatprep.subr.bf16.mxu0 %v15338_v28  ;;  %v15374_v23 = vld [vmem:[%s21956_s2 + $0x1354] ss:$72 sps:$4 sm:$0xff]  }
 0x292   : > { %6474 = vmatprep.subr.bf16.mxu1 %v15341_v25  ;;  %v15377_v28 = vld [vmem:[%s21956_s2 + $0x15c] ss:$72 sps:$4 sm:$0xff]   ;;  %v15372_v25 = vld [vmem:[%s21956_s2 + $0x1350] ss:$72 sps:$4 sm:$0xff]  }
 0x294   : > { %6434 = vmatpush2.bf16.msra.mxu0 %v15336_v26  ;;  %v15375_v26 = vld [vmem:[%s21956_s2 + $0x158] ss:$72 sps:$4 sm:$0xff]  }
 0x295   : > { %6475 = vmatpush2.bf16.msra.mxu1 %v15339_v34  ;;  %6485 = vmatprep.subr.bf16.mxu0 %v15344_v36  ;;  %v15380_v34 = vld [vmem:[%s21956_s2 + $0x12c4] ss:$72 sps:$4 sm:$0xff]   ;;  %v15378_v36 = vld [vmem:[%s21956_s2 + $0x12c0] ss:$72 sps:$4 sm:$0xff]  }
 0x296   : > { %6526 = vmatprep.subr.bf16.mxu1 %v15347_v37  ;;  %v15381_v37 = vld [vmem:[%s21956_s2 + $0xc8] ss:$72 sps:$4 sm:$0xff]  }
 0x297   : > { %v6191_v50 = vpop.f32.mrf.mxu0  ;;  %6436 = vmatmul.mubr.bf16.vlgmr.msra.gmra.mxu0 %v16995_v8 }
 0x298   : > { %v6232_v53 = vpop.f32.mrf.mxu1  ;;  %6477 = vmatmul.mubr.bf16.vlgmr.msra.gmra.mxu1 %v16997_v9  ;;  %v6192_v58 = vadd.f32 %v6191_v50, %v1290_v46  ;;  %6486 = vmatpush1.bf16.msra.mxu0 %v15342_v39  ;;  %v15386_v39 = vld [vmem:[%s21956_s2 + $0x1234] ss:$72 sps:$4 sm:$0xff]   ;;  %v15392_v46 = vld [vmem:[%s21956_s2 + $0x1aa4] ss:$72 sps:$4 sm:$0xff]  }
 0x299   : > { %6527 = vmatpush1.bf16.msra.mxu1 %v15345_v42  ;;  %v6193_v0 = vpop.f32.mrf.mxu0  ;;  %6487 = vmatprep.subr.bf16.mxu0 %v15350_v44  ;;  %v15389_v42 = vld [vmem:[%s21956_s2 + $0x3c] ss:$72 sps:$4 sm:$0xff]   ;;  %v15384_v44 = vld [vmem:[%s21956_s2 + $0x1230] ss:$72 sps:$4 sm:$0xff]  }
 0x29a   : > { %v6234_v11 = vpop.f32.mrf.mxu1  ;;  %6528 = vmatprep.subr.bf16.mxu1 %v15353_v45  ;;  %v18897_v59 = vadd.f32 %v6232_v53, %v6192_v58  ;;  %v6194_v61 = vadd.f32 %v6193_v0, %v1294_v5  ;;  %6517 = vmatprep.mubr.bf16.mxu0 %v17084_v38  ;;  %v15387_v45 = vld [vmem:[%s21956_s2 + $0x38] ss:$72 sps:$4 sm:$0xff]   ;;  %v15395_v5 = vld [vmem:[%s21956_s2 + $0x8ac] ss:$72 sps:$4 sm:$0xff]   ;;  %v15401_v53 = vld [vmem:[%s21956_s2 + $0x81c] ss:$72 sps:$4 sm:$0xff]  }
 0x29b   : > { %6558 = vmatprep.mubr.bf16.mxu1 %v16929_v48  ;;  %v6195_v4 = vpop.f32.mrf.mxu0  ;;  %v15398_v50 = vld [vmem:[%s21956_s2 + $0x1a14] ss:$72 sps:$4 sm:$0xff]   ;;  %v15404_v58 = vld [vmem:[%s21956_s2 + $0x1984] ss:$72 sps:$4 sm:$0xff]  }
 0x29c   : > { %v6236_v1 = vpop.f32.mrf.mxu1  ;;  %v18913_v10 = vadd.f32 %v6234_v11, %v6194_v61  ;;  %6488 = vmatpush1.bf16.msra.mxu0 %v15348_v47  ;;  %v15390_v47 = vld [vmem:[%s21956_s2 + $0x1aa0] ss:$72 sps:$4 sm:$0xff]   ;;  %v15407_v0 = vld [vmem:[%s21956_s2 + $0x78c] ss:$72 sps:$4 sm:$0xff]  }
 0x29d   : > { %6529 = vmatpush1.bf16.msra.mxu1 %v15351_v49  ;;  %6489 = vmatprep.subr.bf16.mxu0 %v15356_v55  ;;  %v6196_v15 = vpop.f32.mrf.mxu0  ;;  %v15393_v49 = vld [vmem:[%s21956_s2 + $0x8a8] ss:$72 sps:$4 sm:$0xff]   ;;  %v15419_v4 = vld [vmem:[%s21956_s2 + $0x66c] ss:$72 sps:$4 sm:$0xff]  }
 0x29e   : > { %v6237_v30 = vpop.f32.mrf.mxu1  ;;  %6530 = vmatprep.subr.bf16.mxu1 %v15359_v56  ;;  %v15396_v55 = vld [vmem:[%s21956_s2 + $0x1a10] ss:$72 sps:$4 sm:$0xff]   ;;  %v15402_v11 = vld [vmem:[%s21956_s2 + $0x1980] ss:$72 sps:$4 sm:$0xff]  }
 0x29f   : > { %v15399_v56 = vld [vmem:[%s21956_s2 + $0x818] ss:$72 sps:$4 sm:$0xff]   ;;  %v15405_v61 = vld [vmem:[%s21956_s2 + $0x788] ss:$72 sps:$4 sm:$0xff]  }
 0x2a0   : > { %6490 = vmatpush1.bf16.msra.mxu0 %v15354_v33  ;;  %v15410_v33 = vld [vmem:[%s21956_s2 + $0x18f4] ss:$72 sps:$4 sm:$0xff]   ;;  %v15408_v1 = vld [vmem:[%s21956_s2 + $0x18f0] ss:$72 sps:$4 sm:$0xff]   ;;  %v15414_v30 = vld [vmem:[%s21956_s2 + $0x1860] ss:$72 sps:$4 sm:$0xff]  }
 0x2a1   : > { %6531 = vmatpush1.bf16.msra.mxu1 %v15357_v63  ;;  %6491 = vmatprep.subr.bf16.mxu0 %v15362_v2  ;;  %v15413_v63 = vld [vmem:[%s21956_s2 + $0x6fc] ss:$72 sps:$4 sm:$0xff]   ;;  %v15411_v2 = vld [vmem:[%s21956_s2 + $0x6f8] ss:$72 sps:$4 sm:$0xff]   ;;  %v15417_v15 = vld [vmem:[%s21956_s2 + $0x668] ss:$72 sps:$4 sm:$0xff]  }
 0x2a2   : > { %6532 = vmatprep.subr.bf16.mxu1 %v15365_v6  ;;  %v15416_v6 = vld [vmem:[%s21956_s2 + $0x1864] ss:$72 sps:$4 sm:$0xff]  }
 0x2a4   : > { %6492 = vmatpush1.bf16.msra.mxu0 %v15360_v16  ;;  %v15422_v16 = vld [vmem:[%s21956_s2 + $0x17d4] ss:$72 sps:$4 sm:$0xff]  }
 0x2a5   : > { %6533 = vmatpush1.bf16.msra.mxu1 %v15363_v43  ;;  %6493 = vmatprep.subr.bf16.mxu0 %v15368_v18  ;;  %v15425_v43 = vld [vmem:[%s21956_s2 + $0x5dc] ss:$72 sps:$4 sm:$0xff]   ;;  %v15420_v18 = vld [vmem:[%s21956_s2 + $0x17d0] ss:$72 sps:$4 sm:$0xff]  }
 0x2a6   : > { %6534 = vmatprep.subr.bf16.mxu1 %v15371_v19  ;;  %v15423_v19 = vld [vmem:[%s21956_s2 + $0x5d8] ss:$72 sps:$4 sm:$0xff]  }
 0x2a8   : > { %6494 = vmatpush1.bf16.msra.mxu0 %v15366_v57  ;;  %v15428_v57 = vld [vmem:[%s21956_s2 + $0x1744] ss:$72 sps:$4 sm:$0xff]  }
 0x2a9   : > { %6535 = vmatpush1.bf16.msra.mxu1 %v15369_v20  ;;  %6495 = vmatprep.subr.bf16.mxu0 %v15374_v23  ;;  %v15431_v20 = vld [vmem:[%s21956_s2 + $0x54c] ss:$72 sps:$4 sm:$0xff]   ;;  %v15426_v23 = vld [vmem:[%s21956_s2 + $0x1740] ss:$72 sps:$4 sm:$0xff]  }
 0x2aa   : > { %6536 = vmatprep.subr.bf16.mxu1 %v15377_v28  ;;  %v15429_v28 = vld [vmem:[%s21956_s2 + $0x548] ss:$72 sps:$4 sm:$0xff]  }
 0x2ac   : > { %6496 = vmatpush1.bf16.msra.mxu0 %v15372_v25  ;;  %v15434_v25 = vld [vmem:[%s21956_s2 + $0x16b4] ss:$72 sps:$4 sm:$0xff]  }
 0x2ad   : > { %6537 = vmatpush1.bf16.msra.mxu1 %v15375_v26  ;;  %6497 = vmatprep.subr.bf16.mxu0 %v15380_v34  ;;  %v15437_v26 = vld [vmem:[%s21956_s2 + $0x4bc] ss:$72 sps:$4 sm:$0xff]   ;;  %v15432_v34 = vld [vmem:[%s21956_s2 + $0x16b0] ss:$72 sps:$4 sm:$0xff]  }
 0x2ae   : > { %6538 = vmatprep.subr.bf16.mxu1 %v15383_v35  ;;  %v15435_v35 = vld [vmem:[%s21956_s2 + $0x4b8] ss:$72 sps:$4 sm:$0xff]  }
 0x2b0   : > { %6498 = vmatpush1.bf16.msra.mxu0 %v15378_v36  ;;  %v15440_v36 = vld [vmem:[%s21956_s2 + $0xd2c] ss:$72 sps:$4 sm:$0xff]  }
 0x2b1   : > { %6539 = vmatpush1.bf16.msra.mxu1 %v15381_v37  ;;  %6499 = vmatprep.subr.bf16.mxu0 %v15386_v39  ;;  %v15443_v37 = vld [vmem:[%s21956_s2 + $0x162c] ss:$72 sps:$4 sm:$0xff]   ;;  %v15438_v39 = vld [vmem:[%s21956_s2 + $0xd28] ss:$72 sps:$4 sm:$0xff]  }
 0x2b2   : > { %6540 = vmatprep.subr.bf16.mxu1 %v15389_v42  ;;  %v15441_v42 = vld [vmem:[%s21956_s2 + $0x1628] ss:$72 sps:$4 sm:$0xff]  }
 0x2b4   : > { %6500 = vmatpush1.bf16.msra.mxu0 %v15384_v44  ;;  %v15446_v44 = vld [vmem:[%s21956_s2 + $0xc9c] ss:$72 sps:$4 sm:$0xff]  }
 0x2b5   : > { %6541 = vmatpush1.bf16.msra.mxu1 %v15387_v45  ;;  %6501 = vmatprep.subr.bf16.mxu0 %v15392_v46  ;;  %v15449_v45 = vld [vmem:[%s21956_s2 + $0x159c] ss:$72 sps:$4 sm:$0xff]   ;;  %v15444_v46 = vld [vmem:[%s21956_s2 + $0xc98] ss:$72 sps:$4 sm:$0xff]  }
 0x2b6   : > { %6542 = vmatprep.subr.bf16.mxu1 %v15395_v5  ;;  %v15447_v5 = vld [vmem:[%s21956_s2 + $0x1598] ss:$72 sps:$4 sm:$0xff]  }
 0x2b8   : > { %6502 = vmatpush2.bf16.msra.mxu0 %v15390_v47 }
 0x2b9   : > { %6543 = vmatpush2.bf16.msra.mxu1 %v15393_v49  ;;  %6503 = vmatprep.subr.bf16.mxu0 %v15398_v50  ;;  %v15452_v50 = vld [vmem:[%s21956_s2 + $0xc0c] ss:$72 sps:$4 sm:$0xff]  }
 0x2ba   : > { %6544 = vmatprep.subr.bf16.mxu1 %v15401_v53  ;;  %v15455_v53 = vld [vmem:[%s21956_s2 + $0x150c] ss:$72 sps:$4 sm:$0xff]  }
 0x2bc   : > { %6504 = vmatpush2.bf16.msra.mxu0 %v15396_v55 }
 0x2bd   : > { %6545 = vmatpush2.bf16.msra.mxu1 %v15399_v56  ;;  %6505 = vmatprep.subr.bf16.mxu0 %v15404_v58 }
 0x2be   : > { %6546 = vmatprep.subr.bf16.mxu1 %v15407_v0 }
 0x2c0   : > { %6506 = vmatpush2.bf16.msra.mxu0 %v15402_v11  ;;  %v15450_v11 = vld [vmem:[%s21956_s2 + $0xc08] ss:$72 sps:$4 sm:$0xff]  }
 0x2c1   : > { %6547 = vmatpush2.bf16.msra.mxu1 %v15405_v61  ;;  %6507 = vmatprep.subr.bf16.mxu0 %v15410_v33  ;;  %v15453_v61 = vld [vmem:[%s21956_s2 + $0x1508] ss:$72 sps:$4 sm:$0xff]  }
 0x2c2   : > { %6548 = vmatprep.subr.bf16.mxu1 %v15413_v63 }
 0x2c4   : > { %6508 = vmatpush2.bf16.msra.mxu0 %v15408_v1  ;;  %v15461_v1 = vld [vmem:[%s21956_s2 + $0x147c] ss:$72 sps:$4 sm:$0xff]  }
 0x2c5   : > { %6549 = vmatpush2.bf16.msra.mxu1 %v15411_v2  ;;  %6509 = vmatprep.subr.bf16.mxu0 %v15416_v6  ;;  %v15456_v6 = vld [vmem:[%s21956_s2 + $0xb78] ss:$72 sps:$4 sm:$0xff]  }
 0x2c6   : > { %6550 = vmatprep.subr.bf16.mxu1 %v15419_v4  ;;  %v15459_v4 = vld [vmem:[%s21956_s2 + $0x1478] ss:$72 sps:$4 sm:$0xff]  }
 0x2c8   : > { %6510 = vmatpush2.bf16.msra.mxu0 %v15414_v30  ;;  %v15464_v30 = vld [vmem:[%s21956_s2 + $0xaec] ss:$72 sps:$4 sm:$0xff]  }
 0x2c9   : > { %6551 = vmatpush2.bf16.msra.mxu1 %v15417_v15  ;;  %6511 = vmatprep.subr.bf16.mxu0 %v15422_v16  ;;  %v15467_v15 = vld [vmem:[%s21956_s2 + $0x13ec] ss:$72 sps:$4 sm:$0xff]   ;;  %v15462_v16 = vld [vmem:[%s21956_s2 + $0xae8] ss:$72 sps:$4 sm:$0xff]  }
 0x2ca   : > { %6552 = vmatprep.subr.bf16.mxu1 %v15425_v43  ;;  %v15465_v43 = vld [vmem:[%s21956_s2 + $0x13e8] ss:$72 sps:$4 sm:$0xff]  }
 0x2cc   : > { %6512 = vmatpush2.bf16.msra.mxu0 %v15420_v18  ;;  %v15470_v18 = vld [vmem:[%s21956_s2 + $0xa5c] ss:$72 sps:$4 sm:$0xff]  }
 0x2cd   : > { %6553 = vmatpush2.bf16.msra.mxu1 %v15423_v19  ;;  %6513 = vmatprep.subr.bf16.mxu0 %v15428_v57  ;;  %v15473_v19 = vld [vmem:[%s21956_s2 + $0x135c] ss:$72 sps:$4 sm:$0xff]   ;;  %v15468_v57 = vld [vmem:[%s21956_s2 + $0xa58] ss:$72 sps:$4 sm:$0xff]  }
 0x2ce   : > { %6554 = vmatprep.subr.bf16.mxu1 %v15431_v20  ;;  %v15471_v20 = vld [vmem:[%s21956_s2 + $0x1358] ss:$72 sps:$4 sm:$0xff]  }
 0x2d0   : > { %6514 = vmatpush2.bf16.msra.mxu0 %v15426_v23  ;;  %v15476_v23 = vld [vmem:[%s21956_s2 + $0x9cc] ss:$72 sps:$4 sm:$0xff]  }
 0x2d1   : > { %6555 = vmatpush2.bf16.msra.mxu1 %v15429_v28  ;;  %6515 = vmatprep.subr.bf16.mxu0 %v15434_v25  ;;  %v15479_v28 = vld [vmem:[%s21956_s2 + $0x12cc] ss:$72 sps:$4 sm:$0xff]   ;;  %v15474_v25 = vld [vmem:[%s21956_s2 + $0x9c8] ss:$72 sps:$4 sm:$0xff]  }
 0x2d2   : > { %6556 = vmatprep.subr.bf16.mxu1 %v15437_v26  ;;  %v15477_v26 = vld [vmem:[%s21956_s2 + $0x12c8] ss:$72 sps:$4 sm:$0xff]  }
 0x2d4   : > { %6516 = vmatpush2.bf16.msra.mxu0 %v15432_v34  ;;  %v15482_v34 = vld [vmem:[%s21956_s2 + $0x93c] ss:$72 sps:$4 sm:$0xff]  }
 0x2d5   : > { %6557 = vmatpush2.bf16.msra.mxu1 %v15435_v35  ;;  %6567 = vmatprep.subr.bf16.mxu0 %v15440_v36  ;;  %v15485_v35 = vld [vmem:[%s21956_s2 + $0x123c] ss:$72 sps:$4 sm:$0xff]   ;;  %v15480_v36 = vld [vmem:[%s21956_s2 + $0x938] ss:$72 sps:$4 sm:$0xff]  }
 0x2d6   : > { %6608 = vmatprep.subr.bf16.mxu1 %v15443_v37  ;;  %v15483_v37 = vld [vmem:[%s21956_s2 + $0x1238] ss:$72 sps:$4 sm:$0xff]  }
 0x2d7   : > { %v6273_v47 = vpop.f32.mrf.mxu0  ;;  %6518 = vmatmul.mubr.bf16.vlgmr.msra.gmra.mxu0 %v17199_v17 }
 0x2d8   : > { %v19089_v49 = vpop.f32.mrf.mxu1  ;;  %6559 = vmatmul.mubr.bf16.vlgmr.msra.gmra.mxu1 %v16995_v8  ;;  %v19100_v55 = vadd.f32 %v6273_v47, %v18897_v59  ;;  %6568 = vmatpush1.bf16.msra.mxu0 %v15438_v39  ;;  %v15488_v39 = vld [vmem:[%s21956_s2 + $0x11ac] ss:$72 sps:$4 sm:$0xff]   ;;  %v15492_v47 = vld [vmem:[%s21956_s2 + $0x1118] ss:$72 sps:$4 sm:$0xff]  }
 0x2d9   : > { %6609 = vmatpush1.bf16.msra.mxu1 %v15441_v42  ;;  %v6275_v56 = vpop.f32.mrf.mxu0  ;;  %6569 = vmatprep.subr.bf16.mxu0 %v15446_v44  ;;  %v15491_v42 = vld [vmem:[%s21956_s2 + $0x1aac] ss:$72 sps:$4 sm:$0xff]   ;;  %v15486_v44 = vld [vmem:[%s21956_s2 + $0x11a8] ss:$72 sps:$4 sm:$0xff]  }
 0x2da   : > { %v19102_v58 = vpop.f32.mrf.mxu1  ;;  %6610 = vmatprep.subr.bf16.mxu1 %v15449_v45  ;;  %v19105_v0 = vadd.f32 %v6275_v56, %v18913_v10  ;;  %6599 = vmatprep.mubr.bf16.mxu0 %v16935_v51  ;;  %v15458_v10 = vld [vmem:[%s21956_s2 + $0xb7c] ss:$72 sps:$4 sm:$0xff]   ;;  %v15489_v45 = vld [vmem:[%s21956_s2 + $0x1aa8] ss:$72 sps:$4 sm:$0xff]   ;;  %v15503_v56 = vld [vmem:[%s21956_s2 + $0x198c] ss:$72 sps:$4 sm:$0xff]  }
 0x2db   : > { %6640 = vmatprep.mubr.bf16.mxu1 %v17084_v38  ;;  %v6277_v33 = vpop.f32.mrf.mxu0 }
 0x2dc   : > { %v6318_v59 = vpop.f32.mrf.mxu1  ;;  %6570 = vmatpush1.bf16.msra.mxu0 %v15444_v46  ;;  %v15494_v46 = vld [vmem:[%s21956_s2 + $0x111c] ss:$72 sps:$4 sm:$0xff]  }
 0x2dd   : > { %6611 = vmatpush1.bf16.msra.mxu1 %v15447_v5  ;;  %6571 = vmatprep.subr.bf16.mxu0 %v15452_v50  ;;  %v6278_v2 = vpop.f32.mrf.mxu0  ;;  %v15497_v5 = vld [vmem:[%s21956_s2 + $0x1a1c] ss:$72 sps:$4 sm:$0xff]   ;;  %v15495_v50 = vld [vmem:[%s21956_s2 + $0x1a18] ss:$72 sps:$4 sm:$0xff]   ;;  %v15501_v59 = vld [vmem:[%s21956_s2 + $0x1988] ss:$72 sps:$4 sm:$0xff]  }
 0x2de   : > { %v6319_v63 = vpop.f32.mrf.mxu1  ;;  %6612 = vmatprep.subr.bf16.mxu1 %v15455_v53  ;;  %v15500_v53 = vld [vmem:[%s21956_s2 + $0x108c] ss:$72 sps:$4 sm:$0xff]   ;;  %v15509_v33 = vld [vmem:[%s21956_s2 + $0x18fc] ss:$72 sps:$4 sm:$0xff]  }
 0x2df   : > { %v15504_v63 = vld [vmem:[%s21956_s2 + $0xff8] ss:$72 sps:$4 sm:$0xff]   ;;  %v15515_v2 = vld [vmem:[%s21956_s2 + $0x186c] ss:$72 sps:$4 sm:$0xff]  }
 0x2e0   : > { %6572 = vmatpush1.bf16.msra.mxu0 %v15450_v11  ;;  %v15498_v11 = vld [vmem:[%s21956_s2 + $0x1088] ss:$72 sps:$4 sm:$0xff]  }
 0x2e1   : > { %6613 = vmatpush1.bf16.msra.mxu1 %v15453_v61  ;;  %6573 = vmatprep.subr.bf16.mxu0 %v15458_v10  ;;  %v15506_v61 = vld [vmem:[%s21956_s2 + $0xffc] ss:$72 sps:$4 sm:$0xff]   ;;  %v15507_v10 = vld [vmem:[%s21956_s2 + $0x18f8] ss:$72 sps:$4 sm:$0xff]  }
 0x2e2   : > { %6614 = vmatprep.subr.bf16.mxu1 %v15461_v1  ;;  %v15512_v1 = vld [vmem:[%s21956_s2 + $0xf6c] ss:$72 sps:$4 sm:$0xff]  }
 0x2e4   : > { %6574 = vmatpush1.bf16.msra.mxu0 %v15456_v6  ;;  %v15510_v6 = vld [vmem:[%s21956_s2 + $0xf68] ss:$72 sps:$4 sm:$0xff]  }
 0x2e5   : > { %6615 = vmatpush1.bf16.msra.mxu1 %v15459_v4  ;;  %6575 = vmatprep.subr.bf16.mxu0 %v15464_v30  ;;  %v15513_v4 = vld [vmem:[%s21956_s2 + $0x1868] ss:$72 sps:$4 sm:$0xff]   ;;  %v15518_v30 = vld [vmem:[%s21956_s2 + $0xedc] ss:$72 sps:$4 sm:$0xff]  }
 0x2e6   : > { %6616 = vmatprep.subr.bf16.mxu1 %v15467_v15  ;;  %v15521_v15 = vld [vmem:[%s21956_s2 + $0x17dc] ss:$72 sps:$4 sm:$0xff]  }
 0x2e8   : > { %6576 = vmatpush1.bf16.msra.mxu0 %v15462_v16  ;;  %v15516_v16 = vld [vmem:[%s21956_s2 + $0xed8] ss:$72 sps:$4 sm:$0xff]  }
 0x2e9   : > { %6617 = vmatpush1.bf16.msra.mxu1 %v15465_v43  ;;  %6577 = vmatprep.subr.bf16.mxu0 %v15470_v18  ;;  %v15519_v43 = vld [vmem:[%s21956_s2 + $0x17d8] ss:$72 sps:$4 sm:$0xff]   ;;  %v15524_v18 = vld [vmem:[%s21956_s2 + $0xe4c] ss:$72 sps:$4 sm:$0xff]  }
 0x2ea   : > { %6618 = vmatprep.subr.bf16.mxu1 %v15473_v19  ;;  %v15527_v19 = vld [vmem:[%s21956_s2 + $0x174c] ss:$72 sps:$4 sm:$0xff]  }
 0x2ec   : > { %6578 = vmatpush1.bf16.msra.mxu0 %v15468_v57  ;;  %v15522_v57 = vld [vmem:[%s21956_s2 + $0xe48] ss:$72 sps:$4 sm:$0xff]  }
 0x2ed   : > { %6619 = vmatpush1.bf16.msra.mxu1 %v15471_v20  ;;  %6579 = vmatprep.subr.bf16.mxu0 %v15476_v23  ;;  %v15525_v20 = vld [vmem:[%s21956_s2 + $0x1748] ss:$72 sps:$4 sm:$0xff]   ;;  %v15530_v23 = vld [vmem:[%s21956_s2 + $0xdbc] ss:$72 sps:$4 sm:$0xff]  }
 0x2ee   : > { %6620 = vmatprep.subr.bf16.mxu1 %v15479_v28  ;;  %v15533_v28 = vld [vmem:[%s21956_s2 + $0x16bc] ss:$72 sps:$4 sm:$0xff]  }
 0x2f0   : > { %6580 = vmatpush1.bf16.msra.mxu0 %v15474_v25  ;;  %v15528_v25 = vld [vmem:[%s21956_s2 + $0xdb8] ss:$72 sps:$4 sm:$0xff]  }
 0x2f1   : > { %6621 = vmatpush1.bf16.msra.mxu1 %v15477_v26  ;;  %6581 = vmatprep.subr.bf16.mxu0 %v15482_v34  ;;  %v15531_v26 = vld [vmem:[%s21956_s2 + $0x16b8] ss:$72 sps:$4 sm:$0xff]   ;;  %v15536_v34 = vld [vmem:[%s21956_s2 + $0x434] ss:$72 sps:$4 sm:$0xff]  }
 0x2f2   : > { %6622 = vmatprep.subr.bf16.mxu1 %v15485_v35  ;;  %v15539_v35 = vld [vmem:[%s21956_s2 + $0xd34] ss:$72 sps:$4 sm:$0xff]  }
 0x2f4   : > { %6582 = vmatpush1.bf16.msra.mxu0 %v15480_v36  ;;  %v19280_v36 = vld [vmem:[%s21957_s3 + $0x8] sm:$0xff] }
 0x2f5   : > { %6623 = vmatpush1.bf16.msra.mxu1 %v15483_v37  ;;  %6583 = vmatprep.subr.bf16.mxu0 %v15488_v39  ;;  %v1298_v37 = vrot.slane %v19280_v36, %v18011_v21  ;;  %v15534_v39 = vld [vmem:[%s21956_s2 + $0x430] ss:$72 sps:$4 sm:$0xff]  }
 0x2f6   : > { %6624 = vmatprep.subr.bf16.mxu1 %v15491_v42  ;;  %v15537_v42 = vld [vmem:[%s21956_s2 + $0xd30] ss:$72 sps:$4 sm:$0xff]  }
 0x2f8   : > { %6584 = vmatpush2.bf16.msra.mxu0 %v15486_v44  ;;  %v15542_v44 = vld [vmem:[%s21956_s2 + $0x3a4] ss:$72 sps:$4 sm:$0xff]  }
 0x2f9   : > { %6625 = vmatpush2.bf16.msra.mxu1 %v15489_v45  ;;  %6585 = vmatprep.subr.bf16.mxu0 %v15494_v46  ;;  %v15545_v45 = vld [vmem:[%s21956_s2 + $0xca4] ss:$72 sps:$4 sm:$0xff]   ;;  %v1302_v46 = vrot.slane %v19280_v36, %v18014_v22 }
 0x2fa   : > { %6626 = vmatprep.subr.bf16.mxu1 %v15497_v5  ;;  %v6315_v5 = vadd.f32 %v19089_v49, %v1298_v37  ;;  %v15575_v37 = vld [vmem:[%s21956_s2 + $0x9d4] ss:$72 sps:$4 sm:$0xff]  }
 0x2fc   : > { %6586 = vmatpush2.bf16.msra.mxu0 %v15492_v47 }
 0x2fd   : > { %6627 = vmatpush2.bf16.msra.mxu1 %v15495_v50  ;;  %6587 = vmatprep.subr.bf16.mxu0 %v15500_v53  ;;  %v6317_v53 = vadd.f32 %v19102_v58, %v1302_v46  ;;  %v15551_v58 = vld [vmem:[%s21956_s2 + $0xc14] ss:$72 sps:$4 sm:$0xff]   ;;  %v15576_v46 = vld [vmem:[%s21956_s2 + $0x40] ss:$72 sps:$4 sm:$0xff]  }
 0x2fe   : > { %6628 = vmatprep.subr.bf16.mxu1 %v15503_v56 }
 0x300   : > { %6588 = vmatpush2.bf16.msra.mxu0 %v15498_v11  ;;  %v15540_v11 = vld [vmem:[%s21956_s2 + $0x3a0] ss:$72 sps:$4 sm:$0xff]  }
 0x301   : > { %6629 = vmatpush2.bf16.msra.mxu1 %v15501_v59  ;;  %6589 = vmatprep.subr.bf16.mxu0 %v15506_v61  ;;  %v15543_v59 = vld [vmem:[%s21956_s2 + $0xca0] ss:$72 sps:$4 sm:$0xff]  }
 0x302   : > { %6630 = vmatprep.subr.bf16.mxu1 %v15509_v33  ;;  %v15548_v33 = vld [vmem:[%s21956_s2 + $0x314] ss:$72 sps:$4 sm:$0xff]  }
 0x304   : > { %6590 = vmatpush2.bf16.msra.mxu0 %v15504_v63 }
 0x305   : > { %6631 = vmatpush2.bf16.msra.mxu1 %v15507_v10  ;;  %6591 = vmatprep.subr.bf16.mxu0 %v15512_v1 }
 0x306   : > { %6632 = vmatprep.subr.bf16.mxu1 %v15515_v2 }
 0x308   : > { %6592 = vmatpush2.bf16.msra.mxu0 %v15510_v6 }
 0x309   : > { %6633 = vmatpush2.bf16.msra.mxu1 %v15513_v4  ;;  %6593 = vmatprep.subr.bf16.mxu0 %v15518_v30  ;;  %v15546_v4 = vld [vmem:[%s21956_s2 + $0x310] ss:$72 sps:$4 sm:$0xff]  }
 0x30a   : > { %6634 = vmatprep.subr.bf16.mxu1 %v15521_v15  ;;  %v15549_v30 = vld [vmem:[%s21956_s2 + $0xc10] ss:$72 sps:$4 sm:$0xff]  }
 0x30c   : > { %6594 = vmatpush2.bf16.msra.mxu0 %v15516_v16 }
 0x30d   : > { %6635 = vmatpush2.bf16.msra.mxu1 %v15519_v43  ;;  %6595 = vmatprep.subr.bf16.mxu0 %v15524_v18  ;;  %v15552_v43 = vld [vmem:[%s21956_s2 + $0x280] ss:$72 sps:$4 sm:$0xff]  }
 0x30e   : > { %6636 = vmatprep.subr.bf16.mxu1 %v15527_v19  ;;  %v15555_v18 = vld [vmem:[%s21956_s2 + $0xb80] ss:$72 sps:$4 sm:$0xff]   ;;  %v15560_v19 = vld [vmem:[%s21956_s2 + $0x1f4] ss:$72 sps:$4 sm:$0xff]  }
 0x310   : > { %6596 = vmatpush2.bf16.msra.mxu0 %v15522_v57  ;;  %v15563_v57 = vld [vmem:[%s21956_s2 + $0xaf4] ss:$72 sps:$4 sm:$0xff]  }
 0x311   : > { %6637 = vmatpush2.bf16.msra.mxu1 %v15525_v20  ;;  %6597 = vmatprep.subr.bf16.mxu0 %v15530_v23  ;;  %v15558_v20 = vld [vmem:[%s21956_s2 + $0x1f0] ss:$72 sps:$4 sm:$0xff]  }
 0x312   : > { %6638 = vmatprep.subr.bf16.mxu1 %v15533_v28  ;;  %v15561_v23 = vld [vmem:[%s21956_s2 + $0xaf0] ss:$72 sps:$4 sm:$0xff]   ;;  %v15566_v28 = vld [vmem:[%s21956_s2 + $0x164] ss:$72 sps:$4 sm:$0xff]  }
 0x314   : > { %6598 = vmatpush2.bf16.msra.mxu0 %v15528_v25  ;;  %v15569_v25 = vld [vmem:[%s21956_s2 + $0xa64] ss:$72 sps:$4 sm:$0xff]  }
 0x315   : > { %6639 = vmatpush2.bf16.msra.mxu1 %v15531_v26  ;;  %6649 = vmatprep.subr.bf16.mxu0 %v15536_v34  ;;  %v15564_v26 = vld [vmem:[%s21956_s2 + $0x160] ss:$72 sps:$4 sm:$0xff]  }
 0x316   : > { %6690 = vmatprep.subr.bf16.mxu1 %v15539_v35  ;;  %v15567_v34 = vld [vmem:[%s21956_s2 + $0xa60] ss:$72 sps:$4 sm:$0xff]   ;;  %v15572_v35 = vld [vmem:[%s21956_s2 + $0xd4] ss:$72 sps:$4 sm:$0xff]  }
 0x317   : > { %v6355_v47 = vpop.f32.mrf.mxu0  ;;  %6600 = vmatmul.mubr.bf16.vlgmr.msra.gmra.mxu0 %v16997_v9 }
 0x318   : > { %v6396_v50 = vpop.f32.mrf.mxu1  ;;  %6641 = vmatmul.mubr.bf16.vlgmr.msra.gmra.mxu1 %v17199_v17  ;;  %v6356_v56 = vadd.f32 %v6355_v47, %v6315_v5  ;;  %6650 = vmatpush1.bf16.msra.mxu0 %v15534_v39  ;;  %v15570_v39 = vld [vmem:[%s21956_s2 + $0xd0] ss:$72 sps:$4 sm:$0xff]   ;;  %v15579_v5 = vld [vmem:[%s21956_s2 + $0x940] ss:$72 sps:$4 sm:$0xff]   ;;  %v15584_v47 = vld [vmem:[%s21956_s2 + $0x8b4] ss:$72 sps:$4 sm:$0xff]  }
 0x319   : > { %6691 = vmatpush1.bf16.msra.mxu1 %v15537_v42  ;;  %v6357_v49 = vpop.f32.mrf.mxu0  ;;  %6651 = vmatprep.subr.bf16.mxu0 %v15542_v44  ;;  %v15573_v42 = vld [vmem:[%s21956_s2 + $0x9d0] ss:$72 sps:$4 sm:$0xff]   ;;  %v15578_v44 = vld [vmem:[%s21956_s2 + $0x44] ss:$72 sps:$4 sm:$0xff]  }
 0x31a   : > { %v6398_v61 = vpop.f32.mrf.mxu1  ;;  %6692 = vmatprep.subr.bf16.mxu1 %v15545_v45  ;;  %v19314_v63 = vadd.f32 %v6396_v50, %v6356_v56  ;;  %v6358_v10 = vadd.f32 %v6357_v49, %v6317_v53  ;;  %6681 = vmatprep.mubr.bf16.mxu0 %v16929_v48  ;;  %v15554_v48 = vld [vmem:[%s21956_s2 + $0x284] ss:$72 sps:$4 sm:$0xff]   ;;  %v15587_v50 = vld [vmem:[%s21956_s2 + $0x11b4] ss:$72 sps:$4 sm:$0xff]   ;;  %v15582_v53 = vld [vmem:[%s21956_s2 + $0x8b0] ss:$72 sps:$4 sm:$0xff]  }
 0x31b   : > { %6722 = vmatprep.mubr.bf16.mxu1 %v16935_v51  ;;  %v6359_v2 = vpop.f32.mrf.mxu0  ;;  %v15557_v51 = vld [vmem:[%s21956_s2 + $0xb84] ss:$72 sps:$4 sm:$0xff]   ;;  %v15585_v56 = vld [vmem:[%s21956_s2 + $0x11b0] ss:$72 sps:$4 sm:$0xff]   ;;  %v15588_v49 = vld [vmem:[%s21956_s2 + $0x820] ss:$72 sps:$4 sm:$0xff]  }
 0x31c   : > { %v6400_v1 = vpop.f32.mrf.mxu1  ;;  %v19318_v6 = vadd.f32 %v6398_v61, %v6358_v10  ;;  %6652 = vmatpush1.bf16.msra.mxu0 %v15540_v11  ;;  %v15581_v45 = vld [vmem:[%s21956_s2 + $0x944] ss:$72 sps:$4 sm:$0xff]   ;;  %v15591_v61 = vld [vmem:[%s21956_s2 + $0x1120] ss:$72 sps:$4 sm:$0xff]   ;;  %v15594_v10 = vld [vmem:[%s21956_s2 + $0x790] ss:$72 sps:$4 sm:$0xff]  }
 0x31d   : > { %6693 = vmatpush1.bf16.msra.mxu1 %v15543_v59  ;;  %6653 = vmatprep.subr.bf16.mxu0 %v15548_v33  ;;  %v6360_v16 = vpop.f32.mrf.mxu0  ;;  %v15590_v11 = vld [vmem:[%s21956_s2 + $0x824] ss:$72 sps:$4 sm:$0xff]   ;;  %v15596_v33 = vld [vmem:[%s21956_s2 + $0x794] ss:$72 sps:$4 sm:$0xff]   ;;  %v15597_v1 = vld [vmem:[%s21956_s2 + $0x1090] ss:$72 sps:$4 sm:$0xff]  }
 0x31e   : > { %v6401_v15 = vpop.f32.mrf.mxu1  ;;  %6694 = vmatprep.subr.bf16.mxu1 %v15551_v58  ;;  %v15593_v59 = vld [vmem:[%s21956_s2 + $0x1124] ss:$72 sps:$4 sm:$0xff]   ;;  %v15599_v58 = vld [vmem:[%s21956_s2 + $0x1094] ss:$72 sps:$4 sm:$0xff]   ;;  %v15606_v16 = vld [vmem:[%s21956_s2 + $0x670] ss:$72 sps:$4 sm:$0xff]  }
 0x31f   : > { %v15602_v2 = vld [vmem:[%s21956_s2 + $0x704] ss:$72 sps:$4 sm:$0xff]   ;;  %v15603_v15 = vld [vmem:[%s21956_s2 + $0x1000] ss:$72 sps:$4 sm:$0xff]  }
 0x320   : > { %6654 = vmatpush1.bf16.msra.mxu0 %v15546_v4  ;;  %v15605_v4 = vld [vmem:[%s21956_s2 + $0x1004] ss:$72 sps:$4 sm:$0xff]  }
 0x321   : > { %6695 = vmatpush1.bf16.msra.mxu1 %v15549_v30  ;;  %6655 = vmatprep.subr.bf16.mxu0 %v15554_v48  ;;  %v15600_v30 = vld [vmem:[%s21956_s2 + $0x700] ss:$72 sps:$4 sm:$0xff]   ;;  %v15608_v48 = vld [vmem:[%s21956_s2 + $0x674] ss:$72 sps:$4 sm:$0xff]  }
 0x322   : > { %6696 = vmatprep.subr.bf16.mxu1 %v15557_v51  ;;  %v15611_v51 = vld [vmem:[%s21956_s2 + $0xf74] ss:$72 sps:$4 sm:$0xff]  }
 0x324   : > { %6656 = vmatpush1.bf16.msra.mxu0 %v15552_v43  ;;  %v15609_v43 = vld [vmem:[%s21956_s2 + $0xf70] ss:$72 sps:$4 sm:$0xff]  }
 0x325   : > { %6697 = vmatpush1.bf16.msra.mxu1 %v15555_v18  ;;  %6657 = vmatprep.subr.bf16.mxu0 %v15560_v19  ;;  %v15614_v18 = vld [vmem:[%s21956_s2 + $0x5e4] ss:$72 sps:$4 sm:$0xff]  }
 0x326   : > { %6698 = vmatprep.subr.bf16.mxu1 %v15563_v57  ;;  %v15617_v19 = vld [vmem:[%s21956_s2 + $0xee4] ss:$72 sps:$4 sm:$0xff]   ;;  %v15612_v57 = vld [vmem:[%s21956_s2 + $0x5e0] ss:$72 sps:$4 sm:$0xff]  }
 0x328   : > { %6658 = vmatpush1.bf16.msra.mxu0 %v15558_v20  ;;  %v15615_v20 = vld [vmem:[%s21956_s2 + $0xee0] ss:$72 sps:$4 sm:$0xff]  }
 0x329   : > { %6699 = vmatpush1.bf16.msra.mxu1 %v15561_v23  ;;  %6659 = vmatprep.subr.bf16.mxu0 %v15566_v28  ;;  %v15620_v23 = vld [vmem:[%s21956_s2 + $0x554] ss:$72 sps:$4 sm:$0xff]  }
 0x32a   : > { %6700 = vmatprep.subr.bf16.mxu1 %v15569_v25  ;;  %v15623_v28 = vld [vmem:[%s21956_s2 + $0xe54] ss:$72 sps:$4 sm:$0xff]   ;;  %v15618_v25 = vld [vmem:[%s21956_s2 + $0x550] ss:$72 sps:$4 sm:$0xff]  }
 0x32c   : > { %6660 = vmatpush1.bf16.msra.mxu0 %v15564_v26  ;;  %v15621_v26 = vld [vmem:[%s21956_s2 + $0xe50] ss:$72 sps:$4 sm:$0xff]  }
 0x32d   : > { %6701 = vmatpush1.bf16.msra.mxu1 %v15567_v34  ;;  %6661 = vmatprep.subr.bf16.mxu0 %v15572_v35  ;;  %v15626_v34 = vld [vmem:[%s21956_s2 + $0x4c4] ss:$72 sps:$4 sm:$0xff]  }
 0x32e   : > { %6702 = vmatprep.subr.bf16.mxu1 %v15575_v37  ;;  %v15629_v35 = vld [vmem:[%s21956_s2 + $0xdc4] ss:$72 sps:$4 sm:$0xff]   ;;  %v15624_v37 = vld [vmem:[%s21956_s2 + $0x4c0] ss:$72 sps:$4 sm:$0xff]  }
 0x330   : > { %6662 = vmatpush1.bf16.msra.mxu0 %v15570_v39  ;;  %v15627_v39 = vld [vmem:[%s21956_s2 + $0xdc0] ss:$72 sps:$4 sm:$0xff]  }
 0x331   : > { %6703 = vmatpush1.bf16.msra.mxu1 %v15573_v42  ;;  %6663 = vmatprep.subr.bf16.mxu0 %v15578_v44  ;;  %v15632_v42 = vld [vmem:[%s21956_s2 + $0x1634] ss:$72 sps:$4 sm:$0xff]   ;;  %v19487_v44 = vpack.c.bf16 %v18692_v62, %v18692_v62 }
 0x332   : > { %6704 = vmatprep.subr.bf16.mxu1 %v15581_v45  ;;  %v15630_v45 = vld [vmem:[%s21956_s2 + $0x1630] ss:$72 sps:$4 sm:$0xff]  }
 0x333   : > { %v6804_v62 = vsel %vm6799_vm0, %v19487_v44, 0 }
 0x334   : > { %6664 = vmatpush1.bf16.msra.mxu0 %v15576_v46  ;;  %v16670_v46 = vmov 0.0  }
 0x335   : > { %6705 = vmatpush1.bf16.msra.mxu1 %v15579_v5  ;;  %6665 = vmatprep.subr.bf16.mxu0 %v15584_v47  ;;  %v15635_v5 = vld [vmem:[%s21956_s2 + $0x15a4] ss:$72 sps:$4 sm:$0xff]   ;;  %v1310_v47 = vrot.slane %v19280_v36, %v18249_v41 }
 0x336   : > { %6706 = vmatprep.subr.bf16.mxu1 %v15587_v50 }
 0x338   : > { %6666 = vmatpush2.bf16.msra.mxu0 %v15582_v53 }
 0x339   : > { %6707 = vmatpush2.bf16.msra.mxu1 %v15585_v56  ;;  %6667 = vmatprep.subr.bf16.mxu0 %v15590_v11  ;;  %v15633_v56 = vld [vmem:[%s21956_s2 + $0x15a0] ss:$72 sps:$4 sm:$0xff]  }
 0x33a   : > { %6708 = vmatprep.subr.bf16.mxu1 %v15593_v59 }
 0x33c   : > { %6668 = vmatpush2.bf16.msra.mxu0 %v15588_v49  ;;  %v15638_v49 = vld [vmem:[%s21956_s2 + $0x1514] ss:$72 sps:$4 sm:$0xff]  }
 0x33d   : > { %6709 = vmatpush2.bf16.msra.mxu1 %v15591_v61  ;;  %6669 = vmatprep.subr.bf16.mxu0 %v15596_v33 }
 0x33e   : > { %6710 = vmatprep.subr.bf16.mxu1 %v15599_v58  ;;  %v15636_v58 = vld [vmem:[%s21956_s2 + $0x1510] ss:$72 sps:$4 sm:$0xff]  }
 0x340   : > { %6670 = vmatpush2.bf16.msra.mxu0 %v15594_v10 }
 0x341   : > { %6711 = vmatpush2.bf16.msra.mxu1 %v15597_v1  ;;  %6671 = vmatprep.subr.bf16.mxu0 %v15602_v2  ;;  %v15641_v1 = vld [vmem:[%s21956_s2 + $0x1484] ss:$72 sps:$4 sm:$0xff]  }
 0x342   : > { %6712 = vmatprep.subr.bf16.mxu1 %v15605_v4  ;;  %v15644_v4 = vld [vmem:[%s21956_s2 + $0x13f4] ss:$72 sps:$4 sm:$0xff]  }
 0x344   : > { %6672 = vmatpush2.bf16.msra.mxu0 %v15600_v30  ;;  %v15642_v30 = vld [vmem:[%s21956_s2 + $0x13f0] ss:$72 sps:$4 sm:$0xff]  }
 0x345   : > { %6713 = vmatpush2.bf16.msra.mxu1 %v15603_v15  ;;  %6673 = vmatprep.subr.bf16.mxu0 %v15608_v48  ;;  %v15645_v15 = vld [vmem:[%s21956_s2 + $0x1360] ss:$72 sps:$4 sm:$0xff]   ;;  %v15650_v48 = vld [vmem:[%s21956_s2 + $0x12d4] ss:$72 sps:$4 sm:$0xff]  }
 0x346   : > { %6714 = vmatprep.subr.bf16.mxu1 %v15611_v51  ;;  %v15648_v51 = vld [vmem:[%s21956_s2 + $0x12d0] ss:$72 sps:$4 sm:$0xff]  }
 0x348   : > { %6674 = vmatpush2.bf16.msra.mxu0 %v15606_v16  ;;  %v15653_v16 = vld [vmem:[%s21956_s2 + $0x1244] ss:$72 sps:$4 sm:$0xff]  }
 0x349   : > { %6715 = vmatpush2.bf16.msra.mxu1 %v15609_v43  ;;  %6675 = vmatprep.subr.bf16.mxu0 %v15614_v18  ;;  %v15651_v43 = vld [vmem:[%s21956_s2 + $0x1240] ss:$72 sps:$4 sm:$0xff]   ;;  %v15656_v18 = vld [vmem:[%s21956_s2 + $0x1ab4] ss:$72 sps:$4 sm:$0xff]  }
 0x34a   : > { %6716 = vmatprep.subr.bf16.mxu1 %v15617_v19  ;;  %v15654_v19 = vld [vmem:[%s21956_s2 + $0x1ab0] ss:$72 sps:$4 sm:$0xff]  }
 0x34c   : > { %6676 = vmatpush2.bf16.msra.mxu0 %v15612_v57  ;;  %v15659_v57 = vld [vmem:[%s21956_s2 + $0x1a24] ss:$72 sps:$4 sm:$0xff]  }
 0x34d   : > { %6717 = vmatpush2.bf16.msra.mxu1 %v15615_v20  ;;  %6677 = vmatprep.subr.bf16.mxu0 %v15620_v23  ;;  %v15657_v20 = vld [vmem:[%s21956_s2 + $0x1a20] ss:$72 sps:$4 sm:$0xff]   ;;  %v15662_v23 = vld [vmem:[%s21956_s2 + $0x1994] ss:$72 sps:$4 sm:$0xff]  }
 0x34e   : > { %6718 = vmatprep.subr.bf16.mxu1 %v15623_v28  ;;  %v15660_v28 = vld [vmem:[%s21956_s2 + $0x1990] ss:$72 sps:$4 sm:$0xff]  }
 0x350   : > { %6678 = vmatpush2.bf16.msra.mxu0 %v15618_v25  ;;  %v15665_v25 = vld [vmem:[%s21956_s2 + $0x1904] ss:$72 sps:$4 sm:$0xff]  }
 0x351   : > { %6719 = vmatpush2.bf16.msra.mxu1 %v15621_v26  ;;  %6679 = vmatprep.subr.bf16.mxu0 %v15626_v34  ;;  %v15663_v26 = vld [vmem:[%s21956_s2 + $0x1900] ss:$72 sps:$4 sm:$0xff]   ;;  %v15668_v34 = vld [vmem:[%s21956_s2 + $0x1874] ss:$72 sps:$4 sm:$0xff]  }
 0x352   : > { %6720 = vmatprep.subr.bf16.mxu1 %v15629_v35  ;;  %v15666_v35 = vld [vmem:[%s21956_s2 + $0x1870] ss:$72 sps:$4 sm:$0xff]  }
 0x354   : > { %6680 = vmatpush2.bf16.msra.mxu0 %v15624_v37  ;;  %v15671_v37 = vld [vmem:[%s21956_s2 + $0x17e4] ss:$72 sps:$4 sm:$0xff]  }
 0x355   : > { %6721 = vmatpush2.bf16.msra.mxu1 %v15627_v39  ;;  %6731 = vmatprep.subr.bf16.mxu0 %v15632_v42  ;;  %v15669_v39 = vld [vmem:[%s21956_s2 + $0x17e0] ss:$72 sps:$4 sm:$0xff]   ;;  %v15674_v42 = vld [vmem:[%s21956_s2 + $0x1754] ss:$72 sps:$4 sm:$0xff]  }
 0x356   : > { %14177 = vmatprep.subr.bf16.mxu1 %v16670_v46 }
 0x357   : > { %v19500_v50 = vpop.f32.mrf.mxu0  ;;  %6682 = vmatmul.mubr.bf16.vlgmr.msra.gmra.mxu0 %v16995_v8 }
 0x358   : > { %v19502_v53 = vpop.f32.mrf.mxu1  ;;  %6723 = vmatmul.mubr.bf16.vlgmr.msra.gmra.mxu1 %v16997_v9  ;;  %6732 = vmatpush1.bf16.msra.mxu0 %v15630_v45  ;;  %v15672_v45 = vld [vmem:[%s21956_s2 + $0x1750] ss:$72 sps:$4 sm:$0xff]  }
 0x359   : > { %14178 = vmatpush3.bf16.xpose.msra.mxu1 %v6804_v62  ;;  %v6439_v11 = vpop.f32.mrf.mxu0  ;;  %6733 = vmatprep.subr.bf16.mxu0 %v15635_v5  ;;  %v15677_v5 = vld [vmem:[%s21956_s2 + $0x16c4] ss:$72 sps:$4 sm:$0xff]   ;;  %v15675_v62 = vld [vmem:[%s21956_s2 + $0x16c0] ss:$72 sps:$4 sm:$0xff]  }
 0x35a   : > { %v6480_v59 = vpop.f32.mrf.mxu1  ;;  %14179 = vmatprep.mubr.msk.bf16.mxu1 %vm16671_vm1, %v16670_v46  ;;  %v6440_v8 = vadd.f32 %v6439_v11, %v1310_v47  ;;  %6763 = vmatprep.mubr.bf16.mxu0 %v17084_v38  ;;  %v15639_v38 = vld [vmem:[%s21956_s2 + $0x1480] ss:$72 sps:$4 sm:$0xff]   ;;  %v1306_v47 = vrot.slane %v19280_v36, %v18234_v40  ;;  %v19608_v11 = vpack.c.bf16 %v19100_v55, %v19100_v55 }
 0x35b   : > { %14183 = vmatprep.subr.bf16.mxu1 %v16670_v46  ;;  %v6441_v61 = vpop.f32.mrf.mxu0 }
 0x35c   : > { %v6482_v9 = vpop.f32.mrf.mxu1  ;;  %v19516_v33 = vadd.f32 %v6480_v59, %v6440_v8  ;;  %6734 = vmatpush1.bf16.msra.mxu0 %v15633_v56  ;;  %v6438_v56 = vadd.f32 %v19500_v50, %v1306_v47 }
 0x35d   : > { %6735 = vmatprep.subr.bf16.mxu0 %v15638_v49  ;;  %v6442_v2 = vpop.f32.mrf.mxu0  ;;  %v7254_v49 = vsel %vm6799_vm0, %v19608_v11, 0 }
 0x35e   : > { %v6483_v10 = vpop.f32.mrf.mxu1  ;;  %v6479_v59 = vadd.f32 %v19502_v53, %v6438_v56 }
 0x360   : > { %14180 = vmatmul.mubr.msk.bf16.vlgmr.msra.gmra.mxu1 %vm6799_vm0, %v17842_v12  ;;  %6736 = vmatpush1.bf16.msra.mxu0 %v15636_v58  ;;  %v15647_v12 = vld [vmem:[%s21956_s2 + $0x1364] ss:$72 sps:$4 sm:$0xff]  }
 0x361   : > { %14185 = vmatprep.mubr.msk.bf16.mxu1 %vm16671_vm1, %v16670_v46  ;;  %6737 = vmatprep.subr.bf16.mxu0 %v15641_v1 }
 0x364   : > { %6738 = vmatpush1.bf16.msra.mxu0 %v15639_v38 }
 0x365   : > { %6739 = vmatprep.subr.bf16.mxu0 %v15644_v4 }
 0x368   : > { %6740 = vmatpush1.bf16.msra.mxu0 %v15642_v30 }
 0x369   : > { %6741 = vmatprep.subr.bf16.mxu0 %v15647_v12 }
 0x36c   : > { %6742 = vmatpush1.bf16.msra.mxu0 %v15645_v15 }
 0x36d   : > { %6743 = vmatprep.subr.bf16.mxu0 %v15650_v48 }
 0x370   : > { %6744 = vmatpush1.bf16.msra.mxu0 %v15648_v51 }
 0x371   : > { %6745 = vmatprep.subr.bf16.mxu0 %v15653_v16 }
 0x374   : > { %6746 = vmatpush1.bf16.msra.mxu0 %v15651_v43 }
 0x375   : > { %6747 = vmatprep.subr.bf16.mxu0 %v15656_v18 }
 0x378   : > { %6748 = vmatpush2.bf16.msra.mxu0 %v15654_v19 }
 0x379   : > { %6749 = vmatprep.subr.bf16.mxu0 %v15659_v57 }
 0x37c   : > { %6750 = vmatpush2.bf16.msra.mxu0 %v15657_v20 }
 0x37d   : > { %6751 = vmatprep.subr.bf16.mxu0 %v15662_v23 }
 0x380   : > { %6752 = vmatpush2.bf16.msra.mxu0 %v15660_v28 }
 0x381   : > { %6753 = vmatprep.subr.bf16.mxu0 %v15665_v25  ;;  %v1322_v25 = vrot.slane %v1251_v29, %v17785_v52 }
 0x384   : > { %6754 = vmatpush2.bf16.msra.mxu0 %v15663_v26  ;;  %v1326_v26 = vrot.slane %v1251_v29, %v17597_v32  ;;  %v6908_v29 = vpop.permute.xlu1 %6907 }
 0x385   : > { %6755 = vmatprep.subr.bf16.mxu0 %v15668_v34 }
 0x388   : > { %6756 = vmatpush2.bf16.msra.mxu0 %v15666_v35 }
 0x389   : > { %6757 = vmatprep.subr.bf16.mxu0 %v15671_v37 }
 0x38c   : > { %6758 = vmatpush2.bf16.msra.mxu0 %v15669_v39  ;;  %v16672_v39 = vmov -1e+30  }
 0x38d   : > { %6759 = vmatprep.subr.bf16.mxu0 %v15674_v42 }
 0x390   : > { %6760 = vmatpush2.bf16.msra.mxu0 %v15672_v45 }
 0x391   : > { %6761 = vmatprep.subr.bf16.mxu0 %v15677_v5 }
 0x394   : > { %6762 = vmatpush2.bf16.msra.mxu0 %v15675_v62 }
 0x395   : > { %14225 = vmatprep.subr.bf16.mxu0 %v16670_v46 }
 0x397   : > { %v6519_v8 = vpop.f32.mrf.mxu0  ;;  %6764 = vmatmul.mubr.bf16.vlgmr.msra.gmra.mxu0 %v17199_v17  ;;  %v19624_v17 = vpack.c.bf16 %v18065_v54, %v18065_v54  ;;  %v1318_v54 = vrot.slane %v19280_v36, %v1285_v31  ;;  %v6791_v31 = vand.u32 127, %v1255_v24 }
 0x398   : > { %v6560_v9 = vpop.f32.mrf.mxu1  ;;  %v6520_v61 = vadd.f32 %v6519_v8, %v6479_v59  ;;  %14226 = vmatpush3.bf16.xpose.msra.mxu0 %v7254_v49  ;;  %14227 = vmatprep.mubr.msk.bf16.mxu0 %vm16671_vm1, %v16670_v46 }
 0x399   : > { %v6521_v55 = vpop.f32.mrf.mxu0  ;;  %14237 = vmatprep.subr.bf16.mxu0 %v16670_v46 }
 0x39a   : > { %v6562_v50 = vpop.f32.mrf.mxu1  ;;  %v6784_v58 = vpack.c.bf16 %v6520_v61, %v6520_v61  ;;  %v19619_v53 = vadd.f32 %v6521_v55, %v19516_v33  ;;  %v1314_v33 = vrot.slane %v19280_v36, %v1281_v27  ;;  %v6792_v36 = vld [vmem:[%s371_s22] sm:$0x1]  ;;  %s12583_s22 = sshll.u32 %s363_s20, 4  ;;  %s21913_s22 = int_to_ptr.vmem [resolvable:$true] %s12583_s22 }
 0x39b   : > { %v6523_v1 = vpop.f32.mrf.mxu0  ;;  %v6563_v48 = vadd.f32 %v6562_v50, %v1318_v54  ;;  %vm6793_vm3 = vcmp.lt.s32.totalorder %v6791_v31, %v6792_v36  ;;  %p16614_p0 = scmp.lt.s32.totalorder %s21913_s22, %s16612_s28 }
 0x39c   : > { %v6564_v10 = vpop.f32.mrf.mxu1  ;;  %v6862_v2 = vsel %vm6860_vm2, %v6784_v58, 0  ;;  %v6561_v30 = vadd.f32 %v6560_v9, %v1314_v33  ;;  %v6794_v42 = vsel %vm6793_vm3, 0.0, %v16672_v39 }
 0x39d   : > { %14184 = vmatpush3.bf16.msra.mxu1 %v6862_v2  ;;  %v6524_v4 = vpop.f32.mrf.mxu0  ;;  %v19652_v49 = vrot.slane %v6794_v42, %v17785_v52 }
 0x39e   : > { %v6565_v38 = vpop.f32.mrf.mxu1  ;;  %14189 = vmatprep.subr.bf16.mxu1 %v16670_v46 }
 0x39f   : > { %14228 = vmatmul.mubr.msk.bf16.vlgmr.msra.gmra.mxu0 %vm6799_vm0, %v19624_v17 }
 0x3a0   : > { %14239 = vmatprep.mubr.msk.bf16.mxu0 %vm16671_vm1, %v16670_v46 }
 0x3d7   : > { %v6601_v12 = vpop.f32.mrf.mxu0 }
 0x3d8   : > { %v6642_v15 = vpop.f32.mrf.mxu1  ;;  %v6602_v51 = vadd.f32 %v6601_v12, %v6561_v30 }
 0x3d9   : > { %v6603_v16 = vpop.f32.mrf.mxu0 }
 0x3da   : > { %v6644_v43 = vpop.f32.mrf.mxu1  ;;  %v19637_v18 = vadd.f32 %v6642_v15, %v6602_v51  ;;  %v6604_v19 = vadd.f32 %v6603_v16, %v6563_v48 }
 0x3db   : > { %v6605_v20 = vpop.f32.mrf.mxu0 }
 0x3dc   : > { %v6646_v57 = vpop.f32.mrf.mxu1  ;;  %v19639_v23 = vadd.f32 %v6644_v43, %v6604_v19 }
 0x3dd   : > { %v6606_v28 = vpop.f32.mrf.mxu0 }
 0x3de   : > { %v6647_v27 = vpop.f32.mrf.mxu1 }
 0x417   : > { %v6683_v34 = vpop.f32.mrf.mxu0 }
 0x418   : > { %v6724_v35 = vpop.f32.mrf.mxu1  ;;  %v6684_v37 = vadd.f32 %v6683_v34, %v1322_v25 }
 0x419   : > { %v6685_v45 = vpop.f32.mrf.mxu0 }
 0x41a   : > { %v6726_v5 = vpop.f32.mrf.mxu1  ;;  %v6725_v47 = vadd.f32 %v6724_v35, %v6684_v37  ;;  %v6686_v62 = vadd.f32 %v6685_v45, %v1326_v26 }
 0x41b   : > { %v6687_v59 = vpop.f32.mrf.mxu0 }
 0x41c   : > { %v6728_v56 = vpop.f32.mrf.mxu1  ;;  %v6727_v24 = vadd.f32 %v6726_v5, %v6686_v62  ;;  %v6773_v62 = vpack.c.bf16 %v17845_v13, %v17845_v13  ;;  %v19696_v59 = vpack.c.bf16 %v18075_v60, %v18075_v60  ;;  %v19702_v13 = vpack.c.bf16 %v19314_v63, %v19314_v63 }
 0x41d   : > { %v6688_v9 = vpop.f32.mrf.mxu0  ;;  %v6781_v56 = vpack.c.bf16 %v19105_v0, %v19105_v0  ;;  %v19714_v60 = vpack.c.bf16 %v19318_v6, %v19318_v6  ;;  %v19729_v6 = vpack.c.bf16 %v19619_v53, %v19619_v53 }
 0x41e   : > { %v6729_v8 = vpop.f32.mrf.mxu1 }
 0x41f   : > { %v7086_v9 = vsel %vm6860_vm2, %v19729_v6, 0 }
 0x420   : > { %v6840_v61 = vpop.f32.mrf.mxu1 }
 0x421   : > { %v6841_v55 = vadd.f32 %v6840_v61, %v19652_v49 }
 0x422   : > { %v14181_v50 = vpop.f32.mrf.mxu1 }
 0x423   : > { %v6847_v10 = vsel %vm6846_vm4, %v6841_v55, -inf }
 0x424   : > { %6848 = vmax.xlane.f32.xlu0 %v6847_v10  ;;  %v6843_v1 = vpop.f32.mrf.mxu1 }
 0x426   : > { %v14182_v2 = vpop.f32.mrf.mxu1 }
 0x43a   : > { %6910 = vrot.lane.b32.xlu0 %v19487_v44, %s21974_s11 }
 0x43e   : > { %6969 = vrot.lane.b32.xlu0 %v6784_v58, %s21974_s11 }
 0x457   : > { %v6765_v38 = vpop.f32.mrf.mxu0 }
 0x458   : > { %v19659_v4 = vadd.f32 %v6765_v38, %v6725_v47  ;;  %v6779_v47 = vpack.c.bf16 %v18708_v14, %v18708_v14  ;;  %v19708_v14 = vpack.c.bf16 %v18478_v3, %v18478_v3 }
 0x459   : > { %v6767_v33 = vpop.f32.mrf.mxu0 }
 0x45a   : > { %v19661_v54 = vadd.f32 %v6767_v33, %v6727_v24  ;;  %v7030_v8 = vsel %vm6799_vm0, %v6779_v47, 0 }
 0x45b   : > { %v6769_v30 = vpop.f32.mrf.mxu0 }
 0x45d   : > { %v6770_v12 = vpop.f32.mrf.mxu0 }
 0x45e   : > { %v6777_v12 = vpack.c.bf16 %v18483_v7, %v18483_v7 }
 0x45f   : > { %v19663_v15 = vpop.f32.mrf.mxu0 }
 0x461   : > { %v14229_v48 = vpop.f32.mrf.mxu0 }
 0x462   : > { %v19748_v48 = vadd.f32 %v19663_v15, %v19652_v49  ;;  %v7478_v15 = vsel %vm6799_vm0, %v6781_v56, 0 }
 0x463   : > { %v7293_v51 = vpop.f32.mrf.mxu0 }
 0x464   : > { %v7296_v51 = vsel %vm6846_vm4, %v19748_v48, -inf }
 0x465   : > { %v14230_v16 = vpop.f32.mrf.mxu0 }
 0x4ad   : > { %v6849_v43 = vpop.xlane.xlu0 %6848 }
 0x4ae   : > { %v6850_v19 = vsub.f32 %v6841_v55, %v6849_v43 }
 0x4b0   : > { %v6851_v57 = vmul.f32 1.442695, %v6850_v19 }
 0x4b1   : > { %v6911_v58 = vpop.permute.xlu0 %6910 }
 0x4b2   : > { %16548 = vpow2.f32 %v6851_v57  ;;  %v6916_v27 = vsel %vm6799_vm0, %v6911_v58, 0 }
 0x4b5   : > { %v6970_v28 = vpop.permute.xlu0 %6969 }
 0x4b6   : > { %v6975_v31 = vsel %vm6860_vm2, %v6970_v28, 0 }
 0x4bf   : > { %v19665_v44 = vpop.eup %16548 }
 0x4c0   : > { %v6856_v20 = vpack.c.bf16 %v19665_v44, %v19665_v44 }
 0x4c2   : > { %14186 = vmatmul.mubr.msk.bf16.vlgmr.msra.gmra.mxu1 %vm6846_vm4, %v6856_v20 }
 0x4c3   : > { %14190 = vmatpush3.bf16.xpose.msra.mxu1 %v6916_v27  ;;  %14191 = vmatprep.mubr.msk.bf16.mxu1 %vm16671_vm1, %v16670_v46 }
 0x4c4   : > { %14195 = vmatprep.subr.bf16.mxu1 %v16670_v46 }
 0x4ca   : > { %14192 = vmatmul.mubr.msk.bf16.vlgmr.msra.gmra.mxu1 %vm6799_vm0, %v6908_v29 }
 0x4cb   : > { %14196 = vmatpush3.bf16.msra.mxu1 %v6975_v31  ;;  %14197 = vmatprep.mubr.msk.bf16.mxu1 %vm16671_vm1, %v16670_v46 }
 0x4cc   : > { %14201 = vmatprep.subr.bf16.mxu1 %v16670_v46 }
 0x582   : > { %v19679_v36 = vpop.f32.mrf.mxu1 }
 0x584   : > { %v14187_v25 = vpop.f32.mrf.mxu1 }
 0x586   : > { %v6901_v26 = vpop.f32.mrf.mxu1 }
 0x588   : > { %v14188_v34 = vpop.f32.mrf.mxu1 }
 0x589   : > { %v7702_v34 = vsel %vm6799_vm0, %v19702_v13, 0 }
 0x58a   : > { %v6952_v35 = vpop.f32.mrf.mxu1 }
 0x58b   : > { %v6953_v37 = vadd.f32 %v6952_v35, %v19652_v49 }
 0x58c   : > { %v14193_v39 = vpop.f32.mrf.mxu1 }
 0x58d   : > { %v6958_v42 = vsel %vm6846_vm4, %v6953_v37, -inf }
 0x58e   : > { %6959 = vmax.xlane.f32.xlu1 %v6958_v42  ;;  %v6955_v45 = vpop.f32.mrf.mxu1  ;;  %v7926_v42 = vsel %vm6799_vm0, %v19714_v60, 0 }
 0x590   : > { %v14194_v5 = vpop.f32.mrf.mxu1 }
 0x59f   : > { %7134 = vrot.lane.b32.xlu1 %v6779_v47, %s21974_s11 }
 0x5a3   : > { %7131 = vrot.lane.b32.xlu1 %v6773_v62, %s21974_s11 }
 0x5a7   : > { %7355 = vrot.lane.b32.xlu1 %v19624_v17, %s21974_s11 }
 0x5ab   : > { %7582 = vrot.lane.b32.xlu1 %v6781_v56, %s21974_s11 }
 0x5af   : > { %7579 = vrot.lane.b32.xlu1 %v19696_v59, %s21974_s11 }
 0x5b3   : > { %7806 = vrot.lane.b32.xlu1 %v19702_v13, %s21974_s11 }
 0x5b7   : > { %7803 = vrot.lane.b32.xlu1 %v19708_v14, %s21974_s11 }
 0x5bb   : > { %8030 = vrot.lane.b32.xlu1 %v19714_v60, %s21974_s11 }
 0x617   : > { %v6960_v0 = vpop.xlane.xlu1 %6959 }
 0x618   : > { %v6961_v63 = vsub.f32 %v6953_v37, %v6960_v0 }
 0x61a   : > { %v6962_v17 = vmul.f32 1.442695, %v6961_v63 }
 0x61b   : > { %v7135_v16 = vpop.permute.xlu1 %7134 }
 0x61c   : > { %16550 = vpow2.f32 %v6962_v17  ;;  %v7140_v31 = vsel %vm6799_vm0, %v7135_v16, 0 }
 0x61f   : > { %v7132_v20 = vpop.permute.xlu1 %7131 }
 0x623   : > { %v7356_v7 = vpop.permute.xlu1 %7355 }
 0x627   : > { %v7583_v28 = vpop.permute.xlu1 %7582 }
 0x628   : > { %v7588_v25 = vsel %vm6799_vm0, %v7583_v28, 0 }
 0x629   : > { %v19718_v24 = vpop.eup %16550 }
 0x62a   : > { %v6967_v3 = vpack.c.bf16 %v19718_v24, %v19718_v24 }
 0x62b   : > { %v7580_v26 = vpop.permute.xlu1 %7579 }
 0x62c   : > { %14198 = vmatmul.mubr.msk.bf16.vlgmr.msra.gmra.mxu1 %vm6846_vm4, %v6967_v3 }
 0x62d   : > { %14202 = vmatpush3.bf16.xpose.msra.mxu1 %v7030_v8  ;;  %14203 = vmatprep.mubr.msk.bf16.mxu1 %vm16671_vm1, %v16670_v46 }
 0x62e   : > { %14207 = vmatprep.subr.bf16.mxu1 %v16670_v46 }
 0x62f   : > { %v7807_v35 = vpop.permute.xlu1 %7806 }
 0x630   : > { %v7812_v37 = vsel %vm6799_vm0, %v7807_v35, 0 }
 0x633   : > { %v7804_v39 = vpop.permute.xlu1 %7803 }
 0x634   : > { %14204 = vmatmul.mubr.msk.bf16.vlgmr.msra.gmra.mxu1 %vm6799_vm0, %v6773_v62 }
 0x635   : > { %14208 = vmatpush3.bf16.msra.mxu1 %v7086_v9  ;;  %14209 = vmatprep.mubr.msk.bf16.mxu1 %vm16671_vm1, %v16670_v46 }
 0x636   : > { %14213 = vmatprep.subr.bf16.mxu1 %v16670_v46 }
 0x637   : > { %v8031_v45 = vpop.permute.xlu1 %8030 }
 0x638   : > { %v8036_v5 = vsel %vm6799_vm0, %v8031_v45, 0 }
 0x6ec   : > { %v19737_v61 = vpop.f32.mrf.mxu1 }
 0x6ee   : > { %v14199_v55 = vpop.f32.mrf.mxu1 }
 0x6f0   : > { %v7014_v50 = vpop.f32.mrf.mxu1 }
 0x6f2   : > { %v14200_v10 = vpop.f32.mrf.mxu1 }
 0x6f4   : > { %v7066_v1 = vpop.f32.mrf.mxu1 }
 0x6f5   : > { %v7067_v53 = vadd.f32 %v7066_v1, %v19652_v49 }
 0x6f6   : > { %v14205_v2 = vpop.f32.mrf.mxu1 }
 0x6f7   : > { %v7072_v38 = vsel %vm6846_vm4, %v7067_v53, -inf }
 0x6f8   : > { %7073 = vmax.xlane.f32.xlu0 %v7072_v38  ;;  %v7069_v33 = vpop.f32.mrf.mxu1 }
 0x6fa   : > { %v14206_v30 = vpop.f32.mrf.mxu1 }
 0x70e   : > { %7358 = vrot.lane.b32.xlu0 %v19608_v11, %s21974_s11 }
 0x712   : > { %8027 = vrot.lane.b32.xlu0 %v6777_v12, %s21974_s11 }
 0x731   : > { %7297 = vmax.xlane.f32.xlu0 %v7296_v51 }
 0x781   : > { %v7074_v43 = vpop.xlane.xlu0 %7073 }
 0x782   : > { %v7075_v19 = vsub.f32 %v7067_v53, %v7074_v43 }
 0x784   : > { %v7076_v57 = vmul.f32 1.442695, %v7075_v19 }
 0x785   : > { %v7359_v58 = vpop.permute.xlu0 %7358 }
 0x786   : > { %16552 = vpow2.f32 %v7076_v57  ;;  %v7364_v11 = vsel %vm6799_vm0, %v7359_v58, 0 }
 0x787   : > { %14238 = vmatpush3.bf16.xpose.msra.mxu0 %v7364_v11 }
 0x788   : > { %14249 = vmatprep.subr.bf16.mxu0 %v16670_v46 }
 0x789   : > { %v8028_v47 = vpop.permute.xlu0 %8027 }
 0x78e   : > { %14240 = vmatmul.mubr.msk.bf16.vlgmr.msra.gmra.mxu0 %vm6799_vm0, %v7356_v7 }
 0x78f   : > { %14250 = vmatpush3.bf16.xpose.msra.mxu0 %v7478_v15  ;;  %14251 = vmatprep.mubr.msk.bf16.mxu0 %vm16671_vm1, %v16670_v46 }
 0x790   : > { %14261 = vmatprep.subr.bf16.mxu0 %v16670_v46 }
 0x793   : > { %v19759_v27 = vpop.eup %16552 }
 0x794   : > { %v7081_v29 = vpack.c.bf16 %v19759_v27, %v19759_v27 }
 0x796   : > { %14210 = vmatmul.mubr.msk.bf16.vlgmr.msra.gmra.mxu1 %vm6846_vm4, %v7081_v29  ;;  %14252 = vmatmul.mubr.msk.bf16.vlgmr.msra.gmra.mxu0 %vm6799_vm0, %v19696_v59 }
 0x797   : > { %14214 = vmatpush3.bf16.xpose.msra.mxu1 %v7140_v31  ;;  %14262 = vmatpush3.bf16.xpose.msra.mxu0 %v7588_v25 }
 0x798   : > { %14215 = vmatprep.mubr.msk.bf16.mxu1 %vm16671_vm1, %v16670_v46  ;;  %14263 = vmatprep.mubr.msk.bf16.mxu0 %vm16671_vm1, %v16670_v46 }
 0x799   : > { %14273 = vmatprep.subr.bf16.mxu0 %v16670_v46  ;;  %14219 = vmatprep.subr.bf16.mxu1 %v16670_v46 }
 0x79e   : > { %14216 = vmatmul.mubr.msk.bf16.vlgmr.msra.gmra.mxu1 %vm6799_vm0, %v7132_v20  ;;  %14264 = vmatmul.mubr.msk.bf16.vlgmr.msra.gmra.mxu0 %vm6799_vm0, %v7580_v26 }
 0x79f   : > { %14274 = vmatpush3.bf16.xpose.msra.mxu0 %v7702_v34  ;;  %14275 = vmatprep.mubr.msk.bf16.mxu0 %vm16671_vm1, %v16670_v46 }
 0x7a0   : > { %14285 = vmatprep.subr.bf16.mxu0 %v16670_v46  ;;  %14221 = vmatprep.mubr.msk.bf16.mxu1 %vm16671_vm1, %v16670_v46 }
 0x7a6   : > { %14276 = vmatmul.mubr.msk.bf16.vlgmr.msra.gmra.mxu0 %vm6799_vm0, %v19708_v14 }
 0x7a7   : > { %14286 = vmatpush3.bf16.xpose.msra.mxu0 %v7812_v37  ;;  %14287 = vmatprep.mubr.msk.bf16.mxu0 %vm16671_vm1, %v16670_v46 }
 0x7a8   : > { %14297 = vmatprep.subr.bf16.mxu0 %v16670_v46 }
 0x7ae   : > { %14288 = vmatmul.mubr.msk.bf16.vlgmr.msra.gmra.mxu0 %vm6799_vm0, %v7804_v39 }
 0x7af   : > { %14298 = vmatpush3.bf16.xpose.msra.mxu0 %v7926_v42  ;;  %14299 = vmatprep.mubr.msk.bf16.mxu0 %vm16671_vm1, %v16670_v46  ;;  %v6786_v42 = vpack.c.bf16 %v19637_v18, %v19637_v18 }
 0x7b0   : > { %14309 = vmatprep.subr.bf16.mxu0 %v16670_v46 }
 0x7b6   : > { %14300 = vmatmul.mubr.msk.bf16.vlgmr.msra.gmra.mxu0 %vm6799_vm0, %v6777_v12 }
 0x7b7   : > { %14310 = vmatpush3.bf16.xpose.msra.mxu0 %v8036_v5  ;;  %14311 = vmatprep.mubr.msk.bf16.mxu0 %vm16671_vm1, %v16670_v46 }
 0x7be   : > { %14312 = vmatmul.mubr.msk.bf16.vlgmr.msra.gmra.mxu0 %vm6799_vm0, %v8028_v47 }
 0x84e   : > { %v7400_v62 = vpop.f32.mrf.mxu0 }
 0x84f   : > { %v19801_v56 = vadd.f32 %v7400_v62, %v19652_v49 }
 0x850   : > { %v14241_v59 = vpop.f32.mrf.mxu0 }
 0x851   : > { %v7406_v13 = vsel %vm6846_vm4, %v19801_v56, -inf }
 0x852   : > { %7407 = vmax.xlane.f32.xlu0 %v7406_v13  ;;  %v7403_v14 = vpop.f32.mrf.mxu0 }
 0x853   : > { %v19836_v14 = vpack.c.bf16 %v19639_v23, %v19639_v23 }
 0x854   : > { %v14242_v60 = vpop.f32.mrf.mxu0 }
 0x855   : > { %v19845_v60 = vpack.c.bf16 %v19661_v54, %v19661_v54  ;;  %v6964_v54 = vsel %vm6846_vm4, %v19718_v24, 0.0 }
 0x856   : > { %v19805_v0 = vpop.f32.mrf.mxu1  ;;  %v7514_v63 = vpop.f32.mrf.mxu0 }
 0x857   : > { %v19808_v17 = vadd.f32 %v7514_v63, %v19652_v49 }
 0x858   : > { %v14211_v3 = vpop.f32.mrf.mxu1  ;;  %v14253_v8 = vpop.f32.mrf.mxu0 }
 0x859   : > { %v7520_v9 = vsel %vm6846_vm4, %v19808_v17, -inf  ;;  %v19858_v8 = vpack.c.bf16 %v19659_v4, %v19659_v4 }
 0x85a   : > { %7521 = vmax.xlane.f32.xlu1 %v7520_v9  ;;  %v7125_v55 = vpop.f32.mrf.mxu1  ;;  %v7517_v50 = vpop.f32.mrf.mxu0  ;;  %v7078_v9 = vsel %vm6846_vm4, %v19759_v27, 0.0 }
 0x85b   : > { %v7298_v55 = vpop.xlane.xlu0 %7297 }
 0x85c   : > { %v14212_v10 = vpop.f32.mrf.mxu1  ;;  %v14254_v1 = vpop.f32.mrf.mxu0 }
 0x85e   : > { %v7176_v53 = vpop.f32.mrf.mxu1  ;;  %v7624_v2 = vpop.f32.mrf.mxu0 }
 0x85f   : > { %v19813_v38 = vadd.f32 %v7624_v2, %v19652_v49  ;;  %v7177_v20 = vadd.f32 %v7176_v53, %v19652_v49 }
 0x860   : > { %v14217_v33 = vpop.f32.mrf.mxu1  ;;  %v14265_v30 = vpop.f32.mrf.mxu0 }
 0x861   : > { %v7630_v12 = vsel %vm6846_vm4, %v19813_v38, -inf  ;;  %v7182_v29 = vsel %vm6846_vm4, %v7177_v20, -inf }
 0x862   : > { %7631 = vmax.xlane.f32.xlu1 %v7630_v12  ;;  %v7179_v51 = vpop.f32.mrf.mxu1  ;;  %v7627_v16 = vpop.f32.mrf.mxu0 }
 0x864   : > { %v14218_v43 = vpop.f32.mrf.mxu1  ;;  %v14266_v19 = vpop.f32.mrf.mxu0 }
 0x866   : > { %v7738_v57 = vpop.f32.mrf.mxu0 }
 0x867   : > { %v19818_v58 = vadd.f32 %v7738_v57, %v19652_v49 }
 0x868   : > { %7193 = vrot.lane.b32.xlu0 %v19729_v6, %s21974_s11  ;;  %v14277_v11 = vpop.f32.mrf.mxu0 }
 0x869   : > { %v7744_v7 = vsel %vm6846_vm4, %v19818_v58, -inf }
 0x86a   : > { %7745 = vmax.xlane.f32.xlu1 %v7744_v7  ;;  %v7741_v15 = vpop.f32.mrf.mxu0 }
 0x86c   : > { %v14278_v28 = vpop.f32.mrf.mxu0 }
 0x86e   : > { %v7848_v31 = vpop.f32.mrf.mxu0  ;;  %7183 = vmax.xlane.f32.xlu1 %v7182_v29 }
 0x86f   : > { %v19830_v47 = vadd.f32 %v7848_v31, %v19652_v49 }
 0x870   : > { %v14289_v25 = vpop.f32.mrf.mxu0 }
 0x871   : > { %v7854_v13 = vsel %vm6846_vm4, %v19830_v47, -inf }
 0x872   : > { %v7851_v26 = vpop.f32.mrf.mxu0 }
 0x874   : > { %v14290_v34 = vpop.f32.mrf.mxu0 }
 0x876   : > { %v7962_v35 = vpop.f32.mrf.mxu0 }
 0x877   : > { %v19841_v18 = vadd.f32 %v7962_v35, %v19652_v49 }
 0x878   : > { %v14301_v37 = vpop.f32.mrf.mxu0 }
 0x879   : > { %v7968_v23 = vsel %vm6846_vm4, %v19841_v18, -inf }
 0x87a   : > { %v7965_v39 = vpop.f32.mrf.mxu0 }
 0x87c   : > { %v14302_v6 = vpop.f32.mrf.mxu0 }
 0x87d   : > { %v7534_v6 = vsel %vm6860_vm2, %v19836_v14, 0 }
 0x87e   : > { %v8072_v45 = vpop.f32.mrf.mxu0 }
 0x87f   : > { %7417 = vrot.lane.b32.xlu1 %v6786_v42, %s21974_s11  ;;  %v19850_v63 = vadd.f32 %v8072_v45, %v19652_v49  ;;  %v6853_v49 = vsel %vm6846_vm4, %v19665_v44, 0.0 }
 0x880   : > { %v14313_v5 = vpop.f32.mrf.mxu0 }
 0x881   : > { %v8078_v3 = vsel %vm6846_vm4, %v19850_v63, -inf }
 0x882   : > { %v8075_v62 = vpop.f32.mrf.mxu0 }
 0x884   : > { %v14314_v59 = vpop.f32.mrf.mxu0 }
 0x887   : > { %7855 = vmax.xlane.f32.xlu0 %v7854_v13 }
 0x89d   : > { %7641 = vrot.lane.b32.xlu0 %v19836_v14, %s21974_s11  ;;  %v7758_v14 = vsel %vm6860_vm2, %v19858_v8, 0 }
 0x8a1   : > { %8089 = vrot.lane.b32.xlu0 %v19845_v60, %s21974_s11 }
 0x8a3   : > { %7969 = vmax.xlane.f32.xlu1 %v7968_v23 }
 0x8a7   : > { %8079 = vmax.xlane.f32.xlu1 %v8078_v3 }
 0x8b8   : > { %7865 = vrot.lane.b32.xlu1 %v19858_v8, %s21974_s11 }
 0x8c0   : > { %6965 = vadd.xlane.f32.xlu0 %v6964_v54 }
 0x8c4   : > { %6854 = vadd.xlane.f32.xlu0 %v6853_v49 }
 0x8c8   : > { %7079 = vadd.xlane.f32.xlu0 %v7078_v9 }
 0x8db   : > { %v7408_v50 = vpop.xlane.xlu0 %7407 }
 0x8dc   : > { %v7409_v4 = vsub.f32 %v19801_v56, %v7408_v50  ;;  %v7299_v56 = vsub.f32 %v19748_v48, %v7298_v55 }
 0x8de   : > { %v7410_v10 = vmul.f32 1.442695, %v7409_v4  ;;  %v7300_v19 = vmul.f32 1.442695, %v7299_v56  ;;  %v15680_v56 = vld [vmem:[%s21958_s4 + $0x154] ss:$24 sps:$4 sm:$0xff]  }
 0x8df   : > { %v7194_v1 = vpop.permute.xlu0 %7193  ;;  %9930 = vmatprep.subr.bf16.mxu0 %v15680_v56 }
 0x8e0   : > { %16554 = vpow2.f32 %v7410_v10  ;;  %v7199_v53 = vsel %vm6860_vm2, %v7194_v1, 0  ;;  %v7982_v1 = vsel %vm6860_vm2, %v19845_v60, 0 }
 0x8e1   : > { %14220 = vmatpush3.bf16.msra.mxu1 %v7199_v53 }
 0x8e2   : > { %14231 = vmatprep.subr.bf16.mxu1 %v16670_v46 }
 0x8e3   : > { %v7522_v24 = vpop.xlane.xlu1 %7521 }
 0x8e4   : > { %v7523_v11 = vsub.f32 %v19808_v17, %v7522_v24 }
 0x8e6   : > { %v7524_v48 = vmul.f32 1.442695, %v7523_v11  ;;  %v15707_v11 = vld [vmem:[%s21958_s4 + $0x454] ss:$24 sps:$4 sm:$0xff]  }
 0x8eb   : > { %v7632_v33 = vpop.xlane.xlu1 %7631 }
 0x8ec   : > { %v7633_v30 = vsub.f32 %v19813_v38, %v7632_v33  ;;  %v7310_v38 = vsel %vm6860_vm2, %v6786_v42, 0 }
 0x8ed   : > { %v16555_v2 = vpop.eup %16554 }
 0x8ee   : > { %v7412_v44 = vsel %vm6846_vm4, %v16555_v2, 0.0  ;;  %v7634_v16 = vmul.f32 1.442695, %v7633_v30  ;;  %v7415_v39 = vpack.c.bf16 %v16555_v2, %v16555_v2 }
 0x8ef   : > { %7413 = vadd.xlane.f32.xlu0 %v7412_v44 }
 0x8f3   : > { %v7746_v27 = vpop.xlane.xlu1 %7745 }
 0x8f4   : > { %v7747_v37 = vsub.f32 %v19818_v58, %v7746_v27 }
 0x8f6   : > { %v7748_v42 = vmul.f32 1.442695, %v7747_v37  ;;  %v15693_v37 = vld [vmem:[%s21958_s4 + $0x60] ss:$24 sps:$4 sm:$0xff]  }
 0x8f7   : > { %v7184_v12 = vpop.xlane.xlu1 %7183 }
 0x8f8   : > { %v7185_v51 = vsub.f32 %v7177_v20, %v7184_v12 }
 0x8fa   : > { %v7186_v43 = vmul.f32 1.442695, %v7185_v51 }
 0x8fb   : > { %v7418_v31 = vpop.permute.xlu1 %7417 }
 0x8fc   : > { %16556 = vpow2.f32 %v7186_v43  ;;  %v7423_v35 = vsel %vm6860_vm2, %v7418_v31, 0  ;;  %v15681_v43 = vld [vmem:[%s21958_s4 + $0x120] ss:$24 sps:$4 sm:$0xff]   ;;  %v15725_v31 = vld [vmem:[%s21958_s4 + $0x3c4] ss:$24 sps:$4 sm:$0xff]  }
 0x8fd   : > { %16558 = vpow2.f32 %v7634_v16  ;;  %v15683_v16 = vld [vmem:[%s21958_s4 + $0x124] ss:$24 sps:$4 sm:$0xff]  }
 0x8fe   : > { %16560 = vpow2.f32 %v7300_v19  ;;  %v15686_v19 = vld [vmem:[%s21958_s4 + $0xf4] ss:$24 sps:$4 sm:$0xff]  }
 0x8ff   : > { %16562 = vpow2.f32 %v7524_v48  ;;  %v15719_v48 = vld [vmem:[%s21958_s4 + $0x3f4] ss:$24 sps:$4 sm:$0xff]  }
 0x909   : > { %v16557_v57 = vpop.eup %16556 }
 0x90a   : > { %v7188_v7 = vsel %vm6846_vm4, %v16557_v57, 0.0  ;;  %v7191_v15 = vpack.c.bf16 %v16557_v57, %v16557_v57  ;;  %v16559_v28 = vpop.eup %16558  ;;  %v15705_v57 = vld [vmem:[%s21958_s4 + $0x450] ss:$24 sps:$4 sm:$0xff]  }
 0x90b   : > { %7189 = vadd.xlane.f32.xlu1 %v7188_v7  ;;  %v7636_v20 = vsel %vm6846_vm4, %v16559_v28, 0.0  ;;  %v19882_v29 = vpop.eup %16560  ;;  %v7639_v13 = vpack.c.bf16 %v16559_v28, %v16559_v28  ;;  %v15684_v7 = vld [vmem:[%s21958_s4 + $0xf0] ss:$24 sps:$4 sm:$0xff]   ;;  %v15689_v28 = vld [vmem:[%s21958_s4 + $0xc4] ss:$24 sps:$4 sm:$0xff]  }
 0x90c   : > { %14222 = vmatmul.mubr.msk.bf16.vlgmr.msra.gmra.mxu1 %vm6846_vm4, %v7191_v15  ;;  %v7305_v26 = vpack.c.bf16 %v19882_v29, %v19882_v29  ;;  %v16563_v45 = vpop.eup %16562  ;;  %v7302_v60 = vsel %vm6846_vm4, %v19882_v29, 0.0  ;;  %v15713_v15 = vld [vmem:[%s21958_s4 + $0x424] ss:$24 sps:$4 sm:$0xff]   ;;  %v15692_v29 = vld [vmem:[%s21958_s4 + $0x94] ss:$24 sps:$4 sm:$0xff]  }
 0x90d   : > { %14232 = vmatpush3.bf16.msra.mxu1 %v7310_v38  ;;  %14233 = vmatprep.mubr.msk.bf16.mxu1 %vm16671_vm1, %v16670_v46  ;;  %v7529_v62 = vpack.c.bf16 %v16563_v45, %v16563_v45  ;;  %v7526_v30 = vsel %vm6846_vm4, %v16563_v45, 0.0  ;;  %v15711_v38 = vld [vmem:[%s21958_s4 + $0x420] ss:$24 sps:$4 sm:$0xff]   ;;  %v15701_v45 = vld [vmem:[%s21958_s4 + $0x4] ss:$24 sps:$4 sm:$0xff]  }
 0x90e   : > { %14243 = vmatprep.subr.bf16.mxu1 %v16670_v46 }
 0x90f   : > { %7637 = vadd.xlane.f32.xlu1 %v7636_v20  ;;  %v15687_v20 = vld [vmem:[%s21958_s4 + $0xc0] ss:$24 sps:$4 sm:$0xff]  }
 0x910   : > { %v7856_v17 = vpop.xlane.xlu0 %7855 }
 0x911   : > { %v7857_v25 = vsub.f32 %v19830_v47, %v7856_v17  ;;  %v15717_v17 = vld [vmem:[%s21958_s4 + $0x3f0] ss:$24 sps:$4 sm:$0xff]  }
 0x913   : > { %v7858_v34 = vmul.f32 1.442695, %v7857_v25  ;;  %v15690_v25 = vld [vmem:[%s21958_s4 + $0x90] ss:$24 sps:$4 sm:$0xff]  }
 0x914   : > { %14234 = vmatmul.mubr.msk.bf16.vlgmr.msra.gmra.mxu1 %vm6846_vm4, %v7305_v26  ;;  %v7642_v5 = vpop.permute.xlu0 %7641  ;;  %v15695_v26 = vld [vmem:[%s21958_s4 + $0x64] ss:$24 sps:$4 sm:$0xff]  }
 0x915   : > { %16564 = vpow2.f32 %v7858_v34  ;;  %14244 = vmatpush3.bf16.msra.mxu1 %v7423_v35  ;;  %14245 = vmatprep.mubr.msk.bf16.mxu1 %vm16671_vm1, %v16670_v46  ;;  %v7647_v59 = vsel %vm6860_vm2, %v7642_v5, 0  ;;  %v15723_v34 = vld [vmem:[%s21958_s4 + $0x3c0] ss:$24 sps:$4 sm:$0xff]   ;;  %v15731_v35 = vld [vmem:[%s21958_s4 + $0x394] ss:$24 sps:$4 sm:$0xff]  }
 0x916   : > { %14255 = vmatprep.subr.bf16.mxu1 %v16670_v46  ;;  %16566 = vpow2.f32 %v7748_v42  ;;  %v15696_v42 = vld [vmem:[%s21958_s4 + $0x30] ss:$24 sps:$4 sm:$0xff]   ;;  %v15699_v5 = vld [vmem:[%s21958_s4] ss:$24 sps:$4 sm:$0xff]  }
 0x918   : > { %v8090_v53 = vpop.permute.xlu0 %8089 }
 0x919   : > { %v8095_v33 = vsel %vm6860_vm2, %v8090_v53, 0 }
 0x91c   : > { %14246 = vmatmul.mubr.msk.bf16.vlgmr.msra.gmra.mxu1 %vm6846_vm4, %v7415_v39  ;;  %v15698_v39 = vld [vmem:[%s21958_s4 + $0x34] ss:$24 sps:$4 sm:$0xff]  }
 0x91d   : > { %14256 = vmatpush3.bf16.msra.mxu1 %v7534_v6  ;;  %14257 = vmatprep.mubr.msk.bf16.mxu1 %vm16671_vm1, %v16670_v46  ;;  %v15729_v6 = vld [vmem:[%s21958_s4 + $0x390] ss:$24 sps:$4 sm:$0xff]  }
 0x91e   : > { %14267 = vmatprep.subr.bf16.mxu1 %v16670_v46 }
 0x922   : > { %v16565_v47 = vpop.eup %16564 }
 0x923   : > { %v7860_v58 = vsel %vm6846_vm4, %v16565_v47, 0.0  ;;  %v16567_v54 = vpop.eup %16566 }
 0x924   : > { %7861 = vadd.xlane.f32.xlu0 %v7860_v58  ;;  %14258 = vmatmul.mubr.msk.bf16.vlgmr.msra.gmra.mxu1 %vm6846_vm4, %v7529_v62  ;;  %v7753_v50 = vpack.c.bf16 %v16567_v54, %v16567_v54  ;;  %v7750_v12 = vsel %vm6846_vm4, %v16567_v54, 0.0  ;;  %v15702_v62 = vld [vmem:[%s21958_s4 + $0x2d0] ss:$24 sps:$4 sm:$0xff]   ;;  %v15710_v58 = vld [vmem:[%s21958_s4 + $0x2a4] ss:$24 sps:$4 sm:$0xff]  }
 0x925   : > { %14268 = vmatpush3.bf16.msra.mxu1 %v7647_v59  ;;  %14269 = vmatprep.mubr.msk.bf16.mxu1 %vm16671_vm1, %v16670_v46  ;;  %v15708_v59 = vld [vmem:[%s21958_s4 + $0x2a0] ss:$24 sps:$4 sm:$0xff]  }
 0x926   : > { %14279 = vmatprep.subr.bf16.mxu1 %v16670_v46 }
 0x92c   : > { %14270 = vmatmul.mubr.msk.bf16.vlgmr.msra.gmra.mxu1 %vm6846_vm4, %v7639_v13  ;;  %v7970_v23 = vpop.xlane.xlu1 %7969  ;;  %v15716_v13 = vld [vmem:[%s21958_s4 + $0x274] ss:$24 sps:$4 sm:$0xff]  }
 0x92d   : > { %14280 = vmatpush3.bf16.msra.mxu1 %v7758_v14  ;;  %v7971_v3 = vsub.f32 %v19841_v18, %v7970_v23  ;;  %14281 = vmatprep.mubr.msk.bf16.mxu1 %vm16671_vm1, %v16670_v46  ;;  %v7863_v18 = vpack.c.bf16 %v16565_v47, %v16565_v47  ;;  %v15704_v47 = vld [vmem:[%s21958_s4 + $0x2d4] ss:$24 sps:$4 sm:$0xff]   ;;  %v15714_v14 = vld [vmem:[%s21958_s4 + $0x270] ss:$24 sps:$4 sm:$0xff]  }
 0x92e   : > { %14291 = vmatprep.subr.bf16.mxu1 %v16670_v46 }
 0x92f   : > { %v7972_v49 = vmul.f32 1.442695, %v7971_v3  ;;  %v15722_v3 = vld [vmem:[%s21958_s4 + $0x244] ss:$24 sps:$4 sm:$0xff]  }
 0x930   : > { %v8080_v9 = vpop.xlane.xlu1 %8079 }
 0x931   : > { %v8081_v55 = vsub.f32 %v19850_v63, %v8080_v9  ;;  %16568 = vpow2.f32 %v7972_v49  ;;  %v15720_v49 = vld [vmem:[%s21958_s4 + $0x240] ss:$24 sps:$4 sm:$0xff]   ;;  %v15728_v9 = vld [vmem:[%s21958_s4 + $0x214] ss:$24 sps:$4 sm:$0xff]  }
 0x933   : > { %v8082_v4 = vmul.f32 1.442695, %v8081_v55  ;;  %v15726_v55 = vld [vmem:[%s21958_s4 + $0x210] ss:$24 sps:$4 sm:$0xff]  }
 0x934   : > { %14282 = vmatmul.mubr.msk.bf16.vlgmr.msra.gmra.mxu1 %vm6846_vm4, %v7753_v50  ;;  %v7866_v8 = vpop.permute.xlu1 %7865  ;;  %v15734_v50 = vld [vmem:[%s21958_s4 + $0x1e4] ss:$24 sps:$4 sm:$0xff]  }
 0x935   : > { %16570 = vpow2.f32 %v8082_v4  ;;  %v7871_v10 = vsel %vm6860_vm2, %v7866_v8, 0  ;;  %14293 = vmatprep.mubr.msk.bf16.mxu1 %vm16671_vm1, %v16670_v46  ;;  %v15737_v4 = vld [vmem:[%s21958_s4 + $0x364] ss:$24 sps:$4 sm:$0xff]   ;;  %v15732_v8 = vld [vmem:[%s21958_s4 + $0x1e0] ss:$24 sps:$4 sm:$0xff]  }
 0x936   : > { %14292 = vmatpush3.bf16.msra.mxu1 %v7871_v10  ;;  %v15735_v10 = vld [vmem:[%s21958_s4 + $0x360] ss:$24 sps:$4 sm:$0xff]  }
 0x937   : > { %14303 = vmatprep.subr.bf16.mxu1 %v16670_v46 }
 0x93c   : > { %14294 = vmatmul.mubr.msk.bf16.vlgmr.msra.gmra.mxu1 %vm6846_vm4, %v7863_v18  ;;  %v15738_v18 = vld [vmem:[%s21958_s4 + $0x1b0] ss:$24 sps:$4 sm:$0xff]  }
 0x93d   : > { %14304 = vmatpush3.bf16.msra.mxu1 %v7982_v1  ;;  %14305 = vmatprep.mubr.msk.bf16.mxu1 %vm16671_vm1, %v16670_v46  ;;  %v15740_v1 = vld [vmem:[%s21958_s4 + $0x1b4] ss:$24 sps:$4 sm:$0xff]  }
 0x93e   : > { %14315 = vmatprep.subr.bf16.mxu1 %v16670_v46  ;;  %v16569_v63 = vpop.eup %16568 }
 0x93f   : > { %v7977_v2 = vpack.c.bf16 %v16569_v63, %v16569_v63  ;;  %v7974_v51 = vsel %vm6846_vm4, %v16569_v63, 0.0  ;;  %v15741_v63 = vld [vmem:[%s21958_s4 + $0x330] ss:$24 sps:$4 sm:$0xff]  }
 0x942   : > { %v16571_v24 = vpop.eup %16570 }
 0x943   : > { %v8084_v44 = vsel %vm6846_vm4, %v16571_v24, 0.0  ;;  %v8087_v27 = vpack.c.bf16 %v16571_v24, %v16571_v24  ;;  %v15743_v24 = vld [vmem:[%s21958_s4 + $0x334] ss:$24 sps:$4 sm:$0xff]  }
 0x944   : > { %8085 = vadd.xlane.f32.xlu1 %v8084_v44  ;;  %14306 = vmatmul.mubr.msk.bf16.vlgmr.msra.gmra.mxu1 %vm6846_vm4, %v7977_v2  ;;  %v15746_v2 = vld [vmem:[%s21958_s4 + $0x184] ss:$24 sps:$4 sm:$0xff]  }
 0x945   : > { %14316 = vmatpush3.bf16.msra.mxu1 %v8095_v33  ;;  %14317 = vmatprep.mubr.msk.bf16.mxu1 %vm16671_vm1, %v16670_v46  ;;  %v15678_v46 = vld [vmem:[%s21958_s4 + $0x150] ss:$24 sps:$4 sm:$0xff]   ;;  %v15749_v44 = vld [vmem:[%s21958_s4 + $0x304] ss:$24 sps:$4 sm:$0xff]  }
 0x946   : > { %9931 = vmatpush1.bf16.msra.mxu0 %v15678_v46  ;;  %9971 = vmatprep.subr.bf16.mxu1 %v15707_v11  ;;  %v15747_v46 = vld [vmem:[%s21958_s4 + $0x300] ss:$24 sps:$4 sm:$0xff]   ;;  %v15752_v11 = vld [vmem:[%s21958_s4 + $0x5d0] ss:$24 sps:$4 sm:$0xff]  }
 0x947   : > { %9932 = vmatprep.subr.bf16.mxu0 %v15683_v16 }
 0x948   : > { %7303 = vadd.xlane.f32.xlu1 %v7302_v60 }
 0x949   : > { %v6966_v23 = vpop.xlane.xlu0 %6965 }
 0x94a   : > { %9933 = vmatpush1.bf16.msra.mxu0 %v15681_v43  ;;  %16572 = vrcp.f32 %v6966_v23 }
 0x94b   : > { %9934 = vmatprep.subr.bf16.mxu0 %v15686_v19  ;;  %v15754_v19 = vld [vmem:[%s21958_s4 + $0x5d4] ss:$24 sps:$4 sm:$0xff]  }
 0x94c   : > { %7527 = vadd.xlane.f32.xlu1 %v7526_v30  ;;  %14318 = vmatmul.mubr.msk.bf16.vlgmr.msra.gmra.mxu1 %vm6846_vm4, %v8087_v27 }
 0x94d   : > { %9972 = vmatpush1.bf16.msra.mxu1 %v15705_v57  ;;  %v20080_v43 = vpop.xlane.xlu0 %6854  ;;  %v15757_v57 = vld [vmem:[%s21958_s4 + $0x754] ss:$24 sps:$4 sm:$0xff]  }
 0x94e   : > { %9973 = vmatprep.subr.bf16.mxu1 %v15713_v15  ;;  %9935 = vmatpush1.bf16.msra.mxu0 %v15684_v7  ;;  %v15760_v15 = vld [vmem:[%s21958_s4 + $0x5a4] ss:$24 sps:$4 sm:$0xff]  }
 0x94f   : > { %9936 = vmatprep.subr.bf16.mxu0 %v15689_v28 }
 0x950   : > { %7751 = vadd.xlane.f32.xlu1 %v7750_v12  ;;  %v15744_v12 = vld [vmem:[%s21958_s4 + $0x180] ss:$24 sps:$4 sm:$0xff]  }
 0x951   : > { %9974 = vmatpush1.bf16.msra.mxu1 %v15711_v38  ;;  %v15758_v38 = vld [vmem:[%s21958_s4 + $0x5a0] ss:$24 sps:$4 sm:$0xff]  }
 0x952   : > { %9975 = vmatprep.subr.bf16.mxu1 %v15719_v48  ;;  %9937 = vmatpush1.bf16.msra.mxu0 %v15687_v20  ;;  %v20100_v48 = vpop.xlane.xlu0 %7079 }
 0x953   : > { %9938 = vmatprep.subr.bf16.mxu0 %v15692_v29  ;;  %v15766_v29 = vld [vmem:[%s21958_s4 + $0x574] ss:$24 sps:$4 sm:$0xff]  }
 0x954   : > { %7975 = vadd.xlane.f32.xlu1 %v7974_v51 }
 0x955   : > { %9976 = vmatpush1.bf16.msra.mxu1 %v15717_v17 }
 0x956   : > { %9977 = vmatprep.subr.bf16.mxu1 %v15725_v31  ;;  %9939 = vmatpush1.bf16.msra.mxu0 %v15690_v25  ;;  %v15764_v31 = vld [vmem:[%s21958_s4 + $0x570] ss:$24 sps:$4 sm:$0xff]  }
 0x957   : > { %9940 = vmatprep.subr.bf16.mxu0 %v15695_v26  ;;  %v16573_v53 = vpop.eup %16572 }
 0x958   : > { %v7018_v27 = vmul.f32 %v16573_v53, %v19737_v61  ;;  %v15807_v53 = vld [vmem:[%s21958_s4 + $0x15c] ss:$24 sps:$4 sm:$0xff]  }
 0x959   : > { %9978 = vmatpush1.bf16.msra.mxu1 %v15723_v34 }
 0x95a   : > { %9979 = vmatprep.subr.bf16.mxu1 %v15731_v35  ;;  %9941 = vmatpush1.bf16.msra.mxu0 %v15693_v37  ;;  %v15772_v35 = vld [vmem:[%s21958_s4 + $0x544] ss:$24 sps:$4 sm:$0xff]  }
 0x95b   : > { %9942 = vmatprep.subr.bf16.mxu0 %v15698_v39  ;;  %v15770_v39 = vld [vmem:[%s21958_s4 + $0x540] ss:$24 sps:$4 sm:$0xff]  }
 0x95d   : > { %9980 = vmatpush1.bf16.msra.mxu1 %v15729_v6 }
 0x95e   : > { %9943 = vmatpush1.bf16.msra.mxu0 %v15696_v42  ;;  %9981 = vmatprep.subr.bf16.mxu1 %v15737_v4  ;;  %v15778_v42 = vld [vmem:[%s21958_s4 + $0x514] ss:$24 sps:$4 sm:$0xff]   ;;  %v15796_v4 = vld [vmem:[%s21958_s4 + $0x484] ss:$24 sps:$4 sm:$0xff]  }
 0x95f   : > { %9944 = vmatprep.subr.bf16.mxu0 %v15701_v45 }
 0x961   : > { %9982 = vmatpush1.bf16.msra.mxu1 %v15735_v10  ;;  %v15794_v10 = vld [vmem:[%s21958_s4 + $0x480] ss:$24 sps:$4 sm:$0xff]  }
 0x962   : > { %9945 = vmatpush1.bf16.msra.mxu0 %v15699_v5  ;;  %9983 = vmatprep.subr.bf16.mxu1 %v15743_v24  ;;  %v15776_v5 = vld [vmem:[%s21958_s4 + $0x510] ss:$24 sps:$4 sm:$0xff]  }
 0x963   : > { %9946 = vmatprep.subr.bf16.mxu0 %v15704_v47 }
 0x965   : > { %9984 = vmatpush1.bf16.msra.mxu1 %v15741_v63 }
 0x966   : > { %9947 = vmatpush2.bf16.msra.mxu0 %v15702_v62  ;;  %9985 = vmatprep.subr.bf16.mxu1 %v15749_v44 }
 0x967   : > { %9948 = vmatprep.subr.bf16.mxu0 %v15710_v58  ;;  %v15784_v58 = vld [vmem:[%s21958_s4 + $0x4e4] ss:$24 sps:$4 sm:$0xff]  }
 0x969   : > { %9986 = vmatpush1.bf16.msra.mxu1 %v15747_v46 }
 0x96a   : > { %9949 = vmatpush2.bf16.msra.mxu0 %v15708_v59  ;;  %9987 = vmatprep.subr.bf16.mxu1 %v15754_v19  ;;  %v15782_v59 = vld [vmem:[%s21958_s4 + $0x4e0] ss:$24 sps:$4 sm:$0xff]  }
 0x96b   : > { %9950 = vmatprep.subr.bf16.mxu0 %v15716_v13 }
 0x96d   : > { %9988 = vmatpush2.bf16.msra.mxu1 %v15752_v11 }
 0x96e   : > { %9951 = vmatpush2.bf16.msra.mxu0 %v15714_v14  ;;  %9989 = vmatprep.subr.bf16.mxu1 %v15760_v15  ;;  %v15790_v14 = vld [vmem:[%s21958_s4 + $0x4b4] ss:$24 sps:$4 sm:$0xff]  }
 0x96f   : > { %9952 = vmatprep.subr.bf16.mxu0 %v15722_v3  ;;  %v15788_v3 = vld [vmem:[%s21958_s4 + $0x4b0] ss:$24 sps:$4 sm:$0xff]  }
 0x971   : > { %9990 = vmatpush2.bf16.msra.mxu1 %v15758_v38 }
 0x972   : > { %9953 = vmatpush2.bf16.msra.mxu0 %v15720_v49  ;;  %9991 = vmatprep.subr.bf16.mxu1 %v15766_v29 }
 0x973   : > { %9954 = vmatprep.subr.bf16.mxu0 %v15728_v9 }
 0x975   : > { %9992 = vmatpush2.bf16.msra.mxu1 %v15764_v31 }
 0x976   : > { %9955 = vmatpush2.bf16.msra.mxu0 %v15726_v55  ;;  %9993 = vmatprep.subr.bf16.mxu1 %v15772_v35 }
 0x977   : > { %9956 = vmatprep.subr.bf16.mxu0 %v15734_v50 }
 0x978   : > { %v7414_v25 = vpop.xlane.xlu0 %7413 }
 0x979   : > { %9994 = vmatpush2.bf16.msra.mxu1 %v15770_v39 }
 0x97a   : > { %9957 = vmatpush2.bf16.msra.mxu0 %v15732_v8  ;;  %9995 = vmatprep.subr.bf16.mxu1 %v15778_v42 }
 0x97b   : > { %9958 = vmatprep.subr.bf16.mxu0 %v15740_v1 }
 0x97d   : > { %9996 = vmatpush2.bf16.msra.mxu1 %v15776_v5 }
 0x97e   : > { %9959 = vmatpush2.bf16.msra.mxu0 %v15738_v18  ;;  %9997 = vmatprep.subr.bf16.mxu1 %v15784_v58 }
 0x97f   : > { %9960 = vmatprep.subr.bf16.mxu0 %v15746_v2 }
 0x981   : > { %9998 = vmatpush2.bf16.msra.mxu1 %v15782_v59 }
 0x982   : > { %9961 = vmatpush2.bf16.msra.mxu0 %v15744_v12  ;;  %9999 = vmatprep.subr.bf16.mxu1 %v15790_v14  ;;  %v15761_v14 = vld [vmem:[%s21958_s4 + $0x720] ss:$24 sps:$4 sm:$0xff]  }
 0x983   : > { %10012 = vmatprep.subr.bf16.mxu0 %v15757_v57 }
 0x985   : > { %10000 = vmatpush2.bf16.msra.mxu1 %v15788_v3 }
 0x986   : > { %10001 = vmatprep.subr.bf16.mxu1 %v15796_v4 }
 0x989   : > { %10002 = vmatpush2.bf16.msra.mxu1 %v15794_v10  ;;  %v15779_v10 = vld [vmem:[%s21958_s4 + $0x690] ss:$24 sps:$4 sm:$0xff]  }
 0x98a   : > { %10053 = vmatprep.subr.bf16.mxu1 %v15807_v53 }
 0x994   : > { %v7190_v54 = vpop.xlane.xlu1 %7189 }
 0x995   : > { %16574 = vrcp.f32 %v7190_v54 }
 0x996   : > { %16576 = vrcp.f32 %v7414_v25 }
 0x998   : > { %v7638_v26 = vpop.xlane.xlu1 %7637 }
 0x999   : > { %16578 = vrcp.f32 %v7638_v26 }
 0x9a2   : > { %v16575_v33 = vpop.eup %16574 }
 0x9a3   : > { %v16577_v54 = vpop.eup %16576 }
 0x9a6   : > { %v16579_v49 = vpop.eup %16578 }
 0x9cc   : > { %v7235_v60 = vpop.f32.mrf.mxu1 }
 0x9cd   : > { %v7242_v30 = vmul.f32 %v16575_v33, %v7235_v60  ;;  %v7862_v60 = vpop.xlane.xlu0 %7861 }
 0x9ce   : > { %v14223_v51 = vpop.f32.mrf.mxu1  ;;  %16580 = vrcp.f32 %v7862_v60 }
 0x9cf   : > { %v14367_v56 = vpack.i.bf16 %v7242_v30, %v7018_v27  ;;  %v8086_v27 = vpop.xlane.xlu1 %8085 }
 0x9d0   : > { %v7238_v16 = vpop.f32.mrf.mxu1  ;;  %16582 = vrcp.f32 %v8086_v27 }
 0x9d1   : > { %14368 = vrot.lane.b32.xlu0 %v14367_v56, %s21974_s11  ;;  %16584 = vrcp.f32 %v20080_v43 }
 0x9d2   : > { %v14224_v61 = vpop.f32.mrf.mxu1  ;;  %16586 = vrcp.f32 %v20100_v48 }
 0x9d3   : > { %v7304_v43 = vpop.xlane.xlu1 %7303 }
 0x9d4   : > { %v20092_v7 = vpop.f32.mrf.mxu1  ;;  %16588 = vrcp.f32 %v7304_v43  ;;  %v15834_v43 = vld [vmem:[%s21958_s4 + $0x7e4] ss:$24 sps:$4 sm:$0xff]  }
 0x9d6   : > { %v14235_v28 = vpop.f32.mrf.mxu1 }
 0x9d7   : > { %v7528_v48 = vpop.xlane.xlu1 %7527 }
 0x9d8   : > { %v7349_v20 = vpop.f32.mrf.mxu1  ;;  %16590 = vrcp.f32 %v7528_v48 }
 0x9da   : > { %v14236_v17 = vpop.f32.mrf.mxu1 }
 0x9db   : > { %v16581_v57 = vpop.eup %16580  ;;  %v7752_v3 = vpop.xlane.xlu1 %7751 }
 0x9dc   : > { %v7459_v34 = vpop.f32.mrf.mxu1  ;;  %16592 = vrcp.f32 %v7752_v3 }
 0x9dd   : > { %v7466_v55 = vmul.f32 %v16577_v54, %v7459_v34  ;;  %v16583_v11 = vpop.eup %16582  ;;  %v15767_v54 = vld [vmem:[%s21958_s4 + $0x6f0] ss:$24 sps:$4 sm:$0xff]  }
 0x9de   : > { %v14247_v37 = vpop.f32.mrf.mxu1  ;;  %v16585_v25 = vpop.eup %16584 }
 0x9df   : > { %v16587_v26 = vpop.eup %16586  ;;  %v6905_v35 = vmul.f32 %v16585_v25, %v19679_v36  ;;  %v15755_v36 = vld [vmem:[%s21958_s4 + $0x750] ss:$24 sps:$4 sm:$0xff]  }
 0x9e0   : > { %v7462_v6 = vpop.f32.mrf.mxu1  ;;  %v7129_v37 = vmul.f32 %v16587_v26, %v19805_v0  ;;  %v15763_v0 = vld [vmem:[%s21958_s4 + $0x724] ss:$24 sps:$4 sm:$0xff]   ;;  %v15814_v25 = vld [vmem:[%s21958_s4 + $0x870] ss:$24 sps:$4 sm:$0xff]  }
 0x9e1   : > { %v16589_v4 = vpop.eup %16588  ;;  %v15817_v26 = vld [vmem:[%s21958_s4 + $0xf8] ss:$24 sps:$4 sm:$0xff]  }
 0x9e2   : > { %v14248_v45 = vpop.f32.mrf.mxu1 }
 0x9e4   : > { %v20120_v47 = vpop.f32.mrf.mxu1 }
 0x9e6   : > { %v14259_v62 = vpop.f32.mrf.mxu1 }
 0x9e8   : > { %v7573_v13 = vpop.f32.mrf.mxu1 }
 0x9ea   : > { %v14260_v23 = vpop.f32.mrf.mxu1 }
 0x9eb   : > { %v15769_v23 = vld [vmem:[%s21958_s4 + $0x6f4] ss:$24 sps:$4 sm:$0xff]  }
 0x9ec   : > { %v7683_v9 = vpop.f32.mrf.mxu1 }
 0x9ed   : > { %v7690_v50 = vmul.f32 %v16579_v49, %v7683_v9  ;;  %v15775_v49 = vld [vmem:[%s21958_s4 + $0x6c4] ss:$24 sps:$4 sm:$0xff]   ;;  %v15773_v9 = vld [vmem:[%s21958_s4 + $0x6c0] ss:$24 sps:$4 sm:$0xff]  }
 0x9ee   : > { %v14271_v8 = vpop.f32.mrf.mxu1 }
 0x9ef   : > { %v14372_v18 = vpack.i.bf16 %v7690_v50, %v7466_v55  ;;  %v15781_v55 = vld [vmem:[%s21958_s4 + $0x694] ss:$24 sps:$4 sm:$0xff]   ;;  %v7976_v50 = vpop.xlane.xlu1 %7975  ;;  %v16591_v8 = vpop.eup %16590 }
 0x9f0   : > { %v7686_v1 = vpop.f32.mrf.mxu1  ;;  %v7577_v53 = vmul.f32 %v16591_v8, %v20120_v47  ;;  %v15791_v47 = vld [vmem:[%s21958_s4 + $0x630] ss:$24 sps:$4 sm:$0xff]   ;;  %16594 = vrcp.f32 %v7976_v50 }
 0x9f1   : > { %14373 = vrot.lane.b32.xlu1 %v14372_v18, %s21974_s11  ;;  %v15787_v18 = vld [vmem:[%s21958_s4 + $0x664] ss:$24 sps:$4 sm:$0xff]   ;;  %v15838_v8 = vld [vmem:[%s21958_s4 + $0x7b0] ss:$24 sps:$4 sm:$0xff]  }
 0x9f2   : > { %v14272_v63 = vpop.f32.mrf.mxu1 }
 0x9f3   : > { %v7353_v63 = vmul.f32 %v16589_v4, %v20092_v7 }
 0x9f4   : > { %v20144_v24 = vpop.f32.mrf.mxu1 }
 0x9f6   : > { %v14283_v2 = vpop.f32.mrf.mxu1 }
 0x9f8   : > { %v7797_v44 = vpop.f32.mrf.mxu1 }
 0x9fa   : > { %v14284_v33 = vpop.f32.mrf.mxu1 }
 0x9fb   : > { %v15785_v33 = vld [vmem:[%s21958_s4 + $0x660] ss:$24 sps:$4 sm:$0xff]  }
 0x9fc   : > { %v7907_v30 = vpop.f32.mrf.mxu1 }
 0x9fd   : > { %v7914_v28 = vmul.f32 %v16581_v57, %v7907_v30  ;;  %v15793_v30 = vld [vmem:[%s21958_s4 + $0x634] ss:$24 sps:$4 sm:$0xff]  }
 0x9fe   : > { %v14295_v12 = vpop.f32.mrf.mxu1 }
 0xa00   : > { %v7910_v51 = vpop.f32.mrf.mxu1 }
 0xa01   : > { %v15799_v51 = vld [vmem:[%s21958_s4 + $0x604] ss:$24 sps:$4 sm:$0xff]  }
 0xa02   : > { %v14296_v46 = vpop.f32.mrf.mxu1 }
 0xa03   : > { %v15797_v46 = vld [vmem:[%s21958_s4 + $0x600] ss:$24 sps:$4 sm:$0xff]  }
 0xa04   : > { %v20146_v56 = vpop.f32.mrf.mxu1 }
 0xa06   : > { %v14307_v16 = vpop.f32.mrf.mxu1 }
 0xa07   : > { %v15804_v16 = vld [vmem:[%s21958_s4 + $0x8d4] ss:$24 sps:$4 sm:$0xff]  }
 0xa08   : > { %v8021_v61 = vpop.f32.mrf.mxu1 }
 0xa0a   : > { %v14308_v19 = vpop.f32.mrf.mxu1 }
 0xa0c   : > { %v8131_v15 = vpop.f32.mrf.mxu1 }
 0xa0d   : > { %v8138_v38 = vmul.f32 %v16583_v11, %v8131_v15  ;;  %v15802_v11 = vld [vmem:[%s21958_s4 + $0x8d0] ss:$24 sps:$4 sm:$0xff]  }
 0xa0e   : > { %v14319_v20 = vpop.f32.mrf.mxu1  ;;  %v15805_v15 = vld [vmem:[%s21958_s4 + $0x158] ss:$24 sps:$4 sm:$0xff]  }
 0xa0f   : > { %v14377_v29 = vpack.i.bf16 %v8138_v38, %v7914_v28  ;;  %v15810_v28 = vld [vmem:[%s21958_s4 + $0x8a4] ss:$24 sps:$4 sm:$0xff]   ;;  %v15808_v20 = vld [vmem:[%s21958_s4 + $0x8a0] ss:$24 sps:$4 sm:$0xff]  }
 0xa10   : > { %v8134_v17 = vpop.f32.mrf.mxu1  ;;  %v15813_v38 = vld [vmem:[%s21958_s4 + $0x12c] ss:$24 sps:$4 sm:$0xff]  }
 0xa11   : > { %14378 = vrot.lane.b32.xlu0 %v14377_v29, %s21974_s11  ;;  %v15811_v29 = vld [vmem:[%s21958_s4 + $0x128] ss:$24 sps:$4 sm:$0xff]   ;;  %v15816_v17 = vld [vmem:[%s21958_s4 + $0x874] ss:$24 sps:$4 sm:$0xff]   ;;  %s12569_s11 = scalar_lea.sflag [#allocation4], %s361_s30 }
 0xa12   : > { %v14320_v31 = vpop.f32.mrf.mxu1 }
 0xa13   : > { %v15819_v31 = vld [vmem:[%s21958_s4 + $0xfc] ss:$24 sps:$4 sm:$0xff]  }
 0xa43   : > { %v14369_v34 = vpop.permute.xlu0 %14368 }
 0xa44   : > { %v14371_v39 = vunpack.i.h.bf16 %v14369_v34  ;;  %v14370_v6 = vunpack.i.l.bf16 %v14369_v34  ;;  %v15822_v34 = vld [vmem:[%s21958_s4 + $0x844] ss:$24 sps:$4 sm:$0xff]  }
 0xa46   : > { %v7247_v42 = vsel %vm6799_vm0, %v7129_v37, %v14371_v39  ;;  %v7023_v45 = vsel %vm6799_vm0, %v6905_v35, %v14370_v6  ;;  %v15825_v35 = vld [vmem:[%s21958_s4 + $0xcc] ss:$24 sps:$4 sm:$0xff]   ;;  %v15820_v37 = vld [vmem:[%s21958_s4 + $0x840] ss:$24 sps:$4 sm:$0xff]  }
 0xa47   : > { %v7248_v5 = vpack.c.bf16 %v7247_v42, %v7247_v42  ;;  %v7024_v62 = vpack.c.bf16 %v7023_v45, %v7023_v45  ;;  %v15823_v39 = vld [vmem:[%s21958_s4 + $0xc8] ss:$24 sps:$4 sm:$0xff]   ;;  %v15828_v6 = vld [vmem:[%s21958_s4 + $0x814] ss:$24 sps:$4 sm:$0xff]  }
 0xa48   : > { %v15831_v42 = vld [vmem:[%s21958_s4 + $0x9c] ss:$24 sps:$4 sm:$0xff]   ;;  %v15826_v45 = vld [vmem:[%s21958_s4 + $0x810] ss:$24 sps:$4 sm:$0xff]  }
 0xa49   : > { %7249 = vst [vmem:[#allocation2 + $0x4] sm:$0xf] %v7248_v5  ;;  %7025 = vst [vmem:[#allocation2] sm:$0xf] %v7024_v62  ;;  %v15829_v5 = vld [vmem:[%s21958_s4 + $0x98] ss:$24 sps:$4 sm:$0xff]   ;;  %v16593_v62 = vpop.eup %16592 }
 0xa4a   : > { %v16595_v48 = vpop.eup %16594 }
 0xa50   : > { %v8146_v58 = vld [vmem:[#allocation2] sm:$0xff] }
 0xa51   : > { %v20155_v59 = vcombine.low %v8146_v58, %v8146_v58  ;;  %v20157_v13 = vcombine.high %v8146_v58, %v8146_v58  ;;  %v15837_v58 = vld [vmem:[%s21958_s4 + $0x6c] ss:$24 sps:$4 sm:$0xff]  }
 0xa53   : > { %9962 = vmatprep.mubr.bf16.mxu0 %v20157_v13 }
 0xa54   : > { %9963 = vmatmul.mubr.bf16.vlgmr.msra.gmra.mxu0 %v20155_v59 }
 0xa55   : > { %10013 = vmatpush1.bf16.msra.mxu0 %v15755_v36 }
 0xa56   : > { %10014 = vmatprep.subr.bf16.mxu0 %v15763_v0  ;;  %v7801_v0 = vmul.f32 %v16593_v62, %v20144_v24  ;;  %v15840_v24 = vld [vmem:[%s21958_s4 + $0x7b4] ss:$24 sps:$4 sm:$0xff]  }
 0xa57   : > { %v15896_v62 = vld [vmem:[%s21958_s4 + $0x18c] ss:$24 sps:$4 sm:$0xff]  }
 0xa59   : > { %10015 = vmatpush1.bf16.msra.mxu0 %v15761_v14  ;;  %v8025_v14 = vmul.f32 %v16595_v48, %v20146_v56  ;;  %v15843_v56 = vld [vmem:[%s21958_s4 + $0x3c] ss:$24 sps:$4 sm:$0xff]   ;;  %v15897_v48 = vld [vmem:[%s21958_s4 + $0x308] ss:$24 sps:$4 sm:$0xff]  }
 0xa5a   : > { %10016 = vmatprep.subr.bf16.mxu0 %v15769_v23 }
 0xa5d   : > { %10017 = vmatpush1.bf16.msra.mxu0 %v15767_v54  ;;  %v15832_v54 = vld [vmem:[%s21958_s4 + $0x7e0] ss:$24 sps:$4 sm:$0xff]  }
 0xa5e   : > { %10018 = vmatprep.subr.bf16.mxu0 %v15775_v49  ;;  %v15835_v49 = vld [vmem:[%s21958_s4 + $0x68] ss:$24 sps:$4 sm:$0xff]  }
 0xa61   : > { %10019 = vmatpush1.bf16.msra.mxu0 %v15773_v9 }
 0xa62   : > { %10020 = vmatprep.subr.bf16.mxu0 %v15781_v55 }
 0xa63   : > { %v14374_v1 = vpop.permute.xlu1 %14373 }
 0xa64   : > { %v14376_v2 = vunpack.i.h.bf16 %v14374_v1  ;;  %v14375_v44 = vunpack.i.l.bf16 %v14374_v1  ;;  %v15849_v1 = vld [vmem:[%s21958_s4 + $0xc] ss:$24 sps:$4 sm:$0xff]  }
 0xa65   : > { %10021 = vmatpush1.bf16.msra.mxu0 %v15779_v10  ;;  %v15841_v10 = vld [vmem:[%s21958_s4 + $0x38] ss:$24 sps:$4 sm:$0xff]  }
 0xa66   : > { %v7695_v60 = vsel %vm6799_vm0, %v7577_v53, %v14376_v2  ;;  %v7471_v27 = vsel %vm6799_vm0, %v7353_v63, %v14375_v44  ;;  %10022 = vmatprep.subr.bf16.mxu0 %v15787_v18  ;;  %v15846_v18 = vld [vmem:[%s21958_s4 + $0x784] ss:$24 sps:$4 sm:$0xff]   ;;  %v15844_v63 = vld [vmem:[%s21958_s4 + $0x780] ss:$24 sps:$4 sm:$0xff]  }
 0xa67   : > { %v7696_v12 = vpack.c.bf16 %v7695_v60, %v7695_v60  ;;  %v7472_v7 = vpack.c.bf16 %v7471_v27, %v7471_v27  ;;  %v15847_v53 = vld [vmem:[%s21958_s4 + $0x8] ss:$24 sps:$4 sm:$0xff]   ;;  %v15854_v2 = vld [vmem:[%s21958_s4 + $0x2dc] ss:$24 sps:$4 sm:$0xff]  }
 0xa68   : > { %v15857_v44 = vld [vmem:[%s21958_s4 + $0x45c] ss:$24 sps:$4 sm:$0xff]  }
 0xa69   : > { %7697 = vst [vmem:[#allocation2 + $0xc] sm:$0xf] %v7696_v12  ;;  %7473 = vst [vmem:[#allocation2 + $0x8] sm:$0xf] %v7472_v7  ;;  %10023 = vmatpush1.bf16.msra.mxu0 %v15785_v33  ;;  %v15855_v12 = vld [vmem:[%s21958_s4 + $0x458] ss:$24 sps:$4 sm:$0xff]  }
 0xa6a   : > { %10024 = vmatprep.subr.bf16.mxu0 %v15793_v30  ;;  %v15852_v30 = vld [vmem:[%s21958_s4 + $0x2d8] ss:$24 sps:$4 sm:$0xff]   ;;  %v15860_v7 = vld [vmem:[%s21958_s4 + $0x2ac] ss:$24 sps:$4 sm:$0xff]  }
 0xa6d   : > { %10025 = vmatpush1.bf16.msra.mxu0 %v15791_v47  ;;  %v15863_v47 = vld [vmem:[%s21958_s4 + $0x42c] ss:$24 sps:$4 sm:$0xff]  }
 0xa6e   : > { %10026 = vmatprep.subr.bf16.mxu0 %v15799_v51  ;;  %v15858_v51 = vld [vmem:[%s21958_s4 + $0x2a8] ss:$24 sps:$4 sm:$0xff]  }
 0xa70   : > { %v8147_v61 = vld [vmem:[#allocation2 + $0x8] sm:$0xff] }
 0xa71   : > { %10027 = vmatpush1.bf16.msra.mxu0 %v15797_v46  ;;  %v20213_v19 = vcombine.low %v8147_v61, %v8147_v61  ;;  %v20215_v57 = vcombine.high %v8147_v61, %v8147_v61  ;;  %v15861_v46 = vld [vmem:[%s21958_s4 + $0x428] ss:$24 sps:$4 sm:$0xff]   ;;  %v15869_v61 = vld [vmem:[%s21958_s4 + $0x3fc] ss:$24 sps:$4 sm:$0xff]  }
 0xa72   : > { %10028 = vmatprep.subr.bf16.mxu0 %v15804_v16  ;;  %v15866_v16 = vld [vmem:[%s21958_s4 + $0x27c] ss:$24 sps:$4 sm:$0xff]  }
 0xa73   : > { %10003 = vmatprep.mubr.bf16.mxu1 %v20215_v57 }
 0xa74   : > { %10004 = vmatmul.mubr.bf16.vlgmr.msra.gmra.mxu1 %v20213_v19 }
 0xa75   : > { %10029 = vmatpush2.bf16.msra.mxu0 %v15802_v11  ;;  %10054 = vmatpush1.bf16.msra.mxu1 %v15805_v15  ;;  %v15864_v11 = vld [vmem:[%s21958_s4 + $0x278] ss:$24 sps:$4 sm:$0xff]  }
 0xa76   : > { %10085 = vmatprep.mubr.bf16.mxu1 %v20157_v13  ;;  %10030 = vmatprep.subr.bf16.mxu0 %v15810_v28  ;;  %v15867_v15 = vld [vmem:[%s21958_s4 + $0x3f8] ss:$24 sps:$4 sm:$0xff]   ;;  %v15872_v28 = vld [vmem:[%s21958_s4 + $0x24c] ss:$24 sps:$4 sm:$0xff]  }
 0xa77   : > { %10055 = vmatprep.subr.bf16.mxu1 %v15813_v38  ;;  %v15875_v38 = vld [vmem:[%s21958_s4 + $0x3cc] ss:$24 sps:$4 sm:$0xff]  }
 0xa79   : > { %10031 = vmatpush2.bf16.msra.mxu0 %v15808_v20  ;;  %10056 = vmatpush1.bf16.msra.mxu1 %v15811_v29  ;;  %v15870_v20 = vld [vmem:[%s21958_s4 + $0x248] ss:$24 sps:$4 sm:$0xff]  }
 0xa7a   : > { %10032 = vmatprep.subr.bf16.mxu0 %v15816_v17  ;;  %10057 = vmatprep.subr.bf16.mxu1 %v15819_v31  ;;  %v15873_v29 = vld [vmem:[%s21958_s4 + $0x3c8] ss:$24 sps:$4 sm:$0xff]   ;;  %v15878_v17 = vld [vmem:[%s21958_s4 + $0x21c] ss:$24 sps:$4 sm:$0xff]  }
 0xa7b   : > { %v15881_v31 = vld [vmem:[%s21958_s4 + $0x39c] ss:$24 sps:$4 sm:$0xff]  }
 0xa7d   : > { %10033 = vmatpush2.bf16.msra.mxu0 %v15814_v25  ;;  %10058 = vmatpush1.bf16.msra.mxu1 %v15817_v26  ;;  %v15876_v25 = vld [vmem:[%s21958_s4 + $0x218] ss:$24 sps:$4 sm:$0xff]  }
 0xa7e   : > { %10034 = vmatprep.subr.bf16.mxu0 %v15822_v34  ;;  %10059 = vmatprep.subr.bf16.mxu1 %v15825_v35  ;;  %v15879_v26 = vld [vmem:[%s21958_s4 + $0x398] ss:$24 sps:$4 sm:$0xff]   ;;  %v15884_v34 = vld [vmem:[%s21958_s4 + $0x1ec] ss:$24 sps:$4 sm:$0xff]  }
 0xa7f   : > { %v15887_v35 = vld [vmem:[%s21958_s4 + $0x36c] ss:$24 sps:$4 sm:$0xff]  }
 0xa81   : > { %10035 = vmatpush2.bf16.msra.mxu0 %v15820_v37  ;;  %10060 = vmatpush1.bf16.msra.mxu1 %v15823_v39  ;;  %v15882_v37 = vld [vmem:[%s21958_s4 + $0x1e8] ss:$24 sps:$4 sm:$0xff]  }
 0xa82   : > { %10036 = vmatprep.subr.bf16.mxu0 %v15828_v6  ;;  %10061 = vmatprep.subr.bf16.mxu1 %v15831_v42  ;;  %v15885_v39 = vld [vmem:[%s21958_s4 + $0x368] ss:$24 sps:$4 sm:$0xff]   ;;  %v15890_v6 = vld [vmem:[%s21958_s4 + $0x1bc] ss:$24 sps:$4 sm:$0xff]  }
 0xa83   : > { %v14379_v36 = vpop.permute.xlu0 %14378  ;;  %v15893_v42 = vld [vmem:[%s21958_s4 + $0x33c] ss:$24 sps:$4 sm:$0xff]  }
 0xa84   : > { %v14381_v23 = vunpack.i.h.bf16 %v14379_v36  ;;  %v14380_v3 = vunpack.i.l.bf16 %v14379_v36  ;;  %v15902_v36 = vld [vmem:[%s21958_s4 + $0x5dc] ss:$24 sps:$4 sm:$0xff]  }
 0xa85   : > { %10037 = vmatpush2.bf16.msra.mxu0 %v15826_v45  ;;  %10062 = vmatpush1.bf16.msra.mxu1 %v15829_v5  ;;  %v15888_v45 = vld [vmem:[%s21958_s4 + $0x1b8] ss:$24 sps:$4 sm:$0xff]  }
 0xa86   : > { %v8143_v9 = vsel %vm6799_vm0, %v8025_v14, %v14381_v23  ;;  %v7919_v55 = vsel %vm6799_vm0, %v7801_v0, %v14380_v3  ;;  %10038 = vmatprep.subr.bf16.mxu0 %v15834_v43  ;;  %10063 = vmatprep.subr.bf16.mxu1 %v15837_v58  ;;  %v15891_v5 = vld [vmem:[%s21958_s4 + $0x338] ss:$24 sps:$4 sm:$0xff]   ;;  %v15899_v43 = vld [vmem:[%s21958_s4 + $0x30c] ss:$24 sps:$4 sm:$0xff]   ;;  %v15894_v58 = vld [vmem:[%s21958_s4 + $0x188] ss:$24 sps:$4 sm:$0xff]  }
 0xa87   : > { %v8144_v50 = vpack.c.bf16 %v8143_v9, %v8143_v9  ;;  %v7920_v4 = vpack.c.bf16 %v7919_v55, %v7919_v55  ;;  %v15905_v0 = vld [vmem:[%s21958_s4 + $0x75c] ss:$24 sps:$4 sm:$0xff]   ;;  %v15900_v14 = vld [vmem:[%s21958_s4 + $0x5d8] ss:$24 sps:$4 sm:$0xff]   ;;  %v15908_v3 = vld [vmem:[%s21958_s4 + $0x5ac] ss:$24 sps:$4 sm:$0xff]  }
 0xa88   : > { %v15903_v23 = vld [vmem:[%s21958_s4 + $0x758] ss:$24 sps:$4 sm:$0xff]   ;;  %v15909_v9 = vld [vmem:[%s21958_s4 + $0x728] ss:$24 sps:$4 sm:$0xff]   ;;  %v15914_v55 = vld [vmem:[%s21958_s4 + $0x57c] ss:$24 sps:$4 sm:$0xff]  }
 0xa89   : > { %8145 = vst [vmem:[#allocation2 + $0x14] sm:$0xf] %v8144_v50  ;;  %7921 = vst [vmem:[#allocation2 + $0x10] sm:$0xf] %v7920_v4  ;;  %10039 = vmatpush2.bf16.msra.mxu0 %v15832_v54  ;;  %10064 = vmatpush1.bf16.msra.mxu1 %v15835_v49  ;;  %v15911_v54 = vld [vmem:[%s21958_s4 + $0x72c] ss:$24 sps:$4 sm:$0xff]  }
 0xa8a   : > { %10040 = vmatprep.subr.bf16.mxu0 %v15840_v24  ;;  %10065 = vmatprep.subr.bf16.mxu1 %v15843_v56  ;;  %v15906_v49 = vld [vmem:[%s21958_s4 + $0x5a8] ss:$24 sps:$4 sm:$0xff]   ;;  %v15917_v24 = vld [vmem:[%s21958_s4 + $0x6fc] ss:$24 sps:$4 sm:$0xff]   ;;  %v15912_v56 = vld [vmem:[%s21958_s4 + $0x578] ss:$24 sps:$4 sm:$0xff]  }
 0xa8b   : > { %v15915_v50 = vld [vmem:[%s21958_s4 + $0x6f8] ss:$24 sps:$4 sm:$0xff]   ;;  %v15920_v4 = vld [vmem:[%s21958_s4 + $0x54c] ss:$24 sps:$4 sm:$0xff]  }
 0xa8d   : > { %10041 = vmatpush2.bf16.msra.mxu0 %v15838_v8  ;;  %10066 = vmatpush1.bf16.msra.mxu1 %v15841_v10  ;;  %v15923_v8 = vld [vmem:[%s21958_s4 + $0x6cc] ss:$24 sps:$4 sm:$0xff]   ;;  %v15918_v10 = vld [vmem:[%s21958_s4 + $0x548] ss:$24 sps:$4 sm:$0xff]  }
 0xa8e   : > { %10042 = vmatprep.subr.bf16.mxu0 %v15846_v18  ;;  %10067 = vmatprep.subr.bf16.mxu1 %v15849_v1  ;;  %v15921_v18 = vld [vmem:[%s21958_s4 + $0x6c8] ss:$24 sps:$4 sm:$0xff]   ;;  %v15926_v1 = vld [vmem:[%s21958_s4 + $0x51c] ss:$24 sps:$4 sm:$0xff]  }
 0xa90   : > { %v8148_v33 = vld [vmem:[#allocation2 + $0x10] sm:$0xff] }
 0xa91   : > { %10043 = vmatpush2.bf16.msra.mxu0 %v15844_v63  ;;  %10068 = vmatpush1.bf16.msra.mxu1 %v15847_v53  ;;  %v20320_v60 = vcombine.low %v8148_v33, %v8148_v33  ;;  %v20322_v27 = vcombine.high %v8148_v33, %v8148_v33  ;;  %v15929_v63 = vld [vmem:[%s21958_s4 + $0x69c] ss:$24 sps:$4 sm:$0xff]   ;;  %v15924_v53 = vld [vmem:[%s21958_s4 + $0x518] ss:$24 sps:$4 sm:$0xff]   ;;  %v15935_v33 = vld [vmem:[%s21958_s4 + $0x66c] ss:$24 sps:$4 sm:$0xff]  }
 0xa92   : > { %10069 = vmatprep.subr.bf16.mxu1 %v15854_v2  ;;  %10094 = vmatprep.subr.bf16.mxu0 %v15857_v44  ;;  %v15927_v2 = vld [vmem:[%s21958_s4 + $0x698] ss:$24 sps:$4 sm:$0xff]   ;;  %v15932_v44 = vld [vmem:[%s21958_s4 + $0x4ec] ss:$24 sps:$4 sm:$0xff]  }
 0xa93   : > { %10044 = vmatprep.mubr.bf16.mxu0 %v20322_v27 }
 0xa94   : > { %10045 = vmatmul.mubr.bf16.vlgmr.msra.gmra.mxu0 %v20320_v60 }
 0xa95   : > { %10070 = vmatpush2.bf16.msra.mxu1 %v15852_v30  ;;  %10095 = vmatpush1.bf16.msra.mxu0 %v15855_v12  ;;  %v15930_v30 = vld [vmem:[%s21958_s4 + $0x4e8] ss:$24 sps:$4 sm:$0xff]  }
 0xa96   : > { %10126 = vmatprep.mubr.bf16.mxu0 %v20215_v57  ;;  %10071 = vmatprep.subr.bf16.mxu1 %v15860_v7  ;;  %v15933_v12 = vld [vmem:[%s21958_s4 + $0x668] ss:$24 sps:$4 sm:$0xff]   ;;  %v15938_v7 = vld [vmem:[%s21958_s4 + $0x4bc] ss:$24 sps:$4 sm:$0xff]  }
 0xa97   : > { %10096 = vmatprep.subr.bf16.mxu0 %v15863_v47  ;;  %v15941_v47 = vld [vmem:[%s21958_s4 + $0x63c] ss:$24 sps:$4 sm:$0xff]  }
 0xa99   : > { %10072 = vmatpush2.bf16.msra.mxu1 %v15858_v51  ;;  %10097 = vmatpush1.bf16.msra.mxu0 %v15861_v46  ;;  %v15936_v51 = vld [vmem:[%s21958_s4 + $0x4b8] ss:$24 sps:$4 sm:$0xff]  }
 0xa9a   : > { %10073 = vmatprep.subr.bf16.mxu1 %v15866_v16  ;;  %10098 = vmatprep.subr.bf16.mxu0 %v15869_v61  ;;  %v15939_v46 = vld [vmem:[%s21958_s4 + $0x638] ss:$24 sps:$4 sm:$0xff]   ;;  %v15944_v16 = vld [vmem:[%s21958_s4 + $0x48c] ss:$24 sps:$4 sm:$0xff]  }
 0xa9b   : > { %v15947_v61 = vld [vmem:[%s21958_s4 + $0x60c] ss:$24 sps:$4 sm:$0xff]  }
 0xa9d   : > { %10074 = vmatpush2.bf16.msra.mxu1 %v15864_v11  ;;  %10099 = vmatpush1.bf16.msra.mxu0 %v15867_v15  ;;  %v15942_v11 = vld [vmem:[%s21958_s4 + $0x488] ss:$24 sps:$4 sm:$0xff]  }
 0xa9e   : > { %10075 = vmatprep.subr.bf16.mxu1 %v15872_v28  ;;  %10100 = vmatprep.subr.bf16.mxu0 %v15875_v38  ;;  %v15945_v15 = vld [vmem:[%s21958_s4 + $0x608] ss:$24 sps:$4 sm:$0xff]   ;;  %v15950_v28 = vld [vmem:[%s21958_s4 + $0x8dc] ss:$24 sps:$4 sm:$0xff]  }
 0xa9f   : > { %v15953_v38 = vld [vmem:[%s21958_s4 + $0x164] ss:$24 sps:$4 sm:$0xff]  }
 0xaa1   : > { %10076 = vmatpush2.bf16.msra.mxu1 %v15870_v20  ;;  %10101 = vmatpush1.bf16.msra.mxu0 %v15873_v29  ;;  %v15948_v20 = vld [vmem:[%s21958_s4 + $0x8d8] ss:$24 sps:$4 sm:$0xff]  }
 0xaa2   : > { %10077 = vmatprep.subr.bf16.mxu1 %v15878_v17  ;;  %10102 = vmatprep.subr.bf16.mxu0 %v15881_v31  ;;  %v15951_v29 = vld [vmem:[%s21958_s4 + $0x160] ss:$24 sps:$4 sm:$0xff]   ;;  %v15956_v17 = vld [vmem:[%s21958_s4 + $0x8ac] ss:$24 sps:$4 sm:$0xff]  }
 0xaa3   : > { %v15959_v31 = vld [vmem:[%s21958_s4 + $0x134] ss:$24 sps:$4 sm:$0xff]  }
 0xaa5   : > { %10078 = vmatpush2.bf16.msra.mxu1 %v15876_v25  ;;  %10103 = vmatpush1.bf16.msra.mxu0 %v15879_v26  ;;  %v15954_v25 = vld [vmem:[%s21958_s4 + $0x8a8] ss:$24 sps:$4 sm:$0xff]  }
 0xaa6   : > { %10079 = vmatprep.subr.bf16.mxu1 %v15884_v34  ;;  %10104 = vmatprep.subr.bf16.mxu0 %v15887_v35  ;;  %v15957_v26 = vld [vmem:[%s21958_s4 + $0x130] ss:$24 sps:$4 sm:$0xff]   ;;  %v15962_v34 = vld [vmem:[%s21958_s4 + $0x87c] ss:$24 sps:$4 sm:$0xff]  }
 0xaa7   : > { %v15965_v35 = vld [vmem:[%s21958_s4 + $0x104] ss:$24 sps:$4 sm:$0xff]  }
 0xaa9   : > { %10080 = vmatpush2.bf16.msra.mxu1 %v15882_v37  ;;  %10105 = vmatpush1.bf16.msra.mxu0 %v15885_v39  ;;  %v15960_v37 = vld [vmem:[%s21958_s4 + $0x878] ss:$24 sps:$4 sm:$0xff]   ;;  %v15968_v39 = vld [vmem:[%s21958_s4 + $0x84c] ss:$24 sps:$4 sm:$0xff]  }
 0xaaa   : > { %10081 = vmatprep.subr.bf16.mxu1 %v15890_v6  ;;  %10106 = vmatprep.subr.bf16.mxu0 %v15893_v42  ;;  %v15971_v6 = vld [vmem:[%s21958_s4 + $0xd4] ss:$24 sps:$4 sm:$0xff]   ;;  %v15966_v42 = vld [vmem:[%s21958_s4 + $0x848] ss:$24 sps:$4 sm:$0xff]  }
 0xaad   : > { %10082 = vmatpush2.bf16.msra.mxu1 %v15888_v45  ;;  %10107 = vmatpush1.bf16.msra.mxu0 %v15891_v5  ;;  %v15969_v45 = vld [vmem:[%s21958_s4 + $0xd0] ss:$24 sps:$4 sm:$0xff]   ;;  %v15974_v5 = vld [vmem:[%s21958_s4 + $0x81c] ss:$24 sps:$4 sm:$0xff]  }
 0xaae   : > { %10083 = vmatprep.subr.bf16.mxu1 %v15896_v62  ;;  %10108 = vmatprep.subr.bf16.mxu0 %v15899_v43  ;;  %v15977_v62 = vld [vmem:[%s21958_s4 + $0xa4] ss:$24 sps:$4 sm:$0xff]   ;;  %v15972_v43 = vld [vmem:[%s21958_s4 + $0x818] ss:$24 sps:$4 sm:$0xff]  }
 0xab1   : > { %10084 = vmatpush2.bf16.msra.mxu1 %v15894_v58  ;;  %10109 = vmatpush1.bf16.msra.mxu0 %v15897_v48  ;;  %v15975_v58 = vld [vmem:[%s21958_s4 + $0xa0] ss:$24 sps:$4 sm:$0xff]   ;;  %v15980_v48 = vld [vmem:[%s21958_s4 + $0x7ec] ss:$24 sps:$4 sm:$0xff]  }
 0xab2   : > { %10110 = vmatprep.subr.bf16.mxu0 %v15902_v36  ;;  %10135 = vmatprep.subr.bf16.mxu1 %v15905_v0  ;;  %v15983_v36 = vld [vmem:[%s21958_s4 + $0x74] ss:$24 sps:$4 sm:$0xff]   ;;  %v15978_v0 = vld [vmem:[%s21958_s4 + $0x7e8] ss:$24 sps:$4 sm:$0xff]  }
 0xab4   : > { %10086 = vmatmul.mubr.bf16.vlgmr.msra.gmra.mxu1 %v20155_v59 }
 0xab5   : > { %10111 = vmatpush2.bf16.msra.mxu0 %v15900_v14  ;;  %10136 = vmatpush1.bf16.msra.mxu1 %v15903_v23  ;;  %v15981_v14 = vld [vmem:[%s21958_s4 + $0x70] ss:$24 sps:$4 sm:$0xff]   ;;  %v15986_v23 = vld [vmem:[%s21958_s4 + $0x7bc] ss:$24 sps:$4 sm:$0xff]  }
 0xab6   : > { %10167 = vmatprep.mubr.bf16.mxu1 %v20322_v27  ;;  %10112 = vmatprep.subr.bf16.mxu0 %v15908_v3  ;;  %v15989_v3 = vld [vmem:[%s21958_s4 + $0x44] ss:$24 sps:$4 sm:$0xff]  }
 0xab7   : > { %10137 = vmatprep.subr.bf16.mxu1 %v15911_v54  ;;  %v15984_v54 = vld [vmem:[%s21958_s4 + $0x7b8] ss:$24 sps:$4 sm:$0xff]  }
 0xab9   : > { %10113 = vmatpush2.bf16.msra.mxu0 %v15906_v49  ;;  %10138 = vmatpush1.bf16.msra.mxu1 %v15909_v9  ;;  %v15987_v49 = vld [vmem:[%s21958_s4 + $0x40] ss:$24 sps:$4 sm:$0xff]   ;;  %v15992_v9 = vld [vmem:[%s21958_s4 + $0x78c] ss:$24 sps:$4 sm:$0xff]  }
 0xaba   : > { %10114 = vmatprep.subr.bf16.mxu0 %v15914_v55  ;;  %10139 = vmatprep.subr.bf16.mxu1 %v15917_v24  ;;  %v15995_v55 = vld [vmem:[%s21958_s4 + $0x14] ss:$24 sps:$4 sm:$0xff]   ;;  %v15990_v24 = vld [vmem:[%s21958_s4 + $0x788] ss:$24 sps:$4 sm:$0xff]  }
 0xabd   : > { %10115 = vmatpush2.bf16.msra.mxu0 %v15912_v56  ;;  %10140 = vmatpush1.bf16.msra.mxu1 %v15915_v50  ;;  %v15993_v56 = vld [vmem:[%s21958_s4 + $0x10] ss:$24 sps:$4 sm:$0xff]   ;;  %v15998_v50 = vld [vmem:[%s21958_s4 + $0x2e4] ss:$24 sps:$4 sm:$0xff]  }
 0xabe   : > { %10116 = vmatprep.subr.bf16.mxu0 %v15920_v4  ;;  %10141 = vmatprep.subr.bf16.mxu1 %v15923_v8  ;;  %v16001_v4 = vld [vmem:[%s21958_s4 + $0x464] ss:$24 sps:$4 sm:$0xff]   ;;  %v15996_v8 = vld [vmem:[%s21958_s4 + $0x2e0] ss:$24 sps:$4 sm:$0xff]  }
 0xac1   : > { %10117 = vmatpush2.bf16.msra.mxu0 %v15918_v10  ;;  %10142 = vmatpush1.bf16.msra.mxu1 %v15921_v18  ;;  %v15999_v10 = vld [vmem:[%s21958_s4 + $0x460] ss:$24 sps:$4 sm:$0xff]   ;;  %v16004_v18 = vld [vmem:[%s21958_s4 + $0x2b4] ss:$24 sps:$4 sm:$0xff]  }
 0xac2   : > { %10118 = vmatprep.subr.bf16.mxu0 %v15926_v1  ;;  %10143 = vmatprep.subr.bf16.mxu1 %v15929_v63  ;;  %v16007_v1 = vld [vmem:[%s21958_s4 + $0x434] ss:$24 sps:$4 sm:$0xff]   ;;  %v16002_v63 = vld [vmem:[%s21958_s4 + $0x2b0] ss:$24 sps:$4 sm:$0xff]  }
 0xac5   : > { %10119 = vmatpush2.bf16.msra.mxu0 %v15924_v53  ;;  %10144 = vmatpush1.bf16.msra.mxu1 %v15927_v2  ;;  %v16005_v53 = vld [vmem:[%s21958_s4 + $0x430] ss:$24 sps:$4 sm:$0xff]   ;;  %v16010_v2 = vld [vmem:[%s21958_s4 + $0x284] ss:$24 sps:$4 sm:$0xff]  }
 0xac6   : > { %10120 = vmatprep.subr.bf16.mxu0 %v15932_v44  ;;  %10145 = vmatprep.subr.bf16.mxu1 %v15935_v33  ;;  %v16013_v44 = vld [vmem:[%s21958_s4 + $0x404] ss:$24 sps:$4 sm:$0xff]   ;;  %v16008_v33 = vld [vmem:[%s21958_s4 + $0x280] ss:$24 sps:$4 sm:$0xff]  }
 0xac9   : > { %10121 = vmatpush2.bf16.msra.mxu0 %v15930_v30  ;;  %10146 = vmatpush1.bf16.msra.mxu1 %v15933_v12  ;;  %v16016_v30 = vld [vmem:[%s21958_s4 + $0x254] ss:$24 sps:$4 sm:$0xff]  }
 0xaca   : > { %10122 = vmatprep.subr.bf16.mxu0 %v15938_v7  ;;  %10147 = vmatprep.subr.bf16.mxu1 %v15941_v47  ;;  %v16019_v12 = vld [vmem:[%s21958_s4 + $0x3d4] ss:$24 sps:$4 sm:$0xff]   ;;  %v16014_v7 = vld [vmem:[%s21958_s4 + $0x250] ss:$24 sps:$4 sm:$0xff]  }
 0xacb   : > { %v16017_v47 = vld [vmem:[%s21958_s4 + $0x3d0] ss:$24 sps:$4 sm:$0xff]  }
 0xacd   : > { %10123 = vmatpush2.bf16.msra.mxu0 %v15936_v51  ;;  %10148 = vmatpush1.bf16.msra.mxu1 %v15939_v46  ;;  %v16022_v51 = vld [vmem:[%s21958_s4 + $0x224] ss:$24 sps:$4 sm:$0xff]  }
 0xace   : > { %10124 = vmatprep.subr.bf16.mxu0 %v15944_v16  ;;  %10149 = vmatprep.subr.bf16.mxu1 %v15947_v61  ;;  %v16025_v46 = vld [vmem:[%s21958_s4 + $0x3a4] ss:$24 sps:$4 sm:$0xff]   ;;  %v16020_v16 = vld [vmem:[%s21958_s4 + $0x220] ss:$24 sps:$4 sm:$0xff]  }
 0xacf   : > { %v16023_v61 = vld [vmem:[%s21958_s4 + $0x3a0] ss:$24 sps:$4 sm:$0xff]  }
 0xad1   : > { %10125 = vmatpush2.bf16.msra.mxu0 %v15942_v11  ;;  %10150 = vmatpush1.bf16.msra.mxu1 %v15945_v15  ;;  %v16028_v11 = vld [vmem:[%s21958_s4 + $0x1f4] ss:$24 sps:$4 sm:$0xff]  }
 0xad2   : > { %10151 = vmatprep.subr.bf16.mxu1 %v15950_v28  ;;  %10176 = vmatprep.subr.bf16.mxu0 %v15953_v38  ;;  %v16031_v15 = vld [vmem:[%s21958_s4 + $0x374] ss:$24 sps:$4 sm:$0xff]   ;;  %v16026_v28 = vld [vmem:[%s21958_s4 + $0x1f0] ss:$24 sps:$4 sm:$0xff]  }
 0xad3   : > { %v16029_v38 = vld [vmem:[%s21958_s4 + $0x370] ss:$24 sps:$4 sm:$0xff]  }
 0xad4   : > { %10127 = vmatmul.mubr.bf16.vlgmr.msra.gmra.mxu0 %v20213_v19 }
 0xad5   : > { %10152 = vmatpush2.bf16.msra.mxu1 %v15948_v20  ;;  %10177 = vmatpush1.bf16.msra.mxu0 %v15951_v29  ;;  %v16034_v20 = vld [vmem:[%s21958_s4 + $0x1c4] ss:$24 sps:$4 sm:$0xff]  }
 0xad6   : > { %10208 = vmatprep.mubr.bf16.mxu0 %v20157_v13  ;;  %10153 = vmatprep.subr.bf16.mxu1 %v15956_v17  ;;  %v15963_v13 = vld [vmem:[%s21958_s4 + $0x100] ss:$24 sps:$4 sm:$0xff]   ;;  %v16037_v29 = vld [vmem:[%s21958_s4 + $0x344] ss:$24 sps:$4 sm:$0xff]  }
 0xad7   : > { %10178 = vmatprep.subr.bf16.mxu0 %v15959_v31  ;;  %v16032_v17 = vld [vmem:[%s21958_s4 + $0x1c0] ss:$24 sps:$4 sm:$0xff]  }
 0xad8   : > { %v16035_v31 = vld [vmem:[%s21958_s4 + $0x340] ss:$24 sps:$4 sm:$0xff]  }
 0xad9   : > { %10154 = vmatpush2.bf16.msra.mxu1 %v15954_v25  ;;  %10179 = vmatpush1.bf16.msra.mxu0 %v15957_v26  ;;  %v16040_v25 = vld [vmem:[%s21958_s4 + $0x194] ss:$24 sps:$4 sm:$0xff]  }
 0xada   : > { %10155 = vmatprep.subr.bf16.mxu1 %v15962_v34  ;;  %10180 = vmatprep.subr.bf16.mxu0 %v15965_v35  ;;  %v16043_v26 = vld [vmem:[%s21958_s4 + $0x314] ss:$24 sps:$4 sm:$0xff]   ;;  %v16038_v34 = vld [vmem:[%s21958_s4 + $0x190] ss:$24 sps:$4 sm:$0xff]  }
 0xadb   : > { %v16041_v35 = vld [vmem:[%s21958_s4 + $0x310] ss:$24 sps:$4 sm:$0xff]  }
 0xadd   : > { %10156 = vmatpush2.bf16.msra.mxu1 %v15960_v37  ;;  %10181 = vmatpush1.bf16.msra.mxu0 %v15963_v13  ;;  %v16046_v37 = vld [vmem:[%s21958_s4 + $0x5e4] ss:$24 sps:$4 sm:$0xff]  }
 0xade   : > { %10157 = vmatprep.subr.bf16.mxu1 %v15968_v39  ;;  %10182 = vmatprep.subr.bf16.mxu0 %v15971_v6  ;;  %v16049_v13 = vld [vmem:[%s21958_s4 + $0x764] ss:$24 sps:$4 sm:$0xff]   ;;  %v16044_v39 = vld [vmem:[%s21958_s4 + $0x5e0] ss:$24 sps:$4 sm:$0xff]  }
 0xadf   : > { %v16047_v6 = vld [vmem:[%s21958_s4 + $0x760] ss:$24 sps:$4 sm:$0xff]  }
 0xae1   : > { %10158 = vmatpush2.bf16.msra.mxu1 %v15966_v42  ;;  %10183 = vmatpush1.bf16.msra.mxu0 %v15969_v45  ;;  %v16052_v42 = vld [vmem:[%s21958_s4 + $0x5b4] ss:$24 sps:$4 sm:$0xff]  }
 0xae2   : > { %10159 = vmatprep.subr.bf16.mxu1 %v15974_v5  ;;  %10184 = vmatprep.subr.bf16.mxu0 %v15977_v62  ;;  %v16055_v45 = vld [vmem:[%s21958_s4 + $0x734] ss:$24 sps:$4 sm:$0xff]   ;;  %v16050_v62 = vld [vmem:[%s21958_s4 + $0x5b0] ss:$24 sps:$4 sm:$0xff]  }
 0xae5   : > { %10160 = vmatpush2.bf16.msra.mxu1 %v15972_v43  ;;  %10185 = vmatpush1.bf16.msra.mxu0 %v15975_v58  ;;  %v16053_v43 = vld [vmem:[%s21958_s4 + $0x730] ss:$24 sps:$4 sm:$0xff]  }
 0xae6   : > { %10161 = vmatprep.subr.bf16.mxu1 %v15980_v48  ;;  %10186 = vmatprep.subr.bf16.mxu0 %v15983_v36  ;;  %v16061_v48 = vld [vmem:[%s21958_s4 + $0x704] ss:$24 sps:$4 sm:$0xff]  }
 0xae9   : > { %10162 = vmatpush2.bf16.msra.mxu1 %v15978_v0  ;;  %10187 = vmatpush1.bf16.msra.mxu0 %v15981_v14  ;;  %v16056_v0 = vld [vmem:[%s21958_s4 + $0x580] ss:$24 sps:$4 sm:$0xff]  }
 0xaea   : > { %10163 = vmatprep.subr.bf16.mxu1 %v15986_v23  ;;  %10188 = vmatprep.subr.bf16.mxu0 %v15989_v3  ;;  %v16064_v23 = vld [vmem:[%s21958_s4 + $0x554] ss:$24 sps:$4 sm:$0xff]  }
 0xaeb   : > { %v16067_v3 = vld [vmem:[%s21958_s4 + $0x6d4] ss:$24 sps:$4 sm:$0xff]  }
 0xaed   : > { %10164 = vmatpush2.bf16.msra.mxu1 %v15984_v54  ;;  %10189 = vmatpush1.bf16.msra.mxu0 %v15987_v49  ;;  %v16062_v54 = vld [vmem:[%s21958_s4 + $0x550] ss:$24 sps:$4 sm:$0xff]  }
 0xaee   : > { %10165 = vmatprep.subr.bf16.mxu1 %v15992_v9  ;;  %10190 = vmatprep.subr.bf16.mxu0 %v15995_v55  ;;  %v16065_v49 = vld [vmem:[%s21958_s4 + $0x6d0] ss:$24 sps:$4 sm:$0xff]   ;;  %v16070_v9 = vld [vmem:[%s21958_s4 + $0x524] ss:$24 sps:$4 sm:$0xff]  }
 0xaef   : > { %v16073_v55 = vld [vmem:[%s21958_s4 + $0x6a4] ss:$24 sps:$4 sm:$0xff]  }
 0xaf1   : > { %10166 = vmatpush2.bf16.msra.mxu1 %v15990_v24  ;;  %10191 = vmatpush1.bf16.msra.mxu0 %v15993_v56  ;;  %v16068_v24 = vld [vmem:[%s21958_s4 + $0x520] ss:$24 sps:$4 sm:$0xff]  }
 0xaf2   : > { %10192 = vmatprep.subr.bf16.mxu0 %v15998_v50  ;;  %10217 = vmatprep.subr.bf16.mxu1 %v16001_v4  ;;  %v16071_v56 = vld [vmem:[%s21958_s4 + $0x6a0] ss:$24 sps:$4 sm:$0xff]   ;;  %v16076_v50 = vld [vmem:[%s21958_s4 + $0x4f4] ss:$24 sps:$4 sm:$0xff]  }
 0xaf3   : > { %v16079_v4 = vld [vmem:[%s21958_s4 + $0x674] ss:$24 sps:$4 sm:$0xff]  }
 0xaf4   : > { %10168 = vmatmul.mubr.bf16.vlgmr.msra.gmra.mxu1 %v20320_v60 }
 0xaf5   : > { %10193 = vmatpush2.bf16.msra.mxu0 %v15996_v8  ;;  %10218 = vmatpush1.bf16.msra.mxu1 %v15999_v10  ;;  %v16074_v8 = vld [vmem:[%s21958_s4 + $0x4f0] ss:$24 sps:$4 sm:$0xff]  }
 0xaf6   : > { %10249 = vmatprep.mubr.bf16.mxu1 %v20215_v57  ;;  %10194 = vmatprep.subr.bf16.mxu0 %v16004_v18  ;;  %v16011_v57 = vld [vmem:[%s21958_s4 + $0x400] ss:$24 sps:$4 sm:$0xff]   ;;  %v16077_v10 = vld [vmem:[%s21958_s4 + $0x670] ss:$24 sps:$4 sm:$0xff]   ;;  %v16082_v18 = vld [vmem:[%s21958_s4 + $0x4c4] ss:$24 sps:$4 sm:$0xff]  }
 0xaf7   : > { %10219 = vmatprep.subr.bf16.mxu1 %v16007_v1  ;;  %v16085_v1 = vld [vmem:[%s21958_s4 + $0x644] ss:$24 sps:$4 sm:$0xff]  }
 0xaf9   : > { %10195 = vmatpush2.bf16.msra.mxu0 %v16002_v63  ;;  %10220 = vmatpush1.bf16.msra.mxu1 %v16005_v53  ;;  %v16080_v63 = vld [vmem:[%s21958_s4 + $0x4c0] ss:$24 sps:$4 sm:$0xff]  }
 0xafa   : > { %10196 = vmatprep.subr.bf16.mxu0 %v16010_v2  ;;  %10221 = vmatprep.subr.bf16.mxu1 %v16013_v44  ;;  %v16083_v53 = vld [vmem:[%s21958_s4 + $0x640] ss:$24 sps:$4 sm:$0xff]   ;;  %v16088_v2 = vld [vmem:[%s21958_s4 + $0x494] ss:$24 sps:$4 sm:$0xff]  }
 0xafb   : > { %v16091_v44 = vld [vmem:[%s21958_s4 + $0x614] ss:$24 sps:$4 sm:$0xff]  }
 0xafd   : > { %10197 = vmatpush2.bf16.msra.mxu0 %v16008_v33  ;;  %10222 = vmatpush1.bf16.msra.mxu1 %v16011_v57  ;;  %v16086_v33 = vld [vmem:[%s21958_s4 + $0x490] ss:$24 sps:$4 sm:$0xff]  }
 0xafe   : > { %10198 = vmatprep.subr.bf16.mxu0 %v16016_v30  ;;  %10223 = vmatprep.subr.bf16.mxu1 %v16019_v12  ;;  %v16089_v57 = vld [vmem:[%s21958_s4 + $0x610] ss:$24 sps:$4 sm:$0xff]   ;;  %v16094_v30 = vld [vmem:[%s21958_s4 + $0x8e4] ss:$24 sps:$4 sm:$0xff]   ;;  %v16097_v12 = vld [vmem:[%s21960_s6 + $0x154] ss:$24 sps:$4 sm:$0xff]  }
 0xb01   : > { %10199 = vmatpush2.bf16.msra.mxu0 %v16014_v7  ;;  %10224 = vmatpush1.bf16.msra.mxu1 %v16017_v47  ;;  %v16092_v7 = vld [vmem:[%s21958_s4 + $0x8e0] ss:$24 sps:$4 sm:$0xff]   ;;  %v16095_v47 = vld [vmem:[%s21960_s6 + $0x150] ss:$24 sps:$4 sm:$0xff]  }
 0xb02   : > { %10200 = vmatprep.subr.bf16.mxu0 %v16022_v51  ;;  %10225 = vmatprep.subr.bf16.mxu1 %v16025_v46  ;;  %v16100_v51 = vld [vmem:[%s21958_s4 + $0x8b4] ss:$24 sps:$4 sm:$0xff]   ;;  %v16103_v46 = vld [vmem:[%s21960_s6 + $0x124] ss:$24 sps:$4 sm:$0xff]  }
 0xb05   : > { %10201 = vmatpush2.bf16.msra.mxu0 %v16020_v16  ;;  %10226 = vmatpush1.bf16.msra.mxu1 %v16023_v61  ;;  %v16098_v61 = vld [vmem:[%s21958_s4 + $0x8b0] ss:$24 sps:$4 sm:$0xff]  }
 0xb06   : > { %10202 = vmatprep.subr.bf16.mxu0 %v16028_v11  ;;  %10227 = vmatprep.subr.bf16.mxu1 %v16031_v15  ;;  %v16101_v11 = vld [vmem:[%s21960_s6 + $0x120] ss:$24 sps:$4 sm:$0xff]  }
 0xb09   : > { %10203 = vmatpush2.bf16.msra.mxu0 %v16026_v28  ;;  %10228 = vmatpush1.bf16.msra.mxu1 %v16029_v38  ;;  %v16109_v28 = vld [vmem:[%s21960_s6 + $0xf4] ss:$24 sps:$4 sm:$0xff]  }
 0xb0a   : > { %10204 = vmatprep.subr.bf16.mxu0 %v16034_v20  ;;  %10229 = vmatprep.subr.bf16.mxu1 %v16037_v29  ;;  %v16104_v20 = vld [vmem:[%s21958_s4 + $0x880] ss:$24 sps:$4 sm:$0xff]   ;;  %v16107_v29 = vld [vmem:[%s21960_s6 + $0xf0] ss:$24 sps:$4 sm:$0xff]  }
 0xb0d   : > { %10205 = vmatpush2.bf16.msra.mxu0 %v16032_v17  ;;  %10230 = vmatpush1.bf16.msra.mxu1 %v16035_v31  ;;  %v16112_v31 = vld [vmem:[%s21958_s4 + $0x854] ss:$24 sps:$4 sm:$0xff]  }
 0xb0e   : > { %10206 = vmatprep.subr.bf16.mxu0 %v16040_v25  ;;  %10231 = vmatprep.subr.bf16.mxu1 %v16043_v26  ;;  %v16115_v25 = vld [vmem:[%s21960_s6 + $0xc4] ss:$24 sps:$4 sm:$0xff]   ;;  %v16110_v26 = vld [vmem:[%s21958_s4 + $0x850] ss:$24 sps:$4 sm:$0xff]  }
 0xb11   : > { %10207 = vmatpush2.bf16.msra.mxu0 %v16038_v34  ;;  %10232 = vmatpush1.bf16.msra.mxu1 %v16041_v35  ;;  %v16113_v34 = vld [vmem:[%s21960_s6 + $0xc0] ss:$24 sps:$4 sm:$0xff]   ;;  %v16118_v35 = vld [vmem:[%s21958_s4 + $0x824] ss:$24 sps:$4 sm:$0xff]  }
 0xb12   : > { %10233 = vmatprep.subr.bf16.mxu1 %v16046_v37  ;;  %10258 = vmatprep.subr.bf16.mxu0 %v16049_v13  ;;  %v16121_v37 = vld [vmem:[%s21960_s6 + $0x94] ss:$24 sps:$4 sm:$0xff]   ;;  %v16116_v13 = vld [vmem:[%s21958_s4 + $0x820] ss:$24 sps:$4 sm:$0xff]  }
 0xb14   : > { %10209 = vmatmul.mubr.bf16.vlgmr.msra.gmra.mxu0 %v20155_v59  ;;  %v20730_v5 = vpop.f32.mrf.mxu0  ;;  %v16058_v59 = vld [vmem:[%s21958_s4 + $0x584] ss:$24 sps:$4 sm:$0xff]  }
 0xb15   : > { %10234 = vmatpush2.bf16.msra.mxu1 %v16044_v39  ;;  %10259 = vmatpush1.bf16.msra.mxu0 %v16047_v6  ;;  %v16119_v39 = vld [vmem:[%s21960_s6 + $0x90] ss:$24 sps:$4 sm:$0xff]   ;;  %v16124_v6 = vld [vmem:[%s21958_s4 + $0x7f4] ss:$24 sps:$4 sm:$0xff]  }
 0xb16   : > { %10290 = vmatprep.mubr.bf16.mxu0 %v20322_v27  ;;  %v20739_v58 = vpop.f32.mrf.mxu0  ;;  %10235 = vmatprep.subr.bf16.mxu1 %v16052_v42  ;;  %v16059_v27 = vld [vmem:[%s21958_s4 + $0x700] ss:$24 sps:$4 sm:$0xff]   ;;  %v16127_v42 = vld [vmem:[%s21960_s6 + $0x64] ss:$24 sps:$4 sm:$0xff]  }
 0xb17   : > { %10260 = vmatprep.subr.bf16.mxu0 %v16055_v45  ;;  %v16122_v45 = vld [vmem:[%s21958_s4 + $0x7f0] ss:$24 sps:$4 sm:$0xff]  }
 0xb18   : > { %v9968_v36 = vpop.f32.mrf.mxu0 }
 0xb19   : > { %10236 = vmatpush2.bf16.msra.mxu1 %v16050_v62  ;;  %10261 = vmatpush1.bf16.msra.mxu0 %v16053_v43  ;;  %v16125_v62 = vld [vmem:[%s21960_s6 + $0x60] ss:$24 sps:$4 sm:$0xff]   ;;  %v16130_v43 = vld [vmem:[%s21958_s4 + $0x7c4] ss:$24 sps:$4 sm:$0xff]   ;;  %v16131_v36 = vld [vmem:[%s21960_s6 + $0x30] ss:$24 sps:$4 sm:$0xff]  }
 0xb1a   : > { %v9969_v14 = vpop.f32.mrf.mxu0  ;;  %10237 = vmatprep.subr.bf16.mxu1 %v16058_v59  ;;  %10262 = vmatprep.subr.bf16.mxu0 %v16061_v48  ;;  %v16133_v59 = vld [vmem:[%s21960_s6 + $0x34] ss:$24 sps:$4 sm:$0xff]   ;;  %v16128_v48 = vld [vmem:[%s21958_s4 + $0x7c0] ss:$24 sps:$4 sm:$0xff]  }
 0xb1b   : > { %v16134_v14 = vld [vmem:[%s21958_s4 + $0x790] ss:$24 sps:$4 sm:$0xff]  }
 0xb1d   : > { %10238 = vmatpush2.bf16.msra.mxu1 %v16056_v0  ;;  %10263 = vmatpush1.bf16.msra.mxu0 %v16059_v27  ;;  %v16136_v0 = vld [vmem:[%s21958_s4 + $0x794] ss:$24 sps:$4 sm:$0xff]   ;;  %v16139_v27 = vld [vmem:[%s21960_s6 + $0x4] ss:$24 sps:$4 sm:$0xff]  }
 0xb1e   : > { %10239 = vmatprep.subr.bf16.mxu1 %v16064_v23  ;;  %10264 = vmatprep.subr.bf16.mxu0 %v16067_v3  ;;  %v16137_v23 = vld [vmem:[%s21960_s6] ss:$24 sps:$4 sm:$0xff]  }
 0xb1f   : > { %v20917_v3 = vld [vmem:[%s21959_s5] sm:$0x3f] }
 0xb21   : > { %10240 = vmatpush2.bf16.msra.mxu1 %v16062_v54  ;;  %10265 = vmatpush1.bf16.msra.mxu0 %v16065_v49  ;;  %v16142_v54 = vld [vmem:[%s21960_s6 + $0x2d4] ss:$24 sps:$4 sm:$0xff]  }
 0xb22   : > { %10241 = vmatprep.subr.bf16.mxu1 %v16070_v9  ;;  %10266 = vmatprep.subr.bf16.mxu0 %v16073_v55  ;;  %v16166_v49 = vld [vmem:[%s21960_s6 + $0x454] ss:$24 sps:$4 sm:$0xff]   ;;  %v8446_v9 = vrot.slane %v20917_v3, %v17597_v32  ;;  %v16140_v55 = vld [vmem:[%s21960_s6 + $0x2d0] ss:$24 sps:$4 sm:$0xff]  }
 0xb25   : > { %10242 = vmatpush2.bf16.msra.mxu1 %v16068_v24  ;;  %10267 = vmatpush1.bf16.msra.mxu0 %v16071_v56  ;;  %v16164_v24 = vld [vmem:[%s21960_s6 + $0x450] ss:$24 sps:$4 sm:$0xff]   ;;  %v16145_v56 = vld [vmem:[%s21960_s6 + $0x2a4] ss:$24 sps:$4 sm:$0xff]  }
 0xb26   : > { %10243 = vmatprep.subr.bf16.mxu1 %v16076_v50  ;;  %10268 = vmatprep.subr.bf16.mxu0 %v16079_v4  ;;  %v16169_v50 = vld [vmem:[%s21960_s6 + $0x424] ss:$24 sps:$4 sm:$0xff]   ;;  %v9967_v4 = vadd.f32 %v20739_v58, %v8446_v9  ;;  %v16148_v58 = vld [vmem:[%s21960_s6 + $0x274] ss:$24 sps:$4 sm:$0xff]   ;;  %v16191_v9 = vld [vmem:[%s21960_s6 + $0x5a0] ss:$24 sps:$4 sm:$0xff]  }
 0xb29   : > { %10244 = vmatpush2.bf16.msra.mxu1 %v16074_v8  ;;  %10269 = vmatpush1.bf16.msra.mxu0 %v16077_v10 }
 0xb2a   : > { %10245 = vmatprep.subr.bf16.mxu1 %v16082_v18  ;;  %10270 = vmatprep.subr.bf16.mxu0 %v16085_v1  ;;  %v16143_v18 = vld [vmem:[%s21960_s6 + $0x2a0] ss:$24 sps:$4 sm:$0xff]  }
 0xb2b   : > { %v16167_v1 = vld [vmem:[%s21960_s6 + $0x420] ss:$24 sps:$4 sm:$0xff]  }
 0xb2d   : > { %10246 = vmatpush2.bf16.msra.mxu1 %v16080_v63  ;;  %10271 = vmatpush1.bf16.msra.mxu0 %v16083_v53 }
 0xb2e   : > { %10247 = vmatprep.subr.bf16.mxu1 %v16088_v2  ;;  %10272 = vmatprep.subr.bf16.mxu0 %v16091_v44  ;;  %v16601_v44 = vld [vmem:[%s16917_s15 + $0x8] sm:$0xff] }
 0xb31   : > { %10248 = vmatpush2.bf16.msra.mxu1 %v16086_v33  ;;  %10273 = vmatpush1.bf16.msra.mxu0 %v16089_v57  ;;  %v16146_v57 = vld [vmem:[%s21960_s6 + $0x270] ss:$24 sps:$4 sm:$0xff]  }
 0xb32   : > { %10274 = vmatprep.subr.bf16.mxu0 %v16094_v30  ;;  %12071 = vmatprep.subr.bf16.mxu1 %v16097_v12  ;;  %v16151_v12 = vld [vmem:[%s21960_s6 + $0x244] ss:$24 sps:$4 sm:$0xff]  }
 0xb34   : > { %10250 = vmatmul.mubr.bf16.vlgmr.msra.gmra.mxu1 %v20213_v19  ;;  %v20832_v16 = vpop.f32.mrf.mxu1  ;;  %v16106_v19 = vld [vmem:[%s21958_s4 + $0x884] ss:$24 sps:$4 sm:$0xff]  }
 0xb35   : > { %10275 = vmatpush2.bf16.msra.mxu0 %v16092_v7  ;;  %12072 = vmatpush1.bf16.msra.mxu1 %v16095_v47  ;;  %v16170_v7 = vld [vmem:[%s21960_s6 + $0x3f0] ss:$24 sps:$4 sm:$0xff]  }
 0xb36   : > { %v20840_v15 = vpop.f32.mrf.mxu1  ;;  %10276 = vmatprep.subr.bf16.mxu0 %v16100_v51  ;;  %12073 = vmatprep.subr.bf16.mxu1 %v16103_v46  ;;  %v16175_v51 = vld [vmem:[%s21960_s6 + $0x3c4] ss:$24 sps:$4 sm:$0xff]   ;;  %v16149_v46 = vld [vmem:[%s21960_s6 + $0x240] ss:$24 sps:$4 sm:$0xff]  }
 0xb37   : > { %v10008_v10 = vadd.f32 %v20840_v15, %v9967_v4  ;;  %v16178_v15 = vld [vmem:[%s21960_s6 + $0x394] ss:$24 sps:$4 sm:$0xff]  }
 0xb38   : > { %v10009_v38 = vpop.f32.mrf.mxu1 }
 0xb39   : > { %10277 = vmatpush2.bf16.msra.mxu0 %v16098_v61  ;;  %12074 = vmatpush1.bf16.msra.mxu1 %v16101_v11  ;;  %v16154_v61 = vld [vmem:[%s21960_s6 + $0x214] ss:$24 sps:$4 sm:$0xff]   ;;  %v16173_v11 = vld [vmem:[%s21960_s6 + $0x3c0] ss:$24 sps:$4 sm:$0xff]   ;;  %v16157_v38 = vld [vmem:[%s21960_s6 + $0x1e4] ss:$24 sps:$4 sm:$0xff]  }
 0xb3a   : > { %v10010_v17 = vpop.f32.mrf.mxu1  ;;  %10278 = vmatprep.subr.bf16.mxu0 %v16106_v19  ;;  %12075 = vmatprep.subr.bf16.mxu1 %v16109_v28  ;;  %v16152_v19 = vld [vmem:[%s21960_s6 + $0x210] ss:$24 sps:$4 sm:$0xff]   ;;  %v8442_v28 = vrot.slane %v20917_v3, %v17785_v52 }
 0xb3b   : > { %v16155_v17 = vld [vmem:[%s21960_s6 + $0x1e0] ss:$24 sps:$4 sm:$0xff]  }
 0xb3d   : > { %10279 = vmatpush2.bf16.msra.mxu0 %v16104_v20  ;;  %12076 = vmatpush1.bf16.msra.mxu1 %v16107_v29  ;;  %v16176_v20 = vld [vmem:[%s21960_s6 + $0x390] ss:$24 sps:$4 sm:$0xff]   ;;  %v16181_v29 = vld [vmem:[%s21960_s6 + $0x364] ss:$24 sps:$4 sm:$0xff]  }
 0xb3e   : > { %10280 = vmatprep.subr.bf16.mxu0 %v16112_v31  ;;  %12077 = vmatprep.subr.bf16.mxu1 %v16115_v25  ;;  %v9965_v31 = vadd.f32 %v20730_v5, %v8442_v28  ;;  %v16160_v25 = vld [vmem:[%s21960_s6 + $0x1b4] ss:$24 sps:$4 sm:$0xff]   ;;  %v16158_v5 = vld [vmem:[%s21960_s6 + $0x1b0] ss:$24 sps:$4 sm:$0xff]   ;;  %v16209_v28 = vld [vmem:[%s21960_s6 + $0x480] ss:$24 sps:$4 sm:$0xff]  }
 0xb41   : > { %10281 = vmatpush2.bf16.msra.mxu0 %v16110_v26  ;;  %12078 = vmatpush1.bf16.msra.mxu1 %v16113_v34  ;;  %v16179_v26 = vld [vmem:[%s21960_s6 + $0x360] ss:$24 sps:$4 sm:$0xff]   ;;  %v16184_v34 = vld [vmem:[%s21960_s6 + $0x334] ss:$24 sps:$4 sm:$0xff]  }
 0xb42   : > { %10282 = vmatprep.subr.bf16.mxu0 %v16118_v35  ;;  %12079 = vmatprep.subr.bf16.mxu1 %v16121_v37  ;;  %v10006_v35 = vadd.f32 %v20832_v16, %v9965_v31  ;;  %v16187_v16 = vld [vmem:[%s21960_s6 + $0x304] ss:$24 sps:$4 sm:$0xff]  }
 0xb45   : > { %10283 = vmatpush2.bf16.msra.mxu0 %v16116_v13  ;;  %12080 = vmatpush1.bf16.msra.mxu1 %v16119_v39  ;;  %v16163_v13 = vld [vmem:[%s21960_s6 + $0x184] ss:$24 sps:$4 sm:$0xff]   ;;  %v16182_v39 = vld [vmem:[%s21960_s6 + $0x330] ss:$24 sps:$4 sm:$0xff]  }
 0xb46   : > { %10284 = vmatprep.subr.bf16.mxu0 %v16124_v6  ;;  %12081 = vmatprep.subr.bf16.mxu1 %v16127_v42  ;;  %v16161_v6 = vld [vmem:[%s21960_s6 + $0x180] ss:$24 sps:$4 sm:$0xff]  }
 0xb47   : > { %v16602_v42 = vld [vmem:[%s16917_s15] sm:$0xff] }
 0xb49   : > { %10285 = vmatpush2.bf16.msra.mxu0 %v16122_v45  ;;  %12082 = vmatpush1.bf16.msra.mxu1 %v16125_v62  ;;  %v16185_v62 = vld [vmem:[%s21960_s6 + $0x300] ss:$24 sps:$4 sm:$0xff]  }
 0xb4a   : > { %10286 = vmatprep.subr.bf16.mxu0 %v16130_v43  ;;  %12083 = vmatprep.subr.bf16.mxu1 %v16133_v59  ;;  %v16238_v43 = vld [vmem:[%s21960_s6 + $0x754] ss:$24 sps:$4 sm:$0xff]  }
 0xb4b   : > { %v16190_v59 = vld [vmem:[%s21960_s6 + $0x5d4] ss:$24 sps:$4 sm:$0xff]  }
 0xb4d   : > { %10287 = vmatpush2.bf16.msra.mxu0 %v16128_v48  ;;  %12084 = vmatpush1.bf16.msra.mxu1 %v16131_v36  ;;  %v16236_v48 = vld [vmem:[%s21960_s6 + $0x750] ss:$24 sps:$4 sm:$0xff]  }
 0xb4e   : > { %10288 = vmatprep.subr.bf16.mxu0 %v16136_v0  ;;  %12085 = vmatprep.subr.bf16.mxu1 %v16139_v27  ;;  %v16188_v0 = vld [vmem:[%s21960_s6 + $0x5d0] ss:$24 sps:$4 sm:$0xff]   ;;  %v16244_v27 = vld [vmem:[%s21960_s6 + $0x724] ss:$24 sps:$4 sm:$0xff]  }
 0xb51   : > { %10289 = vmatpush2.bf16.msra.mxu0 %v16134_v14  ;;  %12086 = vmatpush1.bf16.msra.mxu1 %v16137_v23  ;;  %v16193_v14 = vld [vmem:[%s21960_s6 + $0x5a4] ss:$24 sps:$4 sm:$0xff]  }
 0xb52   : > { %12087 = vmatprep.subr.bf16.mxu1 %v16142_v54  ;;  %12112 = vmatprep.subr.bf16.mxu0 %v16166_v49  ;;  %v16242_v54 = vld [vmem:[%s21960_s6 + $0x720] ss:$24 sps:$4 sm:$0xff]  }
 0xb54   : > { %10291 = vmatmul.mubr.bf16.vlgmr.msra.gmra.mxu0 %v20320_v60  ;;  %v10046_v8 = vpop.f32.mrf.mxu0  ;;  %v16172_v60 = vld [vmem:[%s21960_s6 + $0x3f4] ss:$24 sps:$4 sm:$0xff]  }
 0xb55   : > { %12088 = vmatpush2.bf16.msra.mxu1 %v16140_v55  ;;  %12113 = vmatpush1.bf16.msra.mxu0 %v16164_v24  ;;  %v10047_v37 = vadd.f32 %v10046_v8, %v10006_v35  ;;  %v16250_v55 = vld [vmem:[%s21960_s6 + $0x6f4] ss:$24 sps:$4 sm:$0xff]   ;;  %v16194_v8 = vld [vmem:[%s21960_s6 + $0x570] ss:$24 sps:$4 sm:$0xff]  }
 0xb56   : > { %v10048_v63 = vpop.f32.mrf.mxu0  ;;  %12089 = vmatprep.subr.bf16.mxu1 %v16145_v56  ;;  %12114 = vmatprep.subr.bf16.mxu0 %v16169_v50  ;;  %v16196_v24 = vld [vmem:[%s21960_s6 + $0x574] ss:$24 sps:$4 sm:$0xff]   ;;  %v16248_v50 = vld [vmem:[%s21960_s6 + $0x6f0] ss:$24 sps:$4 sm:$0xff]  }
 0xb57   : > { %v10049_v53 = vadd.f32 %v10048_v63, %v10008_v10  ;;  %v21030_v45 = vadd.f32 %v16602_v42, %v10047_v37  ;;  %v16256_v10 = vld [vmem:[%s21960_s6 + $0x6c4] ss:$24 sps:$4 sm:$0xff]   ;;  %v16197_v63 = vld [vmem:[%s21960_s6 + $0x540] ss:$24 sps:$4 sm:$0xff]  }
 0xb58   : > { %v10050_v2 = vpop.f32.mrf.mxu0  ;;  %v16316_v42 = vld [vmem:[%s21960_s6 + $0x7e4] ss:$24 sps:$4 sm:$0xff]  }
 0xb59   : > { %v20955_v33 = vadd.f32 %v16601_v44, %v10049_v53  ;;  %12090 = vmatpush2.bf16.msra.mxu1 %v16143_v18  ;;  %12115 = vmatpush1.bf16.msra.mxu0 %v16167_v1  ;;  %v21046_v36 = vpack.c.bf16 %v21030_v45, %v21030_v45  ;;  %v16199_v18 = vld [vmem:[%s21960_s6 + $0x544] ss:$24 sps:$4 sm:$0xff]   ;;  %v16254_v1 = vld [vmem:[%s21960_s6 + $0x6c0] ss:$24 sps:$4 sm:$0xff]   ;;  %v16260_v53 = vld [vmem:[%s21960_s6 + $0x690] ss:$24 sps:$4 sm:$0xff]  }
 0xb5a   : > { %v10051_v30 = vpop.f32.mrf.mxu0  ;;  %12091 = vmatprep.subr.bf16.mxu1 %v16148_v58  ;;  %12116 = vmatprep.subr.bf16.mxu0 %v16172_v60  ;;  %v16262_v58 = vld [vmem:[%s21960_s6 + $0x694] ss:$24 sps:$4 sm:$0xff]   ;;  %v16200_v2 = vld [vmem:[%s21960_s6 + $0x510] ss:$24 sps:$4 sm:$0xff]   ;;  %v16268_v44 = vld [vmem:[%s21960_s6 + $0x664] ss:$24 sps:$4 sm:$0xff]  }
 0xb5b   : > { %v20968_v47 = vpack.c.bf16 %v20955_v33, %v20955_v33  ;;  %v16202_v60 = vld [vmem:[%s21960_s6 + $0x514] ss:$24 sps:$4 sm:$0xff]   ;;  %v16266_v30 = vld [vmem:[%s21960_s6 + $0x660] ss:$24 sps:$4 sm:$0xff]  }
 0xb5d   : > { %12092 = vmatpush2.bf16.msra.mxu1 %v16146_v57  ;;  %12103 = vmatprep.mubr.bf16.mxu1 %v20968_v47  ;;  %v16205_v57 = vld [vmem:[%s21960_s6 + $0x4e4] ss:$24 sps:$4 sm:$0xff]  }
 0xb5e   : > { %12093 = vmatprep.subr.bf16.mxu1 %v16151_v12  ;;  %12117 = vmatpush1.bf16.msra.mxu0 %v16170_v7  ;;  %v16203_v12 = vld [vmem:[%s21960_s6 + $0x4e0] ss:$24 sps:$4 sm:$0xff]   ;;  %v16274_v7 = vld [vmem:[%s21960_s6 + $0x634] ss:$24 sps:$4 sm:$0xff]  }
 0xb5f   : > { %12118 = vmatprep.subr.bf16.mxu0 %v16175_v51  ;;  %v16208_v51 = vld [vmem:[%s21960_s6 + $0x4b4] ss:$24 sps:$4 sm:$0xff]  }
 0xb61   : > { %12094 = vmatpush2.bf16.msra.mxu1 %v16149_v46  ;;  %v16272_v46 = vld [vmem:[%s21960_s6 + $0x630] ss:$24 sps:$4 sm:$0xff]  }
 0xb62   : > { %12095 = vmatprep.subr.bf16.mxu1 %v16154_v61  ;;  %12119 = vmatpush1.bf16.msra.mxu0 %v16173_v11  ;;  %v16206_v61 = vld [vmem:[%s21960_s6 + $0x4b0] ss:$24 sps:$4 sm:$0xff]   ;;  %v16280_v11 = vld [vmem:[%s21960_s6 + $0x604] ss:$24 sps:$4 sm:$0xff]  }
 0xb63   : > { %12120 = vmatprep.subr.bf16.mxu0 %v16178_v15  ;;  %v16211_v15 = vld [vmem:[%s21960_s6 + $0x484] ss:$24 sps:$4 sm:$0xff]  }
 0xb65   : > { %12096 = vmatpush2.bf16.msra.mxu1 %v16152_v19  ;;  %v16278_v19 = vld [vmem:[%s21960_s6 + $0x600] ss:$24 sps:$4 sm:$0xff]  }
 0xb66   : > { %12097 = vmatprep.subr.bf16.mxu1 %v16157_v38  ;;  %12121 = vmatpush1.bf16.msra.mxu0 %v16176_v20  ;;  %v16286_v38 = vld [vmem:[%s21960_s6 + $0x8d4] ss:$24 sps:$4 sm:$0xff]  }
 0xb67   : > { %12122 = vmatprep.subr.bf16.mxu0 %v16181_v29  ;;  %v16214_v20 = vld [vmem:[%s21960_s6 + $0x15c] ss:$24 sps:$4 sm:$0xff]   ;;  %v16284_v29 = vld [vmem:[%s21960_s6 + $0x8d0] ss:$24 sps:$4 sm:$0xff]  }
 0xb69   : > { %12098 = vmatpush2.bf16.msra.mxu1 %v16155_v17  ;;  %v16292_v17 = vld [vmem:[%s21960_s6 + $0x8a4] ss:$24 sps:$4 sm:$0xff]  }
 0xb6a   : > { %12099 = vmatprep.subr.bf16.mxu1 %v16160_v25  ;;  %12123 = vmatpush1.bf16.msra.mxu0 %v16179_v26  ;;  %v16290_v25 = vld [vmem:[%s21960_s6 + $0x8a0] ss:$24 sps:$4 sm:$0xff]  }
 0xb6b   : > { %12124 = vmatprep.subr.bf16.mxu0 %v16184_v34  ;;  %v16298_v34 = vld [vmem:[%s21960_s6 + $0x874] ss:$24 sps:$4 sm:$0xff]  }
 0xb6d   : > { %12100 = vmatpush2.bf16.msra.mxu1 %v16158_v5  ;;  %v16296_v5 = vld [vmem:[%s21960_s6 + $0x870] ss:$24 sps:$4 sm:$0xff]  }
 0xb6e   : > { %12101 = vmatprep.subr.bf16.mxu1 %v16163_v13  ;;  %12125 = vmatpush1.bf16.msra.mxu0 %v16182_v39  ;;  %v16304_v13 = vld [vmem:[%s21960_s6 + $0x844] ss:$24 sps:$4 sm:$0xff]   ;;  %v16302_v39 = vld [vmem:[%s21960_s6 + $0x840] ss:$24 sps:$4 sm:$0xff]  }
 0xb6f   : > { %12126 = vmatprep.subr.bf16.mxu0 %v16187_v16  ;;  %v16310_v16 = vld [vmem:[%s21960_s6 + $0x814] ss:$24 sps:$4 sm:$0xff]  }
 0xb71   : > { %12102 = vmatpush2.bf16.msra.mxu1 %v16161_v6  ;;  %v16308_v6 = vld [vmem:[%s21960_s6 + $0x810] ss:$24 sps:$4 sm:$0xff]  }
 0xb72   : > { %12127 = vmatpush1.bf16.msra.mxu0 %v16185_v62  ;;  %12153 = vmatprep.subr.bf16.mxu1 %v16238_v43  ;;  %v16314_v62 = vld [vmem:[%s21960_s6 + $0x7e0] ss:$24 sps:$4 sm:$0xff]   ;;  %v16322_v43 = vld [vmem:[%s21960_s6 + $0x7b4] ss:$24 sps:$4 sm:$0xff]  }
 0xb73   : > { %12128 = vmatprep.subr.bf16.mxu0 %v16190_v59  ;;  %v16320_v59 = vld [vmem:[%s21960_s6 + $0x7b0] ss:$24 sps:$4 sm:$0xff]  }
 0xb74   : > { %v21057_v23 = vpop.f32.mrf.mxu1  ;;  %12104 = vmatmul.mubr.bf16.vlgmr.msra.gmra.mxu1 %v21046_v36 }
 0xb75   : > { %12154 = vmatpush1.bf16.msra.mxu1 %v16236_v48  ;;  %v16328_v48 = vld [vmem:[%s21960_s6 + $0x784] ss:$24 sps:$4 sm:$0xff]  }
 0xb76   : > { %v21063_v49 = vpop.f32.mrf.mxu1  ;;  %12129 = vmatpush2.bf16.msra.mxu0 %v16188_v0  ;;  %12155 = vmatprep.subr.bf16.mxu1 %v16244_v27  ;;  %v8450_v0 = vrot.slane %v20917_v3, %v18011_v21  ;;  %v16326_v27 = vld [vmem:[%s21960_s6 + $0x780] ss:$24 sps:$4 sm:$0xff]  }
 0xb77   : > { %12130 = vmatprep.subr.bf16.mxu0 %v16193_v14  ;;  %v16334_v14 = vld [vmem:[%s21960_s6 + $0x45c] ss:$24 sps:$4 sm:$0xff]  }
 0xb78   : > { %v10091_v56 = vpop.f32.mrf.mxu1 }
 0xb79   : > { %12156 = vmatpush1.bf16.msra.mxu1 %v16242_v54  ;;  %v8454_v54 = vrot.slane %v20917_v3, %v18014_v22 }
 0xb7a   : > { %v10092_v4 = vpop.f32.mrf.mxu1  ;;  %12131 = vmatpush2.bf16.msra.mxu0 %v16191_v9  ;;  %12157 = vmatprep.subr.bf16.mxu1 %v16250_v55  ;;  %v10088_v9 = vadd.f32 %v21057_v23, %v8450_v0 }
 0xb7b   : > { %12132 = vmatprep.subr.bf16.mxu0 %v16196_v24  ;;  %v10090_v55 = vadd.f32 %v21063_v49, %v8454_v54  ;;  %v16212_v49 = vld [vmem:[%s21960_s6 + $0x158] ss:$24 sps:$4 sm:$0xff]   ;;  %v16281_v54 = vld [vmem:[%s21960_s6 + $0x188] ss:$24 sps:$4 sm:$0xff]  }
 0xb7d   : > { %12158 = vmatpush1.bf16.msra.mxu1 %v16248_v50 }
 0xb7e   : > { %12133 = vmatpush2.bf16.msra.mxu0 %v16194_v8  ;;  %12159 = vmatprep.subr.bf16.mxu1 %v16256_v10 }
 0xb7f   : > { %12134 = vmatprep.subr.bf16.mxu0 %v16199_v18  ;;  %v16603_v18 = vld [vmem:[%s16917_s15 + $0x10] sm:$0xff] }
 0xb81   : > { %12160 = vmatpush1.bf16.msra.mxu1 %v16254_v1 }
 0xb82   : > { %12135 = vmatpush2.bf16.msra.mxu0 %v16197_v63  ;;  %12161 = vmatprep.subr.bf16.mxu1 %v16262_v58  ;;  %v16604_v58 = vld [vmem:[%s16917_s15 + $0x18] sm:$0xff] }
 0xb83   : > { %12136 = vmatprep.subr.bf16.mxu0 %v16202_v60 }
 0xb85   : > { %12162 = vmatpush1.bf16.msra.mxu1 %v16260_v53 }
 0xb86   : > { %12137 = vmatpush2.bf16.msra.mxu0 %v16200_v2  ;;  %12163 = vmatprep.subr.bf16.mxu1 %v16268_v44  ;;  %v16217_v44 = vld [vmem:[%s21960_s6 + $0x12c] ss:$24 sps:$4 sm:$0xff]  }
 0xb87   : > { %12138 = vmatprep.subr.bf16.mxu0 %v16205_v57  ;;  %v16215_v57 = vld [vmem:[%s21960_s6 + $0x128] ss:$24 sps:$4 sm:$0xff]  }
 0xb89   : > { %12164 = vmatpush1.bf16.msra.mxu1 %v16266_v30  ;;  %v16220_v30 = vld [vmem:[%s21960_s6 + $0xfc] ss:$24 sps:$4 sm:$0xff]  }
 0xb8a   : > { %12139 = vmatpush2.bf16.msra.mxu0 %v16203_v12  ;;  %12165 = vmatprep.subr.bf16.mxu1 %v16274_v7  ;;  %v16218_v12 = vld [vmem:[%s21960_s6 + $0xf8] ss:$24 sps:$4 sm:$0xff]   ;;  %v16223_v7 = vld [vmem:[%s21960_s6 + $0xcc] ss:$24 sps:$4 sm:$0xff]  }
 0xb8b   : > { %12140 = vmatprep.subr.bf16.mxu0 %v16208_v51  ;;  %v16221_v51 = vld [vmem:[%s21960_s6 + $0xc8] ss:$24 sps:$4 sm:$0xff]  }
 0xb8d   : > { %12166 = vmatpush1.bf16.msra.mxu1 %v16272_v46  ;;  %v16226_v46 = vld [vmem:[%s21960_s6 + $0x9c] ss:$24 sps:$4 sm:$0xff]  }
 0xb8e   : > { %12141 = vmatpush2.bf16.msra.mxu0 %v16206_v61  ;;  %12167 = vmatprep.subr.bf16.mxu1 %v16280_v11  ;;  %v16224_v61 = vld [vmem:[%s21960_s6 + $0x98] ss:$24 sps:$4 sm:$0xff]   ;;  %v16229_v11 = vld [vmem:[%s21960_s6 + $0x6c] ss:$24 sps:$4 sm:$0xff]  }
 0xb8f   : > { %12142 = vmatprep.subr.bf16.mxu0 %v16211_v15  ;;  %v16227_v15 = vld [vmem:[%s21960_s6 + $0x68] ss:$24 sps:$4 sm:$0xff]  }
 0xb91   : > { %12168 = vmatpush1.bf16.msra.mxu1 %v16278_v19  ;;  %v16232_v19 = vld [vmem:[%s21960_s6 + $0x3c] ss:$24 sps:$4 sm:$0xff]  }
 0xb92   : > { %12143 = vmatpush2.bf16.msra.mxu0 %v16209_v28  ;;  %12169 = vmatprep.subr.bf16.mxu1 %v16286_v38  ;;  %v16230_v28 = vld [vmem:[%s21960_s6 + $0x38] ss:$24 sps:$4 sm:$0xff]  }
 0xb93   : > { %12194 = vmatprep.subr.bf16.mxu0 %v16214_v20  ;;  %v16235_v20 = vld [vmem:[%s21960_s6 + $0xc] ss:$24 sps:$4 sm:$0xff]  }
 0xb94   : > { %v10128_v31 = vpop.f32.mrf.mxu0 }
 0xb95   : > { %12170 = vmatpush2.bf16.msra.mxu1 %v16284_v29  ;;  %v10129_v24 = vadd.f32 %v10128_v31, %v10088_v9 }
 0xb96   : > { %v10130_v26 = vpop.f32.mrf.mxu0  ;;  %12171 = vmatprep.subr.bf16.mxu1 %v16292_v17  ;;  %v16233_v17 = vld [vmem:[%s21960_s6 + $0x8] ss:$24 sps:$4 sm:$0xff]  }
 0xb97   : > { %v10131_v50 = vadd.f32 %v10130_v26, %v10090_v55  ;;  %v16289_v55 = vld [vmem:[%s21960_s6 + $0x75c] ss:$24 sps:$4 sm:$0xff]  }
 0xb98   : > { %v10132_v35 = vpop.f32.mrf.mxu0 }
 0xb99   : > { %12172 = vmatpush2.bf16.msra.mxu1 %v16290_v25  ;;  %v16241_v25 = vld [vmem:[%s21960_s6 + $0x2dc] ss:$24 sps:$4 sm:$0xff]   ;;  %v16247_v35 = vld [vmem:[%s21960_s6 + $0x2ac] ss:$24 sps:$4 sm:$0xff]  }
 0xb9a   : > { %v10133_v37 = vpop.f32.mrf.mxu0  ;;  %12173 = vmatprep.subr.bf16.mxu1 %v16298_v34  ;;  %v16239_v34 = vld [vmem:[%s21960_s6 + $0x2d8] ss:$24 sps:$4 sm:$0xff]  }
 0xb9b   : > { %v16253_v37 = vld [vmem:[%s21960_s6 + $0x27c] ss:$24 sps:$4 sm:$0xff]  }
 0xb9d   : > { %12174 = vmatpush2.bf16.msra.mxu1 %v16296_v5  ;;  %v16245_v5 = vld [vmem:[%s21960_s6 + $0x2a8] ss:$24 sps:$4 sm:$0xff]  }
 0xb9e   : > { %12175 = vmatprep.subr.bf16.mxu1 %v16304_v13  ;;  %v16251_v13 = vld [vmem:[%s21960_s6 + $0x278] ss:$24 sps:$4 sm:$0xff]  }
 0xba1   : > { %12176 = vmatpush2.bf16.msra.mxu1 %v16302_v39  ;;  %v16259_v39 = vld [vmem:[%s21960_s6 + $0x24c] ss:$24 sps:$4 sm:$0xff]  }
 0xba2   : > { %12177 = vmatprep.subr.bf16.mxu1 %v16310_v16  ;;  %v16257_v16 = vld [vmem:[%s21960_s6 + $0x248] ss:$24 sps:$4 sm:$0xff]  }
 0xba5   : > { %12178 = vmatpush2.bf16.msra.mxu1 %v16308_v6  ;;  %v16265_v6 = vld [vmem:[%s21960_s6 + $0x21c] ss:$24 sps:$4 sm:$0xff]  }
 0xba6   : > { %12179 = vmatprep.subr.bf16.mxu1 %v16316_v42  ;;  %v16263_v42 = vld [vmem:[%s21960_s6 + $0x218] ss:$24 sps:$4 sm:$0xff]  }
 0xba9   : > { %12180 = vmatpush2.bf16.msra.mxu1 %v16314_v62  ;;  %v16271_v62 = vld [vmem:[%s21960_s6 + $0x1ec] ss:$24 sps:$4 sm:$0xff]  }
 0xbaa   : > { %12181 = vmatprep.subr.bf16.mxu1 %v16322_v43  ;;  %v16269_v43 = vld [vmem:[%s21960_s6 + $0x1e8] ss:$24 sps:$4 sm:$0xff]  }
 0xbad   : > { %12182 = vmatpush2.bf16.msra.mxu1 %v16320_v59  ;;  %v16277_v59 = vld [vmem:[%s21960_s6 + $0x1bc] ss:$24 sps:$4 sm:$0xff]  }
 0xbae   : > { %12183 = vmatprep.subr.bf16.mxu1 %v16328_v48  ;;  %v16275_v48 = vld [vmem:[%s21960_s6 + $0x1b8] ss:$24 sps:$4 sm:$0xff]  }
 0xbb1   : > { %12184 = vmatpush2.bf16.msra.mxu1 %v16326_v27  ;;  %v16283_v27 = vld [vmem:[%s21960_s6 + $0x18c] ss:$24 sps:$4 sm:$0xff]  }
 0xbb2   : > { %12235 = vmatprep.subr.bf16.mxu1 %v16334_v14 }
 0xbb4   : > { %v10169_v56 = vpop.f32.mrf.mxu1 }
 0xbb5   : > { %v10170_v4 = vadd.f32 %v10169_v56, %v10129_v24  ;;  %v16287_v56 = vld [vmem:[%s21960_s6 + $0x758] ss:$24 sps:$4 sm:$0xff]  }
 0xbb6   : > { %v10171_v8 = vpop.f32.mrf.mxu1 }
 0xbb7   : > { %v10172_v10 = vadd.f32 %v10171_v8, %v10131_v50  ;;  %v21201_v1 = vadd.f32 %v16603_v18, %v10170_v4  ;;  %v16295_v50 = vld [vmem:[%s21960_s6 + $0x72c] ss:$24 sps:$4 sm:$0xff]   ;;  %v16293_v4 = vld [vmem:[%s21960_s6 + $0x728] ss:$24 sps:$4 sm:$0xff]   ;;  %v16301_v8 = vld [vmem:[%s21960_s6 + $0x6fc] ss:$24 sps:$4 sm:$0xff]  }
 0xbb8   : > { %v10173_v63 = vpop.f32.mrf.mxu1  ;;  %v16307_v18 = vld [vmem:[%s21960_s6 + $0x6cc] ss:$24 sps:$4 sm:$0xff]  }
 0xbb9   : > { %v21204_v60 = vadd.f32 %v16604_v58, %v10172_v10  ;;  %v21215_v2 = vpack.c.bf16 %v21201_v1, %v21201_v1  ;;  %v16299_v10 = vld [vmem:[%s21960_s6 + $0x6f8] ss:$24 sps:$4 sm:$0xff]   ;;  %v16305_v63 = vld [vmem:[%s21960_s6 + $0x6c8] ss:$24 sps:$4 sm:$0xff]   ;;  %v16313_v58 = vld [vmem:[%s21960_s6 + $0x69c] ss:$24 sps:$4 sm:$0xff]  }
 0xbba   : > { %v10174_v53 = vpop.f32.mrf.mxu1 }
 0xbbb   : > { %v21208_v23 = vpack.c.bf16 %v21204_v60, %v21204_v60  ;;  %v16311_v53 = vld [vmem:[%s21960_s6 + $0x698] ss:$24 sps:$4 sm:$0xff]  }
 0xbbd   : > { %12144 = vmatprep.mubr.bf16.mxu0 %v21208_v23 }
 0xbbe   : > { %12145 = vmatmul.mubr.bf16.vlgmr.msra.gmra.mxu0 %v21215_v2 }
 0xbbf   : > { %12195 = vmatpush1.bf16.msra.mxu0 %v16212_v49  ;;  %12226 = vmatprep.mubr.bf16.mxu0 %v20968_v47  ;;  %v16319_v49 = vld [vmem:[%s21960_s6 + $0x66c] ss:$24 sps:$4 sm:$0xff]  }
 0xbc0   : > { %12196 = vmatprep.subr.bf16.mxu0 %v16217_v44  ;;  %v8458_v44 = vrot.slane %v20917_v3, %v18234_v40 }
 0xbc3   : > { %12197 = vmatpush1.bf16.msra.mxu0 %v16215_v57  ;;  %v8462_v57 = vrot.slane %v20917_v3, %v18249_v41  ;;  %v16323_v3 = vld [vmem:[%s21960_s6 + $0x638] ss:$24 sps:$4 sm:$0xff]  }
 0xbc4   : > { %12198 = vmatprep.subr.bf16.mxu0 %v16220_v30  ;;  %v16317_v30 = vld [vmem:[%s21960_s6 + $0x668] ss:$24 sps:$4 sm:$0xff]  }
 0xbc7   : > { %12199 = vmatpush1.bf16.msra.mxu0 %v16218_v12  ;;  %v16325_v12 = vld [vmem:[%s21960_s6 + $0x63c] ss:$24 sps:$4 sm:$0xff]  }
 0xbc8   : > { %12200 = vmatprep.subr.bf16.mxu0 %v16223_v7 }
 0xbcb   : > { %12201 = vmatpush1.bf16.msra.mxu0 %v16221_v51 }
 0xbcc   : > { %12202 = vmatprep.subr.bf16.mxu0 %v16226_v46 }
 0xbcf   : > { %12203 = vmatpush1.bf16.msra.mxu0 %v16224_v61 }
 0xbd0   : > { %12204 = vmatprep.subr.bf16.mxu0 %v16229_v11  ;;  %v16331_v11 = vld [vmem:[%s21960_s6 + $0x60c] ss:$24 sps:$4 sm:$0xff]  }
 0xbd3   : > { %12205 = vmatpush1.bf16.msra.mxu0 %v16227_v15 }
 0xbd4   : > { %v21256_v38 = vpop.f32.mrf.mxu0  ;;  %12206 = vmatprep.subr.bf16.mxu0 %v16232_v19 }
 0xbd5   : > { %v10211_v7 = vadd.f32 %v21256_v38, %v8458_v44  ;;  %v16329_v38 = vld [vmem:[%s21960_s6 + $0x608] ss:$24 sps:$4 sm:$0xff]  }
 0xbd6   : > { %v21261_v29 = vpop.f32.mrf.mxu0 }
 0xbd7   : > { %12207 = vmatpush1.bf16.msra.mxu0 %v16230_v28  ;;  %v10213_v51 = vadd.f32 %v21261_v29, %v8462_v57  ;;  %v16605_v29 = vld [vmem:[%s16917_s15 + $0x20] sm:$0xff] }
 0xbd8   : > { %v10214_v31 = vpop.f32.mrf.mxu0  ;;  %12208 = vmatprep.subr.bf16.mxu0 %v16235_v20  ;;  %v16376_v57 = vld [vmem:[%s21960_s6 + $0x30c] ss:$24 sps:$4 sm:$0xff]  }
 0xbda   : > { %v10215_v26 = vpop.f32.mrf.mxu0 }
 0xbdb   : > { %12209 = vmatpush1.bf16.msra.mxu0 %v16233_v17  ;;  %v16606_v26 = vld [vmem:[%s16917_s15 + $0x28] sm:$0xff]  ;;  %s16607_s15 = scalar_lea.vmem %s21913_s22, 768 }
 0xbdc   : > { %12210 = vmatprep.subr.bf16.mxu0 %v16241_v25  ;;  %v16337_v25 = vld [vmem:[%s21960_s6 + $0x8dc] ss:$24 sps:$4 sm:$0xff]   ;;  %p16608_p11 = scmp.ne.s32.totalorder %s21913_s22, %s16607_s15  ;;  %p16615_p1 = scmp.lt.s32.totalorder %s16613_s29, %s16607_s15 }
 0xbde   : > { %p16609_p12 = pnand %p16608_p11, %p16767_p5  ;;  %p16616_p2 = por %p16615_p1, %p16614_p0 }
 0xbdf   : > { %12211 = vmatpush2.bf16.msra.mxu0 %v16239_v34 }
 0xbe0   : > { %12212 = vmatprep.subr.bf16.mxu0 %v16247_v35  ;;  %p16610_p13 = pneg %p16609_p12 }
 0xbe2   : > { %p16617_p3 = pnand %p16616_p2, %p16610_p13 }
 0xbe3   : > { %12213 = vmatpush2.bf16.msra.mxu0 %v16245_v5 }
 0xbe4   : > { %12214 = vmatprep.subr.bf16.mxu0 %v16253_v37  ;;  %v16332_v37 = vld [vmem:[%s21960_s6 + $0x458] ss:$24 sps:$4 sm:$0xff]  }
 0xbe7   : > { %12215 = vmatpush2.bf16.msra.mxu0 %v16251_v13  ;;  %v16335_v13 = vld [vmem:[%s21960_s6 + $0x8d8] ss:$24 sps:$4 sm:$0xff]  }
 0xbe8   : > { %12216 = vmatprep.subr.bf16.mxu0 %v16259_v39 }
 0xbeb   : > { %12217 = vmatpush2.bf16.msra.mxu0 %v16257_v16  ;;  %v16340_v16 = vld [vmem:[%s21960_s6 + $0x42c] ss:$24 sps:$4 sm:$0xff]  }
 0xbec   : > { %12218 = vmatprep.subr.bf16.mxu0 %v16265_v6  ;;  %v16343_v6 = vld [vmem:[%s21960_s6 + $0x8ac] ss:$24 sps:$4 sm:$0xff]  }
 0xbef   : > { %12219 = vmatpush2.bf16.msra.mxu0 %v16263_v42  ;;  %v16338_v42 = vld [vmem:[%s21960_s6 + $0x428] ss:$24 sps:$4 sm:$0xff]  }
 0xbf0   : > { %12220 = vmatprep.subr.bf16.mxu0 %v16271_v62  ;;  %v16341_v62 = vld [vmem:[%s21960_s6 + $0x8a8] ss:$24 sps:$4 sm:$0xff]  }
 0xbf3   : > { %12221 = vmatpush2.bf16.msra.mxu0 %v16269_v43  ;;  %v16346_v43 = vld [vmem:[%s21960_s6 + $0x3fc] ss:$24 sps:$4 sm:$0xff]  }
 0xbf4   : > { %v10251_v0 = vpop.f32.mrf.mxu1  ;;  %12222 = vmatprep.subr.bf16.mxu0 %v16277_v59  ;;  %v16349_v59 = vld [vmem:[%s21960_s6 + $0x87c] ss:$24 sps:$4 sm:$0xff]  }
 0xbf5   : > { %v10252_v46 = vadd.f32 %v10251_v0, %v10211_v7  ;;  %v16347_v0 = vld [vmem:[%s21960_s6 + $0x878] ss:$24 sps:$4 sm:$0xff]   ;;  %v16374_v7 = vld [vmem:[%s21960_s6 + $0x308] ss:$24 sps:$4 sm:$0xff]  }
 0xbf6   : > { %v10253_v14 = vpop.f32.mrf.mxu1 }
 0xbf7   : > { %12223 = vmatpush2.bf16.msra.mxu0 %v16275_v48  ;;  %v10254_v15 = vadd.f32 %v10253_v14, %v10213_v51  ;;  %v16344_v48 = vld [vmem:[%s21960_s6 + $0x3f8] ss:$24 sps:$4 sm:$0xff]   ;;  %v16355_v14 = vld [vmem:[%s21960_s6 + $0x84c] ss:$24 sps:$4 sm:$0xff]   ;;  %v16377_v51 = vld [vmem:[%s21960_s6 + $0x788] ss:$24 sps:$4 sm:$0xff]  }
 0xbf8   : > { %v10255_v9 = vpop.f32.mrf.mxu1  ;;  %12224 = vmatprep.subr.bf16.mxu0 %v16283_v27  ;;  %v16352_v27 = vld [vmem:[%s21960_s6 + $0x3cc] ss:$24 sps:$4 sm:$0xff]  }
 0xbf9   : > { %v16353_v9 = vld [vmem:[%s21960_s6 + $0x848] ss:$24 sps:$4 sm:$0xff]  }
 0xbfa   : > { %v10256_v24 = vpop.f32.mrf.mxu1 }
 0xbfb   : > { %12225 = vmatpush2.bf16.msra.mxu0 %v16281_v54  ;;  %v16350_v54 = vld [vmem:[%s21960_s6 + $0x3c8] ss:$24 sps:$4 sm:$0xff]   ;;  %v16361_v24 = vld [vmem:[%s21960_s6 + $0x81c] ss:$24 sps:$4 sm:$0xff]  }
 0xbfc   : > { %12276 = vmatprep.subr.bf16.mxu0 %v16289_v55  ;;  %v16358_v55 = vld [vmem:[%s21960_s6 + $0x39c] ss:$24 sps:$4 sm:$0xff]  }
 0xbfe   : > { %12227 = vmatmul.mubr.bf16.vlgmr.msra.gmra.mxu0 %v21046_v36 }
 0xbff   : > { %12277 = vmatpush1.bf16.msra.mxu0 %v16287_v56  ;;  %v16356_v56 = vld [vmem:[%s21960_s6 + $0x398] ss:$24 sps:$4 sm:$0xff]  }
 0xc00   : > { %12278 = vmatprep.subr.bf16.mxu0 %v16295_v50  ;;  %v16359_v50 = vld [vmem:[%s21960_s6 + $0x818] ss:$24 sps:$4 sm:$0xff]  }
 0xc03   : > { %12279 = vmatpush1.bf16.msra.mxu0 %v16293_v4  ;;  %v16364_v4 = vld [vmem:[%s21960_s6 + $0x36c] ss:$24 sps:$4 sm:$0xff]  }
 0xc04   : > { %12280 = vmatprep.subr.bf16.mxu0 %v16301_v8  ;;  %v16367_v8 = vld [vmem:[%s21960_s6 + $0x7ec] ss:$24 sps:$4 sm:$0xff]  }
 0xc07   : > { %12281 = vmatpush1.bf16.msra.mxu0 %v16299_v10  ;;  %v16362_v10 = vld [vmem:[%s21960_s6 + $0x368] ss:$24 sps:$4 sm:$0xff]  }
 0xc08   : > { %12282 = vmatprep.subr.bf16.mxu0 %v16307_v18  ;;  %v16365_v18 = vld [vmem:[%s21960_s6 + $0x7e8] ss:$24 sps:$4 sm:$0xff]  }
 0xc0b   : > { %12283 = vmatpush1.bf16.msra.mxu0 %v16305_v63  ;;  %v16370_v63 = vld [vmem:[%s21960_s6 + $0x33c] ss:$24 sps:$4 sm:$0xff]  }
 0xc0c   : > { %12284 = vmatprep.subr.bf16.mxu0 %v16313_v58  ;;  %v16373_v58 = vld [vmem:[%s21960_s6 + $0x7bc] ss:$24 sps:$4 sm:$0xff]  }
 0xc0f   : > { %12285 = vmatpush1.bf16.msra.mxu0 %v16311_v53  ;;  %v16368_v53 = vld [vmem:[%s21960_s6 + $0x338] ss:$24 sps:$4 sm:$0xff]  }
 0xc10   : > { %12286 = vmatprep.subr.bf16.mxu0 %v16319_v49  ;;  %v16371_v49 = vld [vmem:[%s21960_s6 + $0x7b8] ss:$24 sps:$4 sm:$0xff]  }
 0xc13   : > { %12287 = vmatpush1.bf16.msra.mxu0 %v16317_v30  ;;  %v16379_v30 = vld [vmem:[%s21960_s6 + $0x78c] ss:$24 sps:$4 sm:$0xff]  }
 0xc14   : > { %v10292_v61 = vpop.f32.mrf.mxu0  ;;  %12288 = vmatprep.subr.bf16.mxu0 %v16325_v12 }
 0xc15   : > { %v10293_v19 = vadd.f32 %v10292_v61, %v10252_v46  ;;  %v16385_v61 = vld [vmem:[%s21960_s6 + $0x464] ss:$24 sps:$4 sm:$0xff]  }
 0xc16   : > { %v10294_v28 = vpop.f32.mrf.mxu0 }
 0xc17   : > { %v10295_v20 = vadd.f32 %v10294_v28, %v10254_v15  ;;  %12289 = vmatpush1.bf16.msra.mxu0 %v16323_v3  ;;  %v21370_v17 = vadd.f32 %v16605_v29, %v10293_v19  ;;  %v16382_v3 = vld [vmem:[%s21960_s6 + $0x5dc] ss:$24 sps:$4 sm:$0xff]   ;;  %v16380_v15 = vld [vmem:[%s21960_s6 + $0x5d8] ss:$24 sps:$4 sm:$0xff]   ;;  %v16388_v28 = vld [vmem:[%s21960_s6 + $0x5ac] ss:$24 sps:$4 sm:$0xff]  }
 0xc18   : > { %v10296_v31 = vpop.f32.mrf.mxu0  ;;  %12290 = vmatprep.subr.bf16.mxu0 %v16331_v11  ;;  %v16383_v19 = vld [vmem:[%s21960_s6 + $0x460] ss:$24 sps:$4 sm:$0xff]   ;;  %v16389_v29 = vld [vmem:[%s21960_s6 + $0x430] ss:$24 sps:$4 sm:$0xff]  }
 0xc19   : > { %v21376_v34 = vadd.f32 %v16606_v26, %v10295_v20  ;;  %v21390_v39 = vpack.c.bf16 %v21370_v17, %v21370_v17  ;;  %v16391_v20 = vld [vmem:[%s21960_s6 + $0x434] ss:$24 sps:$4 sm:$0xff]   ;;  %v16392_v26 = vld [vmem:[%s21960_s6 + $0x578] ss:$24 sps:$4 sm:$0xff]  }
 0xc1a   : > { %v10297_v35 = vpop.f32.mrf.mxu0  ;;  %v16394_v31 = vld [vmem:[%s21960_s6 + $0x57c] ss:$24 sps:$4 sm:$0xff]  }
 0xc1b   : > { %12291 = vmatpush1.bf16.msra.mxu0 %v16329_v38  ;;  %v21380_v5 = vpack.c.bf16 %v21376_v34, %v21376_v34  ;;  %v16386_v38 = vld [vmem:[%s21960_s6 + $0x5a8] ss:$24 sps:$4 sm:$0xff]   ;;  %v16400_v35 = vld [vmem:[%s21960_s6 + $0x54c] ss:$24 sps:$4 sm:$0xff]  }
 0xc1c   : > { %12292 = vmatprep.subr.bf16.mxu0 %v16337_v25  ;;  %v16397_v25 = vld [vmem:[%s21960_s6 + $0x404] ss:$24 sps:$4 sm:$0xff]  }
 0xc1d   : > { %12185 = vmatprep.mubr.bf16.mxu1 %v21380_v5  ;;  %12308 = vmatprep.mubr.bf16.mxu0 %v21380_v5 }
 0xc1e   : > { %12186 = vmatmul.mubr.bf16.vlgmr.msra.gmra.mxu1 %v21390_v39 }
 0xc1f   : > { %12236 = vmatpush1.bf16.msra.mxu1 %v16332_v37  ;;  %12293 = vmatpush2.bf16.msra.mxu0 %v16335_v13  ;;  %v16403_v37 = vld [vmem:[%s21960_s6 + $0x3d4] ss:$24 sps:$4 sm:$0xff]   ;;  %v16398_v13 = vld [vmem:[%s21960_s6 + $0x548] ss:$24 sps:$4 sm:$0xff]  }
 0xc20   : > { %12267 = vmatprep.mubr.bf16.mxu1 %v21208_v23  ;;  %12237 = vmatprep.subr.bf16.mxu1 %v16340_v16  ;;  %v16401_v16 = vld [vmem:[%s21960_s6 + $0x3d0] ss:$24 sps:$4 sm:$0xff]  }
 0xc21   : > { %12294 = vmatprep.subr.bf16.mxu0 %v16343_v6  ;;  %v16406_v6 = vld [vmem:[%s21960_s6 + $0x51c] ss:$24 sps:$4 sm:$0xff]  }
 0xc23   : > { %12238 = vmatpush1.bf16.msra.mxu1 %v16338_v42  ;;  %12295 = vmatpush2.bf16.msra.mxu0 %v16341_v62  ;;  %v16409_v42 = vld [vmem:[%s21960_s6 + $0x3a4] ss:$24 sps:$4 sm:$0xff]   ;;  %v16404_v62 = vld [vmem:[%s21960_s6 + $0x518] ss:$24 sps:$4 sm:$0xff]  }
 0xc24   : > { %12239 = vmatprep.subr.bf16.mxu1 %v16346_v43  ;;  %12296 = vmatprep.subr.bf16.mxu0 %v16349_v59  ;;  %v16407_v43 = vld [vmem:[%s21960_s6 + $0x3a0] ss:$24 sps:$4 sm:$0xff]   ;;  %v16412_v59 = vld [vmem:[%s21960_s6 + $0x4ec] ss:$24 sps:$4 sm:$0xff]  }
 0xc27   : > { %12240 = vmatpush1.bf16.msra.mxu1 %v16344_v48  ;;  %12297 = vmatpush2.bf16.msra.mxu0 %v16347_v0  ;;  %v16415_v48 = vld [vmem:[%s21960_s6 + $0x374] ss:$24 sps:$4 sm:$0xff]   ;;  %v16410_v0 = vld [vmem:[%s21960_s6 + $0x4e8] ss:$24 sps:$4 sm:$0xff]  }
 0xc28   : > { %12241 = vmatprep.subr.bf16.mxu1 %v16352_v27  ;;  %12298 = vmatprep.subr.bf16.mxu0 %v16355_v14  ;;  %v16413_v27 = vld [vmem:[%s21960_s6 + $0x370] ss:$24 sps:$4 sm:$0xff]   ;;  %v16418_v14 = vld [vmem:[%s21960_s6 + $0x4bc] ss:$24 sps:$4 sm:$0xff]  }
 0xc2b   : > { %12242 = vmatpush1.bf16.msra.mxu1 %v16350_v54  ;;  %12299 = vmatpush2.bf16.msra.mxu0 %v16353_v9  ;;  %v16421_v54 = vld [vmem:[%s21960_s6 + $0x344] ss:$24 sps:$4 sm:$0xff]   ;;  %v16416_v9 = vld [vmem:[%s21960_s6 + $0x4b8] ss:$24 sps:$4 sm:$0xff]  }
 0xc2c   : > { %12243 = vmatprep.subr.bf16.mxu1 %v16358_v55  ;;  %12300 = vmatprep.subr.bf16.mxu0 %v16361_v24  ;;  %v16419_v55 = vld [vmem:[%s21960_s6 + $0x340] ss:$24 sps:$4 sm:$0xff]   ;;  %v16424_v24 = vld [vmem:[%s21960_s6 + $0x48c] ss:$24 sps:$4 sm:$0xff]  }
 0xc2f   : > { %12244 = vmatpush1.bf16.msra.mxu1 %v16356_v56  ;;  %12301 = vmatpush2.bf16.msra.mxu0 %v16359_v50  ;;  %v16427_v56 = vld [vmem:[%s21960_s6 + $0x314] ss:$24 sps:$4 sm:$0xff]   ;;  %v16422_v50 = vld [vmem:[%s21960_s6 + $0x488] ss:$24 sps:$4 sm:$0xff]  }
 0xc30   : > { %12245 = vmatprep.subr.bf16.mxu1 %v16364_v4  ;;  %12302 = vmatprep.subr.bf16.mxu0 %v16367_v8  ;;  %v16425_v4 = vld [vmem:[%s21960_s6 + $0x310] ss:$24 sps:$4 sm:$0xff]   ;;  %v16430_v8 = vld [vmem:[%s21960_s6 + $0x164] ss:$24 sps:$4 sm:$0xff]  }
 0xc33   : > { %12246 = vmatpush1.bf16.msra.mxu1 %v16362_v10  ;;  %12303 = vmatpush2.bf16.msra.mxu0 %v16365_v18  ;;  %v16433_v10 = vld [vmem:[%s21960_s6 + $0x5e4] ss:$24 sps:$4 sm:$0xff]   ;;  %v16428_v18 = vld [vmem:[%s21960_s6 + $0x160] ss:$24 sps:$4 sm:$0xff]  }
 0xc34   : > { %v21468_v44 = vpop.f32.mrf.mxu1  ;;  %12247 = vmatprep.subr.bf16.mxu1 %v16370_v63  ;;  %12304 = vmatprep.subr.bf16.mxu0 %v16373_v58  ;;  %v16431_v63 = vld [vmem:[%s21960_s6 + $0x5e0] ss:$24 sps:$4 sm:$0xff]   ;;  %v16436_v58 = vld [vmem:[%s21960_s6 + $0x134] ss:$24 sps:$4 sm:$0xff]  }
 0xc36   : > { %v21476_v12 = vpop.f32.mrf.mxu1 }
 0xc37   : > { %12248 = vmatpush1.bf16.msra.mxu1 %v16368_v53  ;;  %12305 = vmatpush2.bf16.msra.mxu0 %v16371_v49  ;;  %v16439_v53 = vld [vmem:[%s21960_s6 + $0x5b4] ss:$24 sps:$4 sm:$0xff]   ;;  %v16434_v49 = vld [vmem:[%s21960_s6 + $0x130] ss:$24 sps:$4 sm:$0xff]  }
 0xc38   : > { %v12109_v46 = vpop.f32.mrf.mxu1  ;;  %12249 = vmatprep.subr.bf16.mxu1 %v16376_v57  ;;  %12306 = vmatprep.subr.bf16.mxu0 %v16379_v30  ;;  %v16437_v57 = vld [vmem:[%s21960_s6 + $0x5b0] ss:$24 sps:$4 sm:$0xff]   ;;  %v16442_v30 = vld [vmem:[%s21960_s6 + $0x104] ss:$24 sps:$4 sm:$0xff]  }
 0xc39   : > { %v16448_v46 = vld [vmem:[%s21960_s6 + $0xd4] ss:$24 sps:$4 sm:$0xff]  }
 0xc3a   : > { %v12110_v11 = vpop.f32.mrf.mxu1 }
 0xc3b   : > { %12250 = vmatpush1.bf16.msra.mxu1 %v16374_v7  ;;  %12307 = vmatpush2.bf16.msra.mxu0 %v16377_v51  ;;  %v16445_v7 = vld [vmem:[%s21960_s6 + $0x584] ss:$24 sps:$4 sm:$0xff]   ;;  %v16443_v51 = vld [vmem:[%s21960_s6 + $0x580] ss:$24 sps:$4 sm:$0xff]   ;;  %v16449_v11 = vld [vmem:[%s21960_s6 + $0x550] ss:$24 sps:$4 sm:$0xff]  }
 0xc3c   : > { %12251 = vmatprep.subr.bf16.mxu1 %v16382_v3  ;;  %12358 = vmatprep.subr.bf16.mxu0 %v16385_v61  ;;  %v16451_v3 = vld [vmem:[%s21960_s6 + $0x554] ss:$24 sps:$4 sm:$0xff]   ;;  %v16446_v61 = vld [vmem:[%s21960_s6 + $0xd0] ss:$24 sps:$4 sm:$0xff]  }
 0xc3e   : > { %12309 = vmatmul.mubr.bf16.vlgmr.msra.gmra.mxu0 %v21390_v39 }
 0xc3f   : > { %12252 = vmatpush2.bf16.msra.mxu1 %v16380_v15  ;;  %12359 = vmatpush1.bf16.msra.mxu0 %v16383_v19  ;;  %v16454_v15 = vld [vmem:[%s21960_s6 + $0xa4] ss:$24 sps:$4 sm:$0xff]  }
 0xc40   : > { %12390 = vmatprep.mubr.bf16.mxu0 %v21208_v23  ;;  %12253 = vmatprep.subr.bf16.mxu1 %v16388_v28  ;;  %v16395_v23 = vld [vmem:[%s21960_s6 + $0x400] ss:$24 sps:$4 sm:$0xff]   ;;  %v16457_v19 = vld [vmem:[%s21960_s6 + $0x524] ss:$24 sps:$4 sm:$0xff]  }
 0xc41   : > { %12360 = vmatprep.subr.bf16.mxu0 %v16391_v20  ;;  %v16452_v28 = vld [vmem:[%s21960_s6 + $0xa0] ss:$24 sps:$4 sm:$0xff]  }
 0xc42   : > { %v16455_v20 = vld [vmem:[%s21960_s6 + $0x520] ss:$24 sps:$4 sm:$0xff]  }
 0xc43   : > { %12254 = vmatpush2.bf16.msra.mxu1 %v16386_v38  ;;  %12361 = vmatpush1.bf16.msra.mxu0 %v16389_v29  ;;  %v16460_v38 = vld [vmem:[%s21960_s6 + $0x74] ss:$24 sps:$4 sm:$0xff]  }
 0xc44   : > { %12255 = vmatprep.subr.bf16.mxu1 %v16394_v31  ;;  %12362 = vmatprep.subr.bf16.mxu0 %v16397_v25  ;;  %v16463_v29 = vld [vmem:[%s21960_s6 + $0x4f4] ss:$24 sps:$4 sm:$0xff]   ;;  %v16458_v31 = vld [vmem:[%s21960_s6 + $0x70] ss:$24 sps:$4 sm:$0xff]  }
 0xc45   : > { %v16461_v25 = vld [vmem:[%s21960_s6 + $0x4f0] ss:$24 sps:$4 sm:$0xff]  }
 0xc47   : > { %12256 = vmatpush2.bf16.msra.mxu1 %v16392_v26  ;;  %12363 = vmatpush1.bf16.msra.mxu0 %v16395_v23  ;;  %v16466_v26 = vld [vmem:[%s21960_s6 + $0x44] ss:$24 sps:$4 sm:$0xff]  }
 0xc48   : > { %12257 = vmatprep.subr.bf16.mxu1 %v16400_v35  ;;  %12364 = vmatprep.subr.bf16.mxu0 %v16403_v37  ;;  %v16469_v23 = vld [vmem:[%s21960_s6 + $0x4c4] ss:$24 sps:$4 sm:$0xff]   ;;  %v16464_v35 = vld [vmem:[%s21960_s6 + $0x40] ss:$24 sps:$4 sm:$0xff]  }
 0xc49   : > { %v16467_v37 = vld [vmem:[%s21960_s6 + $0x4c0] ss:$24 sps:$4 sm:$0xff]  }
 0xc4b   : > { %12258 = vmatpush2.bf16.msra.mxu1 %v16398_v13  ;;  %12365 = vmatpush1.bf16.msra.mxu0 %v16401_v16  ;;  %v16472_v13 = vld [vmem:[%s21960_s6 + $0x14] ss:$24 sps:$4 sm:$0xff]  }
 0xc4c   : > { %12259 = vmatprep.subr.bf16.mxu1 %v16406_v6  ;;  %12366 = vmatprep.subr.bf16.mxu0 %v16409_v42  ;;  %v16475_v16 = vld [vmem:[%s21960_s6 + $0x494] ss:$24 sps:$4 sm:$0xff]   ;;  %v21677_v6 = vld [vmem:[%s21961_s7] sm:$0x3f]  ;;  %v16470_v42 = vld [vmem:[%s21960_s6 + $0x10] ss:$24 sps:$4 sm:$0xff]  }
 0xc4f   : > { %12260 = vmatpush2.bf16.msra.mxu1 %v16404_v62  ;;  %12367 = vmatpush1.bf16.msra.mxu0 %v16407_v43  ;;  %v16473_v62 = vld [vmem:[%s21960_s6 + $0x490] ss:$24 sps:$4 sm:$0xff]   ;;  %v16478_v43 = vld [vmem:[%s21960_s6 + $0x2e4] ss:$24 sps:$4 sm:$0xff]  }
 0xc50   : > { %12261 = vmatprep.subr.bf16.mxu1 %v16412_v59  ;;  %12368 = vmatprep.subr.bf16.mxu0 %v16415_v48  ;;  %v10604_v59 = vrot.slane %v21677_v6, %v17785_v52  ;;  %v10608_v48 = vrot.slane %v21677_v6, %v17597_v32 }
 0xc53   : > { %12262 = vmatpush2.bf16.msra.mxu1 %v16410_v0  ;;  %12369 = vmatpush1.bf16.msra.mxu0 %v16413_v27  ;;  %v16476_v0 = vld [vmem:[%s21960_s6 + $0x2e0] ss:$24 sps:$4 sm:$0xff]   ;;  %v16481_v27 = vld [vmem:[%s21960_s6 + $0x2b4] ss:$24 sps:$4 sm:$0xff]  }
 0xc54   : > { %12263 = vmatprep.subr.bf16.mxu1 %v16418_v14  ;;  %12370 = vmatprep.subr.bf16.mxu0 %v16421_v54  ;;  %v12106_v14 = vadd.f32 %v21468_v44, %v10604_v59 }
 0xc57   : > { %12264 = vmatpush2.bf16.msra.mxu1 %v16416_v9  ;;  %12371 = vmatpush1.bf16.msra.mxu0 %v16419_v55  ;;  %v12108_v9 = vadd.f32 %v21476_v12, %v10608_v48  ;;  %v16535_v48 = vld [vmem:[%s21960_s6 + $0x854] ss:$24 sps:$4 sm:$0xff]  }
 0xc58   : > { %12265 = vmatprep.subr.bf16.mxu1 %v16424_v24  ;;  %12372 = vmatprep.subr.bf16.mxu0 %v16427_v56  ;;  %v16479_v24 = vld [vmem:[%s21960_s6 + $0x2b0] ss:$24 sps:$4 sm:$0xff]  }
 0xc5b   : > { %12266 = vmatpush2.bf16.msra.mxu1 %v16422_v50  ;;  %12373 = vmatpush1.bf16.msra.mxu0 %v16425_v4  ;;  %v16484_v50 = vld [vmem:[%s21960_s6 + $0x284] ss:$24 sps:$4 sm:$0xff]  }
 0xc5c   : > { %12317 = vmatprep.subr.bf16.mxu1 %v16430_v8  ;;  %12374 = vmatprep.subr.bf16.mxu0 %v16433_v10  ;;  %v16487_v8 = vld [vmem:[%s21960_s6 + $0x254] ss:$24 sps:$4 sm:$0xff]   ;;  %v16485_v10 = vld [vmem:[%s21960_s6 + $0x250] ss:$24 sps:$4 sm:$0xff]  }
 0xc5e   : > { %12268 = vmatmul.mubr.bf16.vlgmr.msra.gmra.mxu1 %v21215_v2 }
 0xc5f   : > { %12318 = vmatpush1.bf16.msra.mxu1 %v16428_v18  ;;  %12349 = vmatprep.mubr.bf16.mxu1 %v20968_v47  ;;  %v16440_v47 = vld [vmem:[%s21960_s6 + $0x100] ss:$24 sps:$4 sm:$0xff]   ;;  %v16490_v18 = vld [vmem:[%s21960_s6 + $0x224] ss:$24 sps:$4 sm:$0xff]  }
 0xc60   : > { %12375 = vmatpush2.bf16.msra.mxu0 %v16431_v63  ;;  %12319 = vmatprep.subr.bf16.mxu1 %v16436_v58  ;;  %v16488_v63 = vld [vmem:[%s21960_s6 + $0x220] ss:$24 sps:$4 sm:$0xff]   ;;  %v16493_v58 = vld [vmem:[%s21960_s6 + $0x1f4] ss:$24 sps:$4 sm:$0xff]  }
 0xc61   : > { %12376 = vmatprep.subr.bf16.mxu0 %v16439_v53  ;;  %v16491_v53 = vld [vmem:[%s21960_s6 + $0x1f0] ss:$24 sps:$4 sm:$0xff]  }
 0xc63   : > { %12320 = vmatpush1.bf16.msra.mxu1 %v16434_v49  ;;  %v16496_v49 = vld [vmem:[%s21960_s6 + $0x1c4] ss:$24 sps:$4 sm:$0xff]  }
 0xc64   : > { %12377 = vmatpush2.bf16.msra.mxu0 %v16437_v57  ;;  %12321 = vmatprep.subr.bf16.mxu1 %v16442_v30  ;;  %v16494_v57 = vld [vmem:[%s21960_s6 + $0x1c0] ss:$24 sps:$4 sm:$0xff]   ;;  %v16499_v30 = vld [vmem:[%s21960_s6 + $0x194] ss:$24 sps:$4 sm:$0xff]  }
 0xc65   : > { %12378 = vmatprep.subr.bf16.mxu0 %v16445_v7  ;;  %v16497_v7 = vld [vmem:[%s21960_s6 + $0x190] ss:$24 sps:$4 sm:$0xff]  }
 0xc67   : > { %12322 = vmatpush1.bf16.msra.mxu1 %v16440_v47  ;;  %v16502_v47 = vld [vmem:[%s21960_s6 + $0x764] ss:$24 sps:$4 sm:$0xff]  }
 0xc68   : > { %12379 = vmatpush2.bf16.msra.mxu0 %v16443_v51  ;;  %12323 = vmatprep.subr.bf16.mxu1 %v16448_v46  ;;  %v16500_v51 = vld [vmem:[%s21960_s6 + $0x760] ss:$24 sps:$4 sm:$0xff]   ;;  %v16505_v46 = vld [vmem:[%s21960_s6 + $0x734] ss:$24 sps:$4 sm:$0xff]  }
 0xc69   : > { %12380 = vmatprep.subr.bf16.mxu0 %v16451_v3  ;;  %v16503_v3 = vld [vmem:[%s21960_s6 + $0x730] ss:$24 sps:$4 sm:$0xff]  }
 0xc6b   : > { %12324 = vmatpush1.bf16.msra.mxu1 %v16446_v61  ;;  %v16508_v61 = vld [vmem:[%s21960_s6 + $0x704] ss:$24 sps:$4 sm:$0xff]  }
 0xc6c   : > { %12381 = vmatpush2.bf16.msra.mxu0 %v16449_v11  ;;  %12325 = vmatprep.subr.bf16.mxu1 %v16454_v15  ;;  %v16506_v11 = vld [vmem:[%s21960_s6 + $0x700] ss:$24 sps:$4 sm:$0xff]   ;;  %v16514_v15 = vld [vmem:[%s21960_s6 + $0x6a4] ss:$24 sps:$4 sm:$0xff]  }
 0xc6d   : > { %12382 = vmatprep.subr.bf16.mxu0 %v16457_v19  ;;  %v16512_v19 = vld [vmem:[%s21960_s6 + $0x6a0] ss:$24 sps:$4 sm:$0xff]  }
 0xc6f   : > { %12326 = vmatpush1.bf16.msra.mxu1 %v16452_v28  ;;  %v16517_v28 = vld [vmem:[%s21960_s6 + $0x674] ss:$24 sps:$4 sm:$0xff]  }
 0xc70   : > { %12383 = vmatpush2.bf16.msra.mxu0 %v16455_v20  ;;  %12327 = vmatprep.subr.bf16.mxu1 %v16460_v38  ;;  %v16515_v20 = vld [vmem:[%s21960_s6 + $0x670] ss:$24 sps:$4 sm:$0xff]   ;;  %v16520_v38 = vld [vmem:[%s21960_s6 + $0x644] ss:$24 sps:$4 sm:$0xff]  }
 0xc71   : > { %12384 = vmatprep.subr.bf16.mxu0 %v16463_v29  ;;  %v16518_v29 = vld [vmem:[%s21960_s6 + $0x640] ss:$24 sps:$4 sm:$0xff]  }
 0xc73   : > { %12328 = vmatpush1.bf16.msra.mxu1 %v16458_v31  ;;  %v16523_v31 = vld [vmem:[%s21960_s6 + $0x614] ss:$24 sps:$4 sm:$0xff]  }
 0xc74   : > { %12385 = vmatpush2.bf16.msra.mxu0 %v16461_v25  ;;  %12329 = vmatprep.subr.bf16.mxu1 %v16466_v26  ;;  %v16521_v25 = vld [vmem:[%s21960_s6 + $0x610] ss:$24 sps:$4 sm:$0xff]   ;;  %v16526_v26 = vld [vmem:[%s21960_s6 + $0x8e4] ss:$24 sps:$4 sm:$0xff]  }
 0xc75   : > { %12386 = vmatprep.subr.bf16.mxu0 %v16469_v23  ;;  %v16524_v23 = vld [vmem:[%s21960_s6 + $0x8e0] ss:$24 sps:$4 sm:$0xff]  }
 0xc77   : > { %12330 = vmatpush1.bf16.msra.mxu1 %v16464_v35  ;;  %v16529_v35 = vld [vmem:[%s21960_s6 + $0x8b4] ss:$24 sps:$4 sm:$0xff]  }
 0xc78   : > { %12387 = vmatpush2.bf16.msra.mxu0 %v16467_v37  ;;  %12331 = vmatprep.subr.bf16.mxu1 %v16472_v13  ;;  %v16527_v13 = vld [vmem:[%s21960_s6 + $0x8b0] ss:$24 sps:$4 sm:$0xff]  }
 0xc79   : > { %12388 = vmatprep.subr.bf16.mxu0 %v16475_v16 }
 0xc7b   : > { %12332 = vmatpush1.bf16.msra.mxu1 %v16470_v42  ;;  %v16532_v42 = vld [vmem:[%s21960_s6 + $0x884] ss:$24 sps:$4 sm:$0xff]  }
 0xc7c   : > { %12389 = vmatpush2.bf16.msra.mxu0 %v16473_v62  ;;  %12333 = vmatprep.subr.bf16.mxu1 %v16478_v43  ;;  %v16530_v43 = vld [vmem:[%s21960_s6 + $0x880] ss:$24 sps:$4 sm:$0xff]  }
 0xc7e   : > { %v12146_v54 = vpop.f32.mrf.mxu0 }
 0xc7f   : > { %12391 = vmatmul.mubr.bf16.vlgmr.msra.gmra.mxu0 %v21215_v2  ;;  %v21701_v55 = vadd.f32 %v12146_v54, %v12106_v14  ;;  %12334 = vmatpush2.bf16.msra.mxu1 %v16476_v0  ;;  %v16482_v2 = vld [vmem:[%s21960_s6 + $0x280] ss:$24 sps:$4 sm:$0xff]   ;;  %v16533_v0 = vld [vmem:[%s21960_s6 + $0x850] ss:$24 sps:$4 sm:$0xff]   ;;  %v16541_v54 = vld [vmem:[%s21960_s6 + $0x7f4] ss:$24 sps:$4 sm:$0xff]  }
 0xc80   : > { %v12148_v56 = vpop.f32.mrf.mxu0  ;;  %12335 = vmatprep.subr.bf16.mxu1 %v16481_v27  ;;  %v16538_v27 = vld [vmem:[%s21960_s6 + $0x824] ss:$24 sps:$4 sm:$0xff]   ;;  %v16536_v14 = vld [vmem:[%s21960_s6 + $0x820] ss:$24 sps:$4 sm:$0xff]  }
 0xc81   : > { %v21709_v4 = vadd.f32 %v12148_v56, %v12108_v9  ;;  %v16539_v9 = vld [vmem:[%s21960_s6 + $0x7f0] ss:$24 sps:$4 sm:$0xff]   ;;  %v16542_v56 = vld [vmem:[%s21960_s6 + $0x7c0] ss:$24 sps:$4 sm:$0xff]  }
 0xc82   : > { %v12150_v44 = vpop.f32.mrf.mxu0 }
 0xc83   : > { %12336 = vmatpush2.bf16.msra.mxu1 %v16479_v24  ;;  %v16544_v24 = vld [vmem:[%s21960_s6 + $0x7c4] ss:$24 sps:$4 sm:$0xff]   ;;  %v16545_v44 = vld [vmem:[%s21960_s6 + $0x790] ss:$24 sps:$4 sm:$0xff]  }
 0xc84   : > { %v12151_v12 = vpop.f32.mrf.mxu0  ;;  %12337 = vmatprep.subr.bf16.mxu1 %v16484_v50  ;;  %v16547_v50 = vld [vmem:[%s21960_s6 + $0x794] ss:$24 sps:$4 sm:$0xff]  }
 0xc87   : > { %12338 = vmatpush2.bf16.msra.mxu1 %v16482_v2 }
 0xc88   : > { %12339 = vmatprep.subr.bf16.mxu1 %v16487_v8 }
 0xc8b   : > { %12340 = vmatpush2.bf16.msra.mxu1 %v16485_v10 }
 0xc8c   : > { %12341 = vmatprep.subr.bf16.mxu1 %v16490_v18 }
 0xc8f   : > { %12342 = vmatpush2.bf16.msra.mxu1 %v16488_v63 }
 0xc90   : > { %12343 = vmatprep.subr.bf16.mxu1 %v16493_v58 }
 0xc93   : > { %12344 = vmatpush2.bf16.msra.mxu1 %v16491_v53 }
 0xc94   : > { %12345 = vmatprep.subr.bf16.mxu1 %v16496_v49 }
 0xc97   : > { %12346 = vmatpush2.bf16.msra.mxu1 %v16494_v57 }
 0xc98   : > { %12347 = vmatprep.subr.bf16.mxu1 %v16499_v30  ;;  %v10612_v30 = vrot.slane %v21677_v6, %v18011_v21 }
 0xc9b   : > { %12348 = vmatpush2.bf16.msra.mxu1 %v16497_v7 }
 0xc9c   : > { %12399 = vmatprep.subr.bf16.mxu1 %v16502_v47 }
 0xc9e   : > { %12350 = vmatmul.mubr.bf16.vlgmr.msra.gmra.mxu1 %v21046_v36  ;;  %v16511_v36 = vld [vmem:[%s21960_s6 + $0x6d4] ss:$24 sps:$4 sm:$0xff]  }
 0xc9f   : > { %12400 = vmatpush1.bf16.msra.mxu1 %v16500_v51  ;;  %12431 = vmatprep.mubr.bf16.mxu1 %v21380_v5  ;;  %v16509_v5 = vld [vmem:[%s21960_s6 + $0x6d0] ss:$24 sps:$4 sm:$0xff]  }
 0xca0   : > { %12401 = vmatprep.subr.bf16.mxu1 %v16505_v46 }
 0xca3   : > { %12402 = vmatpush1.bf16.msra.mxu1 %v16503_v3 }
 0xca4   : > { %12403 = vmatprep.subr.bf16.mxu1 %v16508_v61 }
 0xca7   : > { %12404 = vmatpush1.bf16.msra.mxu1 %v16506_v11 }
 0xca8   : > { %12405 = vmatprep.subr.bf16.mxu1 %v16511_v36 }
 0xcab   : > { %12406 = vmatpush1.bf16.msra.mxu1 %v16509_v5 }
 0xcac   : > { %12407 = vmatprep.subr.bf16.mxu1 %v16514_v15 }
 0xcaf   : > { %12408 = vmatpush1.bf16.msra.mxu1 %v16512_v19 }
 0xcb0   : > { %12409 = vmatprep.subr.bf16.mxu1 %v16517_v28 }
 0xcb3   : > { %12410 = vmatpush1.bf16.msra.mxu1 %v16515_v20 }
 0xcb4   : > { %12411 = vmatprep.subr.bf16.mxu1 %v16520_v38 }
 0xcb7   : > { %12412 = vmatpush1.bf16.msra.mxu1 %v16518_v29 }
 0xcb8   : > { %12413 = vmatprep.subr.bf16.mxu1 %v16523_v31 }
 0xcbb   : > { %12414 = vmatpush1.bf16.msra.mxu1 %v16521_v25  ;;  %v10620_v25 = vrot.slane %v21677_v6, %v18234_v40 }
 0xcbc   : > { %12415 = vmatprep.subr.bf16.mxu1 %v16526_v26 }
 0xcbe   : > { %v12228_v37 = vpop.f32.mrf.mxu0 }
 0xcbf   : > { %12416 = vmatpush2.bf16.msra.mxu1 %v16524_v23  ;;  %v12229_v7 = vadd.f32 %v12228_v37, %v10612_v30  ;;  %v10624_v23 = vrot.slane %v21677_v6, %v18249_v41 }
 0xcc0   : > { %v12230_v16 = vpop.f32.mrf.mxu0  ;;  %12417 = vmatprep.subr.bf16.mxu1 %v16529_v35 }
 0xcc2   : > { %v12232_v62 = vpop.f32.mrf.mxu0 }
 0xcc3   : > { %12418 = vmatpush2.bf16.msra.mxu1 %v16527_v13 }
 0xcc4   : > { %v12233_v59 = vpop.f32.mrf.mxu0  ;;  %12419 = vmatprep.subr.bf16.mxu1 %v16532_v42 }
 0xcc7   : > { %12420 = vmatpush2.bf16.msra.mxu1 %v16530_v43 }
 0xcc8   : > { %12421 = vmatprep.subr.bf16.mxu1 %v16535_v48 }
 0xccb   : > { %12422 = vmatpush2.bf16.msra.mxu1 %v16533_v0 }
 0xccc   : > { %12423 = vmatprep.subr.bf16.mxu1 %v16538_v27 }
 0xccf   : > { %12424 = vmatpush2.bf16.msra.mxu1 %v16536_v14 }
 0xcd0   : > { %12425 = vmatprep.subr.bf16.mxu1 %v16541_v54 }
 0xcd3   : > { %12426 = vmatpush2.bf16.msra.mxu1 %v16539_v9 }
 0xcd4   : > { %12427 = vmatprep.subr.bf16.mxu1 %v16544_v24 }
 0xcd7   : > { %12428 = vmatpush2.bf16.msra.mxu1 %v16542_v56 }
 0xcd8   : > { %12429 = vmatprep.subr.bf16.mxu1 %v16547_v50 }
 0xcdb   : > { %12430 = vmatpush2.bf16.msra.mxu1 %v16545_v44 }
 0xcde   : > { %12432 = vmatmul.mubr.bf16.vlgmr.msra.gmra.mxu1 %v21390_v39  ;;  %v12187_v2 = vpop.f32.mrf.mxu1  ;;  %v10616_v39 = vrot.slane %v21677_v6, %v18014_v22 }
 0xcdf   : > { %v21844_v12 = vadd.f32 %v12187_v2, %v21701_v55 }
 0xce0   : > { %v12189_v8 = vpop.f32.mrf.mxu1  ;;  %v12231_v55 = vadd.f32 %v12230_v16, %v10616_v39 }
 0xce1   : > { %v21847_v10 = vadd.f32 %v12189_v8, %v21709_v4  ;;  %v12449_v35 = vmul.f32 %v21844_v12, %v21844_v12 }
 0xce2   : > { %v12191_v18 = vpop.f32.mrf.mxu1 }
 0xce3   : > { %v12450_v26 = vmul.f32 %v21847_v10, %v21847_v10  ;;  %v12440_v37 = vadd.f32 %v21847_v10, %v21844_v12 }
 0xce4   : > { %v12192_v63 = vpop.f32.mrf.mxu1 }
 0xce5   : > { %v12455_v42 = vadd.f32 %v12450_v26, %v12449_v35 }
 0xcfe   : > { %v12310_v58 = vpop.f32.mrf.mxu0 }
 0xd00   : > { %v12312_v53 = vpop.f32.mrf.mxu0 }
 0xd02   : > { %v12314_v49 = vpop.f32.mrf.mxu0 }
 0xd04   : > { %v12315_v57 = vpop.f32.mrf.mxu0 }
 0xd1e   : > { %v12269_v47 = vpop.f32.mrf.mxu1 }
 0xd1f   : > { %v12270_v51 = vadd.f32 %v12269_v47, %v12229_v7 }
 0xd20   : > { %v12271_v46 = vpop.f32.mrf.mxu1 }
 0xd21   : > { %v21853_v3 = vadd.f32 %v12310_v58, %v12270_v51  ;;  %v12272_v4 = vadd.f32 %v12271_v46, %v12231_v55  ;;  %v12480_v46 = vld [vmem:[%s21962_s8] sm:$0x3f] }
 0xd22   : > { %v12273_v61 = vpop.f32.mrf.mxu1 }
 0xd23   : > { %v21855_v11 = vadd.f32 %v12312_v53, %v12272_v4  ;;  %v12451_v13 = vmul.f32 %v21853_v3, %v21853_v3  ;;  %v12441_v62 = vadd.f32 %v12440_v37, %v21853_v3  ;;  %v12518_v4 = vld [vmem:[%s21963_s9] sm:$0x3f]  ;;  %v12485_v61 = vrot.slane %v12480_v46, %v17785_v52 }
 0xd24   : > { %v12274_v36 = vpop.f32.mrf.mxu1 }
 0xd25   : > { %v12452_v59 = vmul.f32 %v21855_v11, %v21855_v11  ;;  %v12456_v0 = vadd.f32 %v12455_v42, %v12451_v13  ;;  %v12442_v54 = vadd.f32 %v12441_v62, %v21855_v11  ;;  %v12489_v36 = vrot.slane %v12480_v46, %v17597_v32 }
 0xd26   : > { %v12531_v13 = vrot.slane %v12518_v4, %v18011_v21 }
 0xd27   : > { %v12457_v44 = vadd.f32 %v12456_v0, %v12452_v59 }
 0xd3f   : > { %v12392_v5 = vpop.f32.mrf.mxu0 }
 0xd41   : > { %v12394_v15 = vpop.f32.mrf.mxu0 }
 0xd43   : > { %v12396_v19 = vpop.f32.mrf.mxu0 }
 0xd44   : > { %v12501_v19 = vrot.slane %v12480_v46, %v18234_v40 }
 0xd45   : > { %v12397_v28 = vpop.f32.mrf.mxu0 }
 0xd46   : > { %v12505_v28 = vrot.slane %v12480_v46, %v18249_v41 }
 0xd5e   : > { %v12351_v20 = vpop.f32.mrf.mxu1 }
 0xd5f   : > { %v12352_v16 = vadd.f32 %v12351_v20, %v10620_v25  ;;  %v12523_v20 = vrot.slane %v12518_v4, %v17785_v52 }
 0xd60   : > { %v12353_v38 = vpop.f32.mrf.mxu1 }
 0xd61   : > { %v12354_v43 = vadd.f32 %v12353_v38, %v10624_v23  ;;  %v12393_v48 = vadd.f32 %v12392_v5, %v12352_v16  ;;  %v12493_v5 = vrot.slane %v12480_v46, %v18011_v21  ;;  %v12527_v38 = vrot.slane %v12518_v4, %v17597_v32 }
 0xd62   : > { %v12355_v29 = vpop.f32.mrf.mxu1  ;;  %v12535_v16 = vrot.slane %v12518_v4, %v18014_v22 }
 0xd63   : > { %v12395_v14 = vadd.f32 %v12394_v15, %v12354_v43  ;;  %v12497_v15 = vrot.slane %v12480_v46, %v18014_v22 }
 0xd64   : > { %v12356_v31 = vpop.f32.mrf.mxu1 }
 0xd9e   : > { %v12433_v6 = vpop.f32.mrf.mxu1 }
 0xd9f   : > { %v12434_v27 = vadd.f32 %v12433_v6, %v12393_v48 }
 0xda0   : > { %v12435_v9 = vpop.f32.mrf.mxu1 }
 0xda1   : > { %v12453_v24 = vmul.f32 %v12434_v27, %v12434_v27  ;;  %v12436_v56 = vadd.f32 %v12435_v9, %v12395_v14  ;;  %v12443_v50 = vadd.f32 %v12442_v54, %v12434_v27 }
 0xda2   : > { %v12437_v2 = vpop.f32.mrf.mxu1 }
 0xda3   : > { %v12444_v8 = vadd.f32 %v12443_v50, %v12436_v56  ;;  %v12454_v18 = vmul.f32 %v12436_v56, %v12436_v56  ;;  %v12458_v63 = vadd.f32 %v12457_v44, %v12453_v24 }
 0xda4   : > { %v12438_v58 = vpop.f32.mrf.mxu1 }
 0xda5   : > { %12445 = vadd.xlane.f32.xlu0 %v12444_v8  ;;  %v12459_v53 = vadd.f32 %v12458_v63, %v12454_v18 }
 0xda7   : > { %12460 = vadd.xlane.f32.xlu1 %v12459_v53 }
 0xe2e   : > { %v12446_v49 = vpop.xlane.xlu0 %12445 }
 0xe2f   : > { %v12448_v57 = vmul.f32 0.0013020834, %v12446_v49 }
 0xe30   : > { %v12461_v30 = vpop.xlane.xlu1 %12460 }
 0xe31   : > { %v12462_v39 = vmul.f32 0.0013020834, %v12461_v30  ;;  %v12463_v7 = vmul.f32 %v12448_v57, %v12448_v57  ;;  %v12466_v29 = vsub.f32 %v21844_v12, %v12448_v57  ;;  %v12467_v31 = vsub.f32 %v21847_v10, %v12448_v57 }
 0xe32   : > { %v12468_v25 = vsub.f32 %v21853_v3, %v12448_v57  ;;  %v12469_v26 = vsub.f32 %v21855_v11, %v12448_v57  ;;  %v12470_v35 = vsub.f32 %v12434_v27, %v12448_v57  ;;  %v12471_v37 = vsub.f32 %v12436_v56, %v12448_v57 }
 0xe33   : > { %v12464_v47 = vsub.f32 %v12462_v39, %v12463_v7  ;;  %v12539_v10 = vrot.slane %v12518_v4, %v18234_v40  ;;  %v12543_v3 = vrot.slane %v12518_v4, %v18249_v41 }
 0xe35   : > { %v12465_v55 = vmax.f32 %v12464_v47, 0.0 }
 0xe37   : > { %v12472_v51 = vadd.f32 1e-05, %v12465_v55 }
 0xe39   : > { %16596 = vrsqrt.f32 %v12472_v51 }
 0xe46   : > { %v16597_v23 = vpop.eup %16596 }
 0xe47   : > { %v12474_v42 = vmul.f32 %v16597_v23, %v12466_v29  ;;  %v12475_v52 = vmul.f32 %v16597_v23, %v12467_v31  ;;  %v12476_v62 = vmul.f32 %v16597_v23, %v12468_v25  ;;  %v12477_v32 = vmul.f32 %v16597_v23, %v12469_v26 }
 0xe48   : > { %v12478_v12 = vmul.f32 %v16597_v23, %v12470_v35  ;;  %v12479_v43 = vmul.f32 %v16597_v23, %v12471_v37 }
 0xe49   : > { %v12512_v11 = vmul.f32 %v12485_v61, %v12474_v42  ;;  %v12513_v59 = vmul.f32 %v12489_v36, %v12475_v52  ;;  %v12514_v48 = vmul.f32 %v12493_v5, %v12476_v62  ;;  %v12515_v0 = vmul.f32 %v12497_v15, %v12477_v32 }
 0xe4a   : > { %v12516_v6 = vmul.f32 %v12501_v19, %v12478_v12  ;;  %v12517_v21 = vmul.f32 %v12505_v28, %v12479_v43 }
 0xe4b   : > { %v12550_v27 = vadd.f32 %v12523_v20, %v12512_v11  ;;  %v12551_v22 = vadd.f32 %v12527_v38, %v12513_v59  ;;  %v12552_v14 = vadd.f32 %v12531_v13, %v12514_v48  ;;  %v12553_v54 = vadd.f32 %v12535_v16, %v12515_v0 }
 0xe4c   : > { %v12554_v9 = vadd.f32 %v12539_v10, %v12516_v6  ;;  %v12555_v24 = vadd.f32 %v12543_v3, %v12517_v21 }
 0xe4d   : > { %v12556_v40 = vadd.f32 %v12550_v27, %v21030_v45  ;;  %v12557_v41 = vadd.f32 %v12551_v22, %v20955_v33  ;;  %v12558_v56 = vadd.f32 %v12552_v14, %v21201_v1  ;;  %v12559_v50 = vadd.f32 %v12553_v54, %v21204_v60 }
 0xe4e   : > { %v12560_v44 = vadd.f32 %v12554_v9, %v21370_v17  ;;  %v12561_v2 = vadd.f32 %v12555_v24, %v21376_v34 }
 0xe4f   : > { %12562 = vst [vmem:[%s363_s20] sm:$0xff] %v12556_v40  ;;  %12563 = vst [vmem:[%s363_s20 + $0x8] sm:$0xff] %v12557_v41 }
 0xe50   : > { %12564 = vst [vmem:[%s363_s20 + $0x10] sm:$0xff] %v12558_v56  ;;  %12565 = vst [vmem:[%s363_s20 + $0x18] sm:$0xff] %v12559_v50 }
 0xe51   : > { %12566 = vst [vmem:[%s363_s20 + $0x20] sm:$0xff] %v12560_v44  ;;  %12567 = vst [vmem:[%s363_s20 + $0x28] sm:$0xff] %v12561_v2 }
 0xe52   : > { %16620 = shalt.err (!%p16617_p3)
}
 0xe53   : > { %s16621_s12 = scalar_lea.hbm %s21911_s25, 768  ;;  %s16625_s27 = scalar_lea.hbm %s21964_s10, 1536 }
 0xe54   : > { %p16622_p4 = scmp.ne.s32.totalorder %s21911_s25, %s16621_s12  ;;  %p16626_p9 = scmp.lt.s32.totalorder %s21911_s25, %s21964_s10 }
 0xe55   : > { %p16627_p10 = scmp.lt.s32.totalorder %s16625_s27, %s16621_s12 }
 0xe56   : > { %p16623_p7 = pnand %p16622_p4, %p16767_p5 }
 0xe57   : > { %p16628_p11 = por %p16627_p10, %p16626_p9 }
 0xe58   : > { %p16624_p8 = pneg %p16623_p7 }
 0xe5a   : > { %p16629_p12 = pnand %p16628_p11, %p16624_p8 }
 0xe5c   : > { %16632 = shalt.err (!%p16629_p12)
}
 0xe5d   : > { %14324 = dma.vmem_to_hbm [thread:$0]  (%p16767_p5), %s21913_s22, 768, %s21911_s25, %s12569_s11  }
 0xe5e PF: > { %p14330_p13 = scmp.ge.s32.totalorder %s16667_s16, 2  ;;  %s12595_s17 = sand.u32 1, %s16655_s13  }
 0xe5f   : > { %s12596_s21 = scalar_lea.sflag [#allocation4], %s12595_s17 }
 0xe60   : > { %p14327_p0 = pnand %p14330_p13, %p16771_p6 }
 0xe62   : > { %p14328_p1 = pneg %p14327_p0 }
 0xe64   : > { %16650 = dma.done.wait (%p14328_p1), %s12596_s21, 768  }
 0xe65   : > { %16652 = vsyncadd (%p14328_p1), %s12596_s21, 4294966528  ;;  %s21975_s15 = sld [smem:[#allocation6_spill]]  ;;  %p20_p2 = scmp.ge.s32.totalorder %s16754_s19, 4  }
 0xe66   : > { %s21976_s26 = sld [smem:[#allocation7_spill]]  ;;  %s21977_s13 = smov %s16659_s14 }
 0xe67   : > { %s21980_s16 = smov %s16754_s19 }
 0xe68   :  { %22 = sbr.rel (!%p20_p2) target bundleno = 5 (0x5), region = 98 }
 0xe6b   : > { %s21978_s14 = smov %s21975_s15 }
 0xe6c   : > { %s21979_s15 = smov %s21976_s26 }
 0xe6d   :  { %12601 = vsyncpa [#allocation4], 1 }
 0xe6e   :  { %12603 = vsyncpa [#allocation4 + $0x1], 1 }

</bundles_post_ra>
